<compile_context>
chip_gen: v5e
topology: v5e:2x2
jax: 0.10.0
libtpu: 0.0.40
codegen_flags: <defaults>
</compile_context>

<pallas_src>
import jax
import jax.numpy as jnp
from jax import lax
from jax.experimental import pallas as pl
from jax.experimental.pallas import tpu as pltpu

C_IN = 704
C_OUT = 128
EPS = 1e-5
SLAB = 64                    # channel slab: multiple of 16 (bf16 sublane pack), divides 704
NSLAB = C_IN // SLAB         # 11


def bn_relu_conv_kernel(x_ref, gb_ref, w_ref, o_ref, y_ref):
    # x_ref:  (C_IN, M)     f32 or bf16 (producer dtype; stats always f32 in-kernel)
    # gb_ref: (C_IN, 2)     f32, [:, 0] = gamma, [:, 1] = beta
    # w_ref:  (C_OUT, C_IN) bf16
    # o_ref:  (C_OUT, M)    out dtype (f32 or bf16)
    # y_ref:  (C_IN, M)     bf16 VMEM scratch holding relu(bn(x)) for the MXU
    inv_m = 1.0 / x_ref.shape[1]   # single resident block: block M == true N*H*W

    def slab_body(i, carry):
        start = pl.multiple_of(i * SLAB, SLAB)
        xs = x_ref[pl.ds(start, SLAB), :].astype(jnp.float32)   # (SLAB, M) f32

        # Single-pass batch statistics (biased variance == PyTorch train-mode fwd).
        # Note: E[x^2]-E[x]^2 in f32 can cancel if |mean| >> std; fine for
        # normalized activations (documented tolerance).
        s = jnp.sum(xs, axis=1, keepdims=True)                  # (SLAB, 1)
        ss = jnp.sum(xs * xs, axis=1, keepdims=True)            # (SLAB, 1)
        mean = s * inv_m
        var = ss * inv_m - mean * mean
        inv_std = lax.rsqrt(var + EPS)

        # Fold BN affine into one scale/shift, then ReLU.
        gb = gb_ref[pl.ds(start, SLAB), :]                      # (SLAB, 2)
        a = gb[:, 0:1] * inv_std
        b = gb[:, 1:2] - mean * a
        y = jnp.maximum(xs * a + b, 0.0)                        # (SLAB, M)

        y_ref[pl.ds(start, SLAB), :] = y.astype(jnp.bfloat16)
        return carry

    lax.fori_loop(0, NSLAB, slab_body, 0, unroll=True)

    # 1x1 conv == (K, C) @ (C, M); bf16 operands, f32 MXU accumulation.
    o_ref[...] = jnp.dot(
        w_ref[...], y_ref[...], preferred_element_type=jnp.float32
    ).astype(o_ref.dtype)


def bn_relu_conv2d(x_nchw, gamma, beta, conv_w, out_dtype=jnp.float32):
    """x_nchw: (N, 704, H, W) f32/bf16; conv_w: (128, 704, 1, 1) -> (N, 128, H, W) out_dtype."""
    n, c, h, w = x_nchw.shape
    assert c == C_IN
    m = n * h * w

    # NCHW -> (C, M). For N == 1 this is a free reshape (no data movement) and
    # keeps x in whatever dtype the producer emitted (no standalone astype).
    if n == 1:
        x2d = x_nchw.reshape(c, m)
    else:
        # N > 1 reintroduces a real transpose (HBM round trip); correct but slower.
        x2d = jnp.transpose(x_nchw, (1, 0, 2, 3)).reshape(c, m)

    w2d = conv_w.reshape(C_OUT, C_IN).astype(jnp.bfloat16)              # (K, C) bf16
    gb = jnp.stack(
        [gamma.astype(jnp.float32), beta.astype(jnp.float32)], axis=1)  # (C, 2) f32

    x_bytes = x2d.size * jnp.dtype(x2d.dtype).itemsize
    out_bytes = C_OUT * m * jnp.dtype(out_dtype).itemsize
    cost = pl.CostEstimate(
        flops=2 * m * C_IN * C_OUT,
        transcendentals=C_IN,
        bytes_accessed=x_bytes + w2d.size * 2 + gb.size * 4 + out_bytes,
    )

    out2d = pl.pallas_call(
        bn_relu_conv_kernel,
        out_shape=jax.ShapeDtypeStruct((C_OUT, m), out_dtype),
        grid=(1,),
        in_specs=[
            pl.BlockSpec((c, m), lambda i: (0, 0)),
            pl.BlockSpec((c, 2), lambda i: (0, 0)),
            pl.BlockSpec((C_OUT, c), lambda i: (0, 0)),
        ],
        out_specs=pl.BlockSpec((C_OUT, m), lambda i: (0, 0)),
        scratch_shapes=[pltpu.VMEM((C_IN, m), jnp.bfloat16)],
        compiler_params=pltpu.CompilerParams(
            dimension_semantics=("arbitrary",)),
        cost_estimate=cost,
    )(x2d, gb, w2d)

    # (K, M) -> NCHW; free reshape for N == 1.
    if n == 1:
        return out2d.reshape(1, C_OUT, h, w)
    return jnp.transpose(out2d.reshape(C_OUT, n, h, w), (1, 0, 2, 3))


def reference(x_nchw, gamma, beta, conv_w):
    x = x_nchw.astype(jnp.float32)
    mean = jnp.mean(x, axis=(0, 2, 3), keepdims=True)
    var = jnp.mean((x - mean) ** 2, axis=(0, 2, 3), keepdims=True)
    y = (x - mean) * lax.rsqrt(var + EPS)
    y = y * gamma.reshape(1, -1, 1, 1) + beta.reshape(1, -1, 1, 1)
    y = jnp.maximum(y, 0.0)
    return lax.conv_general_dilated(
        y, conv_w.astype(jnp.float32), window_strides=(1, 1), padding="VALID",
        dimension_numbers=("NCHW", "OIHW", "NCHW"))


if __name__ == "__main__":
    key = jax.random.PRNGKey(0)
    kx, kg, kb, kw = jax.random.split(key, 4)

    # Input consistent with the module's forward: (1, 704, 14, 14)
    x = jax.random.normal(kx, (1, C_IN, 14, 14), dtype=jnp.float32)

    # Deterministic synthetic parameters (shapes from module __init__)
    gamma = 1.0 + 0.1 * jax.random.normal(kg, (C_IN,), dtype=jnp.float32)
    beta = 0.1 * jax.random.normal(kb, (C_IN,), dtype=jnp.float32)
    conv_w = 0.05 * jax.random.normal(kw, (C_OUT, C_IN, 1, 1), dtype=jnp.float32)

    ref = jax.block_until_ready(reference(x, gamma, beta, conv_w))

    # 1) Module-faithful path: f32 input stream, f32 output.
    out = jax.block_until_ready(bn_relu_conv2d(x, gamma, beta, conv_w))
    assert out.shape == (1, C_OUT, 14, 14), out.shape
    # bf16 MXU operands (f32 accumulate) vs. pure-f32 reference -> slightly looser tol.
    err = float(jnp.max(jnp.abs(out - ref)))
    assert jnp.allclose(out, ref, atol=2e-2, rtol=1e-2), err

    # 2) Optimized stream path: bf16 input (as emitted by a bf16 producer) and
    #    bf16 output (for a bf16 consumer); stats still accumulated in f32.
    x_bf16 = x.astype(jnp.bfloat16)  # stands in for an upstream op that emits bf16
    out_bf = jax.block_until_ready(
        bn_relu_conv2d(x_bf16, gamma, beta, conv_w, out_dtype=jnp.bfloat16))
    assert out_bf.dtype == jnp.bfloat16 and out_bf.shape == (1, C_OUT, 14, 14)
    err_bf = float(jnp.max(jnp.abs(out_bf.astype(jnp.float32) - ref)))
    assert jnp.allclose(out_bf.astype(jnp.float32), ref, atol=1e-1, rtol=1e-1), err_bf

    print("KERNEL_OK")
</pallas_src>

<mosaic_0001>
module attributes {stable_mosaic.version = 11 : i64} {
  func.func @bn_relu_conv_kernel(%arg0: i32, %arg1: memref<704x196xf32, #tpu.memory_space<vmem>>, %arg2: memref<704x2xf32, #tpu.memory_space<vmem>>, %arg3: memref<128x704xbf16, #tpu.memory_space<vmem>>, %arg4: memref<128x196xf32, #tpu.memory_space<vmem>>, %arg5: memref<704x196xbf16, #tpu.memory_space<vmem>>) attributes {dimension_semantics = [#tpu.dimension_semantics<arbitrary>], iteration_bounds = array<i64: 1>, scalar_prefetch = 0 : i64, scratch_operands = 1 : i64, tpu.core_type = #tpu.core_type<tc>, window_params = [{pipeline_mode = #tpu.pipeline_mode<synchronous>, transform_indices = @transform_0, window_bounds = array<i64: 704, 196>}, {pipeline_mode = #tpu.pipeline_mode<synchronous>, transform_indices = @transform_1, window_bounds = array<i64: 704, 2>}, {pipeline_mode = #tpu.pipeline_mode<synchronous>, transform_indices = @transform_2, window_bounds = array<i64: 128, 704>}, {pipeline_mode = #tpu.pipeline_mode<synchronous>, transform_indices = @transform_3, window_bounds = array<i64: 128, 196>}]} {
    %c0_i32 = arith.constant 0 : i32
    %c64_i32 = arith.constant 64 : i32
    %0 = arith.muli %c0_i32, %c64_i32 : i32
    %1 = tpu.assume_multiple %0, 64 : i32
    %2 = arith.index_cast %1 : i32 to index
    %c0 = arith.constant 0 : index
    %3 = vector.load %arg1[%2, %c0] : memref<704x196xf32, #tpu.memory_space<vmem>>, vector<64x196xf32>
    %cst = arith.constant dense<0.000000e+00> : vector<64xf32>
    %4 = vector.multi_reduction <add>, %3, %cst [1] : vector<64x196xf32> to vector<64xf32>
    %5 = vector.shape_cast %4 : vector<64xf32> to vector<64x1xf32>
    %6 = arith.mulf %3, %3 : vector<64x196xf32>
    %cst_0 = arith.constant dense<0.000000e+00> : vector<64xf32>
    %7 = vector.multi_reduction <add>, %6, %cst_0 [1] : vector<64x196xf32> to vector<64xf32>
    %8 = vector.shape_cast %7 : vector<64xf32> to vector<64x1xf32>
    %cst_1 = arith.constant 0.00510204071 : f32
    %9 = vector.broadcast %cst_1 : f32 to vector<64x1xf32>
    %10 = arith.mulf %5, %9 : vector<64x1xf32>
    %cst_2 = arith.constant 0.00510204071 : f32
    %11 = vector.broadcast %cst_2 : f32 to vector<64x1xf32>
    %12 = arith.mulf %8, %11 : vector<64x1xf32>
    %13 = arith.mulf %10, %10 : vector<64x1xf32>
    %14 = arith.subf %12, %13 : vector<64x1xf32>
    %cst_3 = arith.constant 9.99999974E-6 : f32
    %15 = vector.broadcast %cst_3 : f32 to vector<64x1xf32>
    %16 = arith.addf %14, %15 : vector<64x1xf32>
    %17 = math.rsqrt %16 : vector<64x1xf32>
    %18 = arith.index_cast %1 : i32 to index
    %c0_4 = arith.constant 0 : index
    %19 = vector.load %arg2[%18, %c0_4] : memref<704x2xf32, #tpu.memory_space<vmem>>, vector<64x2xf32>
    %20 = vector.extract_strided_slice %19 {offsets = [0, 0], sizes = [64, 1], strides = [1, 1]} : vector<64x2xf32> to vector<64x1xf32>
    %21 = arith.mulf %20, %17 : vector<64x1xf32>
    %22 = vector.extract_strided_slice %19 {offsets = [0, 1], sizes = [64, 1], strides = [1, 1]} : vector<64x2xf32> to vector<64x1xf32>
    %23 = arith.mulf %10, %21 : vector<64x1xf32>
    %24 = arith.subf %22, %23 : vector<64x1xf32>
    %25 = vector.broadcast %21 : vector<64x1xf32> to vector<64x196xf32>
    %26 = arith.mulf %3, %25 : vector<64x196xf32>
    %27 = vector.broadcast %24 : vector<64x1xf32> to vector<64x196xf32>
    %28 = arith.addf %26, %27 : vector<64x196xf32>
    %cst_5 = arith.constant 0.000000e+00 : f32
    %29 = vector.broadcast %cst_5 : f32 to vector<64x196xf32>
    %30 = arith.maximumf %28, %29 : vector<64x196xf32>
    %31 = arith.truncf %30 : vector<64x196xf32> to vector<64x196xbf16>
    %32 = arith.index_cast %1 : i32 to index
    %c0_6 = arith.constant 0 : index
    %33 = vector.load %arg5[%32, %c0_6] : memref<704x196xbf16, #tpu.memory_space<vmem>>, vector<64x196xbf16>
    tpu.vector_store %arg5[%32, %c0_6], %31 {strides = array<i32>} : memref<704x196xbf16, #tpu.memory_space<vmem>>, vector<64x196xbf16>,
    %c1_i32 = arith.constant 1 : i32
    %c64_i32_7 = arith.constant 64 : i32
    %34 = arith.muli %c1_i32, %c64_i32_7 : i32
    %35 = tpu.assume_multiple %34, 64 : i32
    %36 = arith.index_cast %35 : i32 to index
    %c0_8 = arith.constant 0 : index
    %37 = vector.load %arg1[%36, %c0_8] : memref<704x196xf32, #tpu.memory_space<vmem>>, vector<64x196xf32>
    %cst_9 = arith.constant dense<0.000000e+00> : vector<64xf32>
    %38 = vector.multi_reduction <add>, %37, %cst_9 [1] : vector<64x196xf32> to vector<64xf32>
    %39 = vector.shape_cast %38 : vector<64xf32> to vector<64x1xf32>
    %40 = arith.mulf %37, %37 : vector<64x196xf32>
    %cst_10 = arith.constant dense<0.000000e+00> : vector<64xf32>
    %41 = vector.multi_reduction <add>, %40, %cst_10 [1] : vector<64x196xf32> to vector<64xf32>
    %42 = vector.shape_cast %41 : vector<64xf32> to vector<64x1xf32>
    %cst_11 = arith.constant 0.00510204071 : f32
    %43 = vector.broadcast %cst_11 : f32 to vector<64x1xf32>
    %44 = arith.mulf %39, %43 : vector<64x1xf32>
    %cst_12 = arith.constant 0.00510204071 : f32
    %45 = vector.broadcast %cst_12 : f32 to vector<64x1xf32>
    %46 = arith.mulf %42, %45 : vector<64x1xf32>
    %47 = arith.mulf %44, %44 : vector<64x1xf32>
    %48 = arith.subf %46, %47 : vector<64x1xf32>
    %cst_13 = arith.constant 9.99999974E-6 : f32
    %49 = vector.broadcast %cst_13 : f32 to vector<64x1xf32>
    %50 = arith.addf %48, %49 : vector<64x1xf32>
    %51 = math.rsqrt %50 : vector<64x1xf32>
    %52 = arith.index_cast %35 : i32 to index
    %c0_14 = arith.constant 0 : index
    %53 = vector.load %arg2[%52, %c0_14] : memref<704x2xf32, #tpu.memory_space<vmem>>, vector<64x2xf32>
    %54 = vector.extract_strided_slice %53 {offsets = [0, 0], sizes = [64, 1], strides = [1, 1]} : vector<64x2xf32> to vector<64x1xf32>
    %55 = arith.mulf %54, %51 : vector<64x1xf32>
    %56 = vector.extract_strided_slice %53 {offsets = [0, 1], sizes = [64, 1], strides = [1, 1]} : vector<64x2xf32> to vector<64x1xf32>
    %57 = arith.mulf %44, %55 : vector<64x1xf32>
    %58 = arith.subf %56, %57 : vector<64x1xf32>
    %59 = vector.broadcast %55 : vector<64x1xf32> to vector<64x196xf32>
    %60 = arith.mulf %37, %59 : vector<64x196xf32>
    %61 = vector.broadcast %58 : vector<64x1xf32> to vector<64x196xf32>
    %62 = arith.addf %60, %61 : vector<64x196xf32>
    %cst_15 = arith.constant 0.000000e+00 : f32
    %63 = vector.broadcast %cst_15 : f32 to vector<64x196xf32>
    %64 = arith.maximumf %62, %63 : vector<64x196xf32>
    %65 = arith.truncf %64 : vector<64x196xf32> to vector<64x196xbf16>
    %66 = arith.index_cast %35 : i32 to index
    %c0_16 = arith.constant 0 : index
    %67 = vector.load %arg5[%66, %c0_16] : memref<704x196xbf16, #tpu.memory_space<vmem>>, vector<64x196xbf16>
    tpu.vector_store %arg5[%66, %c0_16], %65 {strides = array<i32>} : memref<704x196xbf16, #tpu.memory_space<vmem>>, vector<64x196xbf16>,
    %c2_i32 = arith.constant 2 : i32
    %c64_i32_17 = arith.constant 64 : i32
    %68 = arith.muli %c2_i32, %c64_i32_17 : i32
    %69 = tpu.assume_multiple %68, 64 : i32
    %70 = arith.index_cast %69 : i32 to index
    %c0_18 = arith.constant 0 : index
    %71 = vector.load %arg1[%70, %c0_18] : memref<704x196xf32, #tpu.memory_space<vmem>>, vector<64x196xf32>
    %cst_19 = arith.constant dense<0.000000e+00> : vector<64xf32>
    %72 = vector.multi_reduction <add>, %71, %cst_19 [1] : vector<64x196xf32> to vector<64xf32>
    %73 = vector.shape_cast %72 : vector<64xf32> to vector<64x1xf32>
    %74 = arith.mulf %71, %71 : vector<64x196xf32>
    %cst_20 = arith.constant dense<0.000000e+00> : vector<64xf32>
    %75 = vector.multi_reduction <add>, %74, %cst_20 [1] : vector<64x196xf32> to vector<64xf32>
    %76 = vector.shape_cast %75 : vector<64xf32> to vector<64x1xf32>
    %cst_21 = arith.constant 0.00510204071 : f32
    %77 = vector.broadcast %cst_21 : f32 to vector<64x1xf32>
    %78 = arith.mulf %73, %77 : vector<64x1xf32>
    %cst_22 = arith.constant 0.00510204071 : f32
    %79 = vector.broadcast %cst_22 : f32 to vector<64x1xf32>
    %80 = arith.mulf %76, %79 : vector<64x1xf32>
    %81 = arith.mulf %78, %78 : vector<64x1xf32>
    %82 = arith.subf %80, %81 : vector<64x1xf32>
    %cst_23 = arith.constant 9.99999974E-6 : f32
    %83 = vector.broadcast %cst_23 : f32 to vector<64x1xf32>
    %84 = arith.addf %82, %83 : vector<64x1xf32>
    %85 = math.rsqrt %84 : vector<64x1xf32>
    %86 = arith.index_cast %69 : i32 to index
    %c0_24 = arith.constant 0 : index
    %87 = vector.load %arg2[%86, %c0_24] : memref<704x2xf32, #tpu.memory_space<vmem>>, vector<64x2xf32>
    %88 = vector.extract_strided_slice %87 {offsets = [0, 0], sizes = [64, 1], strides = [1, 1]} : vector<64x2xf32> to vector<64x1xf32>
    %89 = arith.mulf %88, %85 : vector<64x1xf32>
    %90 = vector.extract_strided_slice %87 {offsets = [0, 1], sizes = [64, 1], strides = [1, 1]} : vector<64x2xf32> to vector<64x1xf32>
    %91 = arith.mulf %78, %89 : vector<64x1xf32>
    %92 = arith.subf %90, %91 : vector<64x1xf32>
    %93 = vector.broadcast %89 : vector<64x1xf32> to vector<64x196xf32>
    %94 = arith.mulf %71, %93 : vector<64x196xf32>
    %95 = vector.broadcast %92 : vector<64x1xf32> to vector<64x196xf32>
    %96 = arith.addf %94, %95 : vector<64x196xf32>
    %cst_25 = arith.constant 0.000000e+00 : f32
    %97 = vector.broadcast %cst_25 : f32 to vector<64x196xf32>
    %98 = arith.maximumf %96, %97 : vector<64x196xf32>
    %99 = arith.truncf %98 : vector<64x196xf32> to vector<64x196xbf16>
    %100 = arith.index_cast %69 : i32 to index
    %c0_26 = arith.constant 0 : index
    %101 = vector.load %arg5[%100, %c0_26] : memref<704x196xbf16, #tpu.memory_space<vmem>>, vector<64x196xbf16>
    tpu.vector_store %arg5[%100, %c0_26], %99 {strides = array<i32>} : memref<704x196xbf16, #tpu.memory_space<vmem>>, vector<64x196xbf16>,
    %c3_i32 = arith.constant 3 : i32
    %c64_i32_27 = arith.constant 64 : i32
    %102 = arith.muli %c3_i32, %c64_i32_27 : i32
    %103 = tpu.assume_multiple %102, 64 : i32
    %104 = arith.index_cast %103 : i32 to index
    %c0_28 = arith.constant 0 : index
    %105 = vector.load %arg1[%104, %c0_28] : memref<704x196xf32, #tpu.memory_space<vmem>>, vector<64x196xf32>
    %cst_29 = arith.constant dense<0.000000e+00> : vector<64xf32>
    %106 = vector.multi_reduction <add>, %105, %cst_29 [1] : vector<64x196xf32> to vector<64xf32>
    %107 = vector.shape_cast %106 : vector<64xf32> to vector<64x1xf32>
    %108 = arith.mulf %105, %105 : vector<64x196xf32>
    %cst_30 = arith.constant dense<0.000000e+00> : vector<64xf32>
    %109 = vector.multi_reduction <add>, %108, %cst_30 [1] : vector<64x196xf32> to vector<64xf32>
    %110 = vector.shape_cast %109 : vector<64xf32> to vector<64x1xf32>
    %cst_31 = arith.constant 0.00510204071 : f32
    %111 = vector.broadcast %cst_31 : f32 to vector<64x1xf32>
    %112 = arith.mulf %107, %111 : vector<64x1xf32>
    %cst_32 = arith.constant 0.00510204071 : f32
    %113 = vector.broadcast %cst_32 : f32 to vector<64x1xf32>
    %114 = arith.mulf %110, %113 : vector<64x1xf32>
    %115 = arith.mulf %112, %112 : vector<64x1xf32>
    %116 = arith.subf %114, %115 : vector<64x1xf32>
    %cst_33 = arith.constant 9.99999974E-6 : f32
    %117 = vector.broadcast %cst_33 : f32 to vector<64x1xf32>
    %118 = arith.addf %116, %117 : vector<64x1xf32>
    %119 = math.rsqrt %118 : vector<64x1xf32>
    %120 = arith.index_cast %103 : i32 to index
    %c0_34 = arith.constant 0 : index
    %121 = vector.load %arg2[%120, %c0_34] : memref<704x2xf32, #tpu.memory_space<vmem>>, vector<64x2xf32>
    %122 = vector.extract_strided_slice %121 {offsets = [0, 0], sizes = [64, 1], strides = [1, 1]} : vector<64x2xf32> to vector<64x1xf32>
    %123 = arith.mulf %122, %119 : vector<64x1xf32>
    %124 = vector.extract_strided_slice %121 {offsets = [0, 1], sizes = [64, 1], strides = [1, 1]} : vector<64x2xf32> to vector<64x1xf32>
    %125 = arith.mulf %112, %123 : vector<64x1xf32>
    %126 = arith.subf %124, %125 : vector<64x1xf32>
    %127 = vector.broadcast %123 : vector<64x1xf32> to vector<64x196xf32>
    %128 = arith.mulf %105, %127 : vector<64x196xf32>
    %129 = vector.broadcast %126 : vector<64x1xf32> to vector<64x196xf32>
    %130 = arith.addf %128, %129 : vector<64x196xf32>
    %cst_35 = arith.constant 0.000000e+00 : f32
    %131 = vector.broadcast %cst_35 : f32 to vector<64x196xf32>
    %132 = arith.maximumf %130, %131 : vector<64x196xf32>
    %133 = arith.truncf %132 : vector<64x196xf32> to vector<64x196xbf16>
    %134 = arith.index_cast %103 : i32 to index
    %c0_36 = arith.constant 0 : index
    %135 = vector.load %arg5[%134, %c0_36] : memref<704x196xbf16, #tpu.memory_space<vmem>>, vector<64x196xbf16>
    tpu.vector_store %arg5[%134, %c0_36], %133 {strides = array<i32>} : memref<704x196xbf16, #tpu.memory_space<vmem>>, vector<64x196xbf16>,
    %c4_i32 = arith.constant 4 : i32
    %c64_i32_37 = arith.constant 64 : i32
    %136 = arith.muli %c4_i32, %c64_i32_37 : i32
    %137 = tpu.assume_multiple %136, 64 : i32
    %138 = arith.index_cast %137 : i32 to index
    %c0_38 = arith.constant 0 : index
    %139 = vector.load %arg1[%138, %c0_38] : memref<704x196xf32, #tpu.memory_space<vmem>>, vector<64x196xf32>
    %cst_39 = arith.constant dense<0.000000e+00> : vector<64xf32>
    %140 = vector.multi_reduction <add>, %139, %cst_39 [1] : vector<64x196xf32> to vector<64xf32>
    %141 = vector.shape_cast %140 : vector<64xf32> to vector<64x1xf32>
    %142 = arith.mulf %139, %139 : vector<64x196xf32>
    %cst_40 = arith.constant dense<0.000000e+00> : vector<64xf32>
    %143 = vector.multi_reduction <add>, %142, %cst_40 [1] : vector<64x196xf32> to vector<64xf32>
    %144 = vector.shape_cast %143 : vector<64xf32> to vector<64x1xf32>
    %cst_41 = arith.constant 0.00510204071 : f32
    %145 = vector.broadcast %cst_41 : f32 to vector<64x1xf32>
    %146 = arith.mulf %141, %145 : vector<64x1xf32>
    %cst_42 = arith.constant 0.00510204071 : f32
    %147 = vector.broadcast %cst_42 : f32 to vector<64x1xf32>
    %148 = arith.mulf %144, %147 : vector<64x1xf32>
    %149 = arith.mulf %146, %146 : vector<64x1xf32>
    %150 = arith.subf %148, %149 : vector<64x1xf32>
    %cst_43 = arith.constant 9.99999974E-6 : f32
    %151 = vector.broadcast %cst_43 : f32 to vector<64x1xf32>
    %152 = arith.addf %150, %151 : vector<64x1xf32>
    %153 = math.rsqrt %152 : vector<64x1xf32>
    %154 = arith.index_cast %137 : i32 to index
    %c0_44 = arith.constant 0 : index
    %155 = vector.load %arg2[%154, %c0_44] : memref<704x2xf32, #tpu.memory_space<vmem>>, vector<64x2xf32>
    %156 = vector.extract_strided_slice %155 {offsets = [0, 0], sizes = [64, 1], strides = [1, 1]} : vector<64x2xf32> to vector<64x1xf32>
    %157 = arith.mulf %156, %153 : vector<64x1xf32>
    %158 = vector.extract_strided_slice %155 {offsets = [0, 1], sizes = [64, 1], strides = [1, 1]} : vector<64x2xf32> to vector<64x1xf32>
    %159 = arith.mulf %146, %157 : vector<64x1xf32>
    %160 = arith.subf %158, %159 : vector<64x1xf32>
    %161 = vector.broadcast %157 : vector<64x1xf32> to vector<64x196xf32>
    %162 = arith.mulf %139, %161 : vector<64x196xf32>
    %163 = vector.broadcast %160 : vector<64x1xf32> to vector<64x196xf32>
    %164 = arith.addf %162, %163 : vector<64x196xf32>
    %cst_45 = arith.constant 0.000000e+00 : f32
    %165 = vector.broadcast %cst_45 : f32 to vector<64x196xf32>
    %166 = arith.maximumf %164, %165 : vector<64x196xf32>
    %167 = arith.truncf %166 : vector<64x196xf32> to vector<64x196xbf16>
    %168 = arith.index_cast %137 : i32 to index
    %c0_46 = arith.constant 0 : index
    %169 = vector.load %arg5[%168, %c0_46] : memref<704x196xbf16, #tpu.memory_space<vmem>>, vector<64x196xbf16>
    tpu.vector_store %arg5[%168, %c0_46], %167 {strides = array<i32>} : memref<704x196xbf16, #tpu.memory_space<vmem>>, vector<64x196xbf16>,
    %c5_i32 = arith.constant 5 : i32
    %c64_i32_47 = arith.constant 64 : i32
    %170 = arith.muli %c5_i32, %c64_i32_47 : i32
    %171 = tpu.assume_multiple %170, 64 : i32
    %172 = arith.index_cast %171 : i32 to index
    %c0_48 = arith.constant 0 : index
    %173 = vector.load %arg1[%172, %c0_48] : memref<704x196xf32, #tpu.memory_space<vmem>>, vector<64x196xf32>
    %cst_49 = arith.constant dense<0.000000e+00> : vector<64xf32>
    %174 = vector.multi_reduction <add>, %173, %cst_49 [1] : vector<64x196xf32> to vector<64xf32>
    %175 = vector.shape_cast %174 : vector<64xf32> to vector<64x1xf32>
    %176 = arith.mulf %173, %173 : vector<64x196xf32>
    %cst_50 = arith.constant dense<0.000000e+00> : vector<64xf32>
    %177 = vector.multi_reduction <add>, %176, %cst_50 [1] : vector<64x196xf32> to vector<64xf32>
    %178 = vector.shape_cast %177 : vector<64xf32> to vector<64x1xf32>
    %cst_51 = arith.constant 0.00510204071 : f32
    %179 = vector.broadcast %cst_51 : f32 to vector<64x1xf32>
    %180 = arith.mulf %175, %179 : vector<64x1xf32>
    %cst_52 = arith.constant 0.00510204071 : f32
    %181 = vector.broadcast %cst_52 : f32 to vector<64x1xf32>
    %182 = arith.mulf %178, %181 : vector<64x1xf32>
    %183 = arith.mulf %180, %180 : vector<64x1xf32>
    %184 = arith.subf %182, %183 : vector<64x1xf32>
    %cst_53 = arith.constant 9.99999974E-6 : f32
    %185 = vector.broadcast %cst_53 : f32 to vector<64x1xf32>
    %186 = arith.addf %184, %185 : vector<64x1xf32>
    %187 = math.rsqrt %186 : vector<64x1xf32>
    %188 = arith.index_cast %171 : i32 to index
    %c0_54 = arith.constant 0 : index
    %189 = vector.load %arg2[%188, %c0_54] : memref<704x2xf32, #tpu.memory_space<vmem>>, vector<64x2xf32>
    %190 = vector.extract_strided_slice %189 {offsets = [0, 0], sizes = [64, 1], strides = [1, 1]} : vector<64x2xf32> to vector<64x1xf32>
    %191 = arith.mulf %190, %187 : vector<64x1xf32>
    %192 = vector.extract_strided_slice %189 {offsets = [0, 1], sizes = [64, 1], strides = [1, 1]} : vector<64x2xf32> to vector<64x1xf32>
    %193 = arith.mulf %180, %191 : vector<64x1xf32>
    %194 = arith.subf %192, %193 : vector<64x1xf32>
    %195 = vector.broadcast %191 : vector<64x1xf32> to vector<64x196xf32>
    %196 = arith.mulf %173, %195 : vector<64x196xf32>
    %197 = vector.broadcast %194 : vector<64x1xf32> to vector<64x196xf32>
    %198 = arith.addf %196, %197 : vector<64x196xf32>
    %cst_55 = arith.constant 0.000000e+00 : f32
    %199 = vector.broadcast %cst_55 : f32 to vector<64x196xf32>
    %200 = arith.maximumf %198, %199 : vector<64x196xf32>
    %201 = arith.truncf %200 : vector<64x196xf32> to vector<64x196xbf16>
    %202 = arith.index_cast %171 : i32 to index
    %c0_56 = arith.constant 0 : index
    %203 = vector.load %arg5[%202, %c0_56] : memref<704x196xbf16, #tpu.memory_space<vmem>>, vector<64x196xbf16>
    tpu.vector_store %arg5[%202, %c0_56], %201 {strides = array<i32>} : memref<704x196xbf16, #tpu.memory_space<vmem>>, vector<64x196xbf16>,
    %c6_i32 = arith.constant 6 : i32
    %c64_i32_57 = arith.constant 64 : i32
    %204 = arith.muli %c6_i32, %c64_i32_57 : i32
    %205 = tpu.assume_multiple %204, 64 : i32
    %206 = arith.index_cast %205 : i32 to index
    %c0_58 = arith.constant 0 : index
    %207 = vector.load %arg1[%206, %c0_58] : memref<704x196xf32, #tpu.memory_space<vmem>>, vector<64x196xf32>
    %cst_59 = arith.constant dense<0.000000e+00> : vector<64xf32>
    %208 = vector.multi_reduction <add>, %207, %cst_59 [1] : vector<64x196xf32> to vector<64xf32>
    %209 = vector.shape_cast %208 : vector<64xf32> to vector<64x1xf32>
    %210 = arith.mulf %207, %207 : vector<64x196xf32>
    %cst_60 = arith.constant dense<0.000000e+00> : vector<64xf32>
    %211 = vector.multi_reduction <add>, %210, %cst_60 [1] : vector<64x196xf32> to vector<64xf32>
    %212 = vector.shape_cast %211 : vector<64xf32> to vector<64x1xf32>
    %cst_61 = arith.constant 0.00510204071 : f32
    %213 = vector.broadcast %cst_61 : f32 to vector<64x1xf32>
    %214 = arith.mulf %209, %213 : vector<64x1xf32>
    %cst_62 = arith.constant 0.00510204071 : f32
    %215 = vector.broadcast %cst_62 : f32 to vector<64x1xf32>
    %216 = arith.mulf %212, %215 : vector<64x1xf32>
    %217 = arith.mulf %214, %214 : vector<64x1xf32>
    %218 = arith.subf %216, %217 : vector<64x1xf32>
    %cst_63 = arith.constant 9.99999974E-6 : f32
    %219 = vector.broadcast %cst_63 : f32 to vector<64x1xf32>
    %220 = arith.addf %218, %219 : vector<64x1xf32>
    %221 = math.rsqrt %220 : vector<64x1xf32>
    %222 = arith.index_cast %205 : i32 to index
    %c0_64 = arith.constant 0 : index
    %223 = vector.load %arg2[%222, %c0_64] : memref<704x2xf32, #tpu.memory_space<vmem>>, vector<64x2xf32>
    %224 = vector.extract_strided_slice %223 {offsets = [0, 0], sizes = [64, 1], strides = [1, 1]} : vector<64x2xf32> to vector<64x1xf32>
    %225 = arith.mulf %224, %221 : vector<64x1xf32>
    %226 = vector.extract_strided_slice %223 {offsets = [0, 1], sizes = [64, 1], strides = [1, 1]} : vector<64x2xf32> to vector<64x1xf32>
    %227 = arith.mulf %214, %225 : vector<64x1xf32>
    %228 = arith.subf %226, %227 : vector<64x1xf32>
    %229 = vector.broadcast %225 : vector<64x1xf32> to vector<64x196xf32>
    %230 = arith.mulf %207, %229 : vector<64x196xf32>
    %231 = vector.broadcast %228 : vector<64x1xf32> to vector<64x196xf32>
    %232 = arith.addf %230, %231 : vector<64x196xf32>
    %cst_65 = arith.constant 0.000000e+00 : f32
    %233 = vector.broadcast %cst_65 : f32 to vector<64x196xf32>
    %234 = arith.maximumf %232, %233 : vector<64x196xf32>
    %235 = arith.truncf %234 : vector<64x196xf32> to vector<64x196xbf16>
    %236 = arith.index_cast %205 : i32 to index
    %c0_66 = arith.constant 0 : index
    %237 = vector.load %arg5[%236, %c0_66] : memref<704x196xbf16, #tpu.memory_space<vmem>>, vector<64x196xbf16>
    tpu.vector_store %arg5[%236, %c0_66], %235 {strides = array<i32>} : memref<704x196xbf16, #tpu.memory_space<vmem>>, vector<64x196xbf16>,
    %c7_i32 = arith.constant 7 : i32
    %c64_i32_67 = arith.constant 64 : i32
    %238 = arith.muli %c7_i32, %c64_i32_67 : i32
    %239 = tpu.assume_multiple %238, 64 : i32
    %240 = arith.index_cast %239 : i32 to index
    %c0_68 = arith.constant 0 : index
    %241 = vector.load %arg1[%240, %c0_68] : memref<704x196xf32, #tpu.memory_space<vmem>>, vector<64x196xf32>
    %cst_69 = arith.constant dense<0.000000e+00> : vector<64xf32>
    %242 = vector.multi_reduction <add>, %241, %cst_69 [1] : vector<64x196xf32> to vector<64xf32>
    %243 = vector.shape_cast %242 : vector<64xf32> to vector<64x1xf32>
    %244 = arith.mulf %241, %241 : vector<64x196xf32>
    %cst_70 = arith.constant dense<0.000000e+00> : vector<64xf32>
    %245 = vector.multi_reduction <add>, %244, %cst_70 [1] : vector<64x196xf32> to vector<64xf32>
    %246 = vector.shape_cast %245 : vector<64xf32> to vector<64x1xf32>
    %cst_71 = arith.constant 0.00510204071 : f32
    %247 = vector.broadcast %cst_71 : f32 to vector<64x1xf32>
    %248 = arith.mulf %243, %247 : vector<64x1xf32>
    %cst_72 = arith.constant 0.00510204071 : f32
    %249 = vector.broadcast %cst_72 : f32 to vector<64x1xf32>
    %250 = arith.mulf %246, %249 : vector<64x1xf32>
    %251 = arith.mulf %248, %248 : vector<64x1xf32>
    %252 = arith.subf %250, %251 : vector<64x1xf32>
    %cst_73 = arith.constant 9.99999974E-6 : f32
    %253 = vector.broadcast %cst_73 : f32 to vector<64x1xf32>
    %254 = arith.addf %252, %253 : vector<64x1xf32>
    %255 = math.rsqrt %254 : vector<64x1xf32>
    %256 = arith.index_cast %239 : i32 to index
    %c0_74 = arith.constant 0 : index
    %257 = vector.load %arg2[%256, %c0_74] : memref<704x2xf32, #tpu.memory_space<vmem>>, vector<64x2xf32>
    %258 = vector.extract_strided_slice %257 {offsets = [0, 0], sizes = [64, 1], strides = [1, 1]} : vector<64x2xf32> to vector<64x1xf32>
    %259 = arith.mulf %258, %255 : vector<64x1xf32>
    %260 = vector.extract_strided_slice %257 {offsets = [0, 1], sizes = [64, 1], strides = [1, 1]} : vector<64x2xf32> to vector<64x1xf32>
    %261 = arith.mulf %248, %259 : vector<64x1xf32>
    %262 = arith.subf %260, %261 : vector<64x1xf32>
    %263 = vector.broadcast %259 : vector<64x1xf32> to vector<64x196xf32>
    %264 = arith.mulf %241, %263 : vector<64x196xf32>
    %265 = vector.broadcast %262 : vector<64x1xf32> to vector<64x196xf32>
    %266 = arith.addf %264, %265 : vector<64x196xf32>
    %cst_75 = arith.constant 0.000000e+00 : f32
    %267 = vector.broadcast %cst_75 : f32 to vector<64x196xf32>
    %268 = arith.maximumf %266, %267 : vector<64x196xf32>
    %269 = arith.truncf %268 : vector<64x196xf32> to vector<64x196xbf16>
    %270 = arith.index_cast %239 : i32 to index
    %c0_76 = arith.constant 0 : index
    %271 = vector.load %arg5[%270, %c0_76] : memref<704x196xbf16, #tpu.memory_space<vmem>>, vector<64x196xbf16>
    tpu.vector_store %arg5[%270, %c0_76], %269 {strides = array<i32>} : memref<704x196xbf16, #tpu.memory_space<vmem>>, vector<64x196xbf16>,
    %c8_i32 = arith.constant 8 : i32
    %c64_i32_77 = arith.constant 64 : i32
    %272 = arith.muli %c8_i32, %c64_i32_77 : i32
    %273 = tpu.assume_multiple %272, 64 : i32
    %274 = arith.index_cast %273 : i32 to index
    %c0_78 = arith.constant 0 : index
    %275 = vector.load %arg1[%274, %c0_78] : memref<704x196xf32, #tpu.memory_space<vmem>>, vector<64x196xf32>
    %cst_79 = arith.constant dense<0.000000e+00> : vector<64xf32>
    %276 = vector.multi_reduction <add>, %275, %cst_79 [1] : vector<64x196xf32> to vector<64xf32>
    %277 = vector.shape_cast %276 : vector<64xf32> to vector<64x1xf32>
    %278 = arith.mulf %275, %275 : vector<64x196xf32>
    %cst_80 = arith.constant dense<0.000000e+00> : vector<64xf32>
    %279 = vector.multi_reduction <add>, %278, %cst_80 [1] : vector<64x196xf32> to vector<64xf32>
    %280 = vector.shape_cast %279 : vector<64xf32> to vector<64x1xf32>
    %cst_81 = arith.constant 0.00510204071 : f32
    %281 = vector.broadcast %cst_81 : f32 to vector<64x1xf32>
    %282 = arith.mulf %277, %281 : vector<64x1xf32>
    %cst_82 = arith.constant 0.00510204071 : f32
    %283 = vector.broadcast %cst_82 : f32 to vector<64x1xf32>
    %284 = arith.mulf %280, %283 : vector<64x1xf32>
    %285 = arith.mulf %282, %282 : vector<64x1xf32>
    %286 = arith.subf %284, %285 : vector<64x1xf32>
    %cst_83 = arith.constant 9.99999974E-6 : f32
    %287 = vector.broadcast %cst_83 : f32 to vector<64x1xf32>
    %288 = arith.addf %286, %287 : vector<64x1xf32>
    %289 = math.rsqrt %288 : vector<64x1xf32>
    %290 = arith.index_cast %273 : i32 to index
    %c0_84 = arith.constant 0 : index
    %291 = vector.load %arg2[%290, %c0_84] : memref<704x2xf32, #tpu.memory_space<vmem>>, vector<64x2xf32>
    %292 = vector.extract_strided_slice %291 {offsets = [0, 0], sizes = [64, 1], strides = [1, 1]} : vector<64x2xf32> to vector<64x1xf32>
    %293 = arith.mulf %292, %289 : vector<64x1xf32>
    %294 = vector.extract_strided_slice %291 {offsets = [0, 1], sizes = [64, 1], strides = [1, 1]} : vector<64x2xf32> to vector<64x1xf32>
    %295 = arith.mulf %282, %293 : vector<64x1xf32>
    %296 = arith.subf %294, %295 : vector<64x1xf32>
    %297 = vector.broadcast %293 : vector<64x1xf32> to vector<64x196xf32>
    %298 = arith.mulf %275, %297 : vector<64x196xf32>
    %299 = vector.broadcast %296 : vector<64x1xf32> to vector<64x196xf32>
    %300 = arith.addf %298, %299 : vector<64x196xf32>
    %cst_85 = arith.constant 0.000000e+00 : f32
    %301 = vector.broadcast %cst_85 : f32 to vector<64x196xf32>
    %302 = arith.maximumf %300, %301 : vector<64x196xf32>
    %303 = arith.truncf %302 : vector<64x196xf32> to vector<64x196xbf16>
    %304 = arith.index_cast %273 : i32 to index
    %c0_86 = arith.constant 0 : index
    %305 = vector.load %arg5[%304, %c0_86] : memref<704x196xbf16, #tpu.memory_space<vmem>>, vector<64x196xbf16>
    tpu.vector_store %arg5[%304, %c0_86], %303 {strides = array<i32>} : memref<704x196xbf16, #tpu.memory_space<vmem>>, vector<64x196xbf16>,
    %c9_i32 = arith.constant 9 : i32
    %c64_i32_87 = arith.constant 64 : i32
    %306 = arith.muli %c9_i32, %c64_i32_87 : i32
    %307 = tpu.assume_multiple %306, 64 : i32
    %308 = arith.index_cast %307 : i32 to index
    %c0_88 = arith.constant 0 : index
    %309 = vector.load %arg1[%308, %c0_88] : memref<704x196xf32, #tpu.memory_space<vmem>>, vector<64x196xf32>
    %cst_89 = arith.constant dense<0.000000e+00> : vector<64xf32>
    %310 = vector.multi_reduction <add>, %309, %cst_89 [1] : vector<64x196xf32> to vector<64xf32>
    %311 = vector.shape_cast %310 : vector<64xf32> to vector<64x1xf32>
    %312 = arith.mulf %309, %309 : vector<64x196xf32>
    %cst_90 = arith.constant dense<0.000000e+00> : vector<64xf32>
    %313 = vector.multi_reduction <add>, %312, %cst_90 [1] : vector<64x196xf32> to vector<64xf32>
    %314 = vector.shape_cast %313 : vector<64xf32> to vector<64x1xf32>
    %cst_91 = arith.constant 0.00510204071 : f32
    %315 = vector.broadcast %cst_91 : f32 to vector<64x1xf32>
    %316 = arith.mulf %311, %315 : vector<64x1xf32>
    %cst_92 = arith.constant 0.00510204071 : f32
    %317 = vector.broadcast %cst_92 : f32 to vector<64x1xf32>
    %318 = arith.mulf %314, %317 : vector<64x1xf32>
    %319 = arith.mulf %316, %316 : vector<64x1xf32>
    %320 = arith.subf %318, %319 : vector<64x1xf32>
    %cst_93 = arith.constant 9.99999974E-6 : f32
    %321 = vector.broadcast %cst_93 : f32 to vector<64x1xf32>
    %322 = arith.addf %320, %321 : vector<64x1xf32>
    %323 = math.rsqrt %322 : vector<64x1xf32>
    %324 = arith.index_cast %307 : i32 to index
    %c0_94 = arith.constant 0 : index
    %325 = vector.load %arg2[%324, %c0_94] : memref<704x2xf32, #tpu.memory_space<vmem>>, vector<64x2xf32>
    %326 = vector.extract_strided_slice %325 {offsets = [0, 0], sizes = [64, 1], strides = [1, 1]} : vector<64x2xf32> to vector<64x1xf32>
    %327 = arith.mulf %326, %323 : vector<64x1xf32>
    %328 = vector.extract_strided_slice %325 {offsets = [0, 1], sizes = [64, 1], strides = [1, 1]} : vector<64x2xf32> to vector<64x1xf32>
    %329 = arith.mulf %316, %327 : vector<64x1xf32>
    %330 = arith.subf %328, %329 : vector<64x1xf32>
    %331 = vector.broadcast %327 : vector<64x1xf32> to vector<64x196xf32>
    %332 = arith.mulf %309, %331 : vector<64x196xf32>
    %333 = vector.broadcast %330 : vector<64x1xf32> to vector<64x196xf32>
    %334 = arith.addf %332, %333 : vector<64x196xf32>
    %cst_95 = arith.constant 0.000000e+00 : f32
    %335 = vector.broadcast %cst_95 : f32 to vector<64x196xf32>
    %336 = arith.maximumf %334, %335 : vector<64x196xf32>
    %337 = arith.truncf %336 : vector<64x196xf32> to vector<64x196xbf16>
    %338 = arith.index_cast %307 : i32 to index
    %c0_96 = arith.constant 0 : index
    %339 = vector.load %arg5[%338, %c0_96] : memref<704x196xbf16, #tpu.memory_space<vmem>>, vector<64x196xbf16>
    tpu.vector_store %arg5[%338, %c0_96], %337 {strides = array<i32>} : memref<704x196xbf16, #tpu.memory_space<vmem>>, vector<64x196xbf16>,
    %c10_i32 = arith.constant 10 : i32
    %c64_i32_97 = arith.constant 64 : i32
    %340 = arith.muli %c10_i32, %c64_i32_97 : i32
    %341 = tpu.assume_multiple %340, 64 : i32
    %342 = arith.index_cast %341 : i32 to index
    %c0_98 = arith.constant 0 : index
    %343 = vector.load %arg1[%342, %c0_98] : memref<704x196xf32, #tpu.memory_space<vmem>>, vector<64x196xf32>
    %cst_99 = arith.constant dense<0.000000e+00> : vector<64xf32>
    %344 = vector.multi_reduction <add>, %343, %cst_99 [1] : vector<64x196xf32> to vector<64xf32>
    %345 = vector.shape_cast %344 : vector<64xf32> to vector<64x1xf32>
    %346 = arith.mulf %343, %343 : vector<64x196xf32>
    %cst_100 = arith.constant dense<0.000000e+00> : vector<64xf32>
    %347 = vector.multi_reduction <add>, %346, %cst_100 [1] : vector<64x196xf32> to vector<64xf32>
    %348 = vector.shape_cast %347 : vector<64xf32> to vector<64x1xf32>
    %cst_101 = arith.constant 0.00510204071 : f32
    %349 = vector.broadcast %cst_101 : f32 to vector<64x1xf32>
    %350 = arith.mulf %345, %349 : vector<64x1xf32>
    %cst_102 = arith.constant 0.00510204071 : f32
    %351 = vector.broadcast %cst_102 : f32 to vector<64x1xf32>
    %352 = arith.mulf %348, %351 : vector<64x1xf32>
    %353 = arith.mulf %350, %350 : vector<64x1xf32>
    %354 = arith.subf %352, %353 : vector<64x1xf32>
    %cst_103 = arith.constant 9.99999974E-6 : f32
    %355 = vector.broadcast %cst_103 : f32 to vector<64x1xf32>
    %356 = arith.addf %354, %355 : vector<64x1xf32>
    %357 = math.rsqrt %356 : vector<64x1xf32>
    %358 = arith.index_cast %341 : i32 to index
    %c0_104 = arith.constant 0 : index
    %359 = vector.load %arg2[%358, %c0_104] : memref<704x2xf32, #tpu.memory_space<vmem>>, vector<64x2xf32>
    %360 = vector.extract_strided_slice %359 {offsets = [0, 0], sizes = [64, 1], strides = [1, 1]} : vector<64x2xf32> to vector<64x1xf32>
    %361 = arith.mulf %360, %357 : vector<64x1xf32>
    %362 = vector.extract_strided_slice %359 {offsets = [0, 1], sizes = [64, 1], strides = [1, 1]} : vector<64x2xf32> to vector<64x1xf32>
    %363 = arith.mulf %350, %361 : vector<64x1xf32>
    %364 = arith.subf %362, %363 : vector<64x1xf32>
    %365 = vector.broadcast %361 : vector<64x1xf32> to vector<64x196xf32>
    %366 = arith.mulf %343, %365 : vector<64x196xf32>
    %367 = vector.broadcast %364 : vector<64x1xf32> to vector<64x196xf32>
    %368 = arith.addf %366, %367 : vector<64x196xf32>
    %cst_105 = arith.constant 0.000000e+00 : f32
    %369 = vector.broadcast %cst_105 : f32 to vector<64x196xf32>
    %370 = arith.maximumf %368, %369 : vector<64x196xf32>
    %371 = arith.truncf %370 : vector<64x196xf32> to vector<64x196xbf16>
    %372 = arith.index_cast %341 : i32 to index
    %c0_106 = arith.constant 0 : index
    %373 = vector.load %arg5[%372, %c0_106] : memref<704x196xbf16, #tpu.memory_space<vmem>>, vector<64x196xbf16>
    tpu.vector_store %arg5[%372, %c0_106], %371 {strides = array<i32>} : memref<704x196xbf16, #tpu.memory_space<vmem>>, vector<64x196xbf16>,
    %c11_i32 = arith.constant 11 : i32
    %c0_107 = arith.constant 0 : index
    %c0_108 = arith.constant 0 : index
    %374 = vector.load %arg3[%c0_107, %c0_108] : memref<128x704xbf16, #tpu.memory_space<vmem>>, vector<128x704xbf16>
    %c0_109 = arith.constant 0 : index
    %c0_110 = arith.constant 0 : index
    %375 = vector.load %arg5[%c0_109, %c0_110] : memref<704x196xbf16, #tpu.memory_space<vmem>>, vector<704x196xbf16>
    %cst_111 = arith.constant dense<0.000000e+00> : vector<128x196xf32>
    %376 = tpu.matmul %374, %375, %cst_111 {dimension_numbers = #tpu.dot_dimension_numbers<[1], [0], [0], [1], [0, 0, 1, 1], [], []>} : vector<128x704xbf16>, vector<704x196xbf16>, vector<128x196xf32> -> vector<128x196xf32>
    %c0_112 = arith.constant 0 : index
    %c0_113 = arith.constant 0 : index
    %377 = vector.load %arg4[%c0_112, %c0_113] : memref<128x196xf32, #tpu.memory_space<vmem>>, vector<128x196xf32>
    tpu.vector_store %arg4[%c0_112, %c0_113], %376 {strides = array<i32>} : memref<128x196xf32, #tpu.memory_space<vmem>>, vector<128x196xf32>,
    return
  }
  func.func @transform_0(%arg0: i32) -> (i32, i32) {
    %c0_i32 = arith.constant 0 : i32
    %c0_i32_0 = arith.constant 0 : i32
    %c0_i32_1 = arith.constant 0 : i32
    return %c0_i32, %c0_i32_0 : i32, i32
  }
  func.func @transform_1(%arg0: i32) -> (i32, i32) {
    %c0_i32 = arith.constant 0 : i32
    %c0_i32_0 = arith.constant 0 : i32
    %c0_i32_1 = arith.constant 0 : i32
    return %c0_i32, %c0_i32_0 : i32, i32
  }
  func.func @transform_2(%arg0: i32) -> (i32, i32) {
    %c0_i32 = arith.constant 0 : i32
    %c0_i32_0 = arith.constant 0 : i32
    %c0_i32_1 = arith.constant 0 : i32
    return %c0_i32, %c0_i32_0 : i32, i32
  }
  func.func @transform_3(%arg0: i32) -> (i32, i32) {
    %c0_i32 = arith.constant 0 : i32
    %c0_i32_0 = arith.constant 0 : i32
    %c0_i32_1 = arith.constant 0 : i32
    return %c0_i32, %c0_i32_0 : i32, i32
  }
}

</mosaic_0001>

<bundles_post_ra>
// kernel: tpu_custom_call.1
= control target key start
LH: loop header
LB: loop body
LE: loop exit
PB: predicated region body
PF: predicated region fallthrough
CT: control target
= control target key end

     0   :  { %vm34_vm0 = vcmask 556032   ;;  %s7618_s26 = smov 1   ;;  %s13339_s0 = inlined_call_operand.vmem [shape: f32[704,196], index: 0, kind: input, shape index: {}]   ;;  %s13340_s1 = inlined_call_operand.vmem [shape: f32[704,2], index: 1, kind: input, shape index: {}]   ;;  %s13341_s2 = inlined_call_operand.vmem [shape: bf16[128,704], index: 2, kind: input, shape index: {}]   ;;  %s13342_s3 = inlined_call_operand.vmem [shape: f32[128,196], index: 3, kind: output, shape index: {}]  }
   0x1   :  { %v7644_v0 = vld [vmem:[%s13339_s0 + $0x40] sm:$0xff]  ;;  %v27_v1 = vld [vmem:[%s13339_s0 + $0x48] sm:$0xff]  ;;  %v29_v10 = vld [vmem:[%s13339_s0 + $0x58] sm:$0xff] }
   0x2   :  { %v22_v2 = vld [vmem:[%s13339_s0 + $0x20] sm:$0xff]  ;;  %v51_v3 = vsel %vm34_vm0, %v27_v1, 0.0  ;;  %v23_v4 = vld [vmem:[%s13339_s0 + $0x28] sm:$0xff]  ;;  %v25_v13 = vld [vmem:[%s13339_s0 + $0x38] sm:$0xff]  ;;  %v55_v16 = vsel %vm34_vm0, %v29_v10, 0.0  ;;  %v78_v49 = vmul.f32 %v29_v10, %v29_v10  ;;  %v76_v50 = vmul.f32 %v27_v1, %v27_v1 }
   0x3   :  { %v18_v5 = vld [vmem:[%s13339_s0] sm:$0xff]  ;;  %v19_v6 = vld [vmem:[%s13339_s0 + $0x8] sm:$0xff]  ;;  %v52_v7 = vadd.f32 %v51_v3, %v7644_v0  ;;  %v43_v8 = vsel %vm34_vm0, %v23_v4, 0.0  ;;  %v21_v14 = vld [vmem:[%s13339_s0 + $0x18] sm:$0xff]  ;;  %v47_v18 = vsel %vm34_vm0, %v25_v13, 0.0  ;;  %v74_v36 = vmul.f32 %v25_v13, %v25_v13 }
   0x4   :  { %v35_v9 = vsel %vm34_vm0, %v19_v6, 0.0  ;;  %v44_v11 = vadd.f32 %v43_v8, %v22_v2  ;;  %v28_v15 = vld [vmem:[%s13339_s0 + $0x50] sm:$0xff]  ;;  %v39_v20 = vsel %vm34_vm0, %v21_v14, 0.0  ;;  %v68_v24 = vmul.f32 %v19_v6, %v19_v6  ;;  %v33_v25 = vld [vmem:[%s13339_s0 + $0x78] sm:$0xff]  ;;  %v31_v26 = vld [vmem:[%s13339_s0 + $0x68] sm:$0xff] }
   0x5   :  { %v36_v12 = vadd.f32 %v35_v9, %v18_v5  ;;  %53 = vadd.xlane.f32.xlu2 %v52_v7  ;;  %v24_v17 = vld [vmem:[%s13339_s0 + $0x30] sm:$0xff]  ;;  %v56_v21 = vadd.f32 %v55_v16, %v28_v15  ;;  %v67_v27 = vmul.f32 %v18_v5, %v18_v5  ;;  %v63_v30 = vsel %vm34_vm0, %v33_v25, 0.0  ;;  %v30_v31 = vld [vmem:[%s13339_s0 + $0x60] sm:$0xff]  ;;  %v6228_v60 = vld [vmem:[%s13339_s0 + $0x98] sm:$0xff] }
   0x6   :  { %45 = vadd.xlane.f32.xlu1 %v44_v11  ;;  %v20_v19 = vld [vmem:[%s13339_s0 + $0x10] sm:$0xff]  ;;  %v48_v22 = vadd.f32 %v47_v18, %v24_v17  ;;  %v83_v28 = vsel %vm34_vm0, %v68_v24, 0.0  ;;  %v59_v32 = vsel %vm34_vm0, %v31_v26, 0.0  ;;  %v72_v37 = vmul.f32 %v23_v4, %v23_v4  ;;  %v6230_v62 = vld [vmem:[%s13339_s0 + $0xa8] sm:$0xff]  ;;  %v6236_v9 = vld [vmem:[%s13339_s0 + $0xd8] sm:$0xff] }
   0x7   :  { %37 = vadd.xlane.f32.xlu0 %v36_v12  ;;  %v40_v23 = vadd.f32 %v39_v20, %v20_v19  ;;  %v32_v29 = vld [vmem:[%s13339_s0 + $0x70] sm:$0xff]  ;;  %v84_v33 = vadd.f32 %v83_v28, %v67_v27  ;;  %v60_v35 = vadd.f32 %v59_v32, %v30_v31  ;;  %v70_v38 = vmul.f32 %v21_v14, %v21_v14  ;;  %v6234_v8 = vld [vmem:[%s13339_s0 + $0xc8] sm:$0xff]  ;;  %v6233_v11 = vld [vmem:[%s13339_s0 + $0xc0] sm:$0xff] }
   0x8   :  { %v64_v34 = vadd.f32 %v63_v30, %v32_v29  ;;  %v73_v39 = vmul.f32 %v24_v17, %v24_v17  ;;  %v71_v40 = vmul.f32 %v22_v2, %v22_v2  ;;  %v95_v41 = vsel %vm34_vm0, %v74_v36, 0.0  ;;  %v7718_v63 = vld [vmem:[%s13339_s0 + $0x90] sm:$0xff]  ;;  %v6229_v2 = vld [vmem:[%s13339_s0 + $0xa0] sm:$0xff]  ;;  %v6226_v10 = vld [vmem:[%s13339_s0 + $0x88] sm:$0xff] }
   0x9   :  { %v69_v42 = vmul.f32 %v20_v19, %v20_v19  ;;  %v91_v43 = vsel %vm34_vm0, %v72_v37, 0.0  ;;  %v87_v44 = vsel %vm34_vm0, %v70_v38, 0.0  ;;  %v80_v48 = vmul.f32 %v31_v26, %v31_v26  ;;  %v6235_v13 = vld [vmem:[%s13339_s0 + $0xd0] sm:$0xff] }
   0xa   :  { %v96_v45 = vadd.f32 %v95_v41, %v73_v39  ;;  %v92_v46 = vadd.f32 %v91_v43, %v71_v40  ;;  %v79_v51 = vmul.f32 %v30_v31, %v30_v31  ;;  %v77_v52 = vmul.f32 %v28_v15, %v28_v15  ;;  %v6225_v15 = vld [vmem:[%s13339_s0 + $0x80] sm:$0xff]  ;;  %v6239_v24 = vld [vmem:[%s13339_s0 + $0xf0] sm:$0xff] }
   0xb   :  { %v88_v47 = vadd.f32 %v87_v44, %v69_v42  ;;  %v107_v53 = vsel %vm34_vm0, %v80_v48, 0.0  ;;  %v75_v54 = vmul.f32 %v7644_v0, %v7644_v0  ;;  %v103_v55 = vsel %vm34_vm0, %v78_v49, 0.0  ;;  %v6231_v27 = vld [vmem:[%s13339_s0 + $0xb0] sm:$0xff]  ;;  %v6237_v39 = vld [vmem:[%s13339_s0 + $0xe0] sm:$0xff] }
   0xc   :  { %v99_v56 = vsel %vm34_vm0, %v76_v50, 0.0  ;;  %v108_v57 = vadd.f32 %v107_v53, %v79_v51  ;;  %v104_v58 = vadd.f32 %v103_v55, %v77_v52  ;;  %v82_v61 = vmul.f32 %v33_v25, %v33_v25 }
   0xd   :  { %57 = vadd.xlane.f32.xlu2 %v56_v21  ;;  %v100_v59 = vadd.f32 %v99_v56, %v75_v54  ;;  %v471_v0 = vsel %vm34_vm0, %v6228_v60, 0.0  ;;  %v81_v1 = vmul.f32 %v32_v29, %v32_v29  ;;  %v475_v3 = vsel %vm34_vm0, %v6230_v62, 0.0  ;;  %v6240_v21 = vld [vmem:[%s13339_s0 + $0xf8] sm:$0xff] }
   0xe   :  { %49 = vadd.xlane.f32.xlu1 %v48_v22  ;;  %v111_v4 = vsel %vm34_vm0, %v82_v61, 0.0  ;;  %v472_v5 = vadd.f32 %v7718_v63, %v471_v0  ;;  %v476_v6 = vadd.f32 %v6229_v2, %v475_v3  ;;  %v483_v12 = vsel %vm34_vm0, %v6234_v8, 0.0  ;;  %v6232_v22 = vld [vmem:[%s13339_s0 + $0xb8] sm:$0xff] }
   0xf   :  { %41 = vadd.xlane.f32.xlu0 %v40_v23  ;;  %v112_v7 = vadd.f32 %v111_v4, %v81_v1  ;;  %v487_v14 = vsel %vm34_vm0, %v6236_v9, 0.0  ;;  %v467_v16 = vsel %vm34_vm0, %v6226_v10, 0.0  ;;  %v484_v17 = vadd.f32 %v6233_v11, %v483_v12 }
  0x10   :  { %v488_v18 = vadd.f32 %v6235_v13, %v487_v14  ;;  %v468_v19 = vadd.f32 %v6225_v15, %v467_v16  ;;  %v500_v20 = vmul.f32 %v6226_v10, %v6226_v10  ;;  %v499_v23 = vmul.f32 %v6225_v15, %v6225_v15 }
  0x11   :  { %v495_v25 = vsel %vm34_vm0, %v6240_v21, 0.0  ;;  %v479_v28 = vsel %vm34_vm0, %v6232_v22, 0.0  ;;  %v504_v32 = vmul.f32 %v6230_v62, %v6230_v62  ;;  %v505_v36 = vmul.f32 %v6231_v27, %v6231_v27 }
  0x12   :  { %v515_v26 = vsel %vm34_vm0, %v500_v20, 0.0  ;;  %v496_v29 = vadd.f32 %v6239_v24, %v495_v25  ;;  %v480_v31 = vadd.f32 %v6231_v27, %v479_v28  ;;  %v510_v44 = vmul.f32 %v6236_v9, %v6236_v9 }
  0x13   :  { %v516_v30 = vadd.f32 %v515_v26, %v499_v23  ;;  %v523_v37 = vsel %vm34_vm0, %v504_v32, 0.0  ;;  %v511_v48 = vmul.f32 %v6237_v39, %v6237_v39  ;;  %v501_v50 = vmul.f32 %v7718_v63, %v7718_v63 }
  0x14   :  { %v535_v49 = vsel %vm34_vm0, %v510_v44, 0.0  ;;  %v508_v56 = vmul.f32 %v6234_v8, %v6234_v8  ;;  %v513_v61 = vmul.f32 %v6239_v24, %v6239_v24 }
  0x15   :  { %85 = vadd.xlane.f32.xlu2 %v84_v33  ;;  %v506_v33 = vmul.f32 %v6232_v22, %v6232_v22 }
  0x16   :  { %65 = vadd.xlane.f32.xlu1 %v64_v34  ;;  %v6238_v34 = vld [vmem:[%s13339_s0 + $0xe8] sm:$0xff] }
  0x17   :  { %61 = vadd.xlane.f32.xlu0 %v60_v35  ;;  %v503_v35 = vmul.f32 %v6229_v2, %v6229_v2  ;;  %v527_v38 = vsel %vm34_vm0, %v506_v33, 0.0  ;;  %v491_v40 = vsel %vm34_vm0, %v6238_v34, 0.0 }
  0x18   :  { %v528_v42 = vadd.f32 %v527_v38, %v505_v36  ;;  %v492_v43 = vadd.f32 %v6237_v39, %v491_v40 }
  0x19   :  { %v524_v41 = vadd.f32 %v523_v37, %v503_v35 }
  0x1d   :  { %97 = vadd.xlane.f32.xlu2 %v96_v45  ;;  %v512_v45 = vmul.f32 %v6238_v34, %v6238_v34 }
  0x1e   :  { %93 = vadd.xlane.f32.xlu1 %v92_v46  ;;  %v502_v46 = vmul.f32 %v6228_v60, %v6228_v60  ;;  %v514_v60 = vmul.f32 %v6240_v21, %v6240_v21 }
  0x1f   :  { %89 = vadd.xlane.f32.xlu0 %v88_v47  ;;  %v509_v47 = vmul.f32 %v6235_v13, %v6235_v13  ;;  %v539_v51 = vsel %vm34_vm0, %v512_v45, 0.0 }
  0x20   :  { %v519_v52 = vsel %vm34_vm0, %v502_v46, 0.0  ;;  %v540_v54 = vadd.f32 %v539_v51, %v511_v48  ;;  %v543_v62 = vsel %vm34_vm0, %v514_v60, 0.0 }
  0x21   :  { %v536_v53 = vadd.f32 %v535_v49, %v509_v47  ;;  %v520_v55 = vadd.f32 %v519_v52, %v501_v50  ;;  %v544_v63 = vadd.f32 %v543_v62, %v513_v61 }
  0x25   :  { %109 = vadd.xlane.f32.xlu2 %v108_v57  ;;  %v507_v57 = vmul.f32 %v6233_v11, %v6233_v11 }
  0x26   :  { %105 = vadd.xlane.f32.xlu1 %v104_v58  ;;  %v531_v58 = vsel %vm34_vm0, %v508_v56, 0.0 }
  0x27   :  { %101 = vadd.xlane.f32.xlu0 %v100_v59  ;;  %v532_v59 = vadd.f32 %v531_v58, %v507_v57 }
  0x2d   :  { %473 = vadd.xlane.f32.xlu2 %v472_v5 }
  0x2e   :  { %477 = vadd.xlane.f32.xlu1 %v476_v6 }
  0x2f   :  { %113 = vadd.xlane.f32.xlu0 %v112_v7 }
  0x35   :  { %485 = vadd.xlane.f32.xlu2 %v484_v17 }
  0x36   :  { %489 = vadd.xlane.f32.xlu1 %v488_v18 }
  0x37   :  { %469 = vadd.xlane.f32.xlu0 %v468_v19 }
  0x3d   :  { %497 = vadd.xlane.f32.xlu2 %v496_v29 }
  0x3e   :  { %517 = vadd.xlane.f32.xlu1 %v516_v30 }
  0x3f   :  { %481 = vadd.xlane.f32.xlu0 %v480_v31 }
  0x45   :  { %525 = vadd.xlane.f32.xlu2 %v524_v41 }
  0x46   :  { %529 = vadd.xlane.f32.xlu1 %v528_v42 }
  0x47   :  { %493 = vadd.xlane.f32.xlu0 %v492_v43 }
  0x4d   :  { %537 = vadd.xlane.f32.xlu2 %v536_v53 }
  0x4e   :  { %541 = vadd.xlane.f32.xlu1 %v540_v54 }
  0x4f   :  { %521 = vadd.xlane.f32.xlu0 %v520_v55 }
  0x57   :  { %533 = vadd.xlane.f32.xlu0 %v532_v59 }
  0x5f   :  { %545 = vadd.xlane.f32.xlu0 %v544_v63 }
  0x78   :  { %v54_v0 = vpop.xlane.xlu2 %53 }
  0x79   :  { %v46_v1 = vpop.xlane.xlu1 %45  ;;  %v7798_v30 = vmul.f32 0.0051020407, %v54_v0 }
  0x7a   :  { %v38_v2 = vpop.xlane.xlu0 %37  ;;  %v7787_v15 = vmul.f32 0.0051020407, %v46_v1 }
  0x7b   :  { %v7779_v6 = vmul.f32 0.0051020407, %v38_v2  ;;  %v135_v39 = vmul.f32 %v7798_v30, %v7798_v30 }
  0x7c   :  { %v133_v22 = vmul.f32 %v7787_v15, %v7787_v15 }
  0x7d   :  { %v131_v8 = vmul.f32 %v7779_v6, %v7779_v6 }
  0x80   :  { %v58_v3 = vpop.xlane.xlu2 %57 }
  0x81   :  { %v50_v4 = vpop.xlane.xlu1 %49  ;;  %v7804_v33 = vmul.f32 0.0051020407, %v58_v3 }
  0x82   :  { %v42_v5 = vpop.xlane.xlu0 %41  ;;  %v7783_v12 = vmul.f32 0.0051020407, %v50_v4 }
  0x83   :  { %v7789_v16 = vmul.f32 0.0051020407, %v42_v5  ;;  %v136_v44 = vmul.f32 %v7804_v33, %v7804_v33 }
  0x84   :  { %v134_v17 = vmul.f32 %v7783_v12, %v7783_v12 }
  0x85   :  { %v132_v23 = vmul.f32 %v7789_v16, %v7789_v16 }
  0x88   :  { %v86_v7 = vpop.xlane.xlu2 %85 }
  0x89   :  { %v66_v9 = vpop.xlane.xlu1 %65  ;;  %v123_v10 = vmul.f32 0.0051020407, %v86_v7 }
  0x8a   :  { %v62_v11 = vpop.xlane.xlu0 %61  ;;  %v7826_v55 = vmul.f32 0.0051020407, %v66_v9 }
  0x8b   :  { %v139_v13 = vsub.f32 %v123_v10, %v131_v8  ;;  %v7800_v31 = vmul.f32 0.0051020407, %v62_v11  ;;  %v235_v8 = vld [vmem:[%s13340_s1] sm:$0xff] }
  0x8c   :  { %v138_v4 = vmul.f32 %v7826_v55, %v7826_v55 }
  0x8d   :  { %v7785_v14 = vadd.f32 1e-05, %v139_v13  ;;  %v137_v40 = vmul.f32 %v7800_v31, %v7800_v31 }
  0x8f   :  { %7195 = vrsqrt.f32 %v7785_v14  ;;  %vm161_vm2 = vweird.f32 %v7785_v14 }
  0x90   :  { %v98_v18 = vpop.xlane.xlu2 %97 }
  0x91   :  { %v94_v19 = vpop.xlane.xlu1 %93  ;;  %v126_v20 = vmul.f32 0.0051020407, %v98_v18 }
  0x92   :  { %v90_v21 = vpop.xlane.xlu0 %89  ;;  %v125_v24 = vmul.f32 0.0051020407, %v94_v19 }
  0x93   :  { %v124_v25 = vmul.f32 0.0051020407, %v90_v21  ;;  %v142_v26 = vsub.f32 %v126_v20, %v134_v17 }
  0x94   :  { %v141_v27 = vsub.f32 %v125_v24, %v133_v22 }
  0x95   :  { %v140_v28 = vsub.f32 %v124_v25, %v132_v23  ;;  %v7196_v29 = vpop.eup %7195  ;;  %v7802_v32 = vadd.f32 1e-05, %v142_v26 }
  0x96   :  { %v156_v34 = vmul.f32 %v7196_v29, %v7785_v14  ;;  %v7807_v35 = vadd.f32 1e-05, %v141_v27  ;;  %vm162_vm1 = vweird.f32 %v7196_v29 }
  0x97   :  { %v7809_v36 = vadd.f32 1e-05, %v140_v28  ;;  %7197 = vrsqrt.f32 %v7802_v32  ;;  %vm163_vm3 = vmor %vm161_vm2, %vm162_vm1  ;;  %vm191_vm12 = vweird.f32 %v7802_v32 }
  0x98   :  { %v157_v37 = vmul.f32 %v7196_v29, %v156_v34  ;;  %7199 = vrsqrt.f32 %v7807_v35  ;;  %v110_v38 = vpop.xlane.xlu2 %109  ;;  %vm181_vm5 = vweird.f32 %v7807_v35 }
  0x99   :  { %7201 = vrsqrt.f32 %v7809_v36  ;;  %v106_v41 = vpop.xlane.xlu1 %105  ;;  %v129_v42 = vmul.f32 0.0051020407, %v110_v38  ;;  %vm171_vm8 = vweird.f32 %v7809_v36 }
  0x9a   :  { %v102_v43 = vpop.xlane.xlu0 %101  ;;  %v158_v45 = vmul.f32 0.5, %v157_v37  ;;  %v128_v46 = vmul.f32 0.0051020407, %v106_v41 }
  0x9b   :  { %v127_v47 = vmul.f32 0.0051020407, %v102_v43  ;;  %v145_v48 = vsub.f32 %v129_v42, %v137_v40 }
  0x9c   :  { %v159_v49 = vsub.f32 1.5, %v158_v45  ;;  %v144_v50 = vsub.f32 %v128_v46, %v136_v44 }
  0x9d   :  { %v143_v51 = vsub.f32 %v127_v47, %v135_v39  ;;  %v7820_v52 = vpop.eup %7197  ;;  %v7822_v53 = vadd.f32 1e-05, %v145_v48 }
  0x9e   :  { %v7824_v54 = vpop.eup %7199  ;;  %v186_v56 = vmul.f32 %v7820_v52, %v7802_v32  ;;  %v7830_v57 = vadd.f32 1e-05, %v144_v50  ;;  %v160_v61 = vmul.f32 %v7196_v29, %v159_v49  ;;  %vm192_vm10 = vweird.f32 %v7820_v52  ;;  %v240_v32 = vld [vmem:[%s13340_s1 + $0x28] sm:$0xff] }
  0x9f   :  { %v7832_v58 = vadd.f32 1e-05, %v143_v51  ;;  %v7834_v59 = vpop.eup %7201  ;;  %v176_v60 = vmul.f32 %v7824_v54, %v7807_v35  ;;  %7203 = vrsqrt.f32 %v7822_v53  ;;  %vm182_vm4 = vweird.f32 %v7824_v54  ;;  %vm7928_vm15 = vmor %vm191_vm12, %vm192_vm10 }
  0xa0   :  { %v187_v62 = vmul.f32 %v7820_v52, %v186_v56  ;;  %v166_v63 = vmul.f32 %v7834_v59, %v7809_v36  ;;  %7205 = vrsqrt.f32 %v7830_v57  ;;  %v7843_v0 = vpop.xlane.xlu2 %473  ;;  %v164_v10 = vsel %vm163_vm3, %v7196_v29, %v160_v61  ;;  %vm183_vm7 = vmor %vm181_vm5, %vm182_vm4  ;;  %v236_v36 = vld [vmem:[%s13340_s1 + $0x8] sm:$0xff] }
  0xa1   :  { %v177_v1 = vmul.f32 %v7824_v54, %v176_v60  ;;  %7207 = vrsqrt.f32 %v7832_v58  ;;  %v7848_v2 = vpop.xlane.xlu1 %477  ;;  %v7858_v19 = vmul.f32 %v235_v8, %v164_v10  ;;  %vm172_vm6 = vweird.f32 %v7834_v59 }
  0xa2   :  { %v114_v3 = vpop.xlane.xlu0 %113  ;;  %v167_v5 = vmul.f32 %v7834_v59, %v166_v63  ;;  %v188_v11 = vmul.f32 0.5, %v187_v62  ;;  %vm173_vm9 = vmor %vm171_vm8, %vm172_vm6  ;;  %vm211_vm14 = vweird.f32 %v7830_v57  ;;  %vm201_vm1 = vweird.f32 %v7832_v58 }
  0xa3   :  { %v130_v7 = vmul.f32 0.0051020407, %v114_v3  ;;  %v178_v9 = vmul.f32 0.5, %v177_v1  ;;  %13452 = vst [vmem:[#allocation3_spill] sm:$0xff] %v7858_v19  ;;  %v251_v26 = vmul.f32 %v7858_v19, %v7779_v6  ;;  %v237_v6 = vld [vmem:[%s13340_s1 + $0x10] sm:$0xff]  ;;  %v238_v1 = vld [vmem:[%s13340_s1 + $0x18] sm:$0xff]  ;;  %vm221_vm6 = vweird.f32 %v7822_v53 }
  0xa4   :  { %v168_v13 = vmul.f32 0.5, %v167_v5  ;;  %v189_v28 = vsub.f32 1.5, %v188_v11 }
  0xa5   :  { %v146_v14 = vsub.f32 %v130_v7, %v138_v4  ;;  %v7856_v17 = vpop.eup %7203  ;;  %v179_v18 = vsub.f32 1.5, %v178_v9  ;;  %267 = vrot.lane.b32.xlu1 %v251_v26, %s7618_s26  ;;  %v239_v4 = vld [vmem:[%s13340_s1 + $0x20] sm:$0xff] }
  0xa6   :  { %v7861_v20 = vpop.eup %7205  ;;  %v169_v21 = vsub.f32 1.5, %v168_v13  ;;  %v216_v22 = vmul.f32 %v7856_v17, %v7822_v53  ;;  %v190_v48 = vmul.f32 %v7820_v52, %v189_v28  ;;  %vm222_vm4 = vweird.f32 %v7856_v17  ;;  %v242_v53 = vld [vmem:[%s13340_s1 + $0x38] sm:$0xff] }
  0xa7   :  { %v7866_v23 = vadd.f32 1e-05, %v146_v14  ;;  %v7868_v24 = vpop.eup %7207  ;;  %v206_v25 = vmul.f32 %v7861_v20, %v7830_v57  ;;  %v180_v27 = vmul.f32 %v7824_v54, %v179_v18  ;;  %vm212_vm11 = vweird.f32 %v7861_v20  ;;  %vm7981_vm8 = vmor %vm221_vm6, %vm222_vm4 }
  0xa8   :  { %v217_v29 = vmul.f32 %v7856_v17, %v216_v22  ;;  %v196_v34 = vmul.f32 %v7868_v24, %v7832_v58  ;;  %v7880_v35 = vpop.xlane.xlu2 %485  ;;  %v170_v41 = vmul.f32 %v7834_v59, %v169_v21  ;;  %vm202_vm13 = vweird.f32 %v7868_v24  ;;  %vm213_vm2 = vmor %vm211_vm14, %vm212_vm11 }
  0xa9   :  { %7209 = vrsqrt.f32 %v7866_v23  ;;  %v207_v37 = vmul.f32 %v7861_v20, %v206_v25  ;;  %v7890_v38 = vpop.xlane.xlu1 %489  ;;  %v184_v40 = vsel %vm183_vm7, %v7824_v54, %v180_v27  ;;  %vm203_vm3 = vmor %vm201_vm1, %vm202_vm13  ;;  %v7966_v25 = vmul.f32 0.0051020407, %v7848_v2 }
  0xaa   :  { %v470_v39 = vpop.xlane.xlu0 %469  ;;  %v197_v42 = vmul.f32 %v7868_v24, %v196_v34  ;;  %v7900_v44 = vmul.f32 %v237_v6, %v184_v40  ;;  %v174_v45 = vsel %vm173_vm9, %v7834_v59, %v170_v41  ;;  %v218_v46 = vmul.f32 0.5, %v217_v29 }
  0xab   :  { %v208_v43 = vmul.f32 0.5, %v207_v37  ;;  %v7907_v51 = vmul.f32 %v236_v36, %v174_v45  ;;  %v7913_v59 = vmul.f32 0.0051020407, %v470_v39  ;;  %vm231_vm7 = vweird.f32 %v7866_v23 }
  0xac   :  { %13453 = vst [vmem:[#allocation4_spill] sm:$0xff] %v7900_v44  ;;  %v198_v47 = vmul.f32 0.5, %v197_v42  ;;  %v253_v50 = vmul.f32 %v7900_v44, %v7787_v15  ;;  %v219_v57 = vsub.f32 1.5, %v218_v46  ;;  %v565_v34 = vmul.f32 %v7966_v25, %v7966_v25 }
  0xad   :  { %v209_v49 = vsub.f32 1.5, %v208_v43  ;;  %v252_v15 = vmul.f32 %v7907_v51, %v7789_v16  ;;  %v194_v16 = vsel %vm7928_vm15, %v7820_v52, %v190_v48  ;;  %v563_v52 = vmul.f32 %v7913_v59, %v7913_v59 }
  0xae   :  { %v199_v56 = vsub.f32 1.5, %v198_v47  ;;  %271 = vrot.lane.b32.xlu0 %v253_v50, %s7618_s26  ;;  %v7957_v14 = vmul.f32 %v238_v1, %v194_v16  ;;  %v220_v22 = vmul.f32 %v7856_v17, %v219_v57  ;;  %v8011_v47 = vmul.f32 0.0051020407, %v7890_v38 }
  0xaf   :  { %v7910_v54 = vpop.eup %7209  ;;  %v210_v61 = vmul.f32 %v7861_v20, %v209_v49  ;;  %269 = vrot.lane.b32.xlu2 %v252_v15, %s7618_s26  ;;  %v8016_v50 = vmul.f32 0.0051020407, %v7843_v0 }
  0xb0   :  { %v226_v60 = vmul.f32 %v7910_v54, %v7866_v23  ;;  %v7933_v63 = vpop.xlane.xlu2 %497  ;;  %v200_v3 = vmul.f32 %v7868_v24, %v199_v56  ;;  %vm232_vm5 = vweird.f32 %v7910_v54  ;;  %v224_v29 = vsel %vm7981_vm8, %v7856_v17, %v220_v22 }
  0xb1   :  { %v518_v5 = vpop.xlane.xlu1 %517  ;;  %v214_v8 = vsel %vm213_vm2, %v7861_v20, %v210_v61  ;;  %vm233_vm9 = vmor %vm231_vm7, %vm232_vm5  ;;  %v568_v0 = vmul.f32 %v8011_v47, %v8011_v47  ;;  %v564_v57 = vmul.f32 %v8016_v50, %v8016_v50 }
  0xb2   :  { %v227_v58 = vmul.f32 %v7910_v54, %v226_v60  ;;  %v482_v7 = vpop.xlane.xlu0 %481  ;;  %v555_v9 = vmul.f32 0.0051020407, %v518_v5  ;;  %v7954_v10 = vmul.f32 %v240_v32, %v214_v8  ;;  %v204_v11 = vsel %vm203_vm3, %v7868_v24, %v200_v3 }
  0xb3   :  { %v7959_v18 = vmul.f32 %v239_v4, %v204_v11  ;;  %v7974_v28 = vmul.f32 0.0051020407, %v482_v7  ;;  %v8038_v11 = vmul.f32 0.0051020407, %v7880_v35 }
  0xb4   :  { %13456 = vst [vmem:[#allocation5_spill] sm:$0xff] %v7954_v10  ;;  %v228_v13 = vmul.f32 0.5, %v227_v58  ;;  %v571_v21 = vsub.f32 %v555_v9, %v563_v52  ;;  %v256_v20 = vmul.f32 %v7954_v10, %v7804_v33  ;;  %v254_v33 = vmul.f32 %v7957_v14, %v7783_v12  ;;  %v241_v12 = vld [vmem:[%s13340_s1 + $0x30] sm:$0xff] }
  0xb5   :  { %13457 = vst [vmem:[#allocation6_spill] sm:$0xff] %v7959_v18  ;;  %v255_v24 = vmul.f32 %v7959_v18, %v7798_v30  ;;  %v566_v17 = vmul.f32 %v7974_v28, %v7974_v28  ;;  %v8006_v43 = vmul.f32 %v241_v12, %v224_v29 }
  0xb6   :  { %v229_v26 = vsub.f32 1.5, %v228_v13  ;;  %v7972_v27 = vadd.f32 1e-05, %v571_v21  ;;  %277 = vrot.lane.b32.xlu0 %v256_v20, %s7618_s26 }
  0xb7   :  { %275 = vrot.lane.b32.xlu1 %v255_v24, %s7618_s26  ;;  %273 = vrot.lane.b32.xlu2 %v254_v33, %s7618_s26  ;;  %v6241_v24 = vld [vmem:[%s13340_s1 + $0x40] sm:$0xff] }
  0xb8   :  { %v230_v30 = vmul.f32 %v7910_v54, %v229_v26  ;;  %7211 = vrsqrt.f32 %v7972_v27  ;;  %v526_v23 = vpop.xlane.xlu2 %525  ;;  %vm593_vm11 = vweird.f32 %v7972_v27 }
  0xb9   :  { %v530_v6 = vpop.xlane.xlu1 %529  ;;  %v557_v37 = vmul.f32 0.0051020407, %v526_v23 }
  0xba   :  { %v494_v39 = vpop.xlane.xlu0 %493  ;;  %v234_v40 = vsel %vm233_vm9, %v7910_v54, %v230_v30  ;;  %v558_v41 = vmul.f32 0.0051020407, %v530_v6 }
  0xbb   :  { %v8004_v42 = vmul.f32 %v242_v53, %v234_v40  ;;  %v573_v36 = vsub.f32 %v557_v37, %v565_v34  ;;  %v8020_v56 = vmul.f32 0.0051020407, %v494_v39  ;;  %v8062_v40 = vmul.f32 0.0051020407, %v7933_v63 }
  0xbc   :  { %v574_v45 = vsub.f32 %v558_v41, %v566_v17 }
  0xbd   :  { %13460 = vst [vmem:[#allocation7_spill] sm:$0xff] %v8004_v42  ;;  %v258_v46 = vmul.f32 %v8004_v42, %v7826_v55  ;;  %v8013_v48 = vadd.f32 1e-05, %v573_v36  ;;  %v257_v55 = vmul.f32 %v8006_v43, %v7800_v31  ;;  %v569_v31 = vmul.f32 %v8020_v56, %v8020_v56 }
  0xbe   :  { %v7212_v49 = vpop.eup %7211  ;;  %v8018_v54 = vadd.f32 1e-05, %v574_v45 }
  0xbf   :  { %v588_v60 = vmul.f32 %v7212_v49, %v7972_v27  ;;  %7213 = vrsqrt.f32 %v8013_v48  ;;  %281 = vrot.lane.b32.xlu1 %v258_v46, %s7618_s26  ;;  %279 = vrot.lane.b32.xlu2 %v257_v55, %s7618_s26  ;;  %vm594_vm10 = vweird.f32 %v7212_v49  ;;  %v567_v27 = vmul.f32 %v8038_v11, %v8038_v11 }
  0xc0   :  { %7215 = vrsqrt.f32 %v8018_v54  ;;  %v538_v38 = vpop.xlane.xlu2 %537  ;;  %vm595_vm12 = vmor %vm593_vm11, %vm594_vm10  ;;  %vm613_vm15 = vweird.f32 %v8013_v48  ;;  %vm623_vm1 = vweird.f32 %v8018_v54 }
  0xc1   :  { %v589_v15 = vmul.f32 %v7212_v49, %v588_v60  ;;  %v542_v61 = vpop.xlane.xlu1 %541  ;;  %v560_v32 = vmul.f32 0.0051020407, %v538_v38 }
  0xc2   :  { %v522_v62 = vpop.xlane.xlu0 %521  ;;  %v561_v16 = vmul.f32 0.0051020407, %v542_v61 }
  0xc3   :  { %v556_v1 = vmul.f32 0.0051020407, %v522_v62  ;;  %v590_v3 = vmul.f32 0.5, %v589_v15  ;;  %v576_v4 = vsub.f32 %v560_v32, %v568_v0  ;;  %v570_v0 = vmul.f32 %v8062_v40, %v8062_v40 }
  0xc4   :  { %v577_v58 = vsub.f32 %v561_v16, %v569_v31 }
  0xc5   :  { %v572_v5 = vsub.f32 %v556_v1, %v564_v57  ;;  %v7214_v7 = vpop.eup %7213  ;;  %v591_v8 = vsub.f32 1.5, %v590_v3  ;;  %v8035_v52 = vadd.f32 1e-05, %v576_v4 }
  0xc6   :  { %v7216_v9 = vpop.eup %7215  ;;  %v608_v13 = vmul.f32 %v7214_v7, %v8013_v48  ;;  %v8041_v21 = vadd.f32 1e-05, %v577_v58  ;;  %vm614_vm13 = vweird.f32 %v7214_v7  ;;  %v6243_v48 = vld [vmem:[%s13340_s1 + $0x50] sm:$0xff] }
  0xc7   :  { %v8043_v20 = vadd.f32 1e-05, %v572_v5  ;;  %v618_v22 = vmul.f32 %v7216_v9, %v8018_v54  ;;  %7217 = vrsqrt.f32 %v8035_v52  ;;  %v592_v26 = vmul.f32 %v7212_v49, %v591_v8  ;;  %vm8072_vm2 = vmor %vm613_vm15, %vm614_vm13  ;;  %v6244_v54 = vld [vmem:[%s13340_s1 + $0x58] sm:$0xff] }
  0xc8   :  { %v609_v33 = vmul.f32 %v7214_v7, %v608_v13  ;;  %7219 = vrsqrt.f32 %v8041_v21  ;;  %vm624_vm14 = vweird.f32 %v7216_v9  ;;  %vm653_vm6 = vweird.f32 %v8041_v21 }
  0xc9   :  { %v619_v35 = vmul.f32 %v7216_v9, %v618_v22  ;;  %7221 = vrsqrt.f32 %v8043_v20  ;;  %v596_v30 = vsel %vm595_vm12, %v7212_v49, %v592_v26  ;;  %vm625_vm3 = vmor %vm623_vm1, %vm624_vm14  ;;  %vm603_vm7 = vweird.f32 %v8043_v20 }
  0xca   :  { %v534_v2 = vpop.xlane.xlu0 %533  ;;  %v610_v53 = vmul.f32 0.5, %v609_v33  ;;  %v8055_v29 = vmul.f32 %v6241_v24, %v596_v30  ;;  %vm643_vm11 = vweird.f32 %v8035_v52 }
  0xcb   :  { %v559_v23 = vmul.f32 0.0051020407, %v534_v2  ;;  %v620_v12 = vmul.f32 0.5, %v619_v35  ;;  %v6242_v2 = vld [vmem:[%s13340_s1 + $0x48] sm:$0xff] }
  0xcc   :  { %13461 = vst [vmem:[#allocation8_spill] sm:$0xff] %v8055_v29  ;;  %v611_v34 = vsub.f32 1.5, %v610_v53  ;;  %v684_v37 = vmul.f32 %v8055_v29, %v7913_v59 }
  0xcd   :  { %v575_v6 = vsub.f32 %v559_v23, %v567_v27  ;;  %v8059_v39 = vpop.eup %7217  ;;  %v621_v17 = vsub.f32 1.5, %v620_v12 }
  0xce   :  { %v7220_v41 = vpop.eup %7219  ;;  %v638_v36 = vmul.f32 %v8059_v39, %v8035_v52  ;;  %700 = vrot.lane.b32.xlu2 %v684_v37, %s7618_s26  ;;  %v612_v46 = vmul.f32 %v7214_v7, %v611_v34  ;;  %vm644_vm10 = vweird.f32 %v8059_v39 }
  0xcf   :  { %v8067_v45 = vadd.f32 1e-05, %v575_v6  ;;  %v7222_v59 = vpop.eup %7221  ;;  %v648_v49 = vmul.f32 %v7220_v41, %v8041_v21  ;;  %v622_v60 = vmul.f32 %v7216_v9, %v621_v17  ;;  %vm654_vm4 = vweird.f32 %v7220_v41  ;;  %vm645_vm12 = vmor %vm643_vm11, %vm644_vm10 }
  0xd0   :  { %v639_v55 = vmul.f32 %v8059_v39, %v638_v36  ;;  %v598_v38 = vmul.f32 %v7222_v59, %v8043_v20  ;;  %v616_v32 = vsel %vm8072_vm2, %v7214_v7, %v612_v46  ;;  %vm604_vm5 = vweird.f32 %v7222_v59  ;;  %vm655_vm8 = vmor %vm653_vm6, %vm654_vm4  ;;  %v6246_v36 = vld [vmem:[%s13340_s1 + $0x68] sm:$0xff] }
  0xd1   :  { %7223 = vrsqrt.f32 %v8067_v45  ;;  %v649_v15 = vmul.f32 %v7220_v41, %v648_v49  ;;  %v626_v62 = vsel %vm625_vm3, %v7216_v9, %v622_v60  ;;  %v8090_v1 = vmul.f32 %v6243_v48, %v616_v32  ;;  %vm605_vm9 = vmor %vm603_vm7, %vm604_vm5 }
  0xd2   :  { %v546_v61 = vpop.xlane.xlu0 %545  ;;  %v640_v57 = vmul.f32 0.5, %v639_v55  ;;  %v599_v31 = vmul.f32 %v7222_v59, %v598_v38  ;;  %v8092_v4 = vmul.f32 %v6244_v54, %v626_v62  ;;  %vm633_vm14 = vweird.f32 %v8067_v45  ;;  %v6248_v38 = vld [vmem:[%s13340_s1 + $0x78] sm:$0xff]  ;;  %v6258_v62 = vld [vmem:[%s13339_s0 + $0x148] sm:$0xff] }
  0xd3   :  { %v562_v16 = vmul.f32 0.0051020407, %v546_v61  ;;  %13464 = vst [vmem:[#allocation9_spill] sm:$0xff] %v8090_v1  ;;  %v650_v3 = vmul.f32 0.5, %v649_v15  ;;  %v686_v8 = vmul.f32 %v8090_v1, %v7966_v25  ;;  %v6247_v25 = vld [vmem:[%s13340_s1 + $0x70] sm:$0xff] }
  0xd4   :  { %13465 = vst [vmem:[#allocation10_spill] sm:$0xff] %v8092_v4  ;;  %v600_v58 = vmul.f32 0.5, %v599_v31  ;;  %v687_v22 = vmul.f32 %v8092_v4, %v7974_v28  ;;  %v641_v9 = vsub.f32 1.5, %v640_v57  ;;  %v6251_v15 = vld [vmem:[%s13339_s0 + $0x110] sm:$0xff]  ;;  %v6257_v57 = vld [vmem:[%s13339_s0 + $0x140] sm:$0xff]  ;;  %v913_v31 = vsel %vm34_vm0, %v6258_v62, 0.0 }
  0xd5   :  { %v578_v5 = vsub.f32 %v562_v16, %v570_v0  ;;  %v651_v13 = vsub.f32 1.5, %v650_v3  ;;  %704 = vrot.lane.b32.xlu0 %v686_v8, %s7618_s26  ;;  %v6249_v16 = vld [vmem:[%s13339_s0 + $0x100] sm:$0xff]  ;;  %v6264_v8 = vld [vmem:[%s13339_s0 + $0x178] sm:$0xff] }
  0xd6   :  { %v601_v26 = vsub.f32 1.5, %v600_v58  ;;  %706 = vrot.lane.b32.xlu2 %v687_v22, %s7618_s26  ;;  %v642_v23 = vmul.f32 %v8059_v39, %v641_v9  ;;  %v914_v58 = vadd.f32 %v6257_v57, %v913_v31  ;;  %v6256_v22 = vld [vmem:[%s13339_s0 + $0x138] sm:$0xff]  ;;  %v925_v9 = vsel %vm34_vm0, %v6264_v8, 0.0 }
  0xd7   :  { %v7224_v7 = vpop.eup %7223  ;;  %v586_v24 = vadd.f32 1e-05, %v578_v5  ;;  %v652_v35 = vmul.f32 %v7220_v41, %v651_v13  ;;  %v6254_v13 = vld [vmem:[%s13339_s0 + $0x128] sm:$0xff] }
  0xd8   :  { %v628_v33 = vmul.f32 %v7224_v7, %v8067_v45  ;;  %v602_v28 = vmul.f32 %v7222_v59, %v601_v26  ;;  %vm634_vm13 = vweird.f32 %v7224_v7  ;;  %v6253_v26 = vld [vmem:[%s13339_s0 + $0x120] sm:$0xff] }
  0xd9   :  { %7225 = vrsqrt.f32 %v586_v24  ;;  %v656_v21 = vsel %vm655_vm8, %v7220_v41, %v652_v35  ;;  %v646_v41 = vsel %vm645_vm12, %v8059_v39, %v642_v23  ;;  %vm635_vm15 = vmor %vm633_vm14, %vm634_vm13  ;;  %vm663_vm2 = vweird.f32 %v586_v24 }
  0xda   :  { %v629_v30 = vmul.f32 %v7224_v7, %v628_v33  ;;  %v8109_v27 = vmul.f32 %v6247_v25, %v656_v21  ;;  %v606_v53 = vsel %vm605_vm9, %v7222_v59, %v602_v28  ;;  %v8130_v59 = vmul.f32 %v6246_v36, %v646_v41  ;;  %v6255_v33 = vld [vmem:[%s13339_s0 + $0x130] sm:$0xff]  ;;  %v6260_v21 = vld [vmem:[%s13339_s0 + $0x158] sm:$0xff] }
  0xdb   :  { %v8113_v34 = vmul.f32 %v6242_v2, %v606_v53  ;;  %v909_v35 = vsel %vm34_vm0, %v6256_v22, 0.0  ;;  %v6262_v53 = vld [vmem:[%s13339_s0 + $0x168] sm:$0xff]  ;;  %v933_v23 = vmul.f32 %v6253_v26, %v6253_v26 }
  0xdc   :  { %v630_v12 = vmul.f32 0.5, %v629_v30  ;;  %v690_v20 = vmul.f32 %v8109_v27, %v8020_v56  ;;  %13466 = vst [vmem:[#allocation11_spill] sm:$0xff] %v8130_v59  ;;  %v689_v60 = vmul.f32 %v8130_v59, %v8011_v47  ;;  %v6252_v47 = vld [vmem:[%s13339_s0 + $0x118] sm:$0xff]  ;;  %v910_v2 = vadd.f32 %v6255_v33, %v909_v35 }
  0xdd   :  { %v685_v37 = vmul.f32 %v8113_v34, %v8016_v50  ;;  %v6245_v50 = vld [vmem:[%s13340_s1 + $0x60] sm:$0xff]  ;;  %v901_v61 = vsel %vm34_vm0, %v6252_v47, 0.0  ;;  %v934_v30 = vmul.f32 %v6254_v13, %v6254_v13 }
  0xde   :  { %v631_v6 = vsub.f32 1.5, %v630_v12  ;;  %712 = vrot.lane.b32.xlu2 %v690_v20, %s7618_s26  ;;  %v902_v32 = vadd.f32 %v6251_v15, %v901_v61  ;;  %v6259_v20 = vld [vmem:[%s13339_s0 + $0x150] sm:$0xff]  ;;  %v936_v61 = vmul.f32 %v6256_v22, %v6256_v22 }
  0xdf   :  { %v7226_v17 = vpop.eup %7225  ;;  %702 = vrot.lane.b32.xlu1 %v685_v37, %s7618_s26  ;;  %v953_v12 = vsel %vm34_vm0, %v934_v30, 0.0  ;;  %v6261_v37 = vld [vmem:[%s13339_s0 + $0x160] sm:$0xff] }
  0xe0   :  { %v658_v46 = vmul.f32 %v7226_v17, %v586_v24  ;;  %v632_v56 = vmul.f32 %v7224_v7, %v631_v6  ;;  %vm664_vm1 = vweird.f32 %v7226_v17  ;;  %v905_v24 = vsel %vm34_vm0, %v6254_v13, 0.0 }
  0xe1   :  { %vm665_vm3 = vmor %vm663_vm2, %vm664_vm1  ;;  %v906_v28 = vadd.f32 %v6253_v26, %v905_v24  ;;  %v917_v6 = vsel %vm34_vm0, %v6260_v21, 0.0  ;;  %v954_v41 = vadd.f32 %v953_v12, %v933_v23  ;;  %v957_v31 = vsel %vm34_vm0, %v936_v61, 0.0 }
  0xe2   :  { %v659_v52 = vmul.f32 %v7226_v17, %v658_v46  ;;  %v636_v39 = vsel %vm635_vm15, %v7224_v7, %v632_v56  ;;  %v6263_v7 = vld [vmem:[%s13339_s0 + $0x170] sm:$0xff]  ;;  %v918_v36 = vadd.f32 %v6259_v20, %v917_v6  ;;  %v940_v56 = vmul.f32 %v6260_v21, %v6260_v21 }
  0xe3   :  { %v8132_v49 = vmul.f32 %v6245_v50, %v636_v39  ;;  %v926_v25 = vadd.f32 %v6263_v7, %v925_v9  ;;  %v939_v39 = vmul.f32 %v6259_v20, %v6259_v20  ;;  %v941_v13 = vmul.f32 %v6261_v37, %v6261_v37 }
  0xe4   :  { %v660_v63 = vmul.f32 0.5, %v659_v52  ;;  %v932_v52 = vmul.f32 %v6252_v47, %v6252_v47  ;;  %v935_v47 = vmul.f32 %v6255_v33, %v6255_v33  ;;  %v943_v9 = vmul.f32 %v6263_v7, %v6263_v7 }
  0xe5   :  { %v688_v45 = vmul.f32 %v8132_v49, %v8038_v11 }
  0xe6   :  { %v661_v48 = vsub.f32 1.5, %v660_v63  ;;  %v929_v63 = vmul.f32 %v6249_v16, %v6249_v16 }
  0xe7   :  { %708 = vrot.lane.b32.xlu0 %v688_v45, %s7618_s26  ;;  %710 = vrot.lane.b32.xlu1 %v689_v60, %s7618_s26  ;;  %v965_v45 = vsel %vm34_vm0, %v940_v56, 0.0 }
  0xe8   :  { %v662_v55 = vmul.f32 %v7226_v17, %v661_v48  ;;  %v931_v48 = vmul.f32 %v6251_v15, %v6251_v15 }
  0xea   :  { %v666_v54 = vsel %vm665_vm3, %v7226_v17, %v662_v55  ;;  %v921_v17 = vsel %vm34_vm0, %v6262_v53, 0.0  ;;  %v949_v55 = vsel %vm34_vm0, %v932_v52, 0.0 }
  0xeb   :  { %v8143_v0 = vmul.f32 %v6248_v38, %v666_v54  ;;  %v922_v46 = vadd.f32 %v6261_v37, %v921_v17  ;;  %v966_v38 = vadd.f32 %v965_v45, %v939_v39 }
  0xed   :  { %13467 = vst [vmem:[#allocation12_spill] sm:$0xff] %v8143_v0  ;;  %v691_v11 = vmul.f32 %v8143_v0, %v8062_v40  ;;  %v6250_v40 = vld [vmem:[%s13339_s0 + $0x108] sm:$0xff] }
  0xee   :  { %v897_v3 = vsel %vm34_vm0, %v6250_v40, 0.0  ;;  %v930_v50 = vmul.f32 %v6250_v40, %v6250_v40  ;;  %v937_v40 = vmul.f32 %v6257_v57, %v6257_v57 }
  0xef   :  { %714 = vrot.lane.b32.xlu0 %v691_v11, %s7618_s26  ;;  %v898_v5 = vadd.f32 %v6249_v16, %v897_v3  ;;  %v950_v11 = vadd.f32 %v949_v55, %v931_v48  ;;  %v958_v3 = vadd.f32 %v957_v31, %v935_v47 }
  0xf0   :  { %v945_v60 = vsel %vm34_vm0, %v930_v50, 0.0 }
  0xf1   :  { %v946_v54 = vadd.f32 %v945_v60, %v929_v63 }
 0x107   :  { %903 = vadd.xlane.f32.xlu2 %v902_v32  ;;  %v938_v32 = vmul.f32 %v6258_v62, %v6258_v62 }
 0x109   :  { %v961_v16 = vsel %vm34_vm0, %v938_v32, 0.0  ;;  %v8212_v57 = vpop.permute.xlu2 %269 }
 0x10a   :  { %v962_v15 = vadd.f32 %v961_v16, %v937_v40  ;;  %13468 = vst [vmem:[#allocation13_spill] sm:$0xff] %v8212_v57 }
 0x10f   :  { %915 = vadd.xlane.f32.xlu2 %v914_v58  ;;  %v942_v58 = vmul.f32 %v6262_v53, %v6262_v53 }
 0x111   :  { %899 = vadd.xlane.f32.xlu1 %v898_v5  ;;  %v944_v5 = vmul.f32 %v6264_v8, %v6264_v8  ;;  %v969_v22 = vsel %vm34_vm0, %v942_v58, 0.0  ;;  %v8214_v33 = vpop.permute.xlu2 %273 }
 0x112   :  { %v970_v26 = vadd.f32 %v969_v22, %v941_v13  ;;  %13469 = vst [vmem:[#allocation14_spill] sm:$0xff] %v8214_v33 }
 0x113   :  { %v973_v62 = vsel %vm34_vm0, %v944_v5, 0.0 }
 0x114   :  { %v974_v24 = vadd.f32 %v973_v62, %v943_v9 }
 0x117   :  { %927 = vadd.xlane.f32.xlu2 %v926_v25  ;;  %v8218_v25 = vpop.permute.xlu1 %267 }
 0x119   :  { %907 = vadd.xlane.f32.xlu0 %v906_v28  ;;  %911 = vadd.xlane.f32.xlu1 %v910_v2  ;;  %v8216_v35 = vpop.permute.xlu2 %279 }
 0x11a   :  { %13470 = vst [vmem:[#allocation15_spill] sm:$0xff] %v8216_v35 }
 0x11f   :  { %955 = vadd.xlane.f32.xlu2 %v954_v41 }
 0x120   :  { %v8220_v8 = vpop.permute.xlu0 %271 }
 0x121   :  { %919 = vadd.xlane.f32.xlu0 %v918_v36  ;;  %923 = vadd.xlane.f32.xlu1 %v922_v46 }
 0x127   :  { %967 = vadd.xlane.f32.xlu2 %v966_v38 }
 0x128   :  { %v8222_v28 = vpop.permute.xlu2 %700  ;;  %v8226_v2 = vpop.permute.xlu0 %277 }
 0x129   :  { %947 = vadd.xlane.f32.xlu0 %v946_v54  ;;  %951 = vadd.xlane.f32.xlu1 %v950_v11  ;;  %v8224_v7 = vpop.permute.xlu1 %275 }
 0x130   :  { %v8228_v30 = vpop.permute.xlu2 %706 }
 0x131   :  { %959 = vadd.xlane.f32.xlu0 %v958_v3  ;;  %963 = vadd.xlane.f32.xlu1 %v962_v15  ;;  %v8230_v21 = vpop.permute.xlu1 %281 }
 0x138   :  { %v8236_v12 = vpop.permute.xlu2 %712 }
 0x139   :  { %971 = vadd.xlane.f32.xlu0 %v970_v26  ;;  %975 = vadd.xlane.f32.xlu1 %v974_v24  ;;  %13472 = vst [vmem:[#allocation17_spill] sm:$0xff] %v8236_v12 }
 0x147   :  { %v8232_v53 = vpop.permute.xlu0 %704 }
 0x151   :  { %v8234_v23 = vpop.permute.xlu1 %702 }
 0x152   :  { %13471 = vst [vmem:[#allocation16_spill] sm:$0xff] %v8234_v23 }
 0x159   :  { %v8238_v20 = vpop.permute.xlu0 %708  ;;  %v8240_v37 = vpop.permute.xlu1 %710 }
 0x15a   :  { %13473 = vst [vmem:[#allocation18_spill] sm:$0xff] %v8238_v20 }
 0x161   :  { %v8242_v17 = vpop.permute.xlu0 %714 }
 0x17a   :  { %v904_v6 = vpop.xlane.xlu2 %903 }
 0x17b   :  { %v8252_v61 = vmul.f32 0.0051020407, %v904_v6 }
 0x17d   :  { %v994_v58 = vmul.f32 %v8252_v61, %v8252_v61 }
 0x182   :  { %v916_v41 = vpop.xlane.xlu2 %915 }
 0x184   :  { %v900_v36 = vpop.xlane.xlu1 %899 }
 0x185   :  { %v8248_v38 = vmul.f32 0.0051020407, %v900_v36  ;;  %v8266_v36 = vmul.f32 0.0051020407, %v916_v41 }
 0x187   :  { %v993_v40 = vmul.f32 %v8248_v38, %v8248_v38  ;;  %v997_v41 = vmul.f32 %v8266_v36, %v8266_v36 }
 0x18a   :  { %v928_v46 = vpop.xlane.xlu2 %927 }
 0x18c   :  { %v908_v56 = vpop.xlane.xlu0 %907  ;;  %v912_v50 = vpop.xlane.xlu1 %911 }
 0x18d   :  { %v8244_v52 = vmul.f32 0.0051020407, %v908_v56  ;;  %v8260_v26 = vmul.f32 0.0051020407, %v912_v50 }
 0x18f   :  { %v995_v45 = vmul.f32 %v8244_v52, %v8244_v52 }
 0x192   :  { %v956_v39 = vpop.xlane.xlu2 %955 }
 0x193   :  { %v987_v48 = vmul.f32 0.0051020407, %v956_v39 }
 0x194   :  { %v920_v63 = vpop.xlane.xlu0 %919  ;;  %v924_v60 = vpop.xlane.xlu1 %923 }
 0x195   :  { %v1003_v55 = vsub.f32 %v987_v48, %v995_v45  ;;  %v8250_v11 = vmul.f32 0.0051020407, %v920_v63  ;;  %v996_v48 = vmul.f32 %v8260_v26, %v8260_v26 }
 0x197   :  { %v1011_v54 = vadd.f32 1e-05, %v1003_v55  ;;  %v998_v31 = vmul.f32 %v8250_v11, %v8250_v11 }
 0x199   :  { %7227 = vrsqrt.f32 %v1011_v54  ;;  %vm1043_vm5 = vweird.f32 %v1011_v54 }
 0x19a   :  { %v968_v32 = vpop.xlane.xlu2 %967 }
 0x19b   :  { %v990_v16 = vmul.f32 0.0051020407, %v968_v32 }
 0x19c   :  { %v948_v47 = vpop.xlane.xlu0 %947  ;;  %v952_v3 = vpop.xlane.xlu1 %951 }
 0x19d   :  { %v985_v15 = vmul.f32 0.0051020407, %v948_v47  ;;  %v986_v5 = vmul.f32 0.0051020407, %v952_v3  ;;  %v1006_v13 = vsub.f32 %v990_v16, %v998_v31  ;;  %v8277_v31 = vmul.f32 0.0051020407, %v928_v46 }
 0x19f   :  { %v1001_v9 = vsub.f32 %v985_v15, %v993_v40  ;;  %v1002_v22 = vsub.f32 %v986_v5, %v994_v58  ;;  %v7228_v62 = vpop.eup %7227  ;;  %v8262_v24 = vadd.f32 1e-05, %v1006_v13  ;;  %v8279_v58 = vmul.f32 0.0051020407, %v924_v60  ;;  %v6267_v60 = vld [vmem:[%s13340_s1 + $0x90] sm:$0xff] }
 0x1a0   :  { %v1038_v56 = vmul.f32 %v7228_v62, %v1011_v54  ;;  %vm1044_vm4 = vweird.f32 %v7228_v62 }
 0x1a1   :  { %v8264_v6 = vadd.f32 1e-05, %v1001_v9  ;;  %v8268_v39 = vadd.f32 1e-05, %v1002_v22  ;;  %7229 = vrsqrt.f32 %v8262_v24  ;;  %vm1045_vm6 = vmor %vm1043_vm5, %vm1044_vm4  ;;  %v999_v54 = vmul.f32 %v8279_v58, %v8279_v58 }
 0x1a2   :  { %v1039_v63 = vmul.f32 %v7228_v62, %v1038_v56  ;;  %vm1073_vm7 = vweird.f32 %v8262_v24 }
 0x1a3   :  { %7231 = vrsqrt.f32 %v8268_v39  ;;  %vm1033_vm9 = vweird.f32 %v8268_v39  ;;  %vm1023_vm13 = vweird.f32 %v8264_v6 }
 0x1a4   :  { %v960_v45 = vpop.xlane.xlu0 %959  ;;  %7233 = vrsqrt.f32 %v8264_v6  ;;  %v964_v50 = vpop.xlane.xlu1 %963  ;;  %v1040_v32 = vmul.f32 0.5, %v1039_v63  ;;  %v1000_v63 = vmul.f32 %v8277_v31, %v8277_v31 }
 0x1a5   :  { %v988_v55 = vmul.f32 0.0051020407, %v960_v45  ;;  %v989_v47 = vmul.f32 0.0051020407, %v964_v50 }
 0x1a6   :  { %v1041_v16 = vsub.f32 1.5, %v1040_v32 }
 0x1a7   :  { %v1004_v40 = vsub.f32 %v988_v55, %v996_v48  ;;  %v1005_v3 = vsub.f32 %v989_v47, %v997_v41  ;;  %v7230_v15 = vpop.eup %7229 }
 0x1a8   :  { %v1068_v9 = vmul.f32 %v7230_v15, %v8262_v24  ;;  %v1042_v56 = vmul.f32 %v7228_v62, %v1041_v16  ;;  %vm1074_vm8 = vweird.f32 %v7230_v15 }
 0x1a9   :  { %v8281_v5 = vadd.f32 1e-05, %v1004_v40  ;;  %v7232_v13 = vpop.eup %7231  ;;  %v8284_v22 = vadd.f32 1e-05, %v1005_v3  ;;  %vm1075_vm11 = vmor %vm1073_vm7, %vm1074_vm8 }
 0x1aa   :  { %v8286_v45 = vpop.eup %7233  ;;  %v1028_v46 = vmul.f32 %v7232_v13, %v8268_v39  ;;  %v1069_v48 = vmul.f32 %v7230_v15, %v1068_v9  ;;  %v1046_v40 = vsel %vm1045_vm6, %v7228_v62, %v1042_v56  ;;  %vm1034_vm10 = vweird.f32 %v7232_v13 }
 0x1ab   :  { %7235 = vrsqrt.f32 %v8281_v5  ;;  %v1018_v50 = vmul.f32 %v8286_v45, %v8264_v6  ;;  %v8302_v9 = vmul.f32 %v6267_v60, %v1046_v40  ;;  %vm1024_vm12 = vweird.f32 %v8286_v45  ;;  %vm1035_vm14 = vmor %vm1033_vm9, %vm1034_vm10 }
 0x1ac   :  { %7237 = vrsqrt.f32 %v8284_v22  ;;  %v972_v55 = vpop.xlane.xlu0 %971  ;;  %v1029_v41 = vmul.f32 %v7232_v13, %v1028_v46  ;;  %v976_v32 = vpop.xlane.xlu1 %975  ;;  %v1070_v16 = vmul.f32 0.5, %v1069_v48  ;;  %vm1025_vm15 = vmor %vm1023_vm13, %vm1024_vm12  ;;  %vm1053_vm3 = vweird.f32 %v8281_v5 }
 0x1ad   :  { %v991_v47 = vmul.f32 0.0051020407, %v972_v55  ;;  %v1019_v3 = vmul.f32 %v8286_v45, %v1018_v50  ;;  %v992_v59 = vmul.f32 0.0051020407, %v976_v32  ;;  %v1116_v46 = vmul.f32 %v8302_v9, %v8244_v52  ;;  %v6265_v32 = vld [vmem:[%s13340_s1 + $0x80] sm:$0xff] }
 0x1ae   :  { %v1030_v4 = vmul.f32 0.5, %v1029_v41  ;;  %v1071_v42 = vsub.f32 1.5, %v1070_v16  ;;  %vm1063_vm4 = vweird.f32 %v8284_v22 }
 0x1af   :  { %v1007_v29 = vsub.f32 %v991_v47, %v999_v54  ;;  %v1020_v18 = vmul.f32 0.5, %v1019_v3  ;;  %v1008_v44 = vsub.f32 %v992_v59, %v1000_v63  ;;  %1134 = vrot.lane.b32.xlu1 %v1116_v46, %s7618_s26  ;;  %v6270_v59 = vld [vmem:[%s13340_s1 + $0xa8] sm:$0xff] }
 0x1b0   :  { %v1031_v55 = vsub.f32 1.5, %v1030_v4  ;;  %v1072_v54 = vmul.f32 %v7230_v15, %v1071_v42 }
 0x1b1   :  { %v7236_v0 = vpop.eup %7235  ;;  %v8308_v62 = vadd.f32 1e-05, %v1007_v29  ;;  %v1021_v60 = vsub.f32 1.5, %v1020_v18  ;;  %v8311_v50 = vadd.f32 1e-05, %v1008_v44  ;;  %v6266_v44 = vld [vmem:[%s13340_s1 + $0x88] sm:$0xff] }
 0x1b2   :  { %v7238_v56 = vpop.eup %7237  ;;  %v1048_v48 = vmul.f32 %v7236_v0, %v8281_v5  ;;  %v1032_v18 = vmul.f32 %v7232_v13, %v1031_v55  ;;  %v1076_v29 = vsel %vm1075_vm11, %v7230_v15, %v1072_v54  ;;  %vm1054_vm1 = vweird.f32 %v7236_v0  ;;  %v6269_v5 = vld [vmem:[%s13340_s1 + $0xa0] sm:$0xff] }
 0x1b3   :  { %v1058_v4 = vmul.f32 %v7238_v56, %v8284_v22  ;;  %7239 = vrsqrt.f32 %v8308_v62  ;;  %v8331_v24 = vmul.f32 %v6270_v59, %v1076_v29  ;;  %v1022_v41 = vmul.f32 %v8286_v45, %v1021_v60  ;;  %vm1055_vm5 = vmor %vm1053_vm3, %vm1054_vm1 }
 0x1b4   :  { %v1049_v42 = vmul.f32 %v7236_v0, %v1048_v48  ;;  %7241 = vrsqrt.f32 %v8311_v50  ;;  %v1036_v63 = vsel %vm1035_vm14, %v7232_v13, %v1032_v18  ;;  %vm1064_vm2 = vweird.f32 %v7238_v56 }
 0x1b5   :  { %v1059_v52 = vmul.f32 %v7238_v56, %v1058_v4  ;;  %13474 = vst [vmem:[#allocation19_spill] sm:$0xff] %v8331_v24  ;;  %v8337_v6 = vmul.f32 %v6266_v44, %v1036_v63  ;;  %v1119_v15 = vmul.f32 %v8331_v24, %v8250_v11  ;;  %v1026_v39 = vsel %vm1025_vm15, %v8286_v45, %v1022_v41  ;;  %vm1065_vm6 = vmor %vm1063_vm4, %vm1064_vm2 }
 0x1b6   :  { %v1050_v47 = vmul.f32 0.5, %v1049_v42  ;;  %v8344_v3 = vmul.f32 %v6265_v32, %v1026_v39  ;;  %vm1083_vm9 = vweird.f32 %v8308_v62  ;;  %vm1093_vm10 = vweird.f32 %v8311_v50 }
 0x1b7   :  { %13475 = vst [vmem:[#allocation20_spill] sm:$0xff] %v8337_v6  ;;  %v1060_v40 = vmul.f32 0.5, %v1059_v52  ;;  %v1115_v13 = vmul.f32 %v8337_v6, %v8252_v61  ;;  %1140 = vrot.lane.b32.xlu1 %v1119_v15, %s7618_s26  ;;  %v6268_v61 = vld [vmem:[%s13340_s1 + $0x98] sm:$0xff] }
 0x1b8   :  { %v1051_v16 = vsub.f32 1.5, %v1050_v47  ;;  %13476 = vst [vmem:[#allocation21_spill] sm:$0xff] %v8344_v3  ;;  %v1114_v11 = vmul.f32 %v8344_v3, %v8248_v38 }
 0x1b9   :  { %v7240_v46 = vpop.eup %7239  ;;  %v1061_v55 = vsub.f32 1.5, %v1060_v40  ;;  %1132 = vrot.lane.b32.xlu0 %v1115_v13, %s7618_s26  ;;  %v6274_v13 = vld [vmem:[%s13339_s0 + $0x188] sm:$0xff] }
 0x1ba   :  { %v7242_v60 = vpop.eup %7241  ;;  %v1078_v48 = vmul.f32 %v7240_v46, %v8308_v62  ;;  %v1052_v45 = vmul.f32 %v7236_v0, %v1051_v16  ;;  %1130 = vrot.lane.b32.xlu2 %v1114_v11, %s7618_s26  ;;  %vm1084_vm7 = vweird.f32 %v7240_v46 }
 0x1bb   :  { %v1088_v54 = vmul.f32 %v7242_v60, %v8311_v50  ;;  %v1062_v59 = vmul.f32 %v7238_v56, %v1061_v55  ;;  %vm1094_vm8 = vweird.f32 %v7242_v60  ;;  %vm1085_vm11 = vmor %vm1083_vm9, %vm1084_vm7  ;;  %v1327_v55 = vsel %vm34_vm0, %v6274_v13, 0.0 }
 0x1bc   :  { %v1079_v4 = vmul.f32 %v7240_v46, %v1078_v48  ;;  %v1056_v38 = vsel %vm1055_vm5, %v7236_v0, %v1052_v45  ;;  %vm1095_vm12 = vmor %vm1093_vm10, %vm1094_vm8  ;;  %v6286_v45 = vld [vmem:[%s13339_s0 + $0x1e8] sm:$0xff] }
 0x1bd   :  { %v1089_v18 = vmul.f32 %v7242_v60, %v1088_v54  ;;  %v1066_v44 = vsel %vm1065_vm6, %v7238_v56, %v1062_v59  ;;  %v8363_v42 = vmul.f32 %v6268_v61, %v1056_v38  ;;  %v6271_v56 = vld [vmem:[%s13340_s1 + $0xb0] sm:$0xff]  ;;  %v6276_v61 = vld [vmem:[%s13339_s0 + $0x198] sm:$0xff]  ;;  %v6278_v54 = vld [vmem:[%s13339_s0 + $0x1a8] sm:$0xff] }
 0x1be   :  { %v1080_v22 = vmul.f32 0.5, %v1079_v4  ;;  %v8365_v29 = vmul.f32 %v6269_v5, %v1066_v44  ;;  %v6285_v59 = vld [vmem:[%s13339_s0 + $0x1e0] sm:$0xff]  ;;  %v1351_v5 = vsel %vm34_vm0, %v6286_v45, 0.0  ;;  %v6275_v4 = vld [vmem:[%s13339_s0 + $0x190] sm:$0xff]  ;;  %v1331_v38 = vsel %vm34_vm0, %v6276_v61, 0.0 }
 0x1bf   :  { %13477 = vst [vmem:[#allocation22_spill] sm:$0xff] %v8363_v42  ;;  %v1090_v52 = vmul.f32 0.5, %v1089_v18  ;;  %v1117_v63 = vmul.f32 %v8363_v42, %v8260_v26  ;;  %v6272_v26 = vld [vmem:[%s13340_s1 + $0xb8] sm:$0xff]  ;;  %v6277_v18 = vld [vmem:[%s13339_s0 + $0x1a0] sm:$0xff]  ;;  %v1335_v44 = vsel %vm34_vm0, %v6278_v54, 0.0 }
 0x1c0   :  { %v1081_v41 = vsub.f32 1.5, %v1080_v22  ;;  %v1118_v32 = vmul.f32 %v8365_v29, %v8266_v36  ;;  %v1352_v22 = vadd.f32 %v6285_v59, %v1351_v5 }
 0x1c1   :  { %v1091_v47 = vsub.f32 1.5, %v1090_v52  ;;  %1136 = vrot.lane.b32.xlu0 %v1117_v63, %s7618_s26  ;;  %v1332_v52 = vadd.f32 %v6275_v4, %v1331_v38  ;;  %v1336_v63 = vadd.f32 %v6277_v18, %v1335_v44  ;;  %v6287_v38 = vld [vmem:[%s13339_s0 + $0x1f0] sm:$0xff] }
 0x1c2   :  { %v1082_v0 = vmul.f32 %v7240_v46, %v1081_v41  ;;  %1138 = vrot.lane.b32.xlu2 %v1118_v32, %s7618_s26  ;;  %v1362_v41 = vmul.f32 %v6276_v61, %v6276_v61  ;;  %v6282_v32 = vld [vmem:[%s13339_s0 + $0x1c8] sm:$0xff] }
 0x1c3   :  { %v1092_v40 = vmul.f32 %v7242_v60, %v1091_v47  ;;  %v6284_v47 = vld [vmem:[%s13339_s0 + $0x1d8] sm:$0xff] }
 0x1c4   :  { %v1086_v36 = vsel %vm1085_vm11, %v7240_v46, %v1082_v0  ;;  %v6273_v46 = vld [vmem:[%s13339_s0 + $0x180] sm:$0xff]  ;;  %v1361_v0 = vmul.f32 %v6275_v4, %v6275_v4 }
 0x1c5   :  { %v1096_v62 = vsel %vm1095_vm12, %v7242_v60, %v1092_v40  ;;  %v8381_v15 = vmul.f32 %v6271_v56, %v1086_v36  ;;  %v1328_v60 = vadd.f32 %v6273_v46, %v1327_v55  ;;  %v1379_v56 = vsel %vm34_vm0, %v1362_v41, 0.0  ;;  %v6281_v40 = vld [vmem:[%s13339_s0 + $0x1c0] sm:$0xff]  ;;  %v6283_v36 = vld [vmem:[%s13339_s0 + $0x1d0] sm:$0xff] }
 0x1c6   :  { %v8383_v39 = vmul.f32 %v6272_v26, %v1096_v62  ;;  %v1343_v26 = vsel %vm34_vm0, %v6282_v32, 0.0  ;;  %v1347_v62 = vsel %vm34_vm0, %v6284_v47, 0.0  ;;  %v1367_v61 = vmul.f32 %v6281_v40, %v6281_v40 }
 0x1c7   :  { %13478 = vst [vmem:[#allocation23_spill] sm:$0xff] %v8381_v15  ;;  %v1120_v16 = vmul.f32 %v8381_v15, %v8279_v58  ;;  %v6280_v58 = vld [vmem:[%s13339_s0 + $0x1b8] sm:$0xff]  ;;  %v1348_v55 = vadd.f32 %v6283_v36, %v1347_v62  ;;  %v1359_v4 = vmul.f32 %v6273_v46, %v6273_v46 }
 0x1c8   :  { %13479 = vst [vmem:[#allocation24_spill] sm:$0xff] %v8383_v39  ;;  %v1121_v50 = vmul.f32 %v8383_v39, %v8277_v31  ;;  %v6279_v31 = vld [vmem:[%s13339_s0 + $0x1b0] sm:$0xff]  ;;  %v1339_v48 = vsel %vm34_vm0, %v6280_v58, 0.0 }
 0x1c9   :  { %1142 = vrot.lane.b32.xlu0 %v1120_v16, %s7618_s26  ;;  %v1340_v11 = vadd.f32 %v6279_v31, %v1339_v48  ;;  %v1380_v16 = vadd.f32 %v1379_v56, %v1361_v0  ;;  %v1360_v48 = vmul.f32 %v6274_v13, %v6274_v13  ;;  %v1366_v0 = vmul.f32 %v6280_v58, %v6280_v58 }
 0x1ca   :  { %1144 = vrot.lane.b32.xlu2 %v1121_v50, %s7618_s26  ;;  %v1344_v50 = vadd.f32 %v6281_v40, %v1343_v26  ;;  %v1373_v56 = vmul.f32 %v6287_v38, %v6287_v38  ;;  %v1363_v40 = vmul.f32 %v6277_v18, %v6277_v18  ;;  %v1365_v26 = vmul.f32 %v6279_v31, %v6279_v31 }
 0x1cb   :  { %v1369_v58 = vmul.f32 %v6283_v36, %v6283_v36 }
 0x1e1   :  { %1329 = vadd.xlane.f32.xlu1 %v1328_v60  ;;  %v1368_v60 = vmul.f32 %v6282_v32, %v6282_v32  ;;  %v1364_v32 = vmul.f32 %v6278_v54, %v6278_v54  ;;  %v1371_v54 = vmul.f32 %v6285_v59, %v6285_v59 }
 0x1e3   :  { %v1391_v5 = vsel %vm34_vm0, %v1368_v60, 0.0  ;;  %v1383_v62 = vsel %vm34_vm0, %v1364_v32, 0.0 }
 0x1e4   :  { %v1392_v13 = vadd.f32 %v1391_v5, %v1367_v61  ;;  %v1372_v61 = vmul.f32 %v6286_v45, %v6286_v45 }
 0x1e9   :  { %1341 = vadd.xlane.f32.xlu1 %v1340_v11  ;;  %v6288_v11 = vld [vmem:[%s13339_s0 + $0x1f8] sm:$0xff] }
 0x1ea   :  { %v1355_v44 = vsel %vm34_vm0, %v6288_v11, 0.0  ;;  %v1374_v41 = vmul.f32 %v6288_v11, %v6288_v11  ;;  %v1399_v11 = vsel %vm34_vm0, %v1372_v61, 0.0 }
 0x1eb   :  { %v1400_v31 = vadd.f32 %v1399_v11, %v1371_v54 }
 0x1ec   :  { %v1403_v46 = vsel %vm34_vm0, %v1374_v41, 0.0 }
 0x1f1   :  { %1353 = vadd.xlane.f32.xlu1 %v1352_v22  ;;  %v1375_v22 = vsel %vm34_vm0, %v1360_v48, 0.0  ;;  %v1370_v48 = vmul.f32 %v6284_v47, %v6284_v47 }
 0x1f3   :  { %1333 = vadd.xlane.f32.xlu0 %v1332_v52  ;;  %1337 = vadd.xlane.f32.xlu2 %v1336_v63  ;;  %v1356_v52 = vadd.f32 %v6287_v38, %v1355_v44  ;;  %v1376_v63 = vadd.f32 %v1375_v22, %v1359_v4  ;;  %v1395_v18 = vsel %vm34_vm0, %v1370_v48, 0.0 }
 0x1f4   :  { %v1396_v5 = vadd.f32 %v1395_v18, %v1369_v58 }
 0x1f9   :  { %1381 = vadd.xlane.f32.xlu1 %v1380_v16  ;;  %v1387_v16 = vsel %vm34_vm0, %v1366_v0, 0.0 }
 0x1fa   :  { %v1388_v60 = vadd.f32 %v1387_v16, %v1365_v26 }
 0x1fb   :  { %1345 = vadd.xlane.f32.xlu0 %v1344_v50  ;;  %1349 = vadd.xlane.f32.xlu2 %v1348_v55  ;;  %v1404_v50 = vadd.f32 %v1403_v46, %v1373_v56  ;;  %v1384_v55 = vadd.f32 %v1383_v62, %v1363_v40 }
 0x201   :  { %1393 = vadd.xlane.f32.xlu1 %v1392_v13 }
 0x203   :  { %1357 = vadd.xlane.f32.xlu0 %v1356_v52  ;;  %1377 = vadd.xlane.f32.xlu2 %v1376_v63 }
 0x209   :  { %1405 = vadd.xlane.f32.xlu1 %v1404_v50 }
 0x20b   :  { %1385 = vadd.xlane.f32.xlu0 %v1384_v55  ;;  %1389 = vadd.xlane.f32.xlu2 %v1388_v60 }
 0x213   :  { %1397 = vadd.xlane.f32.xlu0 %v1396_v5  ;;  %1401 = vadd.xlane.f32.xlu2 %v1400_v31 }
 0x214   :  { %v8459_v44 = vpop.permute.xlu2 %1130 }
 0x21c   :  { %v8465_v36 = vpop.permute.xlu2 %1138 }
 0x21d   :  { %13481 = vst [vmem:[#allocation26_spill] sm:$0xff] %v8465_v36 }
 0x221   :  { %v8455_v4 = vpop.permute.xlu1 %1134 }
 0x222   :  { %13480 = vst [vmem:[#allocation25_spill] sm:$0xff] %v8455_v4 }
 0x224   :  { %v8469_v52 = vpop.permute.xlu2 %1144 }
 0x225   :  { %13482 = vst [vmem:[#allocation27_spill] sm:$0xff] %v8469_v52 }
 0x229   :  { %v8461_v45 = vpop.permute.xlu1 %1140 }
 0x22b   :  { %v8457_v38 = vpop.permute.xlu0 %1132 }
 0x233   :  { %v8463_v47 = vpop.permute.xlu0 %1136 }
 0x23b   :  { %v8467_v22 = vpop.permute.xlu0 %1142 }
 0x254   :  { %v1330_v59 = vpop.xlane.xlu1 %1329 }
 0x255   :  { %v8477_v60 = vmul.f32 0.0051020407, %v1330_v59 }
 0x257   :  { %v1423_v11 = vmul.f32 %v8477_v60, %v8477_v60 }
 0x25c   :  { %v1342_v13 = vpop.xlane.xlu1 %1341 }
 0x264   :  { %v1354_v63 = vpop.xlane.xlu1 %1353 }
 0x265   :  { %v8503_v10 = vmul.f32 0.0051020407, %v1354_v63 }
 0x266   :  { %v1334_v41 = vpop.xlane.xlu0 %1333  ;;  %v1338_v32 = vpop.xlane.xlu2 %1337 }
 0x267   :  { %v8471_v0 = vmul.f32 0.0051020407, %v1334_v41 }
 0x269   :  { %v1424_v46 = vmul.f32 %v8471_v0, %v8471_v0 }
 0x26c   :  { %v1382_v56 = vpop.xlane.xlu1 %1381 }
 0x26d   :  { %v1416_v26 = vmul.f32 0.0051020407, %v1382_v56 }
 0x26e   :  { %v1346_v40 = vpop.xlane.xlu0 %1345  ;;  %v1350_v62 = vpop.xlane.xlu2 %1349 }
 0x26f   :  { %v1432_v16 = vsub.f32 %v1416_v26, %v1424_v46  ;;  %v8475_v55 = vmul.f32 0.0051020407, %v1346_v40  ;;  %v8483_v46 = vmul.f32 0.0051020407, %v1338_v32  ;;  %v8489_v26 = vmul.f32 0.0051020407, %v1342_v13 }
 0x270   :  { %v8501_v15 = vmul.f32 0.0051020407, %v1350_v62  ;;  %v6290_v62 = vld [vmem:[%s13340_s1 + $0xc8] sm:$0xff] }
 0x271   :  { %v1440_v50 = vadd.f32 1e-05, %v1432_v16  ;;  %v1427_v58 = vmul.f32 %v8475_v55, %v8475_v55  ;;  %v1425_v32 = vmul.f32 %v8483_v46, %v8483_v46 }
 0x273   :  { %7243 = vrsqrt.f32 %v1440_v50  ;;  %vm1463_vm14 = vweird.f32 %v1440_v50 }
 0x274   :  { %v1394_v48 = vpop.xlane.xlu1 %1393 }
 0x275   :  { %v1419_v54 = vmul.f32 0.0051020407, %v1394_v48 }
 0x276   :  { %v1358_v61 = vpop.xlane.xlu0 %1357  ;;  %v1378_v18 = vpop.xlane.xlu2 %1377 }
 0x277   :  { %v1415_v5 = vmul.f32 0.0051020407, %v1378_v18  ;;  %v1435_v31 = vsub.f32 %v1419_v54, %v1427_v58  ;;  %v8487_v59 = vmul.f32 0.0051020407, %v1358_v61 }
 0x279   :  { %v1431_v41 = vsub.f32 %v1415_v5, %v1423_v11  ;;  %v7244_v56 = vpop.eup %7243  ;;  %v8485_v40 = vadd.f32 1e-05, %v1435_v31  ;;  %v1430_v54 = vmul.f32 %v8487_v59, %v8487_v59  ;;  %v1426_v5 = vmul.f32 %v8489_v26, %v8489_v26 }
 0x27a   :  { %v1458_v16 = vmul.f32 %v7244_v56, %v1440_v50  ;;  %vm1464_vm13 = vweird.f32 %v7244_v56 }
 0x27b   :  { %v8491_v24 = vadd.f32 1e-05, %v1431_v41  ;;  %7245 = vrsqrt.f32 %v8485_v40  ;;  %vm1465_vm15 = vmor %vm1463_vm14, %vm1464_vm13  ;;  %vm1493_vm3 = vweird.f32 %v8485_v40 }
 0x27c   :  { %v1459_v48 = vmul.f32 %v7244_v56, %v1458_v16  ;;  %v1406_v18 = vpop.xlane.xlu1 %1405 }
 0x27d   :  { %7247 = vrsqrt.f32 %v8491_v24  ;;  %v1422_v61 = vmul.f32 0.0051020407, %v1406_v18  ;;  %vm1453_vm4 = vweird.f32 %v8491_v24 }
 0x27e   :  { %v1386_v58 = vpop.xlane.xlu0 %1385  ;;  %v1390_v11 = vpop.xlane.xlu2 %1389  ;;  %v1460_v31 = vmul.f32 0.5, %v1459_v48 }
 0x27f   :  { %v1417_v13 = vmul.f32 0.0051020407, %v1386_v58  ;;  %v1418_v41 = vmul.f32 0.0051020407, %v1390_v11  ;;  %v1438_v42 = vsub.f32 %v1422_v61, %v1430_v54 }
 0x280   :  { %v1461_v3 = vsub.f32 1.5, %v1460_v31 }
 0x281   :  { %v1433_v16 = vsub.f32 %v1417_v13, %v1425_v32  ;;  %v1434_v6 = vsub.f32 %v1418_v41, %v1426_v5  ;;  %v7246_v1 = vpop.eup %7245  ;;  %v8505_v52 = vadd.f32 1e-05, %v1438_v42  ;;  %v1428_v42 = vmul.f32 %v8501_v15, %v8501_v15 }
 0x282   :  { %v1488_v19 = vmul.f32 %v7246_v1, %v8485_v40  ;;  %v1462_v54 = vmul.f32 %v7244_v56, %v1461_v3  ;;  %v1429_v5 = vmul.f32 %v8503_v10, %v8503_v10  ;;  %vm1494_vm1 = vweird.f32 %v7246_v1 }
 0x283   :  { %v8507_v18 = vadd.f32 1e-05, %v1433_v16  ;;  %v7248_v58 = vpop.eup %7247  ;;  %v8510_v48 = vadd.f32 1e-05, %v1434_v6  ;;  %7249 = vrsqrt.f32 %v8505_v52  ;;  %vm1495_vm5 = vmor %vm1493_vm3, %vm1494_vm1  ;;  %vm1523_vm8 = vweird.f32 %v8505_v52 }
 0x284   :  { %v1448_v32 = vmul.f32 %v7248_v58, %v8491_v24  ;;  %v1489_v63 = vmul.f32 %v7246_v1, %v1488_v19  ;;  %v1466_v61 = vsel %vm1465_vm15, %v7244_v56, %v1462_v54  ;;  %vm1454_vm2 = vweird.f32 %v7248_v58 }
 0x285   :  { %7251 = vrsqrt.f32 %v8510_v48  ;;  %v8521_v13 = vmul.f32 %v6290_v62, %v1466_v61  ;;  %vm1455_vm6 = vmor %vm1453_vm4, %vm1454_vm2  ;;  %vm1483_vm11 = vweird.f32 %v8510_v48  ;;  %vm1473_vm13 = vweird.f32 %v8507_v18 }
 0x286   :  { %v1398_v50 = vpop.xlane.xlu0 %1397  ;;  %v1449_v6 = vmul.f32 %v7248_v58, %v1448_v32  ;;  %7253 = vrsqrt.f32 %v8507_v18  ;;  %v1402_v3 = vpop.xlane.xlu2 %1401  ;;  %v1490_v31 = vmul.f32 0.5, %v1489_v63 }
 0x287   :  { %v1420_v11 = vmul.f32 0.0051020407, %v1398_v50  ;;  %13483 = vst [vmem:[#allocation28_spill] sm:$0xff] %v8521_v13  ;;  %v1421_v41 = vmul.f32 0.0051020407, %v1402_v3  ;;  %v1545_v19 = vmul.f32 %v8521_v13, %v8471_v0 }
 0x288   :  { %v1450_v16 = vmul.f32 0.5, %v1449_v6  ;;  %v1491_v4 = vsub.f32 1.5, %v1490_v31  ;;  %v6289_v6 = vld [vmem:[%s13340_s1 + $0xc0] sm:$0xff] }
 0x289   :  { %v1436_v36 = vsub.f32 %v1420_v11, %v1428_v42  ;;  %v1437_v12 = vsub.f32 %v1421_v41, %v1429_v5  ;;  %v7250_v56 = vpop.eup %7249  ;;  %1562 = vrot.lane.b32.xlu2 %v1545_v19, %s7618_s26 }
 0x28a   :  { %v1451_v54 = vsub.f32 1.5, %v1450_v16  ;;  %v1518_v63 = vmul.f32 %v7250_v56, %v8505_v52  ;;  %v1492_v42 = vmul.f32 %v7246_v1, %v1491_v4  ;;  %vm1524_vm7 = vweird.f32 %v7250_v56 }
 0x28b   :  { %v8527_v32 = vadd.f32 1e-05, %v1436_v36  ;;  %v7252_v62 = vpop.eup %7251  ;;  %v8532_v50 = vadd.f32 1e-05, %v1437_v12  ;;  %v6293_v12 = vld [vmem:[%s13340_s1 + $0xe0] sm:$0xff]  ;;  %vm1525_vm12 = vmor %vm1523_vm8, %vm1524_vm7 }
 0x28c   :  { %v7254_v61 = vpop.eup %7253  ;;  %v1478_v0 = vmul.f32 %v7252_v62, %v8510_v48  ;;  %v1452_v36 = vmul.f32 %v7248_v58, %v1451_v54  ;;  %v1519_v40 = vmul.f32 %v7250_v56, %v1518_v63  ;;  %v1496_v11 = vsel %vm1495_vm5, %v7246_v1, %v1492_v42  ;;  %v6291_v48 = vld [vmem:[%s13340_s1 + $0xd0] sm:$0xff] }
 0x28d   :  { %7255 = vrsqrt.f32 %v8527_v32  ;;  %v1468_v4 = vmul.f32 %v7254_v61, %v8507_v18  ;;  %v8549_v16 = vmul.f32 %v6293_v12, %v1496_v11  ;;  %vm1484_vm9 = vweird.f32 %v7252_v62 }
 0x28e   :  { %7257 = vrsqrt.f32 %v8532_v50  ;;  %v1479_v24 = vmul.f32 %v7252_v62, %v1478_v0  ;;  %v1456_v3 = vsel %vm1455_vm6, %v7248_v58, %v1452_v36  ;;  %v1520_v5 = vmul.f32 0.5, %v1519_v40  ;;  %vm1485_vm14 = vmor %vm1483_vm11, %vm1484_vm9 }
 0x28f   :  { %v1469_v31 = vmul.f32 %v7254_v61, %v1468_v4  ;;  %v8547_v41 = vmul.f32 %v6289_v6, %v1456_v3  ;;  %13485 = vst [vmem:[#allocation30_spill] sm:$0xff] %v8549_v16  ;;  %v1548_v20 = vmul.f32 %v8549_v16, %v8475_v55  ;;  %vm1474_vm10 = vweird.f32 %v7254_v61 }
 0x290   :  { %v1480_v19 = vmul.f32 0.5, %v1479_v24  ;;  %v1521_v54 = vsub.f32 1.5, %v1520_v5  ;;  %vm1475_vm15 = vmor %vm1473_vm13, %vm1474_vm10  ;;  %vm1503_vm3 = vweird.f32 %v8527_v32  ;;  %vm1513_vm4 = vweird.f32 %v8532_v50 }
 0x291   :  { %13484 = vst [vmem:[#allocation29_spill] sm:$0xff] %v8547_v41  ;;  %v1470_v13 = vmul.f32 0.5, %v1469_v31  ;;  %v1544_v63 = vmul.f32 %v8547_v41, %v8477_v60  ;;  %1568 = vrot.lane.b32.xlu2 %v1548_v20, %s7618_s26  ;;  %v6296_v60 = vld [vmem:[%s13340_s1 + $0xf8] sm:$0xff] }
 0x292   :  { %v1481_v1 = vsub.f32 1.5, %v1480_v19  ;;  %v1522_v36 = vmul.f32 %v7250_v56, %v1521_v54 }
 0x293   :  { %v7256_v23 = vpop.eup %7255  ;;  %v1471_v42 = vsub.f32 1.5, %v1470_v13  ;;  %1560 = vrot.lane.b32.xlu0 %v1544_v63, %s7618_s26  ;;  %v6292_v13 = vld [vmem:[%s13340_s1 + $0xd8] sm:$0xff] }
 0x294   :  { %v7258_v58 = vpop.eup %7257  ;;  %v1498_v0 = vmul.f32 %v7256_v23, %v8527_v32  ;;  %v1482_v6 = vmul.f32 %v7252_v62, %v1481_v1  ;;  %v1526_v12 = vsel %vm1525_vm12, %v7250_v56, %v1522_v36  ;;  %vm1504_vm1 = vweird.f32 %v7256_v23 }
 0x295   :  { %v1508_v55 = vmul.f32 %v7258_v58, %v8532_v50  ;;  %v1472_v40 = vmul.f32 %v7254_v61, %v1471_v42  ;;  %v8575_v3 = vmul.f32 %v6296_v60, %v1526_v12  ;;  %vm1514_vm2 = vweird.f32 %v7258_v58  ;;  %vm1505_vm5 = vmor %vm1503_vm3, %vm1504_vm1  ;;  %v6302_v60 = vld [vmem:[%s13339_s0 + $0x228] sm:$0xff]  ;;  %v6297_v12 = vld [vmem:[%s13339_s0 + $0x200] sm:$0xff] }
 0x296   :  { %v1499_v20 = vmul.f32 %v7256_v23, %v1498_v0  ;;  %v1486_v24 = vsel %vm1485_vm14, %v7252_v62, %v1482_v6  ;;  %vm1515_vm6 = vmor %vm1513_vm4, %vm1514_vm2  ;;  %v6300_v6 = vld [vmem:[%s13339_s0 + $0x218] sm:$0xff] }
 0x297   :  { %v1509_v4 = vmul.f32 %v7258_v58, %v1508_v55  ;;  %13486 = vst [vmem:[#allocation31_spill] sm:$0xff] %v8575_v3  ;;  %v8578_v52 = vmul.f32 %v6292_v13, %v1486_v24  ;;  %v1476_v5 = vsel %vm1475_vm15, %v7254_v61, %v1472_v40  ;;  %v1551_v31 = vmul.f32 %v8575_v3, %v8487_v59  ;;  %v6294_v59 = vld [vmem:[%s13340_s1 + $0xe8] sm:$0xff]  ;;  %v6307_v13 = vld [vmem:[%s13339_s0 + $0x250] sm:$0xff] }
 0x298   :  { %v1500_v11 = vmul.f32 0.5, %v1499_v20  ;;  %v8582_v56 = vmul.f32 %v6291_v48, %v1476_v5  ;;  %v6299_v48 = vld [vmem:[%s13339_s0 + $0x210] sm:$0xff] }
 0x299   :  { %13487 = vst [vmem:[#allocation32_spill] sm:$0xff] %v8578_v52  ;;  %v1510_v18 = vmul.f32 0.5, %v1509_v4  ;;  %v1547_v54 = vmul.f32 %v8578_v52, %v8489_v26  ;;  %1574 = vrot.lane.b32.xlu2 %v1551_v31, %s7618_s26  ;;  %v1761_v4 = vsel %vm34_vm0, %v6300_v6, 0.0  ;;  %v6304_v31 = vld [vmem:[%s13339_s0 + $0x238] sm:$0xff] }
 0x29a   :  { %13488 = vst [vmem:[#allocation33_spill] sm:$0xff] %v8582_v56  ;;  %v1501_v19 = vsub.f32 1.5, %v1500_v11  ;;  %v1546_v63 = vmul.f32 %v8582_v56, %v8483_v46  ;;  %v6295_v46 = vld [vmem:[%s13340_s1 + $0xf0] sm:$0xff] }
 0x29b   :  { %v1511_v62 = vsub.f32 1.5, %v1510_v18  ;;  %1566 = vrot.lane.b32.xlu0 %v1547_v54, %s7618_s26  ;;  %v1762_v18 = vadd.f32 %v6299_v48, %v1761_v4  ;;  %v6306_v54 = vld [vmem:[%s13339_s0 + $0x248] sm:$0xff] }
 0x29c   :  { %v1502_v61 = vmul.f32 %v7256_v23, %v1501_v19  ;;  %1564 = vrot.lane.b32.xlu1 %v1546_v63, %s7618_s26  ;;  %v1789_v19 = vmul.f32 %v6297_v12, %v6297_v12  ;;  %v6303_v63 = vld [vmem:[%s13339_s0 + $0x230] sm:$0xff] }
 0x29d   :  { %v1512_v26 = vmul.f32 %v7258_v58, %v1511_v62 }
 0x29e   :  { %v1506_v32 = vsel %vm1505_vm5, %v7256_v23, %v1502_v61  ;;  %v6301_v23 = vld [vmem:[%s13339_s0 + $0x220] sm:$0xff]  ;;  %v1769_v61 = vsel %vm34_vm0, %v6304_v31, 0.0 }
 0x29f   :  { %v1516_v1 = vsel %vm1515_vm6, %v7258_v58, %v1512_v26  ;;  %v8599_v42 = vmul.f32 %v6294_v59, %v1506_v32  ;;  %v1765_v58 = vsel %vm34_vm0, %v6302_v60, 0.0  ;;  %v6305_v59 = vld [vmem:[%s13339_s0 + $0x240] sm:$0xff]  ;;  %v1773_v26 = vsel %vm34_vm0, %v6306_v54, 0.0 }
 0x2a0   :  { %v8601_v0 = vmul.f32 %v6295_v46, %v1516_v1  ;;  %v1766_v55 = vadd.f32 %v6301_v23, %v1765_v58  ;;  %v1770_v32 = vadd.f32 %v6303_v63, %v1769_v61  ;;  %v1796_v1 = vmul.f32 %v6304_v31, %v6304_v31 }
 0x2a1   :  { %13489 = vst [vmem:[#allocation34_spill] sm:$0xff] %v8599_v42  ;;  %v1549_v36 = vmul.f32 %v8599_v42, %v8501_v15  ;;  %v6308_v15 = vld [vmem:[%s13339_s0 + $0x258] sm:$0xff]  ;;  %v1795_v58 = vmul.f32 %v6303_v63, %v6303_v63  ;;  %v1792_v31 = vmul.f32 %v6300_v6, %v6300_v6  ;;  %v1791_v61 = vmul.f32 %v6299_v48, %v6299_v48 }
 0x2a2   :  { %13490 = vst [vmem:[#allocation35_spill] sm:$0xff] %v8601_v0  ;;  %v1550_v50 = vmul.f32 %v8601_v0, %v8503_v10  ;;  %v6298_v10 = vld [vmem:[%s13339_s0 + $0x208] sm:$0xff]  ;;  %v1777_v20 = vsel %vm34_vm0, %v6308_v15, 0.0  ;;  %v1799_v6 = vmul.f32 %v6307_v13, %v6307_v13 }
 0x2a3   :  { %1570 = vrot.lane.b32.xlu0 %v1549_v36, %s7618_s26  ;;  %v1757_v40 = vsel %vm34_vm0, %v6298_v10, 0.0  ;;  %v1778_v24 = vadd.f32 %v6307_v13, %v1777_v20  ;;  %v1790_v5 = vmul.f32 %v6298_v10, %v6298_v10  ;;  %v1774_v36 = vadd.f32 %v6305_v59, %v1773_v26  ;;  %v6309_v20 = vld [vmem:[%s13339_s0 + $0x260] sm:$0xff] }
 0x2a4   :  { %1572 = vrot.lane.b32.xlu1 %v1550_v50, %s7618_s26  ;;  %v1758_v11 = vadd.f32 %v6297_v12, %v1757_v40  ;;  %v6310_v50 = vld [vmem:[%s13339_s0 + $0x268] sm:$0xff]  ;;  %v1817_v10 = vsel %vm34_vm0, %v1796_v1, 0.0  ;;  %v6311_v40 = vld [vmem:[%s13339_s0 + $0x270] sm:$0xff]  ;;  %v1793_v26 = vmul.f32 %v6301_v23, %v6301_v23 }
 0x2a5   :  { %v1805_v62 = vsel %vm34_vm0, %v1790_v5, 0.0  ;;  %v1781_v12 = vsel %vm34_vm0, %v6310_v50, 0.0  ;;  %v1802_v5 = vmul.f32 %v6310_v50, %v6310_v50  ;;  %v1800_v50 = vmul.f32 %v6308_v15, %v6308_v15 }
 0x2a6   :  { %v1806_v46 = vadd.f32 %v1805_v62, %v1789_v19  ;;  %v1794_v19 = vmul.f32 %v6302_v60, %v6302_v60  ;;  %v1801_v62 = vmul.f32 %v6309_v20, %v6309_v20  ;;  %v1797_v60 = vmul.f32 %v6305_v59, %v6305_v59 }
 0x2a7   :  { %v1829_v63 = vsel %vm34_vm0, %v1802_v5, 0.0  ;;  %v1825_v48 = vsel %vm34_vm0, %v1800_v50, 0.0 }
 0x2a8   :  { %v1830_v1 = vadd.f32 %v1829_v63, %v1801_v62  ;;  %v1826_v23 = vadd.f32 %v1825_v48, %v1799_v6 }
 0x2c2   :  { %1767 = vadd.xlane.f32.xlu2 %v1766_v55  ;;  %v6312_v55 = vld [vmem:[%s13339_s0 + $0x278] sm:$0xff] }
 0x2c3   :  { %v1785_v4 = vsel %vm34_vm0, %v6312_v55, 0.0 }
 0x2ca   :  { %1779 = vadd.xlane.f32.xlu2 %v1778_v24  ;;  %v1818_v24 = vadd.f32 %v1817_v10, %v1795_v58  ;;  %v1798_v10 = vmul.f32 %v6306_v54, %v6306_v54 }
 0x2cd   :  { %1759 = vadd.xlane.f32.xlu0 %v1758_v11  ;;  %v1782_v11 = vadd.f32 %v6309_v20, %v1781_v12  ;;  %v1821_v20 = vsel %vm34_vm0, %v1798_v10, 0.0 }
 0x2ce   :  { %1763 = vadd.xlane.f32.xlu1 %v1762_v18  ;;  %v1786_v18 = vadd.f32 %v6311_v40, %v1785_v4  ;;  %v1822_v12 = vadd.f32 %v1821_v20, %v1797_v60  ;;  %v1804_v4 = vmul.f32 %v6312_v55, %v6312_v55 }
 0x2d2   :  { %1807 = vadd.xlane.f32.xlu2 %v1806_v46  ;;  %v1809_v46 = vsel %vm34_vm0, %v1792_v31, 0.0 }
 0x2d5   :  { %1771 = vadd.xlane.f32.xlu0 %v1770_v32  ;;  %v1813_v32 = vsel %vm34_vm0, %v1794_v19, 0.0 }
 0x2d6   :  { %1775 = vadd.xlane.f32.xlu1 %v1774_v36  ;;  %v1810_v36 = vadd.f32 %v1809_v46, %v1791_v61  ;;  %v1814_v58 = vadd.f32 %v1813_v32, %v1793_v26 }
 0x2da   :  { %1819 = vadd.xlane.f32.xlu2 %v1818_v24  ;;  %v1803_v24 = vmul.f32 %v6311_v40, %v6311_v40 }
 0x2dd   :  { %1783 = vadd.xlane.f32.xlu0 %v1782_v11  ;;  %v1833_v11 = vsel %vm34_vm0, %v1804_v4, 0.0 }
 0x2de   :  { %1787 = vadd.xlane.f32.xlu1 %v1786_v18  ;;  %v1834_v5 = vadd.f32 %v1833_v11, %v1803_v24 }
 0x2e2   :  { %1831 = vadd.xlane.f32.xlu2 %v1830_v1 }
 0x2e3   :  { %v8673_v15 = vpop.permute.xlu2 %1562 }
 0x2e4   :  { %13491 = vst [vmem:[#allocation36_spill] sm:$0xff] %v8673_v15 }
 0x2e5   :  { %1811 = vadd.xlane.f32.xlu0 %v1810_v36 }
 0x2e6   :  { %1815 = vadd.xlane.f32.xlu1 %v1814_v58 }
 0x2eb   :  { %v8677_v59 = vpop.permute.xlu2 %1568 }
 0x2ec   :  { %13492 = vst [vmem:[#allocation37_spill] sm:$0xff] %v8677_v59 }
 0x2ed   :  { %1823 = vadd.xlane.f32.xlu0 %v1822_v12 }
 0x2ee   :  { %1827 = vadd.xlane.f32.xlu1 %v1826_v23 }
 0x2f3   :  { %v8681_v18 = vpop.permute.xlu2 %1574 }
 0x2f4   :  { %13494 = vst [vmem:[#allocation39_spill] sm:$0xff] %v8681_v18 }
 0x2f5   :  { %1835 = vadd.xlane.f32.xlu0 %v1834_v5 }
 0x305   :  { %v8675_v54 = vpop.permute.xlu0 %1560 }
 0x30d   :  { %v8679_v13 = vpop.permute.xlu0 %1566 }
 0x30e   :  { %13493 = vst [vmem:[#allocation38_spill] sm:$0xff] %v8679_v13  ;;  %v8683_v31 = vpop.permute.xlu1 %1564 }
 0x30f   :  { %13495 = vst [vmem:[#allocation40_spill] sm:$0xff] %v8683_v31 }
 0x315   :  { %v8685_v19 = vpop.permute.xlu0 %1570 }
 0x316   :  { %v8687_v40 = vpop.permute.xlu1 %1572 }
 0x317   :  { %13496 = vst [vmem:[#allocation41_spill] sm:$0xff] %v8687_v40 }
 0x335   :  { %v1768_v55 = vpop.xlane.xlu2 %1767 }
 0x33d   :  { %v1780_v62 = vpop.xlane.xlu2 %1779 }
 0x33e   :  { %v8717_v35 = vmul.f32 0.0051020407, %v1780_v62 }
 0x340   :  { %v1760_v63 = vpop.xlane.xlu0 %1759  ;;  %v1858_v62 = vmul.f32 %v8717_v35, %v8717_v35 }
 0x341   :  { %v1764_v61 = vpop.xlane.xlu1 %1763  ;;  %v1837_v26 = vmul.f32 0.0051020407, %v1760_v63 }
 0x342   :  { %v8697_v63 = vmul.f32 0.0051020407, %v1764_v61 }
 0x343   :  { %v1853_v46 = vmul.f32 %v1837_v26, %v1837_v26 }
 0x345   :  { %v1808_v32 = vpop.xlane.xlu2 %1807 }
 0x346   :  { %v1845_v1 = vmul.f32 0.0051020407, %v1808_v32  ;;  %v8699_v32 = vmul.f32 0.0051020407, %v1768_v55 }
 0x348   :  { %v1772_v36 = vpop.xlane.xlu0 %1771  ;;  %v1861_v10 = vsub.f32 %v1845_v1, %v1853_v46  ;;  %v1855_v61 = vmul.f32 %v8699_v32, %v8699_v32 }
 0x349   :  { %v1776_v58 = vpop.xlane.xlu1 %1775  ;;  %v8689_v50 = vmul.f32 0.0051020407, %v1772_v36 }
 0x34a   :  { %v1869_v60 = vadd.f32 1e-05, %v1861_v10  ;;  %v8712_v59 = vmul.f32 0.0051020407, %v1776_v58 }
 0x34b   :  { %v1856_v6 = vmul.f32 %v8689_v50, %v8689_v50 }
 0x34c   :  { %7259 = vrsqrt.f32 %v1869_v60  ;;  %vm1883_vm7 = vweird.f32 %v1869_v60 }
 0x34d   :  { %v1820_v20 = vpop.xlane.xlu2 %1819 }
 0x34e   :  { %v1848_v48 = vmul.f32 0.0051020407, %v1820_v20 }
 0x350   :  { %v1784_v12 = vpop.xlane.xlu0 %1783  ;;  %v1864_v4 = vsub.f32 %v1848_v48, %v1856_v6  ;;  %v1854_v6 = vmul.f32 %v8697_v63, %v8697_v63 }
 0x351   :  { %v1788_v23 = vpop.xlane.xlu1 %1787  ;;  %v8693_v24 = vmul.f32 0.0051020407, %v1784_v12 }
 0x352   :  { %v7260_v11 = vpop.eup %7259  ;;  %v8695_v5 = vadd.f32 1e-05, %v1864_v4 }
 0x353   :  { %v1878_v46 = vmul.f32 %v7260_v11, %v1869_v60  ;;  %v1859_v1 = vmul.f32 %v8693_v24, %v8693_v24  ;;  %vm1884_vm8 = vweird.f32 %v7260_v11 }
 0x354   :  { %7261 = vrsqrt.f32 %v8695_v5  ;;  %vm1885_vm9 = vmor %vm1883_vm7, %vm1884_vm8  ;;  %vm1913_vm12 = vweird.f32 %v8695_v5 }
 0x355   :  { %v1879_v36 = vmul.f32 %v7260_v11, %v1878_v46  ;;  %v1832_v10 = vpop.xlane.xlu2 %1831 }
 0x356   :  { %v1851_v20 = vmul.f32 0.0051020407, %v1832_v10 }
 0x357   :  { %v1880_v48 = vmul.f32 0.5, %v1879_v36 }
 0x358   :  { %v1812_v0 = vpop.xlane.xlu0 %1811  ;;  %v1867_v55 = vsub.f32 %v1851_v20, %v1859_v1 }
 0x359   :  { %v1816_v12 = vpop.xlane.xlu1 %1815  ;;  %v1846_v4 = vmul.f32 0.0051020407, %v1812_v0  ;;  %v1881_v42 = vsub.f32 1.5, %v1880_v48  ;;  %v6313_v0 = vld [vmem:[%s13340_s1 + $0x100] sm:$0xff] }
 0x35a   :  { %v1847_v52 = vmul.f32 0.0051020407, %v1816_v12  ;;  %v8708_v46 = vadd.f32 1e-05, %v1867_v55  ;;  %v8710_v10 = vpop.eup %7261 }
 0x35b   :  { %v1862_v41 = vsub.f32 %v1846_v4, %v1854_v6  ;;  %v1882_v36 = vmul.f32 %v7260_v11, %v1881_v42  ;;  %vm1914_vm2 = vweird.f32 %v8710_v10 }
 0x35c   :  { %v1863_v18 = vsub.f32 %v1847_v52, %v1855_v61  ;;  %7263 = vrsqrt.f32 %v8708_v46  ;;  %v1908_v52 = vmul.f32 %v8710_v10, %v8695_v5  ;;  %vm8771_vm3 = vmor %vm1913_vm12, %vm1914_vm2 }
 0x35d   :  { %v1870_v31 = vadd.f32 1e-05, %v1862_v41  ;;  %v1886_v1 = vsel %vm1885_vm9, %v7260_v11, %v1882_v36  ;;  %v1857_v41 = vmul.f32 %v8712_v59, %v8712_v59  ;;  %v8733_v36 = vmul.f32 0.0051020407, %v1788_v23 }
 0x35e   :  { %v1871_v60 = vadd.f32 1e-05, %v1863_v18  ;;  %v8722_v20 = vmul.f32 %v6313_v0, %v1886_v1  ;;  %v1909_v4 = vmul.f32 %v8710_v10, %v1908_v52  ;;  %vm1943_vm9 = vweird.f32 %v8708_v46 }
 0x35f   :  { %7265 = vrsqrt.f32 %v1870_v31  ;;  %vm1893_vm13 = vweird.f32 %v1870_v31 }
 0x360   :  { %7267 = vrsqrt.f32 %v1871_v60  ;;  %v1824_v58 = vpop.xlane.xlu0 %1823  ;;  %13497 = vst [vmem:[#allocation42_spill] sm:$0xff] %v8722_v20  ;;  %v1974_v18 = vmul.f32 %v8722_v20, %v1837_v26  ;;  %v1910_v26 = vmul.f32 0.5, %v1909_v4  ;;  %vm1903_vm14 = vweird.f32 %v1871_v60 }
 0x361   :  { %v1828_v42 = vpop.xlane.xlu1 %1827  ;;  %v1849_v6 = vmul.f32 0.0051020407, %v1824_v58 }
 0x362   :  { %v1850_v48 = vmul.f32 0.0051020407, %v1828_v42  ;;  %v8729_v11 = vpop.eup %7263  ;;  %1990 = vrot.lane.b32.xlu1 %v1974_v18, %s7618_s26  ;;  %v1911_v20 = vsub.f32 1.5, %v1910_v26  ;;  %v6314_v26 = vld [vmem:[%s13340_s1 + $0x108] sm:$0xff] }
 0x363   :  { %v1865_v12 = vsub.f32 %v1849_v6, %v1857_v41  ;;  %v1860_v6 = vmul.f32 %v8733_v36, %v8733_v36  ;;  %v1938_v23 = vmul.f32 %v8729_v11, %v8708_v46 }
 0x364   :  { %v1866_v61 = vsub.f32 %v1850_v48, %v1858_v62 }
 0x365   :  { %v7266_v55 = vpop.eup %7265  ;;  %v8735_v0 = vadd.f32 1e-05, %v1865_v12  ;;  %v1939_v4 = vmul.f32 %v8729_v11, %v1938_v23  ;;  %v6315_v23 = vld [vmem:[%s13340_s1 + $0x110] sm:$0xff] }
 0x366   :  { %v7268_v1 = vpop.eup %7267  ;;  %v1888_v58 = vmul.f32 %v7266_v55, %v1870_v31  ;;  %v8737_v33 = vadd.f32 1e-05, %v1866_v61  ;;  %vm1894_vm10 = vweird.f32 %v7266_v55 }
 0x367   :  { %v1898_v42 = vmul.f32 %v7268_v1, %v1871_v60  ;;  %7269 = vrsqrt.f32 %v8735_v0  ;;  %vm1904_vm11 = vweird.f32 %v7268_v1  ;;  %vm1895_vm15 = vmor %vm1893_vm13, %vm1894_vm10  ;;  %vm1923_vm6 = vweird.f32 %v8735_v0 }
 0x368   :  { %v1889_v41 = vmul.f32 %v7266_v55, %v1888_v58  ;;  %7271 = vrsqrt.f32 %v8737_v33  ;;  %v1836_v52 = vpop.xlane.xlu0 %1835  ;;  %vm1905_vm1 = vmor %vm1903_vm14, %vm1904_vm11  ;;  %vm1933_vm7 = vweird.f32 %v8737_v33  ;;  %vm1944_vm11 = vweird.f32 %v8729_v11 }
 0x369   :  { %v1899_v62 = vmul.f32 %v7268_v1, %v1898_v42  ;;  %v1852_v48 = vmul.f32 0.0051020407, %v1836_v52  ;;  %vm1945_vm12 = vmor %vm1943_vm9, %vm1944_vm11 }
 0x36a   :  { %v1890_v18 = vmul.f32 0.5, %v1889_v41 }
 0x36b   :  { %v1900_v12 = vmul.f32 0.5, %v1899_v62  ;;  %v1868_v61 = vsub.f32 %v1852_v48, %v1860_v6  ;;  %v1940_v48 = vmul.f32 0.5, %v1939_v4 }
 0x36c   :  { %v1891_v57 = vsub.f32 1.5, %v1890_v18 }
 0x36d   :  { %v7270_v3 = vpop.eup %7269  ;;  %v1901_v58 = vsub.f32 1.5, %v1900_v12  ;;  %v8746_v40 = vadd.f32 1e-05, %v1868_v61  ;;  %v1941_v4 = vsub.f32 1.5, %v1940_v48 }
 0x36e   :  { %v7272_v16 = vpop.eup %7271  ;;  %v1918_v42 = vmul.f32 %v7270_v3, %v8735_v0  ;;  %v1892_v52 = vmul.f32 %v7266_v55, %v1891_v57  ;;  %v1912_v57 = vmul.f32 %v8710_v10, %v1911_v20  ;;  %vm1924_vm4 = vweird.f32 %v7270_v3 }
 0x36f   :  { %v1928_v41 = vmul.f32 %v7272_v16, %v8737_v33  ;;  %7273 = vrsqrt.f32 %v8746_v40  ;;  %v1902_v6 = vmul.f32 %v7268_v1, %v1901_v58  ;;  %vm1934_vm5 = vweird.f32 %v7272_v16  ;;  %vm1925_vm8 = vmor %vm1923_vm6, %vm1924_vm4 }
 0x370   :  { %v1919_v31 = vmul.f32 %v7270_v3, %v1918_v42  ;;  %v1896_v62 = vsel %vm1895_vm15, %v7266_v55, %v1892_v52  ;;  %vm1935_vm10 = vmor %vm1933_vm7, %vm1934_vm5  ;;  %vm1953_vm14 = vweird.f32 %v8746_v40 }
 0x371   :  { %v1929_v60 = vmul.f32 %v7272_v16, %v1928_v41  ;;  %v1906_v18 = vsel %vm1905_vm1, %v7268_v1, %v1902_v6  ;;  %v8761_v12 = vmul.f32 %v6314_v26, %v1896_v62 }
 0x372   :  { %v1920_v61 = vmul.f32 0.5, %v1919_v31  ;;  %v8763_v58 = vmul.f32 %v6315_v23, %v1906_v18  ;;  %v1942_v23 = vmul.f32 %v8729_v11, %v1941_v4  ;;  %v6324_v4 = vld [vmem:[%s13339_s0 + $0x298] sm:$0xff] }
 0x373   :  { %13498 = vst [vmem:[#allocation43_spill] sm:$0xff] %v8761_v12  ;;  %v1930_v13 = vmul.f32 0.5, %v1929_v60  ;;  %v1975_v56 = vmul.f32 %v8761_v12, %v8697_v63  ;;  %v1916_v63 = vsel %vm8771_vm3, %v8710_v10, %v1912_v57  ;;  %v6318_v10 = vld [vmem:[%s13340_s1 + $0x128] sm:$0xff]  ;;  %v6319_v60 = vld [vmem:[%s13340_s1 + $0x130] sm:$0xff] }
 0x374   :  { %13499 = vst [vmem:[#allocation44_spill] sm:$0xff] %v8763_v58  ;;  %v1921_v15 = vsub.f32 1.5, %v1920_v61  ;;  %v1976_v55 = vmul.f32 %v8763_v58, %v8699_v32  ;;  %v6316_v32 = vld [vmem:[%s13340_s1 + $0x118] sm:$0xff]  ;;  %v6322_v61 = vld [vmem:[%s13339_s0 + $0x288] sm:$0xff] }
 0x375   :  { %v7274_v1 = vpop.eup %7273  ;;  %v1931_v42 = vsub.f32 1.5, %v1930_v13  ;;  %1992 = vrot.lane.b32.xlu2 %v1975_v56, %s7618_s26  ;;  %v6317_v56 = vld [vmem:[%s13340_s1 + $0x120] sm:$0xff]  ;;  %v8794_v26 = vmul.f32 %v6316_v32, %v1916_v63  ;;  %v2187_v20 = vsel %vm34_vm0, %v6322_v61, 0.0  ;;  %v6327_v32 = vld [vmem:[%s13339_s0 + $0x2b0] sm:$0xff] }
 0x376   :  { %v1948_v5 = vmul.f32 %v7274_v1, %v8746_v40  ;;  %1994 = vrot.lane.b32.xlu0 %v1976_v55, %s7618_s26  ;;  %v1922_v52 = vmul.f32 %v7270_v3, %v1921_v15  ;;  %vm1954_vm13 = vweird.f32 %v7274_v1  ;;  %v6321_v55 = vld [vmem:[%s13339_s0 + $0x280] sm:$0xff] }
 0x377   :  { %v1932_v13 = vmul.f32 %v7272_v16, %v1931_v42  ;;  %13502 = vst [vmem:[#allocation45_spill] sm:$0xff] %v8794_v26  ;;  %vm1955_vm15 = vmor %vm1953_vm14, %vm1954_vm13  ;;  %v6325_v42 = vld [vmem:[%s13339_s0 + $0x2a0] sm:$0xff] }
 0x378   :  { %v1949_v0 = vmul.f32 %v7274_v1, %v1948_v5  ;;  %v1926_v15 = vsel %vm1925_vm8, %v7270_v3, %v1922_v52  ;;  %v1977_v3 = vmul.f32 %v8794_v26, %v8689_v50  ;;  %v6323_v52 = vld [vmem:[%s13339_s0 + $0x290] sm:$0xff] }
 0x379   :  { %v1936_v41 = vsel %vm1935_vm10, %v7272_v16, %v1932_v13  ;;  %v8796_v6 = vmul.f32 %v6317_v56, %v1926_v15  ;;  %v1946_v16 = vsel %vm1945_vm12, %v8729_v11, %v1942_v23  ;;  %v2191_v56 = vsel %vm34_vm0, %v6324_v4, 0.0  ;;  %v6330_v15 = vld [vmem:[%s13339_s0 + $0x2c8] sm:$0xff]  ;;  %v6332_v23 = vld [vmem:[%s13339_s0 + $0x2d8] sm:$0xff] }
 0x37a   :  { %v1950_v33 = vmul.f32 0.5, %v1949_v0  ;;  %v8800_v31 = vmul.f32 %v6318_v10, %v1936_v41  ;;  %v8821_v50 = vmul.f32 %v6319_v60, %v1946_v16  ;;  %v2192_v0 = vadd.f32 %v6323_v52, %v2191_v56  ;;  %v6334_v41 = vld [vmem:[%s13339_s0 + $0x2e8] sm:$0xff] }
 0x37b   :  { %13503 = vst [vmem:[#allocation46_spill] sm:$0xff] %v8796_v6  ;;  %v1978_v62 = vmul.f32 %v8796_v6, %v8712_v59  ;;  %v6320_v59 = vld [vmem:[%s13340_s1 + $0x138] sm:$0xff]  ;;  %v2207_v16 = vsel %vm34_vm0, %v6332_v23, 0.0 }
 0x37c   :  { %13504 = vst [vmem:[#allocation47_spill] sm:$0xff] %v8800_v31  ;;  %v1951_v57 = vsub.f32 1.5, %v1950_v33  ;;  %v1979_v48 = vmul.f32 %v8800_v31, %v8717_v35  ;;  %v1980_v40 = vmul.f32 %v8821_v50, %v8693_v24  ;;  %v6328_v24 = vld [vmem:[%s13339_s0 + $0x2b8] sm:$0xff]  ;;  %v6329_v33 = vld [vmem:[%s13339_s0 + $0x2c0] sm:$0xff] }
 0x37d   :  { %1998 = vrot.lane.b32.xlu2 %v1978_v62, %s7618_s26  ;;  %13505 = vst [vmem:[#allocation48_spill] sm:$0xff] %v8821_v50  ;;  %v2199_v5 = vsel %vm34_vm0, %v6328_v24, 0.0  ;;  %v2203_v62 = vsel %vm34_vm0, %v6330_v15, 0.0 }
 0x37e   :  { %2000 = vrot.lane.b32.xlu1 %v1979_v48, %s7618_s26  ;;  %1996 = vrot.lane.b32.xlu0 %v1977_v3, %s7618_s26  ;;  %v1952_v35 = vmul.f32 %v7274_v1, %v1951_v57  ;;  %v2200_v10 = vadd.f32 %v6327_v32, %v2199_v5  ;;  %v6333_v57 = vld [vmem:[%s13339_s0 + $0x2e0] sm:$0xff]  ;;  %v2211_v48 = vsel %vm34_vm0, %v6334_v41, 0.0  ;;  %v6331_v3 = vld [vmem:[%s13339_s0 + $0x2d0] sm:$0xff]  ;;  %v2204_v60 = vadd.f32 %v6329_v33, %v2203_v62 }
 0x37f   :  { %v2219_v5 = vmul.f32 %v6321_v55, %v6321_v55 }
 0x380   :  { %v1956_v46 = vsel %vm1955_vm15, %v7274_v1, %v1952_v35  ;;  %v2188_v1 = vadd.f32 %v6321_v55, %v2187_v20  ;;  %v2212_v35 = vadd.f32 %v6333_v57, %v2211_v48  ;;  %v6335_v20 = vld [vmem:[%s13339_s0 + $0x2f0] sm:$0xff]  ;;  %v2226_v48 = vmul.f32 %v6328_v24, %v6328_v24 }
 0x381   :  { %v8823_v11 = vmul.f32 %v6320_v59, %v1956_v46  ;;  %v2208_v59 = vadd.f32 %v6331_v3, %v2207_v16  ;;  %v6336_v46 = vld [vmem:[%s13339_s0 + $0x2f8] sm:$0xff]  ;;  %v2223_v16 = vmul.f32 %v6325_v42, %v6325_v42  ;;  %v2229_v24 = vmul.f32 %v6331_v3, %v6331_v3 }
 0x383   :  { %13506 = vst [vmem:[#allocation49_spill] sm:$0xff] %v8823_v11  ;;  %v1981_v18 = vmul.f32 %v8823_v11, %v8733_v36  ;;  %v6326_v36 = vld [vmem:[%s13339_s0 + $0x2a8] sm:$0xff] }
 0x384   :  { %v2195_v63 = vsel %vm34_vm0, %v6326_v36, 0.0 }
 0x385   :  { %2004 = vrot.lane.b32.xlu2 %v1981_v18, %s7618_s26  ;;  %v2196_v13 = vadd.f32 %v6325_v42, %v2195_v63  ;;  %v2222_v18 = vmul.f32 %v6324_v4, %v6324_v4  ;;  %v2221_v63 = vmul.f32 %v6323_v52, %v6323_v52  ;;  %v2247_v52 = vsel %vm34_vm0, %v2226_v48, 0.0 }
 0x386   :  { %2002 = vrot.lane.b32.xlu0 %v1980_v40, %s7618_s26  ;;  %v2220_v40 = vmul.f32 %v6322_v61, %v6322_v61  ;;  %v2228_v61 = vmul.f32 %v6330_v15, %v6330_v15  ;;  %v2233_v15 = vmul.f32 %v6335_v20, %v6335_v20 }
 0x387   :  { %v2239_v56 = vsel %vm34_vm0, %v2222_v18, 0.0 }
 0x388   :  { %v2240_v62 = vadd.f32 %v2239_v56, %v2221_v63  ;;  %v2251_v55 = vsel %vm34_vm0, %v2228_v61, 0.0  ;;  %v2234_v63 = vmul.f32 %v6336_v46, %v6336_v46  ;;  %v2231_v56 = vmul.f32 %v6333_v57, %v6333_v57 }
 0x3a8   :  { %2189 = vadd.xlane.f32.xlu1 %v2188_v1  ;;  %v2215_v1 = vsel %vm34_vm0, %v6336_v46, 0.0 }
 0x3ae   :  { %2197 = vadd.xlane.f32.xlu2 %v2196_v13  ;;  %v2235_v13 = vsel %vm34_vm0, %v2220_v40, 0.0  ;;  %v2230_v40 = vmul.f32 %v6332_v23, %v6332_v23 }
 0x3af   :  { %v2236_v4 = vadd.f32 %v2235_v13, %v2219_v5  ;;  %v2232_v5 = vmul.f32 %v6334_v41, %v6334_v41 }
 0x3b0   :  { %2201 = vadd.xlane.f32.xlu1 %v2200_v10  ;;  %2193 = vadd.xlane.f32.xlu0 %v2192_v0  ;;  %v2216_v10 = vadd.f32 %v6335_v20, %v2215_v1  ;;  %v2224_v0 = vmul.f32 %v6326_v36, %v6326_v36  ;;  %v2255_v42 = vsel %vm34_vm0, %v2230_v40, 0.0 }
 0x3b1   :  { %v2256_v13 = vadd.f32 %v2255_v42, %v2229_v24 }
 0x3b6   :  { %2205 = vadd.xlane.f32.xlu2 %v2204_v60  ;;  %v2243_v60 = vsel %vm34_vm0, %v2224_v0, 0.0 }
 0x3b7   :  { %v2244_v18 = vadd.f32 %v2243_v60, %v2223_v16 }
 0x3b8   :  { %2213 = vadd.xlane.f32.xlu1 %v2212_v35  ;;  %2209 = vadd.xlane.f32.xlu0 %v2208_v59  ;;  %v2227_v35 = vmul.f32 %v6329_v33, %v6329_v33  ;;  %v2225_v59 = vmul.f32 %v6327_v32, %v6327_v32  ;;  %v2263_v32 = vsel %vm34_vm0, %v2234_v63, 0.0  ;;  %v2259_v33 = vsel %vm34_vm0, %v2232_v5, 0.0 }
 0x3b9   :  { %v2260_v0 = vadd.f32 %v2259_v33, %v2231_v56 }
 0x3ba   :  { %v2252_v1 = vadd.f32 %v2251_v55, %v2227_v35  ;;  %v2248_v36 = vadd.f32 %v2247_v52, %v2225_v59 }
 0x3be   :  { %2217 = vadd.xlane.f32.xlu2 %v2216_v10  ;;  %v2264_v10 = vadd.f32 %v2263_v32, %v2233_v15 }
 0x3c0   :  { %2241 = vadd.xlane.f32.xlu1 %v2240_v62  ;;  %2237 = vadd.xlane.f32.xlu0 %v2236_v4 }
 0x3c6   :  { %2245 = vadd.xlane.f32.xlu2 %v2244_v18 }
 0x3c8   :  { %2253 = vadd.xlane.f32.xlu1 %v2252_v1  ;;  %2249 = vadd.xlane.f32.xlu0 %v2248_v36 }
 0x3ce   :  { %2257 = vadd.xlane.f32.xlu2 %v2256_v13 }
 0x3cf   :  { %v8895_v23 = vpop.permute.xlu2 %1992 }
 0x3d0   :  { %2265 = vadd.xlane.f32.xlu1 %v2264_v10  ;;  %2261 = vadd.xlane.f32.xlu0 %v2260_v0  ;;  %13507 = vst [vmem:[#allocation50_spill] sm:$0xff] %v8895_v23 }
 0x3d4   :  { %v8899_v3 = vpop.permute.xlu1 %1990 }
 0x3d5   :  { %13509 = vst [vmem:[#allocation52_spill] sm:$0xff] %v8899_v3 }
 0x3d7   :  { %v8901_v46 = vpop.permute.xlu2 %1998 }
 0x3d8   :  { %13510 = vst [vmem:[#allocation53_spill] sm:$0xff] %v8901_v46 }
 0x3df   :  { %v8907_v62 = vpop.permute.xlu2 %2004 }
 0x3e0   :  { %13513 = vst [vmem:[#allocation56_spill] sm:$0xff] %v8907_v62 }
 0x3e8   :  { %v8897_v41 = vpop.permute.xlu0 %1994 }
 0x3e9   :  { %13508 = vst [vmem:[#allocation51_spill] sm:$0xff] %v8897_v41 }
 0x3f0   :  { %v8903_v20 = vpop.permute.xlu0 %1996  ;;  %v8905_v57 = vpop.permute.xlu1 %2000 }
 0x3f1   :  { %13511 = vst [vmem:[#allocation54_spill] sm:$0xff] %v8903_v20 }
 0x3f2   :  { %13512 = vst [vmem:[#allocation55_spill] sm:$0xff] %v8905_v57 }
 0x3f8   :  { %v8909_v4 = vpop.permute.xlu0 %2002 }
 0x3f9   :  { %13514 = vst [vmem:[#allocation57_spill] sm:$0xff] %v8909_v4 }
 0x41b   :  { %v2190_v61 = vpop.xlane.xlu1 %2189 }
 0x41c   :  { %v8911_v52 = vmul.f32 0.0051020407, %v2190_v61 }
 0x41e   :  { %v2283_v63 = vmul.f32 %v8911_v52, %v8911_v52 }
 0x421   :  { %v2198_v48 = vpop.xlane.xlu2 %2197 }
 0x422   :  { %v8919_v15 = vmul.f32 0.0051020407, %v2198_v48 }
 0x423   :  { %v2202_v16 = vpop.xlane.xlu1 %2201  ;;  %v2194_v60 = vpop.xlane.xlu0 %2193 }
 0x424   :  { %v8913_v18 = vmul.f32 0.0051020407, %v2194_v60  ;;  %v8923_v13 = vmul.f32 0.0051020407, %v2202_v16  ;;  %v2285_v60 = vmul.f32 %v8919_v15, %v8919_v15 }
 0x426   :  { %v2284_v5 = vmul.f32 %v8913_v18, %v8913_v18  ;;  %v2286_v16 = vmul.f32 %v8923_v13, %v8923_v13 }
 0x429   :  { %v2206_v35 = vpop.xlane.xlu2 %2205 }
 0x42a   :  { %v8921_v56 = vmul.f32 0.0051020407, %v2206_v35 }
 0x42b   :  { %v2214_v59 = vpop.xlane.xlu1 %2213  ;;  %v2210_v55 = vpop.xlane.xlu0 %2209 }
 0x42c   :  { %v8941_v26 = vmul.f32 0.0051020407, %v2210_v55 }
 0x431   :  { %v2218_v40 = vpop.xlane.xlu2 %2217 }
 0x433   :  { %v2242_v1 = vpop.xlane.xlu1 %2241  ;;  %v2238_v36 = vpop.xlane.xlu0 %2237 }
 0x434   :  { %v2276_v24 = vmul.f32 0.0051020407, %v2242_v1  ;;  %v2275_v42 = vmul.f32 0.0051020407, %v2238_v36  ;;  %v2287_v1 = vmul.f32 %v8921_v56, %v8921_v56 }
 0x436   :  { %v2292_v32 = vsub.f32 %v2276_v24, %v2284_v5  ;;  %v2291_v33 = vsub.f32 %v2275_v42, %v2283_v63  ;;  %v8937_v42 = vmul.f32 0.0051020407, %v2218_v40 }
 0x438   :  { %v8925_v10 = vadd.f32 1e-05, %v2292_v32  ;;  %v8927_v0 = vadd.f32 1e-05, %v2291_v33 }
 0x439   :  { %v2246_v61 = vpop.xlane.xlu2 %2245 }
 0x43a   :  { %7275 = vrsqrt.f32 %v8925_v10  ;;  %v2277_v48 = vmul.f32 0.0051020407, %v2246_v61  ;;  %v8943_v61 = vmul.f32 0.0051020407, %v2214_v59  ;;  %v2288_v59 = vmul.f32 %v8941_v26, %v8941_v26 }
 0x43b   :  { %7277 = vrsqrt.f32 %v8927_v0  ;;  %v2254_v35 = vpop.xlane.xlu1 %2253  ;;  %v2250_v36 = vpop.xlane.xlu0 %2249  ;;  %vm2323_vm2 = vweird.f32 %v8925_v10  ;;  %vm2313_vm4 = vweird.f32 %v8927_v0 }
 0x43c   :  { %v2293_v63 = vsub.f32 %v2277_v48, %v2285_v60  ;;  %v2279_v5 = vmul.f32 0.0051020407, %v2254_v35  ;;  %v2278_v24 = vmul.f32 0.0051020407, %v2250_v36  ;;  %v2290_v35 = vmul.f32 %v8937_v42, %v8937_v42 }
 0x43e   :  { %v8939_v32 = vadd.f32 1e-05, %v2293_v63  ;;  %v2295_v33 = vsub.f32 %v2279_v5, %v2287_v1  ;;  %v2294_v31 = vsub.f32 %v2278_v24, %v2286_v16  ;;  %v2289_v63 = vmul.f32 %v8943_v61, %v8943_v61 }
 0x440   :  { %v7276_v50 = vpop.eup %7275  ;;  %7279 = vrsqrt.f32 %v8939_v32  ;;  %v8946_v12 = vadd.f32 1e-05, %v2295_v33  ;;  %v8948_v62 = vadd.f32 1e-05, %v2294_v31  ;;  %vm2333_vm5 = vweird.f32 %v8939_v32 }
 0x441   :  { %v7278_v60 = vpop.eup %7277  ;;  %v2318_v48 = vmul.f32 %v7276_v50, %v8925_v10  ;;  %v2258_v40 = vpop.xlane.xlu2 %2257  ;;  %vm2324_vm1 = vweird.f32 %v7276_v50 }
 0x442   :  { %v2308_v1 = vmul.f32 %v7278_v60, %v8927_v0  ;;  %7281 = vrsqrt.f32 %v8946_v12  ;;  %v2280_v36 = vmul.f32 0.0051020407, %v2258_v40  ;;  %vm2314_vm3 = vweird.f32 %v7278_v60  ;;  %vm2325_vm6 = vmor %vm2323_vm2, %vm2324_vm1 }
 0x443   :  { %v2319_v55 = vmul.f32 %v7276_v50, %v2318_v48  ;;  %7283 = vrsqrt.f32 %v8948_v62  ;;  %v2266_v31 = vpop.xlane.xlu1 %2265  ;;  %v2262_v16 = vpop.xlane.xlu0 %2261  ;;  %vm2315_vm7 = vmor %vm2313_vm4, %vm2314_vm3  ;;  %vm2353_vm9 = vweird.f32 %v8946_v12  ;;  %vm2343_vm14 = vweird.f32 %v8948_v62 }
 0x444   :  { %v2309_v5 = vmul.f32 %v7278_v60, %v2308_v1  ;;  %v2282_v24 = vmul.f32 0.0051020407, %v2266_v31  ;;  %v2281_v33 = vmul.f32 0.0051020407, %v2262_v16  ;;  %v2296_v41 = vsub.f32 %v2280_v36, %v2288_v59  ;;  %v6337_v36 = vld [vmem:[%s13340_s1 + $0x140] sm:$0xff] }
 0x445   :  { %v2320_v46 = vmul.f32 0.5, %v2319_v55 }
 0x446   :  { %v7280_v11 = vpop.eup %7279  ;;  %v2310_v57 = vmul.f32 0.5, %v2309_v5  ;;  %v2298_v6 = vsub.f32 %v2282_v24, %v2290_v35  ;;  %v2297_v20 = vsub.f32 %v2281_v33, %v2289_v63  ;;  %v8961_v3 = vadd.f32 1e-05, %v2296_v41 }
 0x447   :  { %v2321_v58 = vsub.f32 1.5, %v2320_v46  ;;  %v2328_v48 = vmul.f32 %v7280_v11, %v8939_v32  ;;  %vm2334_vm8 = vweird.f32 %v7280_v11 }
 0x448   :  { %v8963_v40 = vpop.eup %7281  ;;  %v2311_v4 = vsub.f32 1.5, %v2310_v57  ;;  %v8965_v39 = vadd.f32 1e-05, %v2298_v6  ;;  %v8967_v23 = vadd.f32 1e-05, %v2297_v20  ;;  %7285 = vrsqrt.f32 %v8961_v3  ;;  %v8983_v57 = vld [vmem:[%s13340_s1 + $0x148] sm:$0xff]  ;;  %vm2335_vm11 = vmor %vm2333_vm5, %vm2334_vm8 }
 0x449   :  { %v8969_v1 = vpop.eup %7283  ;;  %v2329_v55 = vmul.f32 %v7280_v11, %v2328_v48  ;;  %v2348_v59 = vmul.f32 %v8963_v40, %v8946_v12  ;;  %v2322_v20 = vmul.f32 %v7276_v50, %v2321_v58  ;;  %vm2354_vm10 = vweird.f32 %v8963_v40 }
 0x44a   :  { %v2338_v41 = vmul.f32 %v8969_v1, %v8948_v62  ;;  %7287 = vrsqrt.f32 %v8965_v39  ;;  %v2312_v35 = vmul.f32 %v7278_v60, %v2311_v4  ;;  %vm2344_vm12 = vweird.f32 %v8969_v1  ;;  %vm2355_vm13 = vmor %vm2353_vm9, %vm2354_vm10 }
 0x44b   :  { %v2330_v6 = vmul.f32 0.5, %v2329_v55  ;;  %v2349_v46 = vmul.f32 %v8963_v40, %v2348_v59  ;;  %7289 = vrsqrt.f32 %v8967_v23  ;;  %v2326_v58 = vsel %vm2325_vm6, %v7276_v50, %v2322_v20  ;;  %v6339_v50 = vld [vmem:[%s13340_s1 + $0x150] sm:$0xff]  ;;  %vm2345_vm15 = vmor %vm2343_vm14, %vm2344_vm12 }
 0x44c   :  { %v2339_v10 = vmul.f32 %v8969_v1, %v2338_v41  ;;  %v8994_v0 = vmul.f32 %v8983_v57, %v2326_v58  ;;  %v2316_v5 = vsel %vm2315_vm7, %v7278_v60, %v2312_v35  ;;  %v6340_v58 = vld [vmem:[%s13340_s1 + $0x158] sm:$0xff]  ;;  %vm2363_vm2 = vweird.f32 %v8961_v3 }
 0x44d   :  { %v2331_v31 = vsub.f32 1.5, %v2330_v6  ;;  %v2350_v16 = vmul.f32 0.5, %v2349_v46  ;;  %v8998_v33 = vmul.f32 %v6337_v36, %v2316_v5  ;;  %v6341_v36 = vld [vmem:[%s13340_s1 + $0x160] sm:$0xff]  ;;  %vm2383_vm5 = vweird.f32 %v8965_v39 }
 0x44e   :  { %v2340_v63 = vmul.f32 0.5, %v2339_v10  ;;  %13515 = vst [vmem:[#allocation58_spill] sm:$0xff] %v8994_v0  ;;  %v8996_v24 = vpop.eup %7285  ;;  %v2405_v60 = vmul.f32 %v8994_v0, %v8913_v18  ;;  %vm2373_vm7 = vweird.f32 %v8967_v23 }
 0x44f   :  { %v2351_v4 = vsub.f32 1.5, %v2350_v16  ;;  %13516 = vst [vmem:[#allocation59_spill] sm:$0xff] %v8998_v33  ;;  %v2332_v48 = vmul.f32 %v7280_v11, %v2331_v31  ;;  %v2358_v41 = vmul.f32 %v8996_v24, %v8961_v3  ;;  %v2404_v20 = vmul.f32 %v8998_v33, %v8911_v52 }
 0x450   :  { %v7288_v55 = vpop.eup %7287  ;;  %v2341_v59 = vsub.f32 1.5, %v2340_v63  ;;  %2422 = vrot.lane.b32.xlu0 %v2405_v60, %s7618_s26  ;;  %vm2364_vm1 = vweird.f32 %v8996_v24 }
 0x451   :  { %v7290_v6 = vpop.eup %7289  ;;  %v2378_v46 = vmul.f32 %v7288_v55, %v8965_v39  ;;  %v2336_v10 = vsel %vm2335_vm11, %v7280_v11, %v2332_v48  ;;  %v2352_v35 = vmul.f32 %v8963_v40, %v2351_v4  ;;  %v2359_v18 = vmul.f32 %v8996_v24, %v2358_v41  ;;  %2420 = vrot.lane.b32.xlu2 %v2404_v20, %s7618_s26  ;;  %v6342_v20 = vld [vmem:[%s13340_s1 + $0x168] sm:$0xff]  ;;  %vm2365_vm6 = vmor %vm2363_vm2, %vm2364_vm1 }
 0x452   :  { %v2368_v32 = vmul.f32 %v7290_v6, %v8967_v23  ;;  %v9022_v31 = vmul.f32 %v6339_v50, %v2336_v10  ;;  %v2342_v16 = vmul.f32 %v8969_v1, %v2341_v59  ;;  %vm2384_vm3 = vweird.f32 %v7288_v55 }
 0x453   :  { %v2379_v11 = vmul.f32 %v7288_v55, %v2378_v46  ;;  %v2356_v52 = vsel %vm2355_vm13, %v8963_v40, %v2352_v35  ;;  %v2360_v63 = vmul.f32 0.5, %v2359_v18  ;;  %vm2374_vm4 = vweird.f32 %v7290_v6  ;;  %vm2385_vm8 = vmor %vm2383_vm5, %vm2384_vm3  ;;  %v9065_v35 = vld [vmem:[%s13340_s1 + $0x170] sm:$0xff] }
 0x454   :  { %13517 = vst [vmem:[#allocation60_spill] sm:$0xff] %v9022_v31  ;;  %v2369_v5 = vmul.f32 %v7290_v6, %v2368_v32  ;;  %v2406_v4 = vmul.f32 %v9022_v31, %v8919_v15  ;;  %v9037_v12 = vmul.f32 %v6341_v36, %v2356_v52  ;;  %v2346_v48 = vsel %vm2345_vm15, %v8969_v1, %v2342_v16  ;;  %vm2375_vm9 = vmor %vm2373_vm7, %vm2374_vm4 }
 0x455   :  { %v2380_v62 = vmul.f32 0.5, %v2379_v11  ;;  %v2361_v40 = vsub.f32 1.5, %v2360_v63  ;;  %v9043_v59 = vmul.f32 %v6340_v58, %v2346_v48  ;;  %13520 = vst [vmem:[#allocation63_spill] sm:$0xff] %v9065_v35  ;;  %v6349_v58 = vld [vmem:[%s13339_s0 + $0x320] sm:$0xff] }
 0x456   :  { %13518 = vst [vmem:[#allocation61_spill] sm:$0xff] %v9037_v12  ;;  %v2370_v50 = vmul.f32 0.5, %v2369_v5  ;;  %2424 = vrot.lane.b32.xlu1 %v2406_v4, %s7618_s26  ;;  %v2408_v15 = vmul.f32 %v9037_v12, %v8921_v56  ;;  %v6344_v56 = vld [vmem:[%s13340_s1 + $0x178] sm:$0xff]  ;;  %v6347_v5 = vld [vmem:[%s13339_s0 + $0x310] sm:$0xff] }
 0x457   :  { %13519 = vst [vmem:[#allocation62_spill] sm:$0xff] %v9043_v59  ;;  %v2381_v41 = vsub.f32 1.5, %v2380_v62  ;;  %v2407_v1 = vmul.f32 %v9043_v59, %v8923_v13  ;;  %v2362_v46 = vmul.f32 %v8996_v24, %v2361_v40  ;;  %v6352_v62 = vld [vmem:[%s13339_s0 + $0x338] sm:$0xff] }
 0x458   :  { %v2371_v60 = vsub.f32 1.5, %v2370_v50  ;;  %v6351_v50 = vld [vmem:[%s13339_s0 + $0x330] sm:$0xff] }
 0x459   :  { %v2382_v3 = vmul.f32 %v7288_v55, %v2381_v41  ;;  %2426 = vrot.lane.b32.xlu0 %v2407_v1, %s7618_s26  ;;  %v2366_v13 = vsel %vm2365_vm6, %v8996_v24, %v2362_v46  ;;  %2428 = vrot.lane.b32.xlu2 %v2408_v15, %s7618_s26  ;;  %v2629_v41 = vsel %vm34_vm0, %v6352_v62, 0.0  ;;  %v6356_v15 = vld [vmem:[%s13339_s0 + $0x358] sm:$0xff]  ;;  %v6355_v46 = vld [vmem:[%s13339_s0 + $0x350] sm:$0xff] }
 0x45a   :  { %v2372_v10 = vmul.f32 %v7290_v6, %v2371_v60  ;;  %v9068_v39 = vmul.f32 %v6342_v20, %v2366_v13  ;;  %v6354_v60 = vld [vmem:[%s13339_s0 + $0x348] sm:$0xff]  ;;  %v2630_v1 = vadd.f32 %v6351_v50, %v2629_v41  ;;  %v2637_v20 = vsel %vm34_vm0, %v6356_v15, 0.0 }
 0x45b   :  { %v2386_v36 = vsel %vm2385_vm8, %v7288_v55, %v2382_v3  ;;  %v6346_v55 = vld [vmem:[%s13339_s0 + $0x308] sm:$0xff]  ;;  %v6353_v3 = vld [vmem:[%s13339_s0 + $0x340] sm:$0xff]  ;;  %v2638_v13 = vadd.f32 %v6355_v46, %v2637_v20  ;;  %v2656_v20 = vmul.f32 %v6352_v62, %v6352_v62  ;;  %v2658_v59 = vmul.f32 %v6354_v60, %v6354_v60 }
 0x45c   :  { %13521 = vst [vmem:[#allocation64_spill] sm:$0xff] %v9068_v39  ;;  %v9070_v18 = vmul.f32 %v6344_v56, %v2386_v36  ;;  %v2376_v32 = vsel %vm2375_vm9, %v7290_v6, %v2372_v10  ;;  %v2409_v23 = vmul.f32 %v9068_v39, %v8941_v26  ;;  %v6345_v26 = vld [vmem:[%s13339_s0 + $0x300] sm:$0xff]  ;;  %v2617_v6 = vsel %vm34_vm0, %v6346_v55, 0.0  ;;  %v6358_v10 = vld [vmem:[%s13339_s0 + $0x368] sm:$0xff] }
 0x45d   :  { %v9075_v24 = vmul.f32 %v9065_v35, %v2376_v32  ;;  %v2618_v16 = vadd.f32 %v6345_v26, %v2617_v6  ;;  %v2633_v56 = vsel %vm34_vm0, %v6354_v60, 0.0  ;;  %v2650_v32 = vmul.f32 %v6346_v55, %v6346_v55  ;;  %v6359_v55 = vld [vmem:[%s13339_s0 + $0x370] sm:$0xff] }
 0x45e   :  { %13522 = vst [vmem:[#allocation65_spill] sm:$0xff] %v9070_v18  ;;  %2430 = vrot.lane.b32.xlu1 %v2409_v23, %s7618_s26  ;;  %v2411_v11 = vmul.f32 %v9070_v18, %v8937_v42  ;;  %v6350_v42 = vld [vmem:[%s13339_s0 + $0x328] sm:$0xff]  ;;  %v2634_v36 = vadd.f32 %v6353_v3, %v2633_v56  ;;  %v6357_v23 = vld [vmem:[%s13339_s0 + $0x360] sm:$0xff]  ;;  %v2649_v6 = vmul.f32 %v6345_v26, %v6345_v26 }
 0x45f   :  { %13523 = vst [vmem:[#allocation66_spill] sm:$0xff] %v9075_v24  ;;  %v2410_v52 = vmul.f32 %v9075_v24, %v8943_v61  ;;  %v6348_v61 = vld [vmem:[%s13339_s0 + $0x318] sm:$0xff]  ;;  %v2625_v63 = vsel %vm34_vm0, %v6350_v42, 0.0  ;;  %v2654_v56 = vmul.f32 %v6350_v42, %v6350_v42  ;;  %v2655_v26 = vmul.f32 %v6351_v50, %v6351_v50 }
 0x460   :  { %v2621_v4 = vsel %vm34_vm0, %v6348_v61, 0.0  ;;  %v2626_v48 = vadd.f32 %v6349_v58, %v2625_v63  ;;  %v2665_v63 = vsel %vm34_vm0, %v2650_v32, 0.0  ;;  %v2681_v42 = vsel %vm34_vm0, %v2658_v59, 0.0 }
 0x461   :  { %2432 = vrot.lane.b32.xlu0 %v2410_v52, %s7618_s26  ;;  %2434 = vrot.lane.b32.xlu2 %v2411_v11, %s7618_s26  ;;  %v2622_v40 = vadd.f32 %v6347_v5, %v2621_v4  ;;  %v2641_v11 = vsel %vm34_vm0, %v6358_v10, 0.0  ;;  %v6360_v52 = vld [vmem:[%s13339_s0 + $0x378] sm:$0xff]  ;;  %v2673_v39 = vsel %vm34_vm0, %v2654_v56, 0.0  ;;  %v2661_v62 = vmul.f32 %v6357_v23, %v6357_v23 }
 0x462   :  { %v2645_v4 = vsel %vm34_vm0, %v6360_v52, 0.0 }
 0x463   :  { %v2646_v41 = vadd.f32 %v6359_v55, %v2645_v4 }
 0x488   :  { %2619 = vadd.xlane.f32.xlu1 %v2618_v16  ;;  %v2642_v16 = vadd.f32 %v6357_v23, %v2641_v11  ;;  %v2677_v11 = vsel %vm34_vm0, %v2656_v20, 0.0 }
 0x489   :  { %v2678_v33 = vadd.f32 %v2677_v11, %v2655_v26 }
 0x48a   :  { %2627 = vadd.xlane.f32.xlu2 %v2626_v48  ;;  %v2652_v48 = vmul.f32 %v6348_v61, %v6348_v61 }
 0x48b   :  { %2623 = vadd.xlane.f32.xlu0 %v2622_v40  ;;  %v2666_v40 = vadd.f32 %v2665_v63, %v2649_v6  ;;  %v2657_v6 = vmul.f32 %v6353_v3, %v6353_v3  ;;  %v2659_v63 = vmul.f32 %v6355_v46, %v6355_v46 }
 0x48d   :  { %v2682_v50 = vadd.f32 %v2681_v42, %v2657_v6 }
 0x490   :  { %2631 = vadd.xlane.f32.xlu1 %v2630_v1  ;;  %v2651_v1 = vmul.f32 %v6347_v5, %v6347_v5  ;;  %v2660_v5 = vmul.f32 %v6356_v15, %v6356_v15 }
 0x492   :  { %2639 = vadd.xlane.f32.xlu2 %v2638_v13  ;;  %v2669_v13 = vsel %vm34_vm0, %v2652_v48, 0.0  ;;  %v2685_v4 = vsel %vm34_vm0, %v2660_v5, 0.0  ;;  %v2664_v48 = vmul.f32 %v6360_v52, %v6360_v52 }
 0x493   :  { %2635 = vadd.xlane.f32.xlu0 %v2634_v36  ;;  %v2653_v36 = vmul.f32 %v6349_v58, %v6349_v58  ;;  %v2670_v32 = vadd.f32 %v2669_v13, %v2651_v1  ;;  %v2686_v60 = vadd.f32 %v2685_v4, %v2659_v63 }
 0x494   :  { %v2693_v3 = vsel %vm34_vm0, %v2664_v48, 0.0 }
 0x495   :  { %v2674_v61 = vadd.f32 %v2673_v39, %v2653_v36  ;;  %v2663_v39 = vmul.f32 %v6359_v55, %v6359_v55 }
 0x497   :  { %v2694_v15 = vadd.f32 %v2693_v3, %v2663_v39 }
 0x498   :  { %2643 = vadd.xlane.f32.xlu1 %v2642_v16  ;;  %v2662_v16 = vmul.f32 %v6358_v10, %v6358_v10 }
 0x49a   :  { %2667 = vadd.xlane.f32.xlu2 %v2666_v40  ;;  %v2689_v58 = vsel %vm34_vm0, %v2662_v16, 0.0 }
 0x49b   :  { %2647 = vadd.xlane.f32.xlu0 %v2646_v41  ;;  %v2690_v40 = vadd.f32 %v2689_v58, %v2661_v62 }
 0x4a0   :  { %2671 = vadd.xlane.f32.xlu1 %v2670_v32 }
 0x4a2   :  { %2679 = vadd.xlane.f32.xlu2 %v2678_v33 }
 0x4a3   :  { %2675 = vadd.xlane.f32.xlu0 %v2674_v61 }
 0x4a8   :  { %2683 = vadd.xlane.f32.xlu1 %v2682_v50 }
 0x4aa   :  { %2691 = vadd.xlane.f32.xlu2 %v2690_v40 }
 0x4ab   :  { %2687 = vadd.xlane.f32.xlu0 %v2686_v60  ;;  %v9148_v33 = vpop.permute.xlu2 %2420 }
 0x4ac   :  { %13524 = vst [vmem:[#allocation67_spill] sm:$0xff] %v9148_v33 }
 0x4b0   :  { %2695 = vadd.xlane.f32.xlu1 %v2694_v15 }
 0x4b3   :  { %v9154_v10 = vpop.permute.xlu2 %2428 }
 0x4b4   :  { %13526 = vst [vmem:[#allocation69_spill] sm:$0xff] %v9154_v10 }
 0x4bb   :  { %v9160_v41 = vpop.permute.xlu2 %2434 }
 0x4bc   :  { %13529 = vst [vmem:[#allocation72_spill] sm:$0xff] %v9160_v41 }
 0x4c2   :  { %v9150_v59 = vpop.permute.xlu0 %2422 }
 0x4c8   :  { %v9152_v46 = vpop.permute.xlu1 %2424 }
 0x4c9   :  { %13525 = vst [vmem:[#allocation68_spill] sm:$0xff] %v9152_v46 }
 0x4cb   :  { %v9156_v23 = vpop.permute.xlu0 %2426 }
 0x4cc   :  { %13527 = vst [vmem:[#allocation70_spill] sm:$0xff] %v9156_v23 }
 0x4d0   :  { %v9158_v52 = vpop.permute.xlu1 %2430 }
 0x4d1   :  { %13528 = vst [vmem:[#allocation71_spill] sm:$0xff] %v9158_v52 }
 0x4d3   :  { %v9162_v55 = vpop.permute.xlu0 %2432 }
 0x4fb   :  { %v2620_v1 = vpop.xlane.xlu1 %2619 }
 0x4fc   :  { %v9164_v32 = vmul.f32 0.0051020407, %v2620_v1 }
 0x4fd   :  { %v2628_v20 = vpop.xlane.xlu2 %2627 }
 0x4fe   :  { %v2624_v56 = vpop.xlane.xlu0 %2623  ;;  %v2713_v61 = vmul.f32 %v9164_v32, %v9164_v32  ;;  %v9172_v50 = vmul.f32 0.0051020407, %v2628_v20 }
 0x4ff   :  { %v9168_v42 = vmul.f32 0.0051020407, %v2624_v56 }
 0x500   :  { %v2715_v1 = vmul.f32 %v9172_v50, %v9172_v50 }
 0x501   :  { %v2714_v48 = vmul.f32 %v9168_v42, %v9168_v42 }
 0x503   :  { %v2632_v13 = vpop.xlane.xlu1 %2631 }
 0x504   :  { %v9170_v62 = vmul.f32 0.0051020407, %v2632_v13 }
 0x505   :  { %v2640_v26 = vpop.xlane.xlu2 %2639 }
 0x506   :  { %v2636_v36 = vpop.xlane.xlu0 %2635  ;;  %v2716_v60 = vmul.f32 %v9170_v62, %v9170_v62  ;;  %v9187_v24 = vmul.f32 0.0051020407, %v2640_v26 }
 0x507   :  { %v9180_v20 = vmul.f32 0.0051020407, %v2636_v36 }
 0x509   :  { %v2717_v36 = vmul.f32 %v9180_v20, %v9180_v20 }
 0x50b   :  { %v2644_v11 = vpop.xlane.xlu1 %2643 }
 0x50d   :  { %v2668_v6 = vpop.xlane.xlu2 %2667 }
 0x50e   :  { %v2648_v16 = vpop.xlane.xlu0 %2647  ;;  %v2705_v5 = vmul.f32 0.0051020407, %v2668_v6  ;;  %v9184_v6 = vmul.f32 0.0051020407, %v2644_v11 }
 0x510   :  { %v2721_v63 = vsub.f32 %v2705_v5, %v2713_v61  ;;  %v2719_v11 = vmul.f32 %v9184_v6, %v9184_v6 }
 0x512   :  { %v2729_v58 = vadd.f32 1e-05, %v2721_v63 }
 0x513   :  { %v2672_v4 = vpop.xlane.xlu1 %2671 }
 0x514   :  { %v2706_v40 = vmul.f32 0.0051020407, %v2672_v4  ;;  %7291 = vrsqrt.f32 %v2729_v58  ;;  %vm2743_vm11 = vweird.f32 %v2729_v58 }
 0x515   :  { %v2680_v3 = vpop.xlane.xlu2 %2679 }
 0x516   :  { %v2722_v39 = vsub.f32 %v2706_v40, %v2714_v48  ;;  %v2676_v15 = vpop.xlane.xlu0 %2675  ;;  %v2708_v56 = vmul.f32 0.0051020407, %v2680_v3 }
 0x517   :  { %v2707_v13 = vmul.f32 0.0051020407, %v2676_v15 }
 0x518   :  { %v9182_v61 = vadd.f32 1e-05, %v2722_v39  ;;  %v2724_v5 = vsub.f32 %v2708_v56, %v2716_v60  ;;  %v2718_v56 = vmul.f32 %v9187_v24, %v9187_v24 }
 0x519   :  { %v2723_v63 = vsub.f32 %v2707_v13, %v2715_v1 }
 0x51a   :  { %7293 = vrsqrt.f32 %v9182_v61  ;;  %v7292_v4 = vpop.eup %7291  ;;  %v9189_v48 = vadd.f32 1e-05, %v2724_v5  ;;  %vm2753_vm14 = vweird.f32 %v9182_v61 }
 0x51b   :  { %v9191_v40 = vadd.f32 1e-05, %v2723_v63  ;;  %v2684_v0 = vpop.xlane.xlu1 %2683  ;;  %v2738_v3 = vmul.f32 %v7292_v4, %v2729_v58  ;;  %vm2744_vm10 = vweird.f32 %v7292_v4 }
 0x51c   :  { %v2709_v39 = vmul.f32 0.0051020407, %v2684_v0  ;;  %7295 = vrsqrt.f32 %v9189_v48  ;;  %v9203_v0 = vmul.f32 0.0051020407, %v2648_v16  ;;  %vm2745_vm12 = vmor %vm2743_vm11, %vm2744_vm10  ;;  %vm2773_vm3 = vweird.f32 %v9189_v48 }
 0x51d   :  { %v2739_v60 = vmul.f32 %v7292_v4, %v2738_v3  ;;  %7297 = vrsqrt.f32 %v9191_v40  ;;  %v2692_v15 = vpop.xlane.xlu2 %2691  ;;  %vm2763_vm5 = vweird.f32 %v9191_v40 }
 0x51e   :  { %v2725_v26 = vsub.f32 %v2709_v39, %v2717_v36  ;;  %v2688_v1 = vpop.xlane.xlu0 %2687  ;;  %v2711_v13 = vmul.f32 0.0051020407, %v2692_v15  ;;  %v2720_v12 = vmul.f32 %v9203_v0, %v9203_v0 }
 0x51f   :  { %v2710_v5 = vmul.f32 0.0051020407, %v2688_v1  ;;  %v2740_v41 = vmul.f32 0.5, %v2739_v60 }
 0x520   :  { %v9201_v63 = vpop.eup %7293  ;;  %v9205_v10 = vadd.f32 1e-05, %v2725_v26  ;;  %v2727_v46 = vsub.f32 %v2711_v13, %v2719_v11 }
 0x521   :  { %v2748_v3 = vmul.f32 %v9201_v63, %v9182_v61  ;;  %v2726_v18 = vsub.f32 %v2710_v5, %v2718_v56  ;;  %v2741_v36 = vsub.f32 1.5, %v2740_v41  ;;  %vm2754_vm13 = vweird.f32 %v9201_v63 }
 0x522   :  { %7299 = vrsqrt.f32 %v9205_v10  ;;  %v9210_v39 = vpop.eup %7295  ;;  %v9213_v1 = vadd.f32 1e-05, %v2727_v46  ;;  %vm9241_vm15 = vmor %vm2753_vm14, %vm2754_vm13  ;;  %vm2783_vm8 = vweird.f32 %v9205_v10 }
 0x523   :  { %v2749_v15 = vmul.f32 %v9201_v63, %v2748_v3  ;;  %v9215_v60 = vadd.f32 1e-05, %v2726_v18  ;;  %v2696_v16 = vpop.xlane.xlu1 %2695  ;;  %v7298_v26 = vpop.eup %7297  ;;  %v2742_v52 = vmul.f32 %v7292_v4, %v2741_v36  ;;  %v2768_v41 = vmul.f32 %v9210_v39, %v9189_v48  ;;  %v9226_v18 = vld [vmem:[%s13340_s1 + $0x180] sm:$0xff] }
 0x524   :  { %v2712_v11 = vmul.f32 0.0051020407, %v2696_v16  ;;  %v2758_v13 = vmul.f32 %v7298_v26, %v9191_v40  ;;  %7301 = vrsqrt.f32 %v9213_v1  ;;  %13530 = vst [vmem:[#allocation73_spill] sm:$0xff] %v9226_v18  ;;  %vm2774_vm1 = vweird.f32 %v9210_v39 }
 0x525   :  { %v2750_v56 = vmul.f32 0.5, %v2749_v15  ;;  %v2769_v46 = vmul.f32 %v9210_v39, %v2768_v41  ;;  %7303 = vrsqrt.f32 %v9215_v60  ;;  %v2746_v36 = vsel %vm2745_vm12, %v7292_v4, %v2742_v52  ;;  %vm2775_vm4 = vmor %vm2773_vm3, %vm2774_vm1 }
 0x526   :  { %v2759_v58 = vmul.f32 %v7298_v26, %v2758_v13  ;;  %v2728_v3 = vsub.f32 %v2712_v11, %v2720_v12  ;;  %v9235_v23 = vmul.f32 %v9226_v18, %v2746_v36  ;;  %vm2764_vm2 = vweird.f32 %v7298_v26 }
 0x527   :  { %v2751_v5 = vsub.f32 1.5, %v2750_v56  ;;  %v2770_v16 = vmul.f32 0.5, %v2769_v46  ;;  %v9257_v46 = vld [vmem:[%s13340_s1 + $0x188] sm:$0xff]  ;;  %vm2765_vm6 = vmor %vm2763_vm5, %vm2764_vm2  ;;  %vm2803_vm12 = vweird.f32 %v9213_v1  ;;  %vm2793_vm14 = vweird.f32 %v9215_v60 }
 0x528   :  { %v9232_v15 = vpop.eup %7299  ;;  %13531 = vst [vmem:[#allocation74_spill] sm:$0xff] %v9235_v23  ;;  %v2760_v33 = vmul.f32 0.5, %v2759_v58  ;;  %v9246_v52 = vadd.f32 1e-05, %v2728_v3  ;;  %v2834_v4 = vmul.f32 %v9235_v23, %v9164_v32 }
 0x529   :  { %v2752_v31 = vmul.f32 %v9201_v63, %v2751_v5  ;;  %v2778_v41 = vmul.f32 %v9232_v15, %v9205_v10  ;;  %v2771_v12 = vsub.f32 1.5, %v2770_v16  ;;  %vm2784_vm7 = vweird.f32 %v9232_v15 }
 0x52a   :  { %v7302_v11 = vpop.eup %7301  ;;  %v2761_v56 = vsub.f32 1.5, %v2760_v33  ;;  %7305 = vrsqrt.f32 %v9246_v52  ;;  %2850 = vrot.lane.b32.xlu0 %v2834_v4, %s7618_s26  ;;  %vm2785_vm9 = vmor %vm2783_vm8, %vm2784_vm7  ;;  %vm2813_vm2 = vweird.f32 %v9246_v52 }
 0x52b   :  { %v2779_v61 = vmul.f32 %v9232_v15, %v2778_v41  ;;  %v2756_v13 = vsel %vm9241_vm15, %v9201_v63, %v2752_v31  ;;  %v7304_v5 = vpop.eup %7303  ;;  %v2772_v58 = vmul.f32 %v9210_v39, %v2771_v12  ;;  %v2798_v32 = vmul.f32 %v7302_v11, %v9213_v1  ;;  %v9267_v31 = vld [vmem:[%s13340_s1 + $0x198] sm:$0xff]  ;;  %v6363_v63 = vld [vmem:[%s13340_s1 + $0x190] sm:$0xff]  ;;  %v9317_v1 = vld [vmem:[%s13340_s1 + $0x1a8] sm:$0xff] }
 0x52c   :  { %v2762_v35 = vmul.f32 %v7298_v26, %v2761_v56  ;;  %v2788_v48 = vmul.f32 %v7304_v5, %v9215_v60  ;;  %v9280_v16 = vmul.f32 %v9257_v46, %v2756_v13  ;;  %vm2804_vm10 = vweird.f32 %v7302_v11 }
 0x52d   :  { %v2780_v33 = vmul.f32 0.5, %v2779_v61  ;;  %v2799_v3 = vmul.f32 %v7302_v11, %v2798_v32  ;;  %v2776_v36 = vsel %vm2775_vm4, %v9210_v39, %v2772_v58  ;;  %v6365_v58 = vld [vmem:[%s13340_s1 + $0x1a0] sm:$0xff]  ;;  %vm2794_vm11 = vweird.f32 %v7304_v5  ;;  %vm2805_vm13 = vmor %vm2803_vm12, %vm2804_vm10 }
 0x52e   :  { %13534 = vst [vmem:[#allocation75_spill] sm:$0xff] %v9280_v16  ;;  %v2789_v12 = vmul.f32 %v7304_v5, %v2788_v48  ;;  %v9283_v40 = vmul.f32 %v9267_v31, %v2776_v36  ;;  %v2766_v4 = vsel %vm2765_vm6, %v7298_v26, %v2762_v35  ;;  %v2835_v61 = vmul.f32 %v9280_v16, %v9168_v42  ;;  %vm2795_vm15 = vmor %vm2793_vm14, %vm2794_vm11 }
 0x52f   :  { %v2781_v41 = vsub.f32 1.5, %v2780_v33  ;;  %v2800_v56 = vmul.f32 0.5, %v2799_v3  ;;  %v9287_v23 = vmul.f32 %v6363_v63, %v2766_v4  ;;  %v9311_v63 = vld [vmem:[%s13340_s1 + $0x1b0] sm:$0xff] }
 0x530   :  { %13535 = vst [vmem:[#allocation76_spill] sm:$0xff] %v9283_v40  ;;  %v2790_v39 = vmul.f32 0.5, %v2789_v12  ;;  %v2837_v13 = vmul.f32 %v9283_v40, %v9170_v62  ;;  %v7306_v32 = vpop.eup %7305  ;;  %2852 = vrot.lane.b32.xlu2 %v2835_v61, %s7618_s26 }
 0x531   :  { %v2782_v18 = vmul.f32 %v9232_v15, %v2781_v41  ;;  %v2801_v26 = vsub.f32 1.5, %v2800_v56  ;;  %v2836_v42 = vmul.f32 %v9287_v23, %v9172_v50  ;;  %v2808_v35 = vmul.f32 %v7306_v32, %v9246_v52  ;;  %v9351_v52 = vld [vmem:[%s13339_s0 + $0x388] sm:$0xff] }
 0x532   :  { %v2791_v10 = vsub.f32 1.5, %v2790_v39  ;;  %2856 = vrot.lane.b32.xlu0 %v2837_v13, %s7618_s26  ;;  %vm2814_vm1 = vweird.f32 %v7306_v32  ;;  %v9356_v13 = vld [vmem:[%s13339_s0 + $0x390] sm:$0xff] }
 0x533   :  { %v2786_v62 = vsel %vm2785_vm9, %v9232_v15, %v2782_v18  ;;  %v2802_v33 = vmul.f32 %v7302_v11, %v2801_v26  ;;  %2854 = vrot.lane.b32.xlu1 %v2836_v42, %s7618_s26  ;;  %v2809_v3 = vmul.f32 %v7306_v32, %v2808_v35  ;;  %vm2815_vm3 = vmor %vm2813_vm2, %vm2814_vm1  ;;  %v6374_v26 = vld [vmem:[%s13339_s0 + $0x3a8] sm:$0xff]  ;;  %v6373_v35 = vld [vmem:[%s13339_s0 + $0x3a0] sm:$0xff] }
 0x534   :  { %v9306_v48 = vmul.f32 %v6365_v58, %v2786_v62  ;;  %v2792_v50 = vmul.f32 %v7304_v5, %v2791_v10  ;;  %v9363_v58 = vld [vmem:[%s13339_s0 + $0x380] sm:$0xff]  ;;  %v3055_v62 = vsel %vm34_vm0, %v6374_v26, 0.0 }
 0x535   :  { %v2806_v15 = vsel %vm2805_vm13, %v7302_v11, %v2802_v33  ;;  %v2810_v36 = vmul.f32 0.5, %v2809_v3  ;;  %v6368_v11 = vld [vmem:[%s13340_s1 + $0x1b8] sm:$0xff]  ;;  %v6378_v33 = vld [vmem:[%s13339_s0 + $0x3c8] sm:$0xff]  ;;  %v3056_v3 = vadd.f32 %v6373_v35, %v3055_v62 }
 0x536   :  { %v2838_v18 = vmul.f32 %v9306_v48, %v9180_v20  ;;  %v9322_v41 = vmul.f32 %v9311_v63, %v2806_v15  ;;  %v2796_v12 = vsel %vm2795_vm15, %v7304_v5, %v2792_v50  ;;  %v6376_v50 = vld [vmem:[%s13339_s0 + $0x3b8] sm:$0xff]  ;;  %v3063_v15 = vsel %vm34_vm0, %v6378_v33, 0.0 }
 0x537   :  { %v9325_v4 = vmul.f32 %v9317_v1, %v2796_v12  ;;  %v2811_v60 = vsub.f32 1.5, %v2810_v36  ;;  %v6375_v36 = vld [vmem:[%s13339_s0 + $0x3b0] sm:$0xff]  ;;  %v3059_v12 = vsel %vm34_vm0, %v6376_v50, 0.0 }
 0x538   :  { %13536 = vst [vmem:[#allocation77_spill] sm:$0xff] %v9322_v41  ;;  %v2840_v56 = vmul.f32 %v9322_v41, %v9184_v6  ;;  %2858 = vrot.lane.b32.xlu2 %v2838_v18, %s7618_s26  ;;  %v6377_v18 = vld [vmem:[%s13339_s0 + $0x3c0] sm:$0xff]  ;;  %v3088_v41 = vmul.f32 %v6378_v33, %v6378_v33 }
 0x539   :  { %13537 = vst [vmem:[#allocation78_spill] sm:$0xff] %v9325_v4  ;;  %v2839_v61 = vmul.f32 %v9325_v4, %v9187_v24  ;;  %v2812_v20 = vmul.f32 %v7306_v32, %v2811_v60  ;;  %v9346_v24 = vld [vmem:[%s13339_s0 + $0x398] sm:$0xff]  ;;  %v6382_v60 = vld [vmem:[%s13339_s0 + $0x3e8] sm:$0xff] }
 0x53b   :  { %2862 = vrot.lane.b32.xlu1 %v2840_v56, %s7618_s26  ;;  %2860 = vrot.lane.b32.xlu0 %v2839_v61, %s7618_s26  ;;  %v2816_v5 = vsel %vm2815_vm3, %v7306_v32, %v2812_v20  ;;  %v3047_v32 = vsel %vm34_vm0, %v9351_v52, 0.0  ;;  %v3064_v56 = vadd.f32 %v6377_v18, %v3063_v15  ;;  %v3060_v61 = vadd.f32 %v6375_v36, %v3059_v12  ;;  %v6381_v20 = vld [vmem:[%s13339_s0 + $0x3e0] sm:$0xff] }
 0x53c   :  { %v9338_v39 = vmul.f32 %v6368_v11, %v2816_v5  ;;  %v3048_v10 = vadd.f32 %v9363_v58, %v3047_v32  ;;  %v3092_v11 = vmul.f32 %v6382_v60, %v6382_v60  ;;  %v3071_v5 = vsel %vm34_vm0, %v6382_v60, 0.0 }
 0x53d   :  { %v3072_v32 = vadd.f32 %v6381_v20, %v3071_v5  ;;  %v6379_v5 = vld [vmem:[%s13339_s0 + $0x3d0] sm:$0xff] }
 0x53e   :  { %v2841_v6 = vmul.f32 %v9338_v39, %v9203_v0  ;;  %v3051_v0 = vsel %vm34_vm0, %v9346_v24, 0.0 }
 0x53f   :  { %v3052_v42 = vadd.f32 %v9356_v13, %v3051_v0  ;;  %v3091_v0 = vmul.f32 %v6381_v20, %v6381_v20 }
 0x540   :  { %2864 = vrot.lane.b32.xlu2 %v2841_v6, %s7618_s26  ;;  %v6384_v6 = vld [vmem:[%s13339_s0 + $0x3f8] sm:$0xff] }
 0x541   :  { %v3075_v62 = vsel %vm34_vm0, %v6384_v6, 0.0 }
 0x565   :  { %3053 = vadd.xlane.f32.xlu1 %v3052_v42  ;;  %3049 = vadd.xlane.f32.xlu0 %v3048_v10  ;;  %v3119_v42 = vsel %vm34_vm0, %v3092_v11, 0.0  ;;  %v6383_v10 = vld [vmem:[%s13339_s0 + $0x3f0] sm:$0xff]  ;;  %v3111_v11 = vsel %vm34_vm0, %v3088_v41, 0.0 }
 0x566   :  { %v3120_v15 = vadd.f32 %v3119_v42, %v3091_v0  ;;  %v3076_v12 = vadd.f32 %v6383_v10, %v3075_v62  ;;  %v3093_v60 = vmul.f32 %v6383_v10, %v6383_v10  ;;  %v3089_v42 = vmul.f32 %v6379_v5, %v6379_v5 }
 0x567   :  { %v3086_v10 = vmul.f32 %v6376_v50, %v6376_v50  ;;  %v3084_v62 = vmul.f32 %v6374_v26, %v6374_v26 }
 0x569   :  { %3057 = vadd.xlane.f32.xlu2 %v3056_v3  ;;  %v3094_v3 = vmul.f32 %v6384_v6, %v6384_v6 }
 0x56b   :  { %v3123_v40 = vsel %vm34_vm0, %v3094_v3, 0.0 }
 0x56c   :  { %v3124_v20 = vadd.f32 %v3123_v40, %v3093_v60  ;;  %v3085_v40 = vmul.f32 %v6375_v36, %v6375_v36  ;;  %v3080_v60 = vmul.f32 %v9351_v52, %v9351_v52  ;;  %v3079_v36 = vmul.f32 %v9363_v58, %v9363_v58 }
 0x56d   :  { %3065 = vadd.xlane.f32.xlu1 %v3064_v56  ;;  %3061 = vadd.xlane.f32.xlu0 %v3060_v61  ;;  %v6380_v56 = vld [vmem:[%s13339_s0 + $0x3d8] sm:$0xff]  ;;  %v3087_v61 = vmul.f32 %v6377_v18, %v6377_v18  ;;  %v3083_v18 = vmul.f32 %v6373_v35, %v6373_v35  ;;  %v3082_v35 = vmul.f32 %v9346_v24, %v9346_v24  ;;  %v7371_v24 = vld [vmem:[%s13340_s1 + $0x10] sm:$0xff] }
 0x56e   :  { %v3067_v6 = vsel %vm34_vm0, %v6380_v56, 0.0  ;;  %v3090_v0 = vmul.f32 %v6380_v56, %v6380_v56  ;;  %v13388_v56 = vmov 1   ;;  %v3081_v52 = vmul.f32 %v9356_v13, %v9356_v13  ;;  %v7373_v13 = vld [vmem:[%s13340_s1 + $0x20] sm:$0xff] }
 0x56f   :  { %v3112_v33 = vadd.f32 %v3111_v11, %v3087_v61  ;;  %7164 = vset.pattern.permute.xlu1 %v13388_v56  ;;  %7166 = vset.pattern.permute.xlu0 %v13388_v56  ;;  %v3095_v61 = vsel %vm34_vm0, %v3080_v60, 0.0  ;;  %v293_v58 = vsub.f32 %v7371_v24, %v8220_v8  ;;  %v7374_v8 = vld [vmem:[%s13340_s1 + $0x28] sm:$0xff]  ;;  %v7384_v60 = vld [vmem:[%s13340_s1 + $0xc0] sm:$0xff] }
 0x570   :  { %v3115_v3 = vsel %vm34_vm0, %v3090_v0, 0.0  ;;  %v3096_v11 = vadd.f32 %v3095_v61, %v3079_v36  ;;  %v7372_v0 = vld [vmem:[%s13340_s1] sm:$0xff] }
 0x571   :  { %3073 = vadd.xlane.f32.xlu2 %v3072_v32  ;;  %v3068_v32 = vadd.f32 %v6379_v5, %v3067_v6  ;;  %v3116_v41 = vadd.f32 %v3115_v3, %v3089_v42  ;;  %v3099_v5 = vsel %vm34_vm0, %v3082_v35, 0.0  ;;  %v296_v42 = vsub.f32 %v7374_v8, %v8226_v2  ;;  %v13541_v8 = vld [vmem:[#allocation57_spill] sm:$0xff] }
 0x572   :  { %v3100_v6 = vadd.f32 %v3099_v5, %v3081_v52  ;;  %v7388_v5 = vld [vmem:[%s13340_s1 + $0x108] sm:$0xff] }
 0x575   :  { %3121 = vadd.xlane.f32.xlu1 %v3120_v15  ;;  %3077 = vadd.xlane.f32.xlu0 %v3076_v12  ;;  %v3107_v15 = vsel %vm34_vm0, %v3086_v10, 0.0  ;;  %v3103_v12 = vsel %vm34_vm0, %v3084_v62, 0.0 }
 0x576   :  { %v3108_v26 = vadd.f32 %v3107_v15, %v3085_v40  ;;  %v3104_v50 = vadd.f32 %v3103_v12, %v3083_v18 }
 0x579   :  { %3125 = vadd.xlane.f32.xlu2 %v3124_v20  ;;  %v13390_v20 = vmov 0  }
 0x57a   :  { %7165 = vset.pattern.permute.xlu2 %v13390_v20  ;;  %v9903_v20 = vld [vmem:[%s13339_s0 + $0x4e0] sm:$0xff] }
 0x57d   :  { %3113 = vadd.xlane.f32.xlu1 %v3112_v33  ;;  %3069 = vadd.xlane.f32.xlu0 %v3068_v32  ;;  %v291_v33 = vsub.f32 %v7372_v0, %v8218_v25  ;;  %v295_v32 = vsub.f32 %v7373_v13, %v8224_v7  ;;  %v7376_v7 = vld [vmem:[%s13340_s1 + $0x50] sm:$0xff]  ;;  %v13539_v0 = vld [vmem:[#allocation24_spill] sm:$0xff] }
 0x57e   :  { %v726_v10 = vsub.f32 %v7376_v7, %v8232_v53  ;;  %v13542_v7 = vld [vmem:[#allocation33_spill] sm:$0xff] }
 0x581   :  { %3117 = vadd.xlane.f32.xlu2 %v3116_v41 }
 0x585   :  { %3109 = vadd.xlane.f32.xlu1 %v3108_v26  ;;  %3105 = vadd.xlane.f32.xlu0 %v3104_v50  ;;  %v1584_v26 = vsub.f32 %v7384_v60, %v8675_v54  ;;  %v7386_v54 = vld [vmem:[%s13340_s1 + $0xe8] sm:$0xff] }
 0x586   :  { %v1589_v35 = vsub.f32 %v7386_v54, %v8685_v19  ;;  %v13538_v19 = vld [vmem:[#allocation50_spill] sm:$0xff] }
 0x589   :  { %3097 = vadd.xlane.f32.xlu2 %v3096_v11 }
 0x58a   :  { %v9476_v18 = vpop.permute.xlu2 %2852 }
 0x58d   :  { %3101 = vadd.xlane.f32.xlu0 %v3100_v6  ;;  %v2015_v6 = vsub.f32 %v7388_v5, %v13538_v19  ;;  %v13547_v19 = vld [vmem:[#allocation31_spill] sm:$0xff] }
 0x59c   :  { %v9470_v3 = vpop.permute.xlu0 %2850 }
 0x59e   :  { %367 = vperm.xlu1 %7164, %v293_v58  }
 0x5a1   :  { %357 = vperm.xlu0 %7166, %v291_v33   ;;  %306 = vperm.xlu2 %7165, %v7907_v51   ;;  %v7375_v51 = vld [vmem:[%s13340_s1 + $0x38] sm:$0xff]  ;;  %v13540_v33 = vld [vmem:[#allocation36_spill] sm:$0xff] }
 0x5a2   :  { %v298_v25 = vsub.f32 %v7375_v51, %v8230_v21  ;;  %v7378_v21 = vld [vmem:[%s13340_s1 + $0x78] sm:$0xff] }
 0x5a3   :  { %v731_v62 = vsub.f32 %v7378_v21, %v8242_v17 }
 0x5a4   :  { %v9483_v17 = vpop.permute.xlu0 %2856 }
 0x5a5   :  { %v9485_v41 = vpop.permute.xlu1 %2854 }
 0x5a6   :  { %377 = vperm.xlu1 %7164, %v295_v32   ;;  %v7390_v32 = vld [vmem:[%s13340_s1 + $0x130] sm:$0xff] }
 0x5a9   :  { %382 = vperm.xlu0 %7166, %v296_v42   ;;  %316 = vperm.xlu2 %7165, %v7957_v14   ;;  %v7377_v14 = vld [vmem:[%s13340_s1 + $0x40] sm:$0xff]  ;;  %v2020_v42 = vsub.f32 %v7390_v32, %v13541_v8  ;;  %v13549_v32 = vld [vmem:[#allocation73_spill] sm:$0xff] }
 0x5aa   :  { %v724_v2 = vsub.f32 %v7377_v14, %v8222_v28  ;;  %v7380_v28 = vld [vmem:[%s13340_s1 + $0x88] sm:$0xff]  ;;  %v13543_v14 = vld [vmem:[#allocation38_spill] sm:$0xff]  ;;  %v2874_v8 = vsub.f32 %v13549_v32, %v9470_v3 }
 0x5ab   :  { %v1155_v40 = vsub.f32 %v7380_v28, %v8457_v38  ;;  %v7382_v38 = vld [vmem:[%s13340_s1 + $0xb0] sm:$0xff] }
 0x5ac   :  { %v1160_v15 = vsub.f32 %v7382_v38, %v8467_v22 }
 0x5ad   :  { %v9502_v50 = vpop.permute.xlu1 %2862  ;;  %v9504_v22 = vpop.permute.xlu0 %2860 }
 0x5ae   :  { %392 = vperm.xlu1 %7164, %v298_v25   ;;  %v2879_v3 = vsub.f32 %v9317_v1, %v9504_v22 }
 0x5b1   :  { %800 = vperm.xlu0 %7166, %v726_v10   ;;  %331 = vperm.xlu2 %7165, %v8006_v43   ;;  %v7379_v43 = vld [vmem:[%s13340_s1 + $0x58] sm:$0xff] }
 0x5b2   :  { %v727_v53 = vsub.f32 %v7379_v43, %v8228_v30  ;;  %v7391_v10 = vld [vmem:[%s13340_s1 + $0xd8] sm:$0xff]  ;;  %v2445_v43 = vsub.f32 %v8983_v57, %v9150_v59  ;;  %v13545_v57 = vld [vmem:[#allocation41_spill] sm:$0xff] }
 0x5b6   :  { %790 = vperm.xlu1 %7164, %v724_v2   ;;  %v1587_v2 = vsub.f32 %v7391_v10, %v13543_v14  ;;  %v13551_v10 = vld [vmem:[#allocation54_spill] sm:$0xff] }
 0x5b9   :  { %825 = vperm.xlu0 %7166, %v731_v62   ;;  %739 = vperm.xlu2 %7165, %v8113_v34   ;;  %v7381_v34 = vld [vmem:[%s13340_s1 + $0x68] sm:$0xff] }
 0x5ba   :  { %v729_v30 = vsub.f32 %v7381_v34, %v8240_v37  ;;  %v7383_v37 = vld [vmem:[%s13340_s1 + $0x80] sm:$0xff] }
 0x5bb   :  { %v1154_v12 = vsub.f32 %v7383_v37, %v8459_v44  ;;  %v7392_v37 = vld [vmem:[%s13340_s1 + $0xf0] sm:$0xff] }
 0x5bc   :  { %v1590_v59 = vsub.f32 %v7392_v37, %v13545_v57 }
 0x5be   :  { %805 = vperm.xlu1 %7164, %v727_v53  }
 0x5c1   :  { %1225 = vperm.xlu0 %7166, %v1155_v40   ;;  %754 = vperm.xlu2 %7165, %v8132_v49   ;;  %v9492_v49 = vpop.permute.xlu2 %2858 }
 0x5c6   :  { %815 = vperm.xlu1 %7164, %v729_v30   ;;  %v13544_v30 = vld [vmem:[#allocation30_spill] sm:$0xff] }
 0x5c9   :  { %1250 = vperm.xlu0 %7166, %v1160_v15   ;;  %764 = vperm.xlu2 %7165, %v8109_v27   ;;  %v7385_v27 = vld [vmem:[%s13340_s1 + $0x98] sm:$0xff]  ;;  %v9511_v36 = vpop.permute.xlu2 %2864 }
 0x5ca   :  { %v1157_v44 = vsub.f32 %v7385_v27, %v8463_v47 }
 0x5ce   :  { %1220 = vperm.xlu1 %7164, %v1154_v12  }
 0x5d1   :  { %1650 = vperm.xlu0 %7166, %v1584_v26   ;;  %1174 = vperm.xlu2 %7165, %v8302_v9   ;;  %v7387_v9 = vld [vmem:[%s13340_s1 + $0xa8] sm:$0xff]  ;;  %v13546_v26 = vld [vmem:[#allocation63_spill] sm:$0xff] }
 0x5d2   :  { %v1159_v47 = vsub.f32 %v7387_v9, %v8461_v45  ;;  %v2450_v27 = vsub.f32 %v13546_v26, %v9162_v55  ;;  %v7393_v55 = vld [vmem:[%s13340_s1 + $0x100] sm:$0xff]  ;;  %v13552_v26 = vld [vmem:[#allocation46_spill] sm:$0xff] }
 0x5d6   :  { %1235 = vperm.xlu1 %7164, %v1157_v44  }
 0x5d8   :  { %v9517_v61 = vpop.xlane.xlu1 %3053  ;;  %v9519_v52 = vpop.xlane.xlu0 %3049 }
 0x5d9   :  { %1675 = vperm.xlu0 %7166, %v1589_v35   ;;  %1184 = vperm.xlu2 %7165, %v8365_v29   ;;  %v7389_v29 = vld [vmem:[%s13340_s1 + $0xc8] sm:$0xff] }
 0x5da   :  { %v1585_v45 = vsub.f32 %v7389_v29, %v13540_v33 }
 0x5dc   :  { %v3058_v11 = vpop.xlane.xlu2 %3057 }
 0x5dd   :  { %v9561_v38 = vmul.f32 0.0051020407, %v3058_v11 }
 0x5de   :  { %1245 = vperm.xlu1 %7164, %v1159_v47  }
 0x5df   :  { %v3145_v44 = vmul.f32 %v9561_v38, %v9561_v38 }
 0x5e0   :  { %v9530_v24 = vpop.xlane.xlu1 %3065  ;;  %v3062_v58 = vpop.xlane.xlu0 %3061 }
 0x5e1   :  { %2085 = vperm.xlu0 %7166, %v2015_v6   ;;  %1199 = vperm.xlu2 %7165, %v13539_v0   ;;  %v9563_v15 = vmul.f32 0.0051020407, %v3062_v58  ;;  %v13548_v0 = vld [vmem:[#allocation52_spill] sm:$0xff] }
 0x5e2   :  { %v2014_v29 = vsub.f32 %v7393_v55, %v13548_v0 }
 0x5e3   :  { %v3146_v54 = vmul.f32 %v9563_v15, %v9563_v15 }
 0x5e4   :  { %v3074_v13 = vpop.xlane.xlu2 %3073 }
 0x5e5   :  { %v9550_v62 = vmul.f32 0.0051020407, %v3074_v13 }
 0x5e6   :  { %1655 = vperm.xlu1 %7164, %v1585_v45  }
 0x5e7   :  { %v3149_v40 = vmul.f32 %v9550_v62, %v9550_v62 }
 0x5e8   :  { %v3122_v51 = vpop.xlane.xlu1 %3121  ;;  %v9541_v25 = vpop.xlane.xlu0 %3077 }
 0x5e9   :  { %2110 = vperm.xlu0 %7166, %v2020_v42   ;;  %1604 = vperm.xlu2 %7165, %v13542_v7   ;;  %v3141_v34 = vmul.f32 0.0051020407, %v3122_v51  ;;  %v13550_v42 = vld [vmem:[#allocation44_spill] sm:$0xff]  ;;  %v7394_v7 = vld [vmem:[%s13340_s1 + $0x118] sm:$0xff] }
 0x5ea   :  { %v2017_v14 = vsub.f32 %v7394_v7, %v13551_v10  ;;  %v7396_v7 = vld [vmem:[%s13340_s1 + $0x140] sm:$0xff] }
 0x5eb   :  { %v3157_v60 = vsub.f32 %v3141_v34, %v3149_v40 }
 0x5ec   :  { %v9548_v21 = vpop.xlane.xlu2 %3125 }
 0x5ed   :  { %v9577_v5 = vadd.f32 1e-05, %v3157_v60 }
 0x5ee   :  { %1665 = vperm.xlu1 %7164, %v1587_v2  }
 0x5ef   :  { %7307 = vrsqrt.f32 %v9577_v5  ;;  %vm3233_vm11 = vweird.f32 %v9577_v5 }
 0x5f0   :  { %v9554_v53 = vpop.xlane.xlu1 %3113  ;;  %v9556_v28 = vpop.xlane.xlu0 %3069 }
 0x5f1   :  { %2515 = vperm.xlu0 %7166, %v2445_v43   ;;  %1614 = vperm.xlu2 %7165, %v13544_v30  }
 0x5f4   :  { %v9569_v12 = vpop.xlane.xlu2 %3117 }
 0x5f5   :  { %v9588_v51 = vpop.eup %7307 }
 0x5f6   :  { %1680 = vperm.xlu1 %7164, %v1590_v59   ;;  %v3228_v57 = vmul.f32 %v9588_v51, %v9577_v5  ;;  %vm3234_vm10 = vweird.f32 %v9588_v51 }
 0x5f7   :  { %vm9664_vm12 = vmor %vm3233_vm11, %vm3234_vm10 }
 0x5f8   :  { %v3110_v35 = vpop.xlane.xlu1 %3109  ;;  %v3106_v9 = vpop.xlane.xlu0 %3105  ;;  %v3229_v1 = vmul.f32 %v9588_v51, %v3228_v57  ;;  %v9637_v57 = vmul.f32 0.0051020407, %v9517_v61 }
 0x5f9   :  { %v3138_v47 = vmul.f32 0.0051020407, %v3110_v35  ;;  %v3137_v11 = vmul.f32 0.0051020407, %v3106_v9  ;;  %2540 = vperm.xlu0 %7166, %v2450_v27   ;;  %1629 = vperm.xlu2 %7165, %v13547_v19   ;;  %v13553_v35 = vld [vmem:[#allocation55_spill] sm:$0xff] }
 0x5fa   :  { %v3230_v0 = vmul.f32 0.5, %v3229_v1  ;;  %v3144_v61 = vmul.f32 %v9637_v57, %v9637_v57 }
 0x5fb   :  { %v3154_v6 = vsub.f32 %v3138_v47, %v3146_v54  ;;  %v3153_v58 = vsub.f32 %v3137_v11, %v3145_v44  ;;  %v7395_v54 = vld [vmem:[%s13340_s1 + $0x128] sm:$0xff] }
 0x5fc   :  { %v3098_v13 = vpop.xlane.xlu2 %3097  ;;  %v2019_v9 = vsub.f32 %v7395_v54, %v13553_v35  ;;  %v9656_v54 = vmul.f32 0.0051020407, %v9556_v28 }
 0x5fd   :  { %v3162_v33 = vadd.f32 1e-05, %v3154_v6  ;;  %v3161_v45 = vadd.f32 1e-05, %v3153_v58  ;;  %v6387_v6 = vld [vmem:[%s13340_s1 + $0x1d0] sm:$0xff] }
 0x5fe   :  { %2080 = vperm.xlu1 %7164, %v2014_v29   ;;  %v9612_v58 = vmul.f32 0.0051020407, %v9519_v52  ;;  %v13558_v52 = vld [vmem:[#allocation67_spill] sm:$0xff] }
 0x5ff   :  { %7309 = vrsqrt.f32 %v3162_v33  ;;  %vm3193_vm5 = vweird.f32 %v3161_v45  ;;  %vm3203_vm8 = vweird.f32 %v3162_v33  ;;  %v2444_v10 = vsub.f32 %v7396_v7, %v13558_v52 }
 0x600   :  { %7311 = vrsqrt.f32 %v3161_v45  ;;  %v3102_v44 = vpop.xlane.xlu0 %3101 }
 0x601   :  { %2940 = vperm.xlu0 %7166, %v2874_v8   ;;  %2034 = vperm.xlu2 %7165, %v13550_v42   ;;  %v13555_v8 = vld [vmem:[#allocation49_spill] sm:$0xff] }
 0x604   :  { %v9594_v43 = vpop.permute.xlu2 %306 }
 0x605   :  { %v7310_v2 = vpop.eup %7309 }
 0x606   :  { %v7312_v40 = vpop.eup %7311  ;;  %v3198_v34 = vmul.f32 %v7310_v2, %v3162_v33  ;;  %2095 = vperm.xlu1 %7164, %v2017_v14   ;;  %vm3204_vm7 = vweird.f32 %v7310_v2  ;;  %v3143_v14 = vmul.f32 %v9612_v58, %v9612_v58 }
 0x607   :  { %v3188_v30 = vmul.f32 %v7312_v40, %v3161_v45  ;;  %vm3194_vm4 = vweird.f32 %v7312_v40  ;;  %vm3205_vm9 = vmor %vm3203_vm8, %vm3204_vm7 }
 0x608   :  { %v3199_v37 = vmul.f32 %v7310_v2, %v3198_v34  ;;  %vm3195_vm6 = vmor %vm3193_vm5, %vm3194_vm4  ;;  %v3135_v34 = vmul.f32 0.0051020407, %v3098_v13  ;;  %v3136_v13 = vmul.f32 0.0051020407, %v3102_v44  ;;  %v3139_v44 = vmul.f32 0.0051020407, %v9554_v53 }
 0x609   :  { %v3189_v59 = vmul.f32 %v7312_v40, %v3188_v30  ;;  %2965 = vperm.xlu0 %7166, %v2879_v3   ;;  %2044 = vperm.xlu2 %7165, %v13552_v26   ;;  %v3231_v3 = vsub.f32 1.5, %v3230_v0  ;;  %v9682_v0 = vld [vmem:[%s13340_s1 + $0x1f0] sm:$0xff] }
 0x60a   :  { %v3200_v60 = vmul.f32 0.5, %v3199_v37  ;;  %v9634_v37 = vld [vmem:[%s13340_s1 + $0x1d8] sm:$0xff]  ;;  %v3152_v5 = vsub.f32 %v3136_v13, %v3144_v61 }
 0x60b   :  { %v3190_v27 = vmul.f32 0.5, %v3189_v59  ;;  %v3151_v59 = vsub.f32 %v3135_v34, %v3143_v14  ;;  %v3232_v26 = vmul.f32 %v9588_v51, %v3231_v3  ;;  %v3142_v14 = vmul.f32 0.0051020407, %v9548_v21  ;;  %v13569_v3 = vld [vmem:[#allocation71_spill] sm:$0xff] }
 0x60c   :  { %v3201_v22 = vsub.f32 1.5, %v3200_v60  ;;  %v9606_v11 = vpop.permute.xlu2 %316 }
 0x60d   :  { %v3191_v47 = vsub.f32 1.5, %v3190_v27  ;;  %v13560_v27 = vld [vmem:[#allocation60_spill] sm:$0xff] }
 0x60e   :  { %2105 = vperm.xlu1 %7164, %v2019_v9   ;;  %v3202_v29 = vmul.f32 %v7310_v2, %v3201_v22  ;;  %v13562_v9 = vld [vmem:[#allocation70_spill] sm:$0xff] }
 0x60f   :  { %v3192_v19 = vmul.f32 %v7312_v40, %v3191_v47  ;;  %v9668_v47 = vadd.f32 1e-05, %v3151_v59 }
 0x610   :  { %v9614_v55 = vpop.permute.xlu1 %367  ;;  %v3206_v33 = vsel %vm3205_vm9, %v7310_v2, %v3202_v29  ;;  %v9646_v2 = vmul.f32 0.0051020407, %v9530_v24  ;;  %v7397_v24 = vld [vmem:[%s13340_s1 + $0x158] sm:$0xff]  ;;  %v9686_v29 = vmul.f32 0.0051020407, %v9541_v25 }
 0x611   :  { %13554 = vst [vmem:[#allocation50_spill] sm:$0xff] %v9614_v55  ;;  %v3196_v32 = vsel %vm3195_vm6, %v7312_v40, %v3192_v19  ;;  %2059 = vperm.xlu2 %7165, %v13555_v8   ;;  %v2447_v1 = vsub.f32 %v7397_v24, %v13562_v9  ;;  %v3140_v8 = vmul.f32 0.0051020407, %v9569_v12  ;;  %7313 = vrsqrt.f32 %v9668_v47  ;;  %v7398_v12 = vld [vmem:[%s13340_s1 + $0x168] sm:$0xff] }
 0x612   :  { %v9617_v42 = vmul.f32 %v6387_v6, %v3196_v32  ;;  %v3147_v28 = vmul.f32 %v9646_v2, %v9646_v2  ;;  %v3236_v6 = vsel %vm9664_vm12, %v9588_v51, %v3232_v26  ;;  %v3148_v32 = vmul.f32 %v9656_v54, %v9656_v54 }
 0x613   :  { %v9619_v45 = vpop.permute.xlu0 %357  ;;  %v9692_v51 = vadd.f32 1e-05, %v3152_v5  ;;  %v9697_v52 = vmul.f32 %v9682_v0, %v3236_v6  ;;  %v3150_v25 = vmul.f32 %v9686_v29, %v9686_v29  ;;  %v2875_v5 = vsub.f32 %v9257_v46, %v9476_v18 }
 0x614   :  { %13556 = vst [vmem:[#allocation24_spill] sm:$0xff] %v9617_v42  ;;  %v3266_v40 = vmul.f32 %v9617_v42, %v9561_v38  ;;  %v9629_v30 = vpop.permute.xlu2 %331  ;;  %v9643_v38 = vmul.f32 %v9634_v37, %v3206_v33  ;;  %v2449_v33 = vsub.f32 %v7398_v12, %v13569_v3  ;;  %v3156_v59 = vsub.f32 %v3140_v8, %v3148_v32 }
 0x615   :  { %13557 = vst [vmem:[#allocation36_spill] sm:$0xff] %v9619_v45  ;;  %7315 = vrsqrt.f32 %v9692_v51  ;;  %v3270_v13 = vmul.f32 %v9697_v52, %v9550_v62  ;;  %v3158_v21 = vsub.f32 %v3142_v14, %v3150_v25  ;;  %v2877_v14 = vsub.f32 %v9267_v31, %v9483_v17 }
 0x616   :  { %3284 = vrot.lane.b32.xlu0 %v3266_v40, %s7618_s26  ;;  %2510 = vperm.xlu1 %7164, %v2444_v10   ;;  %v3267_v53 = vmul.f32 %v9643_v38, %v9563_v15  ;;  %v3155_v15 = vsub.f32 %v3139_v44, %v3147_v28  ;;  %13566 = vst [vmem:[#allocation30_spill] sm:$0xff] %v9697_v52  ;;  %v13567_v10 = vld [vmem:[#allocation61_spill] sm:$0xff]  ;;  %vm3173_vm13 = vweird.f32 %v9668_v47  ;;  %vm3183_vm2 = vweird.f32 %v9692_v51 }
 0x617   :  { %v7314_v61 = vpop.eup %7313  ;;  %v9726_v62 = vadd.f32 1e-05, %v3158_v21  ;;  %v3951_v45 = vmul.f32 %v9903_v20, %v9903_v20 }
 0x618   :  { %v9640_v60 = vpop.permute.xlu1 %377  ;;  %v9703_v34 = vadd.f32 1e-05, %v3155_v15  ;;  %v3168_v24 = vmul.f32 %v7314_v61, %v9668_v47  ;;  %vm3174_vm14 = vweird.f32 %v7314_v61  ;;  %v2880_v47 = vsub.f32 %v9311_v63, %v9502_v50 }
 0x619   :  { %13559 = vst [vmem:[#allocation57_spill] sm:$0xff] %v9640_v60  ;;  %2464 = vperm.xlu2 %7165, %v13560_v27   ;;  %v9718_v27 = vadd.f32 1e-05, %v3156_v59  ;;  %vm9765_vm15 = vmor %vm3173_vm13, %vm3174_vm14  ;;  %vm3243_vm10 = vweird.f32 %v9726_v62  ;;  %vm437_vm13 = vcmask 1043456   ;;  %vm438_vm14 = vcmask 556036  }
 0x61a   :  { %7317 = vrsqrt.f32 %v9703_v34  ;;  %v3169_v28 = vmul.f32 %v7314_v61, %v3168_v24  ;;  %vm3213_vm5 = vweird.f32 %v9703_v34 }
 0x61b   :  { %v9658_v35 = vpop.permute.xlu0 %382  ;;  %v9723_v9 = vpop.eup %7315  ;;  %7319 = vrsqrt.f32 %v9718_v27  ;;  %vm3223_vm6 = vweird.f32 %v9718_v27 }
 0x61c   :  { %13561 = vst [vmem:[#allocation33_spill] sm:$0xff] %v9658_v35  ;;  %v9674_v19 = vpop.permute.xlu2 %739  ;;  %v3178_v6 = vmul.f32 %v9723_v9, %v9692_v51  ;;  %7321 = vrsqrt.f32 %v9726_v62  ;;  %vm3184_vm1 = vweird.f32 %v9723_v9 }
 0x61d   :  { %vm3185_vm4 = vmor %vm3183_vm2, %vm3184_vm1 }
 0x61e   :  { %3286 = vrot.lane.b32.xlu0 %v3267_v53, %s7618_s26  ;;  %2525 = vperm.xlu1 %7164, %v2447_v1   ;;  %v13571_v1 = vld [vmem:[#allocation65_spill] sm:$0xff]  ;;  %v3179_v46 = vmul.f32 %v9723_v9, %v3178_v6 }
 0x620   :  { %v9694_v7 = vpop.permute.xlu1 %392  ;;  %v9733_v53 = vpop.eup %7317 }
 0x621   :  { %13565 = vst [vmem:[#allocation38_spill] sm:$0xff] %v9694_v7  ;;  %2474 = vperm.xlu2 %7165, %v13567_v10   ;;  %v3208_v32 = vmul.f32 %v9733_v53, %v9703_v34  ;;  %v3170_v10 = vmul.f32 0.5, %v3169_v28  ;;  %v9745_v18 = vpop.eup %7319  ;;  %vm3214_vm3 = vweird.f32 %v9733_v53  ;;  %v6389_v34 = vld [vmem:[%s13340_s1 + $0x1e0] sm:$0xff] }
 0x622   :  { %v9753_v3 = vpop.eup %7321  ;;  %vm3224_vm7 = vweird.f32 %v9745_v18  ;;  %vm3215_vm8 = vmor %vm3213_vm5, %vm3214_vm3 }
 0x623   :  { %v9705_v40 = vpop.permute.xlu0 %800  ;;  %v3209_v12 = vmul.f32 %v9733_v53, %v3208_v32  ;;  %v3171_v59 = vsub.f32 1.5, %v3170_v10  ;;  %vm3225_vm9 = vmor %vm3223_vm6, %vm3224_vm7  ;;  %vm3244_vm11 = vweird.f32 %v9753_v3 }
 0x624   :  { %13568 = vst [vmem:[#allocation41_spill] sm:$0xff] %v9705_v40  ;;  %v9714_v26 = vpop.permute.xlu2 %754  ;;  %vm3245_vm12 = vmor %vm3243_vm10, %vm3244_vm11  ;;  %v10138_v40 = vld [vmem:[%s13339_s0 + $0x528] sm:$0xff] }
 0x625   :  { %v3210_v24 = vmul.f32 0.5, %v3209_v12 }
 0x626   :  { %3292 = vrot.lane.b32.xlu0 %v3270_v13, %s7618_s26  ;;  %2535 = vperm.xlu1 %7164, %v2449_v33   ;;  %v3218_v33 = vmul.f32 %v9745_v18, %v9718_v27  ;;  %v3180_v13 = vmul.f32 0.5, %v3179_v46 }
 0x627   :  { %v3211_v10 = vsub.f32 1.5, %v3210_v24 }
 0x628   :  { %v9720_v44 = vpop.permute.xlu1 %790  ;;  %v3219_v17 = vmul.f32 %v9745_v18, %v3218_v33 }
 0x629   :  { %13570 = vst [vmem:[#allocation63_spill] sm:$0xff] %v9720_v44  ;;  %2489 = vperm.xlu2 %7165, %v13571_v1   ;;  %v3172_v1 = vmul.f32 %v7314_v61, %v3171_v59 }
 0x62a   :  { %v3220_v46 = vmul.f32 0.5, %v3219_v17 }
 0x62b   :  { %v9728_v22 = vpop.permute.xlu0 %825  ;;  %v3176_v33 = vsel %vm9765_vm15, %v7314_v61, %v3172_v1  ;;  %v9793_v61 = vld [vmem:[%s13340_s1 + $0x1c8] sm:$0xff]  ;;  %vm10284_vm15 = vmor %vm438_vm14, %vm437_vm13 }
 0x62c   :  { %13572 = vst [vmem:[#allocation31_spill] sm:$0xff] %v9728_v22  ;;  %v9737_v15 = vpop.permute.xlu2 %764 }
 0x62e   :  { %2945 = vperm.xlu1 %7164, %v2875_v5   ;;  %v3181_v5 = vsub.f32 1.5, %v3180_v13  ;;  %v3212_v13 = vmul.f32 %v9733_v53, %v3211_v10  ;;  %v9826_v10 = vld [vmem:[%s13340_s1 + $0x1e8] sm:$0xff] }
 0x630   :  { %v9742_v8 = vpop.permute.xlu1 %805 }
 0x631   :  { %13573 = vst [vmem:[#allocation52_spill] sm:$0xff] %v9742_v8  ;;  %2894 = vperm.xlu2 %7165, %v9287_v23   ;;  %v3238_v23 = vmul.f32 %v9753_v3, %v9726_v62  ;;  %v9953_v8 = vld [vmem:[%s13339_s0 + $0x4b8] sm:$0xff] }
 0x633   :  { %v9748_v25 = vpop.permute.xlu0 %1225  ;;  %v3239_v32 = vmul.f32 %v9753_v3, %v3238_v23  ;;  %v3221_v23 = vsub.f32 1.5, %v3220_v46 }
 0x634   :  { %13574 = vst [vmem:[#allocation73_spill] sm:$0xff] %v9748_v25  ;;  %v9757_v21 = vpop.permute.xlu2 %1174 }
 0x635   :  { %v3240_v59 = vmul.f32 0.5, %v3239_v32 }
 0x636   :  { %2955 = vperm.xlu1 %7164, %v2877_v14   ;;  %v3182_v14 = vmul.f32 %v9723_v9, %v3181_v5  ;;  %v3222_v5 = vmul.f32 %v9745_v18, %v3221_v23 }
 0x637   :  { %v3241_v1 = vsub.f32 1.5, %v3240_v59 }
 0x638   :  { %v9762_v31 = vpop.permute.xlu1 %815  ;;  %v3186_v24 = vsel %vm3185_vm4, %v9723_v9, %v3182_v14  ;;  %v3226_v32 = vsel %vm3225_vm9, %v9745_v18, %v3222_v5  ;;  %v9840_v18 = vld [vmem:[%s13340_s1 + $0x1f8] sm:$0xff] }
 0x639   :  { %13575 = vst [vmem:[#allocation44_spill] sm:$0xff] %v9762_v31  ;;  %2904 = vperm.xlu2 %7165, %v9306_v48   ;;  %v6385_v48 = vld [vmem:[%s13340_s1 + $0x1c0] sm:$0xff]  ;;  %v9803_v9 = vmul.f32 %v9793_v61, %v3186_v24 }
 0x63a   :  { %v3256_v50 = vmul.f32 %v6385_v48, %v3176_v33 }
 0x63b   :  { %v9770_v6 = vpop.permute.xlu0 %1250  ;;  %13581 = vst [vmem:[#allocation49_spill] sm:$0xff] %v9803_v9  ;;  %v3265_v27 = vmul.f32 %v9803_v9, %v9637_v57  ;;  %v3261_v57 = vmul.f32 %v9826_v10, %v3226_v32 }
 0x63c   :  { %13578 = vst [vmem:[#allocation54_spill] sm:$0xff] %v9770_v6  ;;  %v9777_v12 = vpop.permute.xlu2 %1184  ;;  %v3264_v17 = vmul.f32 %v3256_v50, %v9612_v58 }
 0x63d   :  { %v3269_v59 = vmul.f32 %v3261_v57, %v9656_v54 }
 0x63e   :  { %2970 = vperm.xlu1 %7164, %v2880_v47  }
 0x640   :  { %v9786_v63 = vpop.permute.xlu1 %1220 }
 0x641   :  { %13579 = vst [vmem:[#allocation46_spill] sm:$0xff] %v9786_v63  ;;  %2919 = vperm.xlu2 %7165, %v9338_v39   ;;  %v3216_v39 = vsel %vm3215_vm8, %v9733_v53, %v3212_v13  ;;  %v3242_v53 = vmul.f32 %v9753_v3, %v3241_v1  ;;  %v9937_v63 = vld [vmem:[%s13339_s0 + $0x4c0] sm:$0xff] }
 0x642   :  { %v9819_v47 = vmul.f32 %v6389_v34, %v3216_v39 }
 0x643   :  { %v9799_v51 = vpop.permute.xlu0 %1650  ;;  %v3246_v33 = vsel %vm3245_vm12, %v9753_v3, %v3242_v53 }
 0x644   :  { %13580 = vst [vmem:[#allocation55_spill] sm:$0xff] %v9799_v51  ;;  %v9806_v28 = vpop.permute.xlu2 %1199  ;;  %v3268_v46 = vmul.f32 %v9819_v47, %v9646_v2  ;;  %v9847_v13 = vmul.f32 %v9840_v18, %v3246_v33 }
 0x645   :  { %13583 = vst [vmem:[#allocation60_spill] sm:$0xff] %v9819_v47 }
 0x646   :  { %3280 = vrot.lane.b32.xlu1 %v3264_v17, %s7618_s26  ;;  %13586 = vst [vmem:[#allocation71_spill] sm:$0xff] %v9847_v13  ;;  %v3271_v3 = vmul.f32 %v9847_v13, %v9686_v29 }
 0x648   :  { %v9815_v58 = vpop.permute.xlu1 %1235 }
 0x649   :  { %13582 = vst [vmem:[#allocation67_spill] sm:$0xff] %v9815_v58  ;;  %3282 = vrot.lane.b32.xlu2 %v3265_v27, %s7618_s26 }
 0x64b   :  { %v9829_v62 = vpop.permute.xlu0 %1675 }
 0x64c   :  { %13584 = vst [vmem:[#allocation70_spill] sm:$0xff] %v9829_v62  ;;  %v9834_v14 = vpop.permute.xlu2 %1604 }
 0x64e   :  { %3288 = vrot.lane.b32.xlu1 %v3268_v46, %s7618_s26 }
 0x650   :  { %v9843_v48 = vpop.permute.xlu1 %1245 }
 0x651   :  { %13585 = vst [vmem:[#allocation61_spill] sm:$0xff] %v9843_v48  ;;  %3290 = vrot.lane.b32.xlu2 %v3269_v59, %s7618_s26 }
 0x653   :  { %v9850_v2 = vpop.permute.xlu0 %2085 }
 0x654   :  { %13587 = vst [vmem:[#allocation65_spill] sm:$0xff] %v9850_v2  ;;  %v9854_v23 = vpop.permute.xlu2 %1614  ;;  %v10044_v2 = vld [vmem:[%s13339_s0 + $0x560] sm:$0xff] }
 0x656   :  { %3294 = vrot.lane.b32.xlu1 %v3271_v3, %s7618_s26 }
 0x658   :  { %v9857_v24 = vpop.permute.xlu1 %1655 }
 0x659   :  { %13588 = vst [vmem:[#allocation79_spill] sm:$0xff] %v9857_v24  ;;  %3314 = vperm.xlu2 %7165, %v3256_v50  }
 0x65b   :  { %v9859_v17 = vpop.permute.xlu0 %2110 }
 0x65c   :  { %13589 = vst [vmem:[#allocation80_spill] sm:$0xff] %v9859_v17  ;;  %v9861_v54 = vpop.permute.xlu2 %1629 }
 0x660   :  { %v9863_v1 = vpop.permute.xlu1 %1665 }
 0x661   :  { %13590 = vst [vmem:[#allocation81_spill] sm:$0xff] %v9863_v1  ;;  %3329 = vperm.xlu2 %7165, %v9643_v38   ;;  %v9918_v1 = vld [vmem:[%s13339_s0 + $0x4f0] sm:$0xff] }
 0x662   :  { %v3953_v48 = vmul.f32 %v9918_v1, %v9918_v1 }
 0x663   :  { %v9866_v5 = vpop.permute.xlu0 %2515 }
 0x664   :  { %13591 = vst [vmem:[#allocation82_spill] sm:$0xff] %v9866_v5  ;;  %v9870_v29 = vpop.permute.xlu2 %2034  ;;  %v10010_v5 = vld [vmem:[%s13339_s0 + $0x460] sm:$0xff] }
 0x668   :  { %v9868_v39 = vpop.permute.xlu1 %1680 }
 0x669   :  { %13592 = vst [vmem:[#allocation83_spill] sm:$0xff] %v9868_v39  ;;  %3339 = vperm.xlu2 %7165, %v3261_v57  }
 0x66b   :  { %v9872_v34 = vpop.permute.xlu0 %2540 }
 0x66c   :  { %13593 = vst [vmem:[#allocation84_spill] sm:$0xff] %v9872_v34  ;;  %v9877_v50 = vpop.permute.xlu2 %2044 }
 0x670   :  { %v9874_v27 = vpop.permute.xlu1 %2080 }
 0x671   :  { %13594 = vst [vmem:[#allocation85_spill] sm:$0xff] %v9874_v27  ;;  %7167 = vset.pattern.permute.xlu2 %v13388_v56  ;;  %v9898_v56 = vld [vmem:[%s13339_s0 + $0x4e8] sm:$0xff] }
 0x672   :  { %v3952_v35 = vmul.f32 %v9898_v56, %v9898_v56 }
 0x673   :  { %v9879_v53 = vpop.permute.xlu0 %2940 }
 0x674   :  { %13595 = vst [vmem:[#allocation86_spill] sm:$0xff] %v9879_v53  ;;  %v9883_v38 = vpop.permute.xlu2 %2059 }
 0x678   :  { %v9881_v32 = vpop.permute.xlu1 %2095 }
 0x679   :  { %13596 = vst [vmem:[#allocation87_spill] sm:$0xff] %v9881_v32  ;;  %v3931_v32 = vsel %vm34_vm0, %v9898_v56, 0.0  ;;  %v10210_v56 = vld [vmem:[%s13339_s0 + $0x440] sm:$0xff] }
 0x67b   :  { %v9885_v46 = vpop.permute.xlu0 %2965 }
 0x67c   :  { %13597 = vst [vmem:[#allocation88_spill] sm:$0xff] %v9885_v46  ;;  %v9889_v59 = vpop.permute.xlu2 %2464 }
 0x680   :  { %v9887_v33 = vpop.permute.xlu1 %2105 }
 0x681   :  { %13598 = vst [vmem:[#allocation89_spill] sm:$0xff] %v9887_v33  ;;  %v9910_v33 = vld [vmem:[%s13339_s0 + $0x4f8] sm:$0xff] }
 0x682   :  { %v3954_v24 = vmul.f32 %v9910_v33, %v9910_v33 }
 0x684   :  { %v9922_v13 = vpop.permute.xlu2 %2474  ;;  %v3983_v47 = vsel %vm34_vm0, %v3954_v24, 0.0  ;;  %v3947_v24 = vmul.f32 %v9937_v63, %v9937_v63 }
 0x685   :  { %13601 = vst [vmem:[#allocation92_spill] sm:$0xff] %v9922_v13 }
 0x688   :  { %v9891_v57 = vpop.permute.xlu0 %3284  ;;  %v9893_v3 = vpop.permute.xlu1 %2510 }
 0x689   :  { %13599 = vst [vmem:[#allocation90_spill] sm:$0xff] %v9893_v3  ;;  %v3932_v3 = vadd.f32 %v9903_v20, %v3931_v32  ;;  %v9930_v32 = vld [vmem:[%s13339_s0 + $0x4c8] sm:$0xff]  ;;  %v10219_v20 = vld [vmem:[%s13339_s0 + $0x518] sm:$0xff] }
 0x68a   :  { %v3923_v6 = vsel %vm34_vm0, %v9930_v32, 0.0 }
 0x68c   :  { %v9944_v31 = vpop.permute.xlu2 %2489 }
 0x68d   :  { %13603 = vst [vmem:[#allocation94_spill] sm:$0xff] %v9944_v31  ;;  %v10056_v31 = vld [vmem:[%s13339_s0 + $0x458] sm:$0xff] }
 0x690   :  { %v3287_v27 = vpop.permute.xlu0 %3286  ;;  %v9913_v39 = vpop.permute.xlu1 %2525 }
 0x691   :  { %13600 = vst [vmem:[#allocation91_spill] sm:$0xff] %v9913_v39  ;;  %v3984_v39 = vadd.f32 %v3983_v47, %v3953_v48  ;;  %v3307_v53 = vsub.f32 %v9634_v37, %v3287_v27  ;;  %v9970_v27 = vld [vmem:[%s13339_s0 + $0x488] sm:$0xff] }
 0x692   :  { %3933 = vadd.xlane.f32.xlu2 %v3932_v3  ;;  %v3948_v3 = vmul.f32 %v9930_v32, %v9930_v32  ;;  %v10077_v32 = vld [vmem:[%s13339_s0 + $0x4d0] sm:$0xff] }
 0x694   :  { %v3971_v47 = vsel %vm34_vm0, %v3948_v3, 0.0  ;;  %v9976_v3 = vld [vmem:[%s13339_s0 + $0x480] sm:$0xff] }
 0x695   :  { %v3972_v48 = vadd.f32 %v3971_v47, %v3947_v24  ;;  %v3907_v24 = vsel %vm34_vm0, %v9970_v27, 0.0  ;;  %v9983_v47 = vld [vmem:[%s13339_s0 + $0x498] sm:$0xff] }
 0x698   :  { %v3293_v58 = vpop.permute.xlu0 %3292  ;;  %v9932_v42 = vpop.permute.xlu1 %2535 }
 0x699   :  { %13602 = vst [vmem:[#allocation93_spill] sm:$0xff] %v9932_v42  ;;  %v3310_v46 = vsub.f32 %v9682_v0, %v3293_v58  ;;  %v9958_v0 = vld [vmem:[%s13339_s0 + $0x4b0] sm:$0xff]  ;;  %v3919_v58 = vsel %vm34_vm0, %v9953_v8, 0.0 }
 0x69a   :  { %3985 = vadd.xlane.f32.xlu2 %v3984_v39  ;;  %v9962_v39 = vpop.permute.xlu2 %2894 }
 0x69b   :  { %3400 = vperm.xlu0 %7166, %v3310_v46   ;;  %13605 = vst [vmem:[#allocation96_spill] sm:$0xff] %v9962_v39  ;;  %v3920_v46 = vadd.f32 %v9958_v0, %v3919_v58 }
 0x6a0   :  { %v9947_v42 = vpop.permute.xlu1 %2945 }
 0x6a1   :  { %13604 = vst [vmem:[#allocation95_spill] sm:$0xff] %v9947_v42  ;;  %v3942_v42 = vmul.f32 %v9983_v47, %v9983_v47 }
 0x6a2   :  { %3973 = vadd.xlane.f32.xlu2 %v3972_v48  ;;  %v3908_v48 = vadd.f32 %v9976_v3, %v3907_v24  ;;  %v9986_v58 = vpop.permute.xlu2 %2904  ;;  %v10003_v24 = vld [vmem:[%s13339_s0 + $0x468] sm:$0xff] }
 0x6a3   :  { %3385 = vperm.xlu0 %7166, %v3307_v53   ;;  %v13607_v53 = vmov 0   ;;  %13608 = vst [vmem:[#allocation98_spill] sm:$0xff] %v9986_v58  ;;  %v3959_v34 = vsel %vm34_vm0, %v3942_v42, 0.0  ;;  %v3521_v42 = vmul.f32 %v10010_v5, %v10010_v5 }
 0x6a8   :  { %v9965_v37 = vpop.permute.xlu1 %2955 }
 0x6a9   :  { %13606 = vst [vmem:[#allocation97_spill] sm:$0xff] %v9965_v37  ;;  %v9993_v37 = vld [vmem:[%s13339_s0 + $0x490] sm:$0xff] }
 0x6aa   :  { %3921 = vadd.xlane.f32.xlu2 %v3920_v46  ;;  %v3941_v16 = vmul.f32 %v9993_v37, %v9993_v37  ;;  %v10014_v58 = vpop.permute.xlu2 %2919 }
 0x6ab   :  { %7168 = vset.pattern.permute.xlu0 %v13607_v53  ;;  %13611 = vst [vmem:[#allocation101_spill] sm:$0xff] %v10014_v58  ;;  %v10029_v58 = vld [vmem:[%s13339_s0 + $0x570] sm:$0xff] }
 0x6b0   :  { %v9988_v46 = vpop.permute.xlu1 %2970 }
 0x6b1   :  { %13609 = vst [vmem:[#allocation99_spill] sm:$0xff] %v9988_v46  ;;  %v3960_v46 = vadd.f32 %v3959_v34, %v3941_v16  ;;  %v10024_v34 = vld [vmem:[%s13339_s0 + $0x578] sm:$0xff] }
 0x6b2   :  { %3909 = vadd.xlane.f32.xlu2 %v3908_v48  ;;  %v3522_v48 = vmul.f32 %v10003_v24, %v10003_v24  ;;  %v3283_v60 = vpop.permute.xlu2 %3282 }
 0x6b4   :  { %v3549_v7 = vsel %vm34_vm0, %v3522_v48, 0.0  ;;  %v3935_v48 = vsel %vm34_vm0, %v9910_v33, 0.0  ;;  %v4381_v33 = vmul.f32 %v10044_v2, %v10044_v2 }
 0x6b5   :  { %v3550_v17 = vadd.f32 %v3549_v7, %v3521_v42  ;;  %v10036_v7 = vld [vmem:[%s13339_s0 + $0x568] sm:$0xff]  ;;  %v3936_v62 = vadd.f32 %v9918_v1, %v3935_v48  ;;  %v10063_v1 = vld [vmem:[%s13339_s0 + $0x4d8] sm:$0xff]  ;;  %v3924_v48 = vadd.f32 %v9937_v63, %v3923_v6 }
 0x6b6   :  { %v4382_v55 = vmul.f32 %v10036_v7, %v10036_v7 }
 0x6b8   :  { %v10005_v44 = vpop.permute.xlu1 %3280 }
 0x6b9   :  { %13610 = vst [vmem:[#allocation100_spill] sm:$0xff] %v10005_v44 }
 0x6ba   :  { %3961 = vadd.xlane.f32.xlu2 %v3960_v46  ;;  %v4365_v46 = vsel %vm34_vm0, %v10024_v34, 0.0  ;;  %v3291_v51 = vpop.permute.xlu2 %3290 }
 0x6bb   :  { %v4366_v42 = vadd.f32 %v10029_v58, %v4365_v46  ;;  %v4409_v46 = vsel %vm34_vm0, %v4382_v55, 0.0  ;;  %v10068_v55 = vld [vmem:[%s13339_s0 + $0x450] sm:$0xff] }
 0x6c0   :  { %v10019_v16 = vpop.permute.xlu1 %3288 }
 0x6c1   :  { %13612 = vst [vmem:[#allocation102_spill] sm:$0xff] %v10019_v16  ;;  %v10226_v16 = vld [vmem:[%s13339_s0 + $0x510] sm:$0xff] }
 0x6c2   :  { %3551 = vadd.xlane.f32.xlu2 %v3550_v17 }
 0x6c8   :  { %v3295_v17 = vpop.permute.xlu1 %3294 }
 0x6c9   :  { %v3311_v39 = vsub.f32 %v9840_v18, %v3295_v17  ;;  %v4410_v18 = vadd.f32 %v4409_v46, %v4381_v33  ;;  %v3519_v17 = vmul.f32 %v10068_v55, %v10068_v55  ;;  %v3305_v46 = vsub.f32 %v9793_v61, %v3283_v60  ;;  %v10108_v60 = vld [vmem:[%s13339_s0 + $0x420] sm:$0xff] }
 0x6ca   :  { %4367 = vadd.xlane.f32.xlu2 %v4366_v42  ;;  %v3950_v42 = vmul.f32 %v10063_v1, %v10063_v1 }
 0x6cb   :  { %3405 = vperm.xlu1 %7164, %v3311_v39   ;;  %v3309_v39 = vsub.f32 %v9826_v10, %v3291_v51  ;;  %v3949_v51 = vmul.f32 %v10077_v32, %v10077_v32  ;;  %v10090_v10 = vld [vmem:[%s13339_s0 + $0x4a8] sm:$0xff] }
 0x6cc   :  { %v3975_v6 = vsel %vm34_vm0, %v3950_v42, 0.0 }
 0x6cd   :  { %3937 = vadd.xlane.f32.xlu0 %v3936_v62  ;;  %v3520_v62 = vmul.f32 %v10056_v31, %v10056_v31 }
 0x6cf   :  { %v3545_v33 = vsel %vm34_vm0, %v3520_v62, 0.0  ;;  %v10101_v62 = vld [vmem:[%s13339_s0 + $0x4a0] sm:$0xff] }
 0x6d0   :  { %v3546_v63 = vadd.f32 %v3545_v33, %v3519_v17  ;;  %v3943_v42 = vmul.f32 %v10101_v62, %v10101_v62  ;;  %v10117_v17 = vld [vmem:[%s13339_s0 + $0x558] sm:$0xff] }
 0x6d2   :  { %4411 = vadd.xlane.f32.xlu2 %v4410_v18  ;;  %v3976_v18 = vadd.f32 %v3975_v6, %v3949_v51  ;;  %v10124_v6 = vld [vmem:[%s13339_s0 + $0x550] sm:$0xff] }
 0x6d3   :  { %3395 = vperm.xlu1 %7164, %v3309_v39   ;;  %v10096_v39 = vld [vmem:[%s13339_s0 + $0x428] sm:$0xff] }
 0x6d4   :  { %v3485_v61 = vsel %vm34_vm0, %v10096_v39, 0.0 }
 0x6d5   :  { %3925 = vadd.xlane.f32.xlu0 %v3924_v48  ;;  %v3944_v48 = vmul.f32 %v10090_v10, %v10090_v10  ;;  %v3486_v51 = vadd.f32 %v10108_v60, %v3485_v61 }
 0x6d7   :  { %v3963_v33 = vsel %vm34_vm0, %v3944_v48, 0.0  ;;  %v3911_v48 = vsel %vm34_vm0, %v9983_v47, 0.0  ;;  %v10155_v47 = vld [vmem:[%s13339_s0 + $0x478] sm:$0xff] }
 0x6d8   :  { %v3912_v22 = vadd.f32 %v9993_v37, %v3911_v48  ;;  %v10173_v48 = vld [vmem:[%s13339_s0 + $0x410] sm:$0xff] }
 0x6da   :  { %3547 = vadd.xlane.f32.xlu2 %v3546_v63  ;;  %v4380_v63 = vmul.f32 %v10117_v17, %v10117_v17 }
 0x6db   :  { %3375 = vperm.xlu1 %7164, %v3305_v46   ;;  %v3964_v46 = vadd.f32 %v3963_v33, %v3943_v42  ;;  %v10140_v42 = vpop.permute.xlu2 %3314  ;;  %v10145_v33 = vld [vmem:[%s13339_s0 + $0x520] sm:$0xff] }
 0x6dc   :  { %v4405_v25 = vsel %vm34_vm0, %v4380_v63, 0.0  ;;  %13613 = vst [vmem:[#allocation103_spill] sm:$0xff] %v10140_v42 }
 0x6dd   :  { %3977 = vadd.xlane.f32.xlu0 %v3976_v18  ;;  %v4379_v18 = vmul.f32 %v10124_v6, %v10124_v6 }
 0x6df   :  { %v4406_v61 = vadd.f32 %v4405_v25, %v4379_v18  ;;  %v3501_v25 = vsel %vm34_vm0, %v10003_v24, 0.0  ;;  %v3524_v24 = vmul.f32 %v10155_v47, %v10155_v47 }
 0x6e0   :  { %v3502_v63 = vadd.f32 %v10010_v5, %v3501_v25 }
 0x6e1   :  { %v3553_v25 = vsel %vm34_vm0, %v3524_v24, 0.0  ;;  %v10200_v24 = vld [vmem:[%s13339_s0 + $0x448] sm:$0xff] }
 0x6e2   :  { %3487 = vadd.xlane.f32.xlu2 %v3486_v51  ;;  %v4345_v51 = vsel %vm34_vm0, %v10138_v40, 0.0 }
 0x6e3   :  { %7169 = vset.pattern.permute.xlu1 %v13607_v53  ;;  %v4346_v37 = vadd.f32 %v10145_v33, %v4345_v51  ;;  %v3330_v18 = vpop.permute.xlu2 %3329  ;;  %v10182_v51 = vld [vmem:[%s13339_s0 + $0x408] sm:$0xff]  ;;  %v10189_v53 = vld [vmem:[%s13339_s0 + $0x400] sm:$0xff] }
 0x6e4   :  { %v3509_v52 = vmul.f32 %v10189_v53, %v10189_v53 }
 0x6e5   :  { %3965 = vadd.xlane.f32.xlu0 %v3964_v46  ;;  %v10161_v46 = vld [vmem:[%s13339_s0 + $0x418] sm:$0xff] }
 0x6e6   :  { %v3481_v5 = vsel %vm34_vm0, %v10161_v46, 0.0 }
 0x6ea   :  { %4407 = vadd.xlane.f32.xlu2 %v4406_v61 }
 0x6eb   :  { %v10205_v9 = vpop.permute.xlu2 %3339 }
 0x6ed   :  { %3913 = vadd.xlane.f32.xlu0 %v3912_v22  ;;  %v10166_v22 = vld [vmem:[%s13339_s0 + $0x470] sm:$0xff] }
 0x6ee   :  { %v3523_v61 = vmul.f32 %v10166_v22, %v10166_v22 }
 0x6f0   :  { %v3554_v42 = vadd.f32 %v3553_v25, %v3523_v61  ;;  %v3493_v61 = vsel %vm34_vm0, %v10200_v24, 0.0  ;;  %v3979_v25 = vsel %vm34_vm0, %v3952_v35, 0.0  ;;  %v4341_v35 = vsel %vm34_vm0, %v10219_v20, 0.0 }
 0x6f1   :  { %v3494_v4 = vadd.f32 %v10210_v56, %v3493_v61  ;;  %v4342_v61 = vadd.f32 %v10226_v16, %v4341_v35 }
 0x6f2   :  { %4347 = vadd.xlane.f32.xlu2 %v4346_v37  ;;  %v3482_v37 = vadd.f32 %v10173_v48, %v3481_v5 }
 0x6f5   :  { %3503 = vadd.xlane.f32.xlu0 %v3502_v63  ;;  %v3510_v63 = vmul.f32 %v10182_v51, %v10182_v51 }
 0x6f7   :  { %v3525_v5 = vsel %vm34_vm0, %v3510_v63, 0.0  ;;  %v3980_v63 = vadd.f32 %v3979_v25, %v3951_v45  ;;  %v4383_v45 = vmul.f32 %v10029_v58, %v10029_v58 }
 0x6fa   :  { %3483 = vadd.xlane.f32.xlu2 %v3482_v37  ;;  %v3526_v37 = vadd.f32 %v3525_v5, %v3509_v52 }
 0x6fd   :  { %3555 = vadd.xlane.f32.xlu0 %v3554_v42  ;;  %v4384_v42 = vmul.f32 %v10024_v34, %v10024_v34  ;;  %v3927_v34 = vsel %vm34_vm0, %v10063_v1, 0.0  ;;  %v10251_v1 = vld [vmem:[%s13339_s0 + $0x540] sm:$0xff] }
 0x6ff   :  { %v4413_v5 = vsel %vm34_vm0, %v4384_v42, 0.0  ;;  %v3915_v42 = vsel %vm34_vm0, %v10090_v10, 0.0  ;;  %v7400_v10 = vld [vmem:[%s13339_s0 + $0x3b8] sm:$0xff] }
 0x700   :  { %v4414_v25 = vadd.f32 %v4413_v5, %v4383_v45  ;;  %v3916_v45 = vadd.f32 %v10101_v62, %v3915_v42  ;;  %v3946_v5 = vmul.f32 %v9953_v8, %v9953_v8  ;;  %v3945_v8 = vmul.f32 %v9958_v0, %v9958_v0 }
 0x702   :  { %3527 = vadd.xlane.f32.xlu2 %v3526_v37  ;;  %v3928_v37 = vadd.f32 %v10077_v32, %v3927_v34  ;;  %v10264_v34 = vld [vmem:[%s13339_s0 + $0x438] sm:$0xff] }
 0x705   :  { %3495 = vadd.xlane.f32.xlu0 %v3494_v4  ;;  %3981 = vadd.xlane.f32.xlu1 %v3980_v63  ;;  %v10232_v52 = vpop.xlane.xlu2 %3933  ;;  %v10242_v4 = vld [vmem:[%s13339_s0 + $0x548] sm:$0xff] }
 0x706   :  { %v4353_v32 = vsel %vm34_vm0, %v10242_v4, 0.0 }
 0x707   :  { %v4354_v35 = vadd.f32 %v10251_v1, %v4353_v32 }
 0x70a   :  { %4343 = vadd.xlane.f32.xlu2 %v4342_v61  ;;  %v7399_v61 = vld [vmem:[%s13339_s0 + $0x3b0] sm:$0xff] }
 0x70d   :  { %4415 = vadd.xlane.f32.xlu0 %v4414_v25  ;;  %v10244_v58 = vpop.permute.xlu0 %3400  ;;  %3929 = vadd.xlane.f32.xlu1 %v3928_v37  ;;  %v10246_v63 = vpop.xlane.xlu2 %3985  ;;  %v3358_v25 = vmul.f32 %v7399_v61, %v3330_v18  ;;  %v3359_v37 = vmul.f32 %v7400_v10, %v3330_v18  ;;  %v10279_v61 = vld [vmem:[%s13339_s0 + $0x430] sm:$0xff]  ;;  %v3489_v18 = vsel %vm34_vm0, %v10264_v34, 0.0 }
 0x70e   :  { %13614 = vst [vmem:[#allocation104_spill] sm:$0xff] %v10244_v58  ;;  %v3490_v0 = vadd.f32 %v10279_v61, %v3489_v18 }
 0x715   :  { %4355 = vadd.xlane.f32.xlu0 %v4354_v35  ;;  %v3386_v62 = vpop.permute.xlu0 %3385  ;;  %3917 = vadd.xlane.f32.xlu1 %v3916_v45  ;;  %v10274_v58 = vpop.xlane.xlu2 %3973  ;;  %v3967_v35 = vsel %vm34_vm0, %v3946_v5, 0.0  ;;  %v3513_v5 = vmul.f32 %v10108_v60, %v10108_v60  ;;  %v10310_v60 = vld [vmem:[%s13339_s0 + $0x538] sm:$0xff] }
 0x716   :  { %v3414_v32 = vadd.f32 %v3386_v62, %v3358_v25  ;;  %v3415_v42 = vadd.f32 %v3386_v62, %v3359_v37  ;;  %13615 = vst [vmem:[#allocation105_spill] sm:$0xff] %v10274_v58  ;;  %v3968_v25 = vadd.f32 %v3967_v35, %v3945_v8  ;;  %v3514_v62 = vmul.f32 %v10096_v39, %v10096_v39  ;;  %v13618_v8 = vld [vmem:[#allocation13_spill] sm:$0xff] }
 0x717   :  { %v3940_v58 = vmul.f32 %v9970_v27, %v9970_v27  ;;  %v7401_v27 = vld [vmem:[%s13340_s1 + $0x8] sm:$0xff] }
 0x718   :  { %v3430_v10 = vmax.f32 %v3414_v32, 0.0  ;;  %v3431_v44 = vmax.f32 %v3415_v42, 0.0  ;;  %v3939_v32 = vmul.f32 %v9976_v3, %v9976_v3  ;;  %v292_v18 = vsub.f32 %v7401_v27, %v13618_v8 }
 0x719   :  { %v3955_v39 = vsel %vm34_vm0, %v3940_v58, 0.0  ;;  %v10317_v58 = vld [vmem:[%s13339_s0 + $0x530] sm:$0xff]  ;;  %v4373_v27 = vmul.f32 %v10145_v33, %v10145_v33  ;;  %v3511_v33 = vmul.f32 %v10173_v48, %v10173_v48 }
 0x71a   :  { %v3443_v37 = vpack.c.bf16 %v3431_v44, %v3430_v10  ;;  %v3533_v44 = vsel %vm34_vm0, %v3514_v62, 0.0  ;;  %v3956_v10 = vadd.f32 %v3955_v39, %v3939_v32  ;;  %v13620_v62 = vld [vmem:[#allocation14_spill] sm:$0xff]  ;;  %v4374_v39 = vmul.f32 %v10138_v40, %v10138_v40 }
 0x71b   :  { %v3534_v35 = vadd.f32 %v3533_v44, %v3513_v5 }
 0x71c   :  { %3453 = vst.msk [vmem:[#allocation2 + $0x1d8] sm:$0xff] %vm10284_vm15, %v3443_v37  ;;  %v7402_v37 = vld [vmem:[%s13340_s1 + $0x18] sm:$0xff]  ;;  %v4393_v8 = vsel %vm34_vm0, %v4374_v39, 0.0  ;;  %v10365_v39 = vld [vmem:[%s13339_s0 + $0x500] sm:$0xff] }
 0x71d   :  { %3491 = vadd.xlane.f32.xlu0 %v3490_v0  ;;  %3969 = vadd.xlane.f32.xlu1 %v3968_v25  ;;  %v10299_v42 = vpop.xlane.xlu2 %3921  ;;  %v4349_v0 = vsel %vm34_vm0, %v10310_v60, 0.0  ;;  %v3505_v25 = vsel %vm34_vm0, %v10155_v47, 0.0  ;;  %v294_v5 = vsub.f32 %v7402_v37, %v13620_v62  ;;  %v4394_v40 = vadd.f32 %v4393_v8, %v4373_v27 }
 0x71e   :  { %v4350_v32 = vadd.f32 %v10317_v58, %v4349_v0  ;;  %v3506_v44 = vadd.f32 %v10166_v22, %v3505_v25  ;;  %v7403_v22 = vld [vmem:[%s13340_s1 + $0x30] sm:$0xff]  ;;  %v3512_v25 = vmul.f32 %v10161_v46, %v10161_v46  ;;  %v3497_v62 = vsel %vm34_vm0, %v10056_v31, 0.0  ;;  %v7404_v46 = vld [vmem:[%s13340_s1 + $0x48] sm:$0xff] }
 0x71f   :  { %v3498_v48 = vadd.f32 %v10068_v55, %v3497_v62  ;;  %v3518_v27 = vmul.f32 %v10200_v24, %v10200_v24  ;;  %v3517_v55 = vmul.f32 %v10210_v56, %v10210_v56  ;;  %v7405_v24 = vld [vmem:[%s13340_s1 + $0x60] sm:$0xff]  ;;  %v7406_v56 = vld [vmem:[%s13339_s0 + $0x3d0] sm:$0xff] }
 0x720   :  { %v3362_v62 = vmul.f32 %v7406_v56, %v10205_v9 }
 0x722   :  { %362 = vperm.xlu2 %7167, %v292_v18   ;;  %v4361_v18 = vsel %vm34_vm0, %v10036_v7, 0.0  ;;  %v3529_v7 = vsel %vm34_vm0, %v3512_v25, 0.0 }
 0x723   :  { %v4362_v0 = vadd.f32 %v10044_v2, %v4361_v18  ;;  %v10355_v2 = vld [vmem:[%s13339_s0 + $0x508] sm:$0xff]  ;;  %v4369_v18 = vmul.f32 %v10365_v39, %v10365_v39 }
 0x724   :  { %v4370_v31 = vmul.f32 %v10355_v2, %v10355_v2 }
 0x725   :  { %3535 = vadd.xlane.f32.xlu0 %v3534_v35  ;;  %3957 = vadd.xlane.f32.xlu1 %v3956_v10  ;;  %v10312_v3 = vpop.xlane.xlu2 %3909  ;;  %v13621_v35 = vld [vmem:[#allocation15_spill] sm:$0xff] }
 0x726   :  { %13619 = vst [vmem:[#allocation13_spill] sm:$0xff] %v10312_v3  ;;  %v297_v10 = vsub.f32 %v7403_v22, %v13621_v35  ;;  %v4385_v35 = vsel %vm34_vm0, %v4370_v31, 0.0 }
 0x72a   :  { %372 = vperm.xlu2 %7167, %v294_v5   ;;  %v13622_v5 = vld [vmem:[#allocation16_spill] sm:$0xff] }
 0x72d   :  { %4351 = vadd.xlane.f32.xlu0 %v4350_v32  ;;  %3507 = vadd.xlane.f32.xlu1 %v3506_v44  ;;  %v10333_v47 = vpop.xlane.xlu2 %3961  ;;  %v725_v32 = vsub.f32 %v7404_v46, %v13622_v5  ;;  %v3530_v44 = vadd.f32 %v3529_v7, %v3511_v33  ;;  %v4386_v33 = vadd.f32 %v4385_v35, %v4369_v18  ;;  %v7407_v46 = vld [vmem:[%s13339_s0 + $0x3d8] sm:$0xff] }
 0x72e   :  { %v3363_v5 = vmul.f32 %v7407_v46, %v10205_v9  ;;  %v13627_v46 = vld [vmem:[#allocation25_spill] sm:$0xff] }
 0x732   :  { %387 = vperm.xlu2 %7167, %v297_v10   ;;  %v3541_v10 = vsel %vm34_vm0, %v3518_v27, 0.0  ;;  %v4357_v27 = vsel %vm34_vm0, %v10117_v17, 0.0  ;;  %v4377_v17 = vmul.f32 %v10251_v1, %v10251_v1  ;;  %v3515_v1 = vmul.f32 %v10279_v61, %v10279_v61 }
 0x733   :  { %v3542_v7 = vadd.f32 %v3541_v10, %v3517_v55  ;;  %v7408_v10 = vld [vmem:[%s13340_s1 + $0x70] sm:$0xff]  ;;  %v3477_v61 = vsel %vm34_vm0, %v10182_v51, 0.0  ;;  %v4375_v51 = vmul.f32 %v10317_v58, %v10317_v58  ;;  %v4337_v58 = vsel %vm34_vm0, %v10355_v2, 0.0 }
 0x734   :  { %v4371_v2 = vmul.f32 %v10226_v16, %v10226_v16 }
 0x735   :  { %4395 = vadd.xlane.f32.xlu0 %v4394_v40  ;;  %4363 = vadd.xlane.f32.xlu1 %v4362_v0  ;;  %v10347_v37 = vpop.xlane.xlu2 %3551  ;;  %v13624_v0 = vld [vmem:[#allocation18_spill] sm:$0xff] }
 0x736   :  { %v728_v25 = vsub.f32 %v7405_v24, %v13624_v0  ;;  %v13626_v24 = vld [vmem:[#allocation17_spill] sm:$0xff]  ;;  %v4358_v0 = vadd.f32 %v10124_v6, %v4357_v27 }
 0x737   :  { %v730_v9 = vsub.f32 %v7408_v10, %v13626_v24  ;;  %v7409_v6 = vld [vmem:[%s13340_s1 + $0x90] sm:$0xff]  ;;  %v13629_v24 = vld [vmem:[#allocation3_spill] sm:$0xff] }
 0x73a   :  { %795 = vperm.xlu2 %7167, %v725_v32  }
 0x73d   :  { %3531 = vadd.xlane.f32.xlu0 %v3530_v44  ;;  %v10371_v8 = vpop.permute.xlu1 %3405  ;;  %3499 = vadd.xlane.f32.xlu1 %v3498_v48  ;;  %v10377_v22 = vpop.xlane.xlu2 %4367 }
 0x73e   :  { %13623 = vst [vmem:[#allocation14_spill] sm:$0xff] %v10371_v8 }
 0x740   :  { %v10381_v40 = vpop.xlane.xlu0 %3937 }
 0x742   :  { %810 = vperm.xlu2 %7167, %v728_v25  }
 0x745   :  { %4387 = vadd.xlane.f32.xlu0 %v4386_v33  ;;  %3543 = vadd.xlane.f32.xlu1 %v3542_v7  ;;  %v3396_v32 = vpop.permute.xlu1 %3395  ;;  %v10395_v31 = vpop.xlane.xlu2 %4411  ;;  %v4378_v33 = vmul.f32 %v10242_v4, %v10242_v4  ;;  %v1156_v4 = vsub.f32 %v7409_v6, %v13627_v46  ;;  %v3478_v6 = vadd.f32 %v10189_v53, %v3477_v61  ;;  %v13638_v61 = vld [vmem:[#allocation37_spill] sm:$0xff] }
 0x746   :  { %v3418_v44 = vadd.f32 %v3396_v32, %v3362_v62  ;;  %v3419_v48 = vadd.f32 %v3396_v32, %v3363_v5  ;;  %v3516_v32 = vmul.f32 %v10264_v34, %v10264_v34  ;;  %v4376_v46 = vmul.f32 %v10310_v60, %v10310_v60 }
 0x747   :  { %v4401_v56 = vsel %vm34_vm0, %v4378_v33, 0.0  ;;  %v13631_v33 = vld [vmem:[#allocation27_spill] sm:$0xff] }
 0x748   :  { %v3434_v18 = vmax.f32 %v3418_v44, 0.0  ;;  %v3435_v55 = vmax.f32 %v3419_v48, 0.0  ;;  %v10399_v35 = vpop.xlane.xlu0 %3925  ;;  %v4402_v5 = vadd.f32 %v4401_v56, %v4377_v17  ;;  %v3537_v48 = vsel %vm34_vm0, %v3516_v32, 0.0  ;;  %v13632_v56 = vld [vmem:[#allocation5_spill] sm:$0xff] }
 0x749   :  { %13625 = vst [vmem:[#allocation15_spill] sm:$0xff] %v10399_v35  ;;  %v3538_v34 = vadd.f32 %v3537_v48, %v3515_v1  ;;  %v7412_v1 = vld [vmem:[%s13340_s1 + $0xd0] sm:$0xff]  ;;  %v13634_v48 = vld [vmem:[#allocation40_spill] sm:$0xff] }
 0x74a   :  { %v3445_v25 = vpack.c.bf16 %v3435_v55, %v3434_v18  ;;  %820 = vperm.xlu2 %7167, %v730_v9   ;;  %v7410_v18 = vld [vmem:[%s13340_s1 + $0xa0] sm:$0xff]  ;;  %v13628_v55 = vld [vmem:[#allocation26_spill] sm:$0xff]  ;;  %v1586_v53 = vsub.f32 %v7412_v1, %v13634_v48 }
 0x74b   :  { %v1158_v10 = vsub.f32 %v7410_v18, %v13628_v55  ;;  %v13635_v18 = vld [vmem:[#allocation9_spill] sm:$0xff]  ;;  %v13640_v1 = vld [vmem:[#allocation39_spill] sm:$0xff] }
 0x74c   :  { %3455 = vst.msk [vmem:[#allocation2 + $0x1e8] sm:$0xff] %vm10284_vm15, %v3445_v25  ;;  %v7411_v25 = vld [vmem:[%s13340_s1 + $0xb8] sm:$0xff] }
 0x74d   :  { %4359 = vadd.xlane.f32.xlu1 %v4358_v0  ;;  %v10412_v7 = vpop.xlane.xlu2 %3547  ;;  %v1161_v17 = vsub.f32 %v7411_v25, %v13631_v33  ;;  %v13639_v33 = vld [vmem:[#allocation12_spill] sm:$0xff] }
 0x750   :  { %v10415_v62 = vpop.xlane.xlu0 %3977 }
 0x752   :  { %1230 = vperm.xlu2 %7167, %v1156_v4  }
 0x755   :  { %4403 = vadd.xlane.f32.xlu1 %v4402_v5  ;;  %v10425_v44 = vpop.xlane.xlu2 %3487  ;;  %v4397_v5 = vsel %vm34_vm0, %v4376_v46, 0.0 }
 0x756   :  { %v4398_v60 = vadd.f32 %v4397_v5, %v4375_v51 }
 0x758   :  { %v10428_v27 = vpop.xlane.xlu0 %3965 }
 0x759   :  { %301 = vperm.xlu0 %7168, %v13629_v24  }
 0x75a   :  { %1240 = vperm.xlu2 %7167, %v1158_v10   ;;  %v10465_v10 = vpop.permute.xlu1 %3375 }
 0x75b   :  { %13637 = vst [vmem:[#allocation25_spill] sm:$0xff] %v10465_v10  ;;  %v13662_v10 = vld [vmem:[#allocation7_spill] sm:$0xff] }
 0x75d   :  { %3539 = vadd.xlane.f32.xlu1 %v3538_v34  ;;  %v10435_v9 = vpop.xlane.xlu2 %4407  ;;  %v7413_v34 = vld [vmem:[%s13340_s1 + $0xe0] sm:$0xff] }
 0x75e   :  { %13630 = vst [vmem:[#allocation16_spill] sm:$0xff] %v10435_v9  ;;  %v1588_v25 = vsub.f32 %v7413_v34, %v13638_v61  ;;  %v13642_v34 = vld [vmem:[#allocation51_spill] sm:$0xff] }
 0x75f   :  { %v13651_v9 = vld [vmem:[#allocation43_spill] sm:$0xff] }
 0x760   :  { %v10439_v0 = vpop.xlane.xlu0 %3913 }
 0x761   :  { %326 = vperm.xlu0 %7168, %v13632_v56   ;;  %v4372_v56 = vmul.f32 %v10219_v20, %v10219_v20  ;;  %v13641_v20 = vld [vmem:[#allocation20_spill] sm:$0xff] }
 0x762   :  { %1255 = vperm.xlu2 %7167, %v1161_v17   ;;  %v4338_v17 = vadd.f32 %v10365_v39, %v4337_v58  ;;  %v7414_v39 = vld [vmem:[%s13340_s1 + $0xf8] sm:$0xff]  ;;  %v7415_v58 = vld [vmem:[%s13340_s1 + $0x110] sm:$0xff] }
 0x763   :  { %v4389_v46 = vsel %vm34_vm0, %v4372_v56, 0.0  ;;  %v1591_v48 = vsub.f32 %v7414_v39, %v13640_v1  ;;  %v2016_v61 = vsub.f32 %v7415_v58, %v13642_v34  ;;  %v7417_v56 = vld [vmem:[%s13339_s0 + $0x18] sm:$0xff]  ;;  %v13644_v58 = vld [vmem:[#allocation53_spill] sm:$0xff] }
 0x765   :  { %3479 = vadd.xlane.f32.xlu1 %v3478_v6  ;;  %v10451_v4 = vpop.xlane.xlu2 %4347 }
 0x766   :  { %13633 = vst [vmem:[#allocation18_spill] sm:$0xff] %v10451_v4 }
 0x768   :  { %v10454_v32 = vpop.xlane.xlu0 %3503 }
 0x769   :  { %744 = vperm.xlu0 %7168, %v13635_v18  }
 0x76a   :  { %1660 = vperm.xlu2 %7167, %v1586_v53   ;;  %v4390_v53 = vadd.f32 %v4389_v46, %v4371_v2  ;;  %v342_v2 = vmul.f32 %v7417_v56, %v9594_v43 }
 0x76d   :  { %4399 = vadd.xlane.f32.xlu1 %v4398_v60  ;;  %v10461_v55 = vpop.xlane.xlu2 %3483 }
 0x76e   :  { %13636 = vst [vmem:[#allocation17_spill] sm:$0xff] %v10461_v55  ;;  %v7422_v55 = vld [vmem:[%s13339_s0 + $0x60] sm:$0xff] }
 0x76f   :  { %v351_v4 = vmul.f32 %v7422_v55, %v9629_v30  ;;  %v7424_v55 = vld [vmem:[%s13340_s1 + $0x150] sm:$0xff] }
 0x770   :  { %v10467_v24 = vpop.xlane.xlu0 %3555 }
 0x771   :  { %769 = vperm.xlu0 %7168, %v13639_v33   ;;  %v7416_v33 = vld [vmem:[%s13339_s0 + $0x10] sm:$0xff] }
 0x772   :  { %1670 = vperm.xlu2 %7167, %v1588_v25   ;;  %v13643_v25 = vld [vmem:[#allocation23_spill] sm:$0xff] }
 0x775   :  { %4339 = vadd.xlane.f32.xlu1 %v4338_v17  ;;  %v10479_v6 = vpop.xlane.xlu2 %3527  ;;  %v341_v17 = vmul.f32 %v7416_v33, %v9594_v43  ;;  %v13645_v33 = vld [vmem:[#allocation29_spill] sm:$0xff]  ;;  %v10520_v43 = vmul.f32 0.0051020407, %v10381_v40  ;;  %v4002_v40 = vmul.f32 0.0051020407, %v10246_v63 }
 0x778   :  { %v10482_v51 = vpop.xlane.xlu1 %3981  ;;  %v10484_v5 = vpop.xlane.xlu0 %3495 }
 0x779   :  { %1169 = vperm.xlu0 %7168, %v13641_v20  }
 0x77a   :  { %1685 = vperm.xlu2 %7167, %v1591_v48  }
 0x77d   :  { %4391 = vadd.xlane.f32.xlu1 %v4390_v53  ;;  %v10491_v16 = vpop.xlane.xlu2 %4343  ;;  %v7418_v53 = vld [vmem:[%s13340_s1 + $0x120] sm:$0xff] }
 0x77e   :  { %v2018_v34 = vsub.f32 %v7418_v53, %v13644_v58  ;;  %v4010_v58 = vmul.f32 %v10520_v43, %v10520_v43 }
 0x780   :  { %v10493_v18 = vpop.xlane.xlu1 %3929  ;;  %v10495_v60 = vpop.xlane.xlu0 %4415 }
 0x781   :  { %1194 = vperm.xlu0 %7168, %v13643_v25  }
 0x782   :  { %2090 = vperm.xlu2 %7167, %v2016_v61  }
 0x785   :  { %v363_v46 = vpop.permute.xlu2 %362 }
 0x786   :  { %v397_v39 = vadd.f32 %v363_v46, %v341_v17  ;;  %v398_v1 = vadd.f32 %v363_v46, %v342_v2  ;;  %v7419_v17 = vld [vmem:[%s13339_s0 + $0x30] sm:$0xff]  ;;  %v7420_v2 = vld [vmem:[%s13339_s0 + $0x38] sm:$0xff] }
 0x787   :  { %v345_v56 = vmul.f32 %v7419_v17, %v9606_v11  ;;  %v346_v46 = vmul.f32 %v7420_v2, %v9606_v11  ;;  %v7421_v11 = vld [vmem:[%s13340_s1 + $0x138] sm:$0xff] }
 0x788   :  { %v10510_v48 = vpop.xlane.xlu1 %3917  ;;  %v10512_v20 = vpop.xlane.xlu0 %4355  ;;  %v413_v61 = vmax.f32 %v397_v39, 0.0  ;;  %v414_v25 = vmax.f32 %v398_v1, 0.0  ;;  %v13647_v2 = vld [vmem:[#allocation34_spill] sm:$0xff] }
 0x789   :  { %1594 = vperm.xlu0 %7168, %v13645_v33  }
 0x78a   :  { %v428_v8 = vpack.c.bf16 %v414_v25, %v413_v61  ;;  %2100 = vperm.xlu2 %7167, %v2018_v34   ;;  %v10536_v34 = vmul.f32 0.0051020407, %v10439_v0  ;;  %v4018_v0 = vsub.f32 %v4002_v40, %v4010_v58 }
 0x78c   :  { %441 = vst.msk [vmem:[#allocation2 + $0x8] sm:$0xff] %vm10284_vm15, %v428_v8  ;;  %v13646_v8 = vld [vmem:[#allocation56_spill] sm:$0xff] }
 0x78d   :  { %v373_v39 = vpop.permute.xlu2 %372  ;;  %v2021_v33 = vsub.f32 %v7421_v11, %v13646_v8  ;;  %v10561_v8 = vadd.f32 1e-05, %v4018_v0 }
 0x78e   :  { %v401_v1 = vadd.f32 %v373_v39, %v345_v56  ;;  %v402_v53 = vadd.f32 %v373_v39, %v346_v46  ;;  %v3996_v46 = vmul.f32 0.0051020407, %v10333_v47  ;;  %v4004_v39 = vmul.f32 %v10536_v34, %v10536_v34  ;;  %v13648_v47 = vld [vmem:[#allocation4_spill] sm:$0xff] }
 0x78f   :  { %7323 = vrsqrt.f32 %v10561_v8  ;;  %vm4103_vm1 = vweird.f32 %v10561_v8 }
 0x790   :  { %v10538_v61 = vpop.xlane.xlu1 %3969  ;;  %v10540_v25 = vpop.xlane.xlu0 %3491  ;;  %v417_v17 = vmax.f32 %v401_v1, 0.0  ;;  %v418_v56 = vmax.f32 %v402_v53, 0.0  ;;  %v7423_v1 = vld [vmem:[%s13339_s0 + $0x68] sm:$0xff] }
 0x791   :  { %1619 = vperm.xlu0 %7168, %v13647_v2   ;;  %v352_v53 = vmul.f32 %v7423_v1, %v9629_v30 }
 0x792   :  { %v430_v63 = vpack.c.bf16 %v418_v56, %v417_v17  ;;  %2115 = vperm.xlu2 %7167, %v2021_v33   ;;  %v4012_v33 = vsub.f32 %v3996_v46, %v4004_v39  ;;  %v13650_v56 = vld [vmem:[#allocation68_spill] sm:$0xff]  ;;  %v7425_v39 = vld [vmem:[%s13339_s0 + $0x90] sm:$0xff] }
 0x793   :  { %v2446_v2 = vsub.f32 %v7424_v55, %v13650_v56 }
 0x794   :  { %443 = vst.msk [vmem:[#allocation2 + $0x18] sm:$0xff] %vm10284_vm15, %v430_v63  ;;  %v10576_v46 = vadd.f32 1e-05, %v4012_v33 }
 0x795   :  { %v388_v40 = vpop.permute.xlu2 %387 }
 0x796   :  { %311 = vperm.xlu1 %7169, %v13648_v47   ;;  %v407_v58 = vadd.f32 %v388_v40, %v351_v4  ;;  %v408_v11 = vadd.f32 %v388_v40, %v352_v53  ;;  %v10573_v4 = vmul.f32 0.0051020407, %v10454_v32  ;;  %v774_v53 = vmul.f32 %v7425_v39, %v9674_v19  ;;  %v13654_v40 = vld [vmem:[#allocation6_spill] sm:$0xff]  ;;  %v13657_v39 = vld [vmem:[#allocation48_spill] sm:$0xff] }
 0x797   :  { %v10589_v32 = vmul.f32 0.0051020407, %v10232_v52  ;;  %7325 = vrsqrt.f32 %v10576_v46  ;;  %v13656_v52 = vld [vmem:[#allocation69_spill] sm:$0xff]  ;;  %vm4043_vm4 = vweird.f32 %v10576_v46 }
 0x798   :  { %v10563_v17 = vpop.xlane.xlu1 %3957  ;;  %v423_v30 = vmax.f32 %v407_v58, 0.0  ;;  %v424_v1 = vmax.f32 %v408_v11, 0.0  ;;  %v10570_v63 = vpop.xlane.xlu0 %3535  ;;  %13652 = vst [vmem:[#allocation3_spill] sm:$0xff] %v10573_v4  ;;  %v3571_v11 = vmul.f32 0.0051020407, %v10347_v37  ;;  %v3579_v33 = vmul.f32 %v10573_v4, %v10573_v4 }
 0x799   :  { %13649 = vst [vmem:[#allocation26_spill] sm:$0xff] %v10563_v17  ;;  %2029 = vperm.xlu0 %7168, %v13651_v9   ;;  %v7426_v9 = vld [vmem:[%s13339_s0 + $0x98] sm:$0xff]  ;;  %v10603_v37 = vpop.eup %7323 }
 0x79a   :  { %v433_v0 = vpack.c.bf16 %v424_v1, %v423_v30  ;;  %2520 = vperm.xlu2 %7167, %v2446_v2   ;;  %v775_v47 = vmul.f32 %v7426_v9, %v9674_v19  ;;  %13653 = vst [vmem:[#allocation27_spill] sm:$0xff] %v10589_v32  ;;  %v7427_v19 = vld [vmem:[%s13340_s1 + $0x160] sm:$0xff]  ;;  %v4001_v9 = vmul.f32 0.0051020407, %v10482_v51  ;;  %vm4104_vm2 = vweird.f32 %v10603_v37 }
 0x79b   :  { %v2448_v30 = vsub.f32 %v7427_v19, %v13656_v52  ;;  %v7428_v19 = vld [vmem:[%s13340_s1 + $0x178] sm:$0xff]  ;;  %v10615_v52 = vmul.f32 0.0051020407, %v10377_v22  ;;  %v10631_v22 = vmul.f32 0.0051020407, %v10493_v18  ;;  %vm10847_vm3 = vmor %vm4103_vm1, %vm4104_vm2 }
 0x79c   :  { %446 = vst.msk [vmem:[#allocation2 + $0x30] sm:$0xff] %vm10284_vm15, %v433_v0  ;;  %v10663_v18 = vmul.f32 0.0051020407, %v10510_v48 }
 0x79d   :  { %v796_v58 = vpop.permute.xlu2 %795  ;;  %13660 = vst [vmem:[#allocation9_spill] sm:$0xff] %v10615_v52 }
 0x79e   :  { %321 = vperm.xlu1 %7169, %v13654_v40   ;;  %v830_v55 = vadd.f32 %v796_v58, %v774_v53  ;;  %v831_v56 = vadd.f32 %v796_v58, %v775_v47  ;;  %v4009_v53 = vmul.f32 %v10589_v32, %v10589_v32  ;;  %v3587_v47 = vsub.f32 %v3571_v11, %v3579_v33  ;;  %v7430_v11 = vld [vmem:[%s13339_s0 + $0xc0] sm:$0xff] }
 0x79f   :  { %v780_v33 = vmul.f32 %v7430_v11, %v9714_v26  ;;  %13661 = vst [vmem:[#allocation37_spill] sm:$0xff] %v10631_v22 }
 0x7a0   :  { %v10596_v2 = vpop.xlane.xlu1 %3507  ;;  %v846_v1 = vmax.f32 %v830_v55, 0.0  ;;  %v847_v0 = vmax.f32 %v831_v56, 0.0  ;;  %v10608_v58 = vpop.xlane.xlu0 %4351  ;;  %v13659_v55 = vld [vmem:[#allocation72_spill] sm:$0xff]  ;;  %v4017_v51 = vsub.f32 %v4001_v9, %v4009_v53  ;;  %v10660_v35 = vadd.f32 1e-05, %v3587_v47  ;;  %13663 = vst [vmem:[#allocation12_spill] sm:$0xff] %v10663_v18 }
 0x7a1   :  { %13655 = vst [vmem:[#allocation5_spill] sm:$0xff] %v10596_v2  ;;  %2054 = vperm.xlu0 %7168, %v13657_v39   ;;  %v2451_v56 = vsub.f32 %v7428_v19, %v13659_v55  ;;  %v10620_v39 = vld [vmem:[%s13340_s1 + $0x1a0] sm:$0xff]  ;;  %v10647_v55 = vld [vmem:[%s13340_s1 + $0x190] sm:$0xff]  ;;  %v10677_v47 = vmul.f32 %v10615_v52, %v10615_v52  ;;  %v4432_v52 = vmul.f32 0.0051020407, %v10495_v60 }
 0x7a2   :  { %v861_v40 = vpack.c.bf16 %v847_v0, %v846_v1  ;;  %2530 = vperm.xlu2 %7167, %v2448_v30   ;;  %13658 = vst [vmem:[#allocation40_spill] sm:$0xff] %v10608_v58  ;;  %v4098_v30 = vmul.f32 %v10603_v37, %v10561_v8  ;;  %v10635_v1 = vpop.eup %7325  ;;  %v10640_v0 = vld [vmem:[%s13340_s1 + $0x1b8] sm:$0xff]  ;;  %v7434_v19 = vld [vmem:[%s13339_s0 + $0xe0] sm:$0xff]  ;;  %7327 = vrsqrt.f32 %v10660_v35  ;;  %vm3663_vm7 = vweird.f32 %v10660_v35 }
 0x7a3   :  { %v784_v3 = vmul.f32 %v7434_v19, %v9737_v15  ;;  %v13664_v58 = vld [vmem:[#allocation58_spill] sm:$0xff]  ;;  %v7438_v60 = vld [vmem:[%s13339_s0 + $0x140] sm:$0xff]  ;;  %vm4044_vm5 = vweird.f32 %v10635_v1 }
 0x7a4   :  { %871 = vst.msk [vmem:[#allocation2 + $0x48] sm:$0xff] %vm10284_vm15, %v861_v40  ;;  %v7433_v40 = vld [vmem:[%s13339_s0 + $0xc8] sm:$0xff]  ;;  %vm10916_vm6 = vmor %vm4043_vm4, %vm4044_vm5 }
 0x7a5   :  { %v781_v11 = vmul.f32 %v7433_v40, %v9714_v26  ;;  %v811_v17 = vpop.permute.xlu2 %810  ;;  %v7435_v26 = vld [vmem:[%s13339_s0 + $0xe8] sm:$0xff]  ;;  %v4000_v40 = vmul.f32 0.0051020407, %v10415_v62 }
 0x7a6   :  { %336 = vperm.xlu1 %7169, %v13662_v10   ;;  %v836_v4 = vadd.f32 %v811_v17, %v780_v33  ;;  %v785_v53 = vmul.f32 %v7435_v26, %v9737_v15  ;;  %v7436_v10 = vld [vmem:[%s13339_s0 + $0x120] sm:$0xff]  ;;  %v4099_v33 = vmul.f32 %v10603_v37, %v4098_v30  ;;  %v4038_v15 = vmul.f32 %v10635_v1, %v10576_v46  ;;  %v7437_v30 = vld [vmem:[%s13339_s0 + $0x128] sm:$0xff] }
 0x7a7   :  { %v10673_v9 = vmul.f32 %v7436_v10, %v9757_v21  ;;  %v837_v48 = vadd.f32 %v811_v17, %v781_v11  ;;  %v4008_v26 = vmul.f32 %v10631_v22, %v10631_v22  ;;  %v10688_v10 = vadd.f32 1e-05, %v4017_v51 }
 0x7a8   :  { %v10679_v19 = vpop.xlane.xlu1 %4363  ;;  %v852_v32 = vmax.f32 %v836_v4, 0.0  ;;  %v10695_v62 = vmul.f32 %v7437_v30, %v9757_v21  ;;  %v3997_v11 = vmul.f32 0.0051020407, %v10428_v27  ;;  %v10705_v4 = vmul.f32 %v7438_v60, %v9777_v12  ;;  %v7439_v21 = vld [vmem:[%s13339_s0 + $0x148] sm:$0xff]  ;;  %v7440_v27 = vld [vmem:[%s13339_s0 + $0x170] sm:$0xff]  ;;  %v7441_v30 = vld [vmem:[%s13339_s0 + $0x178] sm:$0xff] }
 0x7a9   :  { %2459 = vperm.xlu0 %7168, %v13664_v58   ;;  %v853_v17 = vmax.f32 %v837_v48, 0.0  ;;  %v4005_v58 = vmul.f32 %v10663_v18, %v10663_v18  ;;  %v10711_v51 = vmul.f32 %v7439_v21, %v9777_v12  ;;  %v10723_v60 = vmul.f32 %v7441_v30, %v9806_v28  ;;  %v7442_v12 = vld [vmem:[%s13339_s0 + $0x1a0] sm:$0xff]  ;;  %v10737_v18 = vpop.xlane.xlu0 %4395 }
 0x7aa   :  { %2545 = vperm.xlu2 %7167, %v2451_v56   ;;  %v10717_v56 = vmul.f32 %v7440_v27, %v9806_v28  ;;  %v10729_v21 = vmul.f32 %v7442_v12, %v9834_v14  ;;  %v7443_v27 = vld [vmem:[%s13339_s0 + $0x1a8] sm:$0xff]  ;;  %13665 = vst [vmem:[#allocation39_spill] sm:$0xff] %v10737_v18  ;;  %v4100_v22 = vmul.f32 0.5, %v4099_v33  ;;  %v4039_v28 = vmul.f32 %v10635_v1, %v4038_v15 }
 0x7ab   :  { %v864_v48 = vpack.c.bf16 %v853_v17, %v852_v32  ;;  %v10735_v32 = vmul.f32 %v7443_v27, %v9834_v14  ;;  %v4016_v17 = vsub.f32 %v4000_v40, %v4008_v26  ;;  %7329 = vrsqrt.f32 %v10688_v10  ;;  %v13666_v12 = vld [vmem:[#allocation8_spill] sm:$0xff]  ;;  %v7444_v14 = vld [vmem:[%s13339_s0 + $0x1c0] sm:$0xff] }
 0x7ac   :  { %v4448_v30 = vsub.f32 %v4432_v52, %v10677_v47  ;;  %v10749_v40 = vmul.f32 %v7444_v14, %v9854_v23  ;;  %v4013_v33 = vsub.f32 %v3997_v11, %v4005_v58  ;;  %v7445_v52 = vld [vmem:[%s13339_s0 + $0x1c8] sm:$0xff]  ;;  %v7447_v11 = vld [vmem:[%s13339_s0 + $0x1f8] sm:$0xff]  ;;  %v10777_v58 = vpop.eup %7327  ;;  %v4101_v18 = vsub.f32 1.5, %v4100_v22 }
 0x7ad   :  { %874 = vst.msk [vmem:[#allocation2 + $0x60] sm:$0xff] %vm10284_vm15, %v864_v48  ;;  %v821_v2 = vpop.permute.xlu2 %820  ;;  %v10755_v47 = vmul.f32 %v7445_v52, %v9854_v23  ;;  %v7446_v48 = vld [vmem:[%s13339_s0 + $0x1f0] sm:$0xff]  ;;  %v10782_v14 = vadd.f32 1e-05, %v4016_v17  ;;  %vm3664_vm8 = vweird.f32 %v10777_v58  ;;  %vm4093_vm10 = vweird.f32 %v10688_v10 }
 0x7ae   :  { %734 = vperm.xlu1 %7169, %v13666_v12   ;;  %v840_v26 = vadd.f32 %v821_v2, %v784_v3  ;;  %v841_v15 = vadd.f32 %v821_v2, %v785_v53  ;;  %v10761_v27 = vmul.f32 %v7446_v48, %v9861_v54  ;;  %v10767_v3 = vmul.f32 %v7447_v11, %v9861_v54  ;;  %v7448_v2 = vld [vmem:[%s13339_s0 + $0x220] sm:$0xff]  ;;  %v13669_v54 = vld [vmem:[#allocation66_spill] sm:$0xff]  ;;  %v7449_v11 = vld [vmem:[%s13339_s0 + $0x228] sm:$0xff] }
 0x7af   :  { %v10773_v23 = vmul.f32 %v7448_v2, %v9870_v29  ;;  %v10780_v12 = vmul.f32 0.0051020407, %v10299_v42  ;;  %v10789_v2 = vmul.f32 %v7449_v11, %v9870_v29  ;;  %v7450_v42 = vld [vmem:[%s13339_s0 + $0x240] sm:$0xff]  ;;  %v10805_v29 = vadd.f32 1e-05, %v4013_v33  ;;  %vm11006_vm9 = vmor %vm3663_vm7, %vm3664_vm8 }
 0x7b0   :  { %13667 = vst [vmem:[#allocation20_spill] sm:$0xff] %v10767_v3  ;;  %v10775_v53 = vpop.xlane.xlu1 %3499  ;;  %v856_v52 = vmax.f32 %v840_v26, 0.0  ;;  %v857_v48 = vmax.f32 %v841_v15, 0.0  ;;  %v10791_v3 = vadd.f32 1e-05, %v4448_v30  ;;  %v10797_v17 = vmul.f32 %v7450_v42, %v9877_v50  ;;  %v7451_v26 = vld [vmem:[%s13339_s0 + $0x248] sm:$0xff] }
 0x7b1   :  { %13668 = vst [vmem:[#allocation51_spill] sm:$0xff] %v10773_v23  ;;  %2484 = vperm.xlu0 %7168, %v13669_v54   ;;  %v4040_v23 = vmul.f32 0.5, %v4039_v28  ;;  %v10803_v15 = vmul.f32 %v7451_v26, %v9877_v50  ;;  %v13672_v28 = vsub.f32 %v10647_v55, %v9485_v41  ;;  %v10810_v30 = vpop.eup %7329  ;;  %v7452_v54 = vld [vmem:[%s13339_s0 + $0x270] sm:$0xff]  ;;  %v3658_v50 = vmul.f32 %v10777_v58, %v10660_v35  ;;  %v7453_v41 = vld [vmem:[%s13339_s0 + $0x278] sm:$0xff]  ;;  %v7454_v33 = vld [vmem:[%s13339_s0 + $0x2a0] sm:$0xff] }
 0x7b2   :  { %13670 = vst [vmem:[#allocation23_spill] sm:$0xff] %v10797_v17  ;;  %v866_v22 = vpack.c.bf16 %v857_v48, %v856_v52  ;;  %v10816_v11 = vmul.f32 %v7452_v54, %v9883_v38  ;;  %v10826_v55 = vmul.f32 %v7453_v41, %v9883_v38  ;;  %v10832_v52 = vmul.f32 %v7454_v33, %v9889_v59 }
 0x7b3   :  { %13671 = vst [vmem:[#allocation53_spill] sm:$0xff] %v10803_v15  ;;  %2950 = vperm.xlu2 %7167, %v13672_v28   ;;  %v4006_v48 = vmul.f32 %v10780_v12, %v10780_v12  ;;  %7331 = vrsqrt.f32 %v10782_v14  ;;  %v4102_v42 = vmul.f32 %v10603_v37, %v4101_v18  ;;  %v4041_v26 = vsub.f32 1.5, %v4040_v23  ;;  %v13676_v28 = vld [vmem:[#allocation10_spill] sm:$0xff]  ;;  %v10856_v23 = vpop.xlane.xlu0 %3531 }
 0x7b4   :  { %13673 = vst [vmem:[#allocation29_spill] sm:$0xff] %v10816_v11  ;;  %7333 = vrsqrt.f32 %v10791_v3  ;;  %v3998_v38 = vmul.f32 0.0051020407, %v10538_v61  ;;  %v10859_v33 = vmul.f32 0.0051020407, %v10425_v44  ;;  %v3659_v8 = vmul.f32 %v10777_v58, %v3658_v50  ;;  %v7456_v44 = vld [vmem:[%s13339_s0 + $0x2c0] sm:$0xff] }
 0x7b5   :  { %13674 = vst [vmem:[#allocation56_spill] sm:$0xff] %v10826_v55  ;;  %v1231_v54 = vpop.permute.xlu2 %1230  ;;  %7335 = vrsqrt.f32 %v10805_v29  ;;  %v10881_v50 = vld [vmem:[%s13340_s1 + $0x1d0] sm:$0xff]  ;;  %v13689_v41 = vsub.f32 %v10620_v39, %v9492_v49  ;;  %vm4094_vm11 = vweird.f32 %v10810_v30  ;;  %v11021_v35 = vmul.f32 0.0051020407, %v10512_v20 }
 0x7b6   :  { %13675 = vst [vmem:[#allocation34_spill] sm:$0xff] %v10832_v52  ;;  %749 = vperm.xlu1 %7169, %v13676_v28   ;;  %v1262_v18 = vadd.f32 %v1231_v54, %v10673_v9  ;;  %v1263_v61 = vadd.f32 %v1231_v54, %v10695_v62  ;;  %v7455_v52 = vld [vmem:[%s13339_s0 + $0x2a8] sm:$0xff]  ;;  %v10876_v62 = vmul.f32 %v7456_v44, %v9922_v13  ;;  %v10908_v13 = vld [vmem:[%s13340_s1 + $0x1e0] sm:$0xff]  ;;  %v4431_v54 = vmul.f32 0.0051020407, %v10395_v31  ;;  %vm11047_vm12 = vmor %vm4093_vm10, %vm4094_vm11 }
 0x7b7   :  { %876 = vst.msk [vmem:[#allocation2 + $0x70] sm:$0xff] %vm10284_vm15, %v866_v22  ;;  %v4088_v22 = vmul.f32 %v10810_v30, %v10688_v10  ;;  %v10870_v9 = vmul.f32 %v7455_v52, %v9889_v59  ;;  %v13684_v59 = vld [vmem:[#allocation74_spill] sm:$0xff]  ;;  %v4106_v44 = vsel %vm10847_vm3, %v10603_v37, %v4102_v42  ;;  %v10928_v42 = vmul.f32 0.0051020407, %v10412_v7  ;;  %v6434_v31 = vld [vmem:[%s13340_s1 + $0x248] sm:$0xff] }
 0x7b8   :  { %13679 = vst [vmem:[#allocation4_spill] sm:$0xff] %v10856_v23  ;;  %v10864_v28 = vpop.xlane.xlu1 %3543  ;;  %v10886_v23 = vmul.f32 0.0051020407, %v10679_v19  ;;  %v6440_v52 = vld [vmem:[%s13340_s1 + $0x278] sm:$0xff]  ;;  %v1278_v55 = vmax.f32 %v1262_v18, 0.0  ;;  %v10901_v19 = vld [vmem:[%s13340_s1 + $0x1c0] sm:$0xff]  ;;  %v10932_v46 = vmul.f32 %v10859_v33, %v10859_v33  ;;  %vm4083_vm13 = vweird.f32 %v10782_v14 }
 0x7b9   :  { %13680 = vst [vmem:[#allocation68_spill] sm:$0xff] %v10859_v33  ;;  %2884 = vperm.xlu0 %7168, %v13684_v59   ;;  %v10896_v11 = vpop.eup %7331  ;;  %v13685_v59 = vld [vmem:[#allocation100_spill] sm:$0xff]  ;;  %v13686_v37 = vld [vmem:[#allocation102_spill] sm:$0xff]  ;;  %vm4533_vm14 = vweird.f32 %v10791_v3 }
 0x7ba   :  { %13681 = vst [vmem:[#allocation43_spill] sm:$0xff] %v10864_v28  ;;  %v10924_v18 = vpop.eup %7333  ;;  %v3660_v28 = vmul.f32 0.5, %v3659_v8  ;;  %v4439_v49 = vmul.f32 %v10886_v23, %v10886_v23  ;;  %v4078_v8 = vmul.f32 %v10896_v11, %v10782_v14  ;;  %v13691_v33 = vld [vmem:[#allocation78_spill] sm:$0xff]  ;;  %vm4084_vm2 = vweird.f32 %v10896_v11 }
 0x7bb   :  { %13682 = vst [vmem:[#allocation6_spill] sm:$0xff] %v10870_v9  ;;  %v4014_v9 = vsub.f32 %v3998_v38, %v4006_v48  ;;  %v1279_v38 = vmax.f32 %v1263_v61, 0.0  ;;  %2960 = vperm.xlu2 %7167, %v13689_v41   ;;  %v10934_v15 = vpop.eup %7335  ;;  %v10948_v61 = vmul.f32 0.0051020407, %v10467_v24  ;;  %v4528_v48 = vmul.f32 %v10924_v18, %v10791_v3  ;;  %vm11128_vm5 = vmor %vm4083_vm13, %vm4084_vm2 }
 0x7bc   :  { %13683 = vst [vmem:[#allocation69_spill] sm:$0xff] %v10876_v62  ;;  %v4042_v62 = vmul.f32 %v10635_v1, %v4041_v26  ;;  %v4089_v26 = vmul.f32 %v10810_v30, %v4088_v22  ;;  %v10936_v22 = vmul.f32 %v6440_v52, %v4106_v44  ;;  %v13690_v44 = vld [vmem:[#allocation11_spill] sm:$0xff]  ;;  %vm4534_vm1 = vweird.f32 %v10924_v18 }
 0x7bd   :  { %v1292_v39 = vpack.c.bf16 %v1279_v38, %v1278_v55  ;;  %v10952_v52 = vadd.f32 1e-05, %v4014_v9  ;;  %v1241_v41 = vpop.permute.xlu2 %1240  ;;  %v10956_v55 = vmul.f32 0.0051020407, %v10479_v6  ;;  %v4048_v9 = vmul.f32 %v10934_v15, %v10805_v29  ;;  %vm11116_vm4 = vmor %vm4533_vm14, %vm4534_vm1 }
 0x7be   :  { %v4046_v7 = vsel %vm10916_vm6, %v10635_v1, %v4042_v62  ;;  %759 = vperm.xlu1 %7169, %v13690_v44   ;;  %v4090_v38 = vmul.f32 0.5, %v4089_v26  ;;  %v1266_v1 = vadd.f32 %v1241_v41, %v10705_v4  ;;  %v1267_v24 = vadd.f32 %v1241_v41, %v10711_v51  ;;  %v10975_v51 = vpop.xlane.xlu0 %4387 }
 0x7bf   :  { %1302 = vst.msk [vmem:[#allocation2 + $0x90] sm:$0xff] %vm10284_vm15, %v1292_v39  ;;  %v3661_v62 = vsub.f32 1.5, %v3660_v28  ;;  %v10969_v6 = vmul.f32 %v6434_v31, %v4046_v7  ;;  %v4447_v26 = vsub.f32 %v4431_v54, %v4439_v49  ;;  %v10972_v39 = vmul.f32 0.0051020407, %v10775_v53 }
 0x7c0   :  { %v10967_v44 = vpop.xlane.xlu1 %4359  ;;  %v1282_v4 = vmax.f32 %v1266_v1, 0.0  ;;  %v4079_v28 = vmul.f32 %v10896_v11, %v4078_v8  ;;  %v10979_v41 = vmul.f32 0.0051020407, %v10484_v5  ;;  %7337 = vrsqrt.f32 %v10952_v52 }
 0x7c1   :  { %2909 = vperm.xlu0 %7168, %v13691_v33   ;;  %v1283_v17 = vmax.f32 %v1267_v24, 0.0  ;;  %v10984_v31 = vmul.f32 %v10936_v22, %v10520_v43  ;;  %v4091_v54 = vsub.f32 1.5, %v4090_v38  ;;  %v10987_v53 = vmul.f32 0.0051020407, %v10491_v16 }
 0x7c2   :  { %v3567_v33 = vmul.f32 0.0051020407, %v10570_v63  ;;  %v13692_v49 = vsub.f32 %v10640_v0, %v9511_v36  ;;  %v10994_v5 = vmul.f32 %v10777_v58, %v3661_v62  ;;  %v4049_v7 = vmul.f32 %v10934_v15, %v4048_v9 }
 0x7c3   :  { %v4529_v8 = vmul.f32 %v10924_v18, %v4528_v48  ;;  %v1294_v1 = vpack.c.bf16 %v1283_v17, %v1282_v4  ;;  %v11000_v43 = vmul.f32 %v10969_v6, %v10536_v34  ;;  %v11011_v36 = vadd.f32 1e-05, %v4447_v26  ;;  %v13695_v17 = vld [vmem:[#allocation21_spill] sm:$0xff] }
 0x7c4   :  { %2975 = vperm.xlu2 %7167, %v13692_v49   ;;  %v3578_v63 = vmul.f32 %v10972_v39, %v10972_v39  ;;  %v4080_v0 = vmul.f32 0.5, %v4079_v28  ;;  %v11018_v34 = vmul.f32 %v10979_v41, %v10979_v41  ;;  %v4092_v24 = vmul.f32 %v10810_v30, %v4091_v54 }
 0x7c5   :  { %1304 = vst.msk [vmem:[#allocation2 + $0xa0] sm:$0xff] %vm10284_vm15, %v1294_v1  ;;  %v1256_v38 = vpop.permute.xlu2 %1255  ;;  %v3583_v62 = vsub.f32 %v3567_v33, %v10932_v46  ;;  %v3666_v20 = vsel %vm11006_vm9, %v10777_v58, %v10994_v5  ;;  %v11038_v4 = vmul.f32 %v10987_v53, %v10987_v53  ;;  %v4050_v28 = vmul.f32 0.5, %v4049_v7  ;;  %v13696_v33 = vld [vmem:[#allocation49_spill] sm:$0xff] }
 0x7c6   :  { %1164 = vperm.xlu1 %7169, %v13695_v17   ;;  %v1272_v9 = vadd.f32 %v1256_v38, %v10717_v56  ;;  %v1273_v48 = vadd.f32 %v1256_v38, %v10723_v60  ;;  %v11030_v26 = vpop.eup %7337  ;;  %v4530_v49 = vmul.f32 0.5, %v4529_v8  ;;  %7339 = vrsqrt.f32 %v11011_v36  ;;  %v7460_v38 = vld [vmem:[%s13339_s0] sm:$0xff] }
 0x7c7   :  { %v3586_v56 = vsub.f32 %v10928_v42, %v3578_v63  ;;  %v4081_v5 = vsub.f32 1.5, %v4080_v0  ;;  %v11055_v42 = vmul.f32 %v11021_v35, %v11021_v35  ;;  %v4058_v7 = vmul.f32 %v11030_v26, %v10952_v52  ;;  %v6439_v0 = vld [vmem:[%s13340_s1 + $0x270] sm:$0xff] }
 0x7c8   :  { %v4404_v54 = vpop.xlane.xlu1 %4403  ;;  %v1288_v46 = vmax.f32 %v1272_v9, 0.0  ;;  %v1289_v60 = vmax.f32 %v1273_v48, 0.0  ;;  %v11059_v8 = vadd.f32 1e-05, %v3583_v62  ;;  %v13699_v16 = vsub.f32 %v10901_v19, %v13685_v59  ;;  %v7461_v19 = vld [vmem:[%s13339_s0 + $0x8] sm:$0xff] }
 0x7c9   :  { %3319 = vperm.xlu0 %7168, %v13696_v33   ;;  %v4096_v63 = vsel %vm11047_vm12, %v10810_v30, %v4092_v24  ;;  %v4051_v17 = vsub.f32 1.5, %v4050_v28  ;;  %v4531_v30 = vsub.f32 1.5, %v4530_v49  ;;  %v11079_v24 = vmul.f32 0.0051020407, %v10540_v25  ;;  %v13700_v28 = vld [vmem:[#allocation36_spill] sm:$0xff]  ;;  %v13701_v33 = vld [vmem:[#allocation22_spill] sm:$0xff] }
 0x7ca   :  { %v1297_v1 = vpack.c.bf16 %v1289_v60, %v1288_v46  ;;  %v11081_v9 = vadd.f32 1e-05, %v3586_v56  ;;  %v4082_v48 = vmul.f32 %v10896_v11, %v4081_v5  ;;  %v4059_v25 = vmul.f32 %v11030_v26, %v4058_v7  ;;  %v6415_v5 = vld [vmem:[%s13340_s1 + $0x230] sm:$0xff] }
 0x7cb   :  { %v302_v10 = vpop.permute.xlu0 %301  ;;  %7341 = vrsqrt.f32 %v11059_v8  ;;  %vm4054_vm3 = vweird.f32 %v10934_v15  ;;  %vm4053_vm6 = vweird.f32 %v10805_v29  ;;  %v11144_v14 = vmul.f32 %v11079_v24, %v11079_v24  ;;  %v7462_v29 = vld [vmem:[%s13339_s0 + $0x50] sm:$0xff] }
 0x7cc   :  { %3370 = vperm.xlu2 %7167, %v13699_v16   ;;  %v339_v62 = vmul.f32 %v7460_v38, %v302_v10  ;;  %v340_v59 = vmul.f32 %v7461_v19, %v302_v10  ;;  %1307 = vst.msk [vmem:[#allocation2 + $0xb8] sm:$0xff] %vm10284_vm15, %v1297_v1  ;;  %v11089_v10 = vmul.f32 %v6439_v0, %v4096_v63  ;;  %v11091_v49 = vpop.eup %7339  ;;  %7343 = vrsqrt.f32 %v11081_v9  ;;  %vm11138_vm7 = vmor %vm4053_vm6, %vm4054_vm3 }
 0x7cd   :  { %v1661_v58 = vpop.permute.xlu2 %1660  ;;  %v4052_v16 = vmul.f32 %v10934_v15, %v4051_v17  ;;  %v4060_v3 = vmul.f32 0.5, %v4059_v25  ;;  %v13711_v25 = vld [vmem:[#allocation27_spill] sm:$0xff]  ;;  %vm4063_vm8 = vweird.f32 %v10952_v52  ;;  %vm4064_vm9 = vweird.f32 %v11030_v26 }
 0x7ce   :  { %v395_v46 = vadd.f32 %v13700_v28, %v339_v62  ;;  %v396_v60 = vadd.f32 %v13700_v28, %v340_v59  ;;  %1179 = vperm.xlu1 %7169, %v13701_v33   ;;  %v1692_v56 = vadd.f32 %v1661_v58, %v10729_v21  ;;  %v1693_v1 = vadd.f32 %v1661_v58, %v10735_v32  ;;  %v13702_v62 = vld [vmem:[#allocation5_spill] sm:$0xff]  ;;  %v13703_v32 = vld [vmem:[#allocation30_spill] sm:$0xff]  ;;  %vm11240_vm10 = vmor %vm4063_vm8, %vm4064_vm9 }
 0x7cf   :  { %v11105_v7 = vmul.f32 0.0051020407, %v13702_v62  ;;  %v11110_v59 = vmul.f32 %v10924_v18, %v4531_v30  ;;  %v4518_v28 = vmul.f32 %v11091_v49, %v11011_v36  ;;  %v11122_v33 = vmul.f32 %v6415_v5, %v3666_v20 }
 0x7d0   :  { %v411_v63 = vmax.f32 %v395_v46, 0.0  ;;  %v412_v0 = vmax.f32 %v396_v60, 0.0  ;;  %v11102_v38 = vpop.xlane.xlu1 %3539  ;;  %v1708_v21 = vmax.f32 %v1692_v56, 0.0  ;;  %v1709_v19 = vmax.f32 %v1693_v1, 0.0 }
 0x7d1   :  { %3344 = vperm.xlu0 %7168, %v13703_v32   ;;  %v4429_v46 = vmul.f32 0.0051020407, %v4404_v54  ;;  %v13708_v1 = vsub.f32 %v10908_v13, %v13686_v37  ;;  %v7463_v13 = vld [vmem:[%s13339_s0 + $0x58] sm:$0xff]  ;;  %v11156_v5 = vmul.f32 %v11089_v10, %v13711_v25  ;;  %v4086_v62 = vsel %vm11128_vm5, %v10896_v11, %v4082_v48  ;;  %v13712_v48 = vld [vmem:[#allocation33_spill] sm:$0xff] }
 0x7d2   :  { %v427_v60 = vpack.c.bf16 %v412_v0, %v411_v63  ;;  %v1722_v58 = vpack.c.bf16 %v1709_v19, %v1708_v21  ;;  %v11158_v63 = vpop.eup %7341  ;;  %v6438_v0 = vld [vmem:[%s13340_s1 + $0x268] sm:$0xff]  ;;  %v6435_v21 = vld [vmem:[%s13340_s1 + $0x250] sm:$0xff]  ;;  %v4056_v19 = vsel %vm11138_vm7, %v10934_v15, %v4052_v16  ;;  %v3580_v32 = vmul.f32 %v11105_v7, %v11105_v7 }
 0x7d3   :  { %v327_v56 = vpop.permute.xlu0 %326  ;;  %v4445_v11 = vsub.f32 %v4429_v46, %v11055_v42  ;;  %v4536_v15 = vsel %vm11116_vm4, %v10924_v18, %v11110_v59  ;;  %v11185_v16 = vpop.eup %7343  ;;  %v4061_v20 = vsub.f32 1.5, %v4060_v3  ;;  %v11190_v42 = vmul.f32 %v6438_v0, %v4086_v62  ;;  %v13714_v62 = vld [vmem:[#allocation40_spill] sm:$0xff] }
 0x7d4   :  { %3390 = vperm.xlu2 %7167, %v13708_v1   ;;  %440 = vst.msk [vmem:[#allocation2] sm:$0xff] %vm10284_vm15, %v427_v60  ;;  %v349_v54 = vmul.f32 %v7462_v29, %v327_v56  ;;  %v350_v37 = vmul.f32 %v7463_v13, %v327_v56  ;;  %v4519_v60 = vmul.f32 %v11091_v49, %v4518_v28  ;;  %v13713_v56 = vld [vmem:[#allocation19_spill] sm:$0xff]  ;;  %vm4524_vm11 = vweird.f32 %v11091_v49 }
 0x7d5   :  { %1732 = vst.msk [vmem:[#allocation2 + $0xd0] sm:$0xff] %vm10284_vm15, %v1722_v58  ;;  %v1671_v1 = vpop.permute.xlu2 %1670  ;;  %v11192_v46 = vmul.f32 %v6435_v21, %v4056_v19  ;;  %v3588_v18 = vsub.f32 %v10948_v61, %v3580_v32  ;;  %v11205_v0 = vadd.f32 1e-05, %v4445_v11  ;;  %v11208_v61 = vmul.f32 %v11030_v26, %v4061_v20 }
 0x7d6   :  { %v405_v30 = vadd.f32 %v13712_v48, %v349_v54  ;;  %1189 = vperm.xlu1 %7169, %v13713_v56   ;;  %v406_v29 = vadd.f32 %v13712_v48, %v350_v37  ;;  %v1696_v58 = vadd.f32 %v1671_v1, %v10749_v40  ;;  %v1697_v28 = vadd.f32 %v1671_v1, %v10755_v47  ;;  %v6464_v40 = vld [vmem:[%s13340_s1 + $0x2b8] sm:$0xff]  ;;  %v7464_v56 = vld [vmem:[%s13339_s0 + $0xa0] sm:$0xff] }
 0x7d7   :  { %v3618_v54 = vmul.f32 %v11158_v63, %v11059_v8  ;;  %v4520_v47 = vmul.f32 0.5, %v4519_v60  ;;  %v3648_v37 = vmul.f32 %v11185_v16, %v11081_v9  ;;  %v11211_v21 = vmul.f32 0.0051020407, %v13714_v62 }
 0x7d8   :  { %v421_v13 = vmax.f32 %v405_v30, 0.0  ;;  %v3480_v25 = vpop.xlane.xlu1 %3479  ;;  %v422_v59 = vmax.f32 %v406_v29, 0.0  ;;  %v1712_v17 = vmax.f32 %v1696_v58, 0.0  ;;  %v1713_v3 = vmax.f32 %v1697_v28, 0.0  ;;  %v13716_v30 = vld [vmem:[#allocation37_spill] sm:$0xff]  ;;  %v13717_v29 = vld [vmem:[#allocation12_spill] sm:$0xff] }
 0x7d9   :  { %4154 = vrot.lane.b32.xlu0 %v10984_v31, %s7618_s26  ;;  %v13715_v48 = vsub.f32 %v10881_v50, %v9891_v57  ;;  %v11218_v60 = vmul.f32 %v11190_v42, %v13716_v30  ;;  %v3619_v11 = vmul.f32 %v11158_v63, %v3618_v54  ;;  %v11224_v20 = vmul.f32 %v6464_v40, %v4536_v15  ;;  %v7465_v50 = vld [vmem:[%s13339_s0 + $0xa8] sm:$0xff] }
 0x7da   :  { %v432_v19 = vpack.c.bf16 %v422_v59, %v421_v13  ;;  %v1724_v31 = vpack.c.bf16 %v1713_v3, %v1712_v17  ;;  %v4126_v58 = vmul.f32 %v11192_v46, %v13717_v29  ;;  %v11228_v28 = vadd.f32 1e-05, %v3588_v18  ;;  %v13721_v40 = vld [vmem:[#allocation28_spill] sm:$0xff] }
 0x7db   :  { %v745_v32 = vpop.permute.xlu0 %744  ;;  %v3568_v57 = vmul.f32 0.0051020407, %v11102_v38  ;;  %v4521_v13 = vsub.f32 1.5, %v4520_v47  ;;  %v3649_v18 = vmul.f32 %v11185_v16, %v3648_v37  ;;  %7345 = vrsqrt.f32 %v11205_v0  ;;  %v13720_v38 = vld [vmem:[#allocation41_spill] sm:$0xff] }
 0x7dc   :  { %3380 = vperm.xlu2 %7167, %v13715_v48   ;;  %v776_v1 = vmul.f32 %v7464_v56, %v745_v32  ;;  %445 = vst.msk [vmem:[#allocation2 + $0x28] sm:$0xff] %vm10284_vm15, %v432_v19  ;;  %v777_v54 = vmul.f32 %v7465_v50, %v745_v32  ;;  %v4436_v3 = vmul.f32 %v11211_v21, %v11211_v21  ;;  %v11258_v37 = vmul.f32 0.5, %v3619_v11  ;;  %v13722_v32 = vld [vmem:[#allocation20_spill] sm:$0xff] }
 0x7dd   :  { %1734 = vst.msk [vmem:[#allocation2 + $0xe0] sm:$0xff] %vm10284_vm15, %v1724_v31  ;;  %v1686_v17 = vpop.permute.xlu2 %1685  ;;  %v4066_v47 = vsel %vm11240_vm10, %v11030_v26, %v11208_v61  ;;  %v11260_v19 = vmul.f32 0.0051020407, %v3480_v25  ;;  %v3584_v56 = vsub.f32 %v3568_v57, %v11144_v14  ;;  %v3650_v26 = vmul.f32 0.5, %v3649_v18  ;;  %v6436_v25 = vld [vmem:[%s13340_s1 + $0x258] sm:$0xff] }
 0x7de   :  { %v832_v59 = vadd.f32 %v13720_v38, %v776_v1  ;;  %v833_v52 = vadd.f32 %v13720_v38, %v777_v54  ;;  %1599 = vperm.xlu1 %7169, %v13721_v40   ;;  %v1702_v62 = vadd.f32 %v1686_v17, %v10761_v27  ;;  %v1703_v48 = vadd.f32 %v1686_v17, %v13722_v32  ;;  %v6463_v40 = vld [vmem:[%s13340_s1 + $0x2b0] sm:$0xff] }
 0x7df   :  { %v4522_v27 = vmul.f32 %v11091_v49, %v4521_v13  ;;  %7347 = vrsqrt.f32 %v11228_v28  ;;  %vm4523_vm12 = vweird.f32 %v11011_v36  ;;  %v3573_v54 = vmul.f32 %v11260_v19, %v11260_v19  ;;  %v7466_v13 = vld [vmem:[%s13339_s0 + $0xf0] sm:$0xff]  ;;  %v7467_v36 = vld [vmem:[%s13339_s0 + $0xf8] sm:$0xff] }
 0x7e0   :  { %v848_v31 = vmax.f32 %v832_v59, 0.0  ;;  %v4400_v30 = vpop.xlane.xlu1 %4399  ;;  %v849_v1 = vmax.f32 %v833_v52, 0.0  ;;  %v1718_v29 = vmax.f32 %v1702_v62, 0.0  ;;  %v1719_v61 = vmax.f32 %v1703_v48, 0.0  ;;  %vm11288_vm14 = vmor %vm4523_vm12, %vm4524_vm11 }
 0x7e1   :  { %v4428_v50 = vmul.f32 0.0051020407, %v4400_v30  ;;  %4144 = vrot.lane.b32.xlu0 %v4126_v58, %s7618_s26  ;;  %v11274_v58 = vpop.eup %7345  ;;  %v3621_v59 = vsub.f32 1.5, %v11258_v37  ;;  %vm3623_vm13 = vweird.f32 %v11059_v8  ;;  %v11292_v17 = vadd.f32 1e-05, %v3584_v56 }
 0x7e2   :  { %v862_v14 = vpack.c.bf16 %v849_v1, %v848_v31  ;;  %v1727_v15 = vpack.c.bf16 %v1719_v61, %v1718_v29  ;;  %v11298_v52 = vmul.f32 %v6436_v25, %v4066_v47  ;;  %v4526_v62 = vsel %vm11288_vm14, %v11091_v49, %v4522_v27  ;;  %v13725_v31 = vld [vmem:[#allocation31_spill] sm:$0xff]  ;;  %v13726_v1 = vld [vmem:[#allocation32_spill] sm:$0xff] }
 0x7e3   :  { %v4444_v11 = vsub.f32 %v4428_v50, %v4436_v3  ;;  %v770_v57 = vpop.permute.xlu0 %769  ;;  %v3651_v37 = vsub.f32 1.5, %v3650_v26  ;;  %v4425_v47 = vmul.f32 0.0051020407, %v10975_v51  ;;  %v4498_v56 = vmul.f32 %v11274_v58, %v11205_v0  ;;  %v13727_v29 = vld [vmem:[#allocation51_spill] sm:$0xff] }
 0x7e4   :  { %4152 = vrot.lane.b32.xlu2 %v11156_v5, %s7618_s26  ;;  %v786_v18 = vmul.f32 %v7466_v13, %v770_v57  ;;  %v787_v38 = vmul.f32 %v7467_v36, %v770_v57  ;;  %872 = vst.msk [vmem:[#allocation2 + $0x50] sm:$0xff] %vm10284_vm15, %v862_v14  ;;  %v3581_v50 = vsub.f32 %v10956_v55, %v3573_v54  ;;  %vm3654_vm1 = vweird.f32 %v11185_v16 }
 0x7e5   :  { %v11296_v3 = vadd.f32 1e-05, %v4444_v11  ;;  %1737 = vst.msk [vmem:[#allocation2 + $0xf8] sm:$0xff] %vm10284_vm15, %v1727_v15  ;;  %v2091_v30 = vpop.permute.xlu2 %2090  ;;  %v11318_v14 = vpop.eup %7347  ;;  %v11320_v11 = vmul.f32 %v6463_v40, %v4526_v62  ;;  %v3652_v15 = vmul.f32 %v11185_v16, %v3651_v37  ;;  %vm3624_vm2 = vweird.f32 %v11158_v63  ;;  %v7469_v40 = vld [vmem:[%s13339_s0 + $0x118] sm:$0xff] }
 0x7e6   :  { %v842_v32 = vadd.f32 %v13725_v31, %v786_v18  ;;  %v843_v48 = vadd.f32 %v13725_v31, %v787_v38  ;;  %1609 = vperm.xlu1 %7169, %v13726_v1   ;;  %v2122_v49 = vadd.f32 %v2091_v30, %v13727_v29  ;;  %v2123_v61 = vadd.f32 %v2091_v30, %v10789_v2  ;;  %v7468_v38 = vld [vmem:[%s13339_s0 + $0x110] sm:$0xff]  ;;  %vm11384_vm5 = vmor %vm3623_vm13, %vm3624_vm2 }
 0x7e7   :  { %7349 = vrsqrt.f32 %v11296_v3  ;;  %vm3653_vm3 = vweird.f32 %v11081_v9  ;;  %v4499_v2 = vmul.f32 %v11274_v58, %v4498_v56  ;;  %v4560_v31 = vmul.f32 %v11320_v11, %v10886_v23  ;;  %v6414_v56 = vld [vmem:[%s13340_s1 + $0x228] sm:$0xff]  ;;  %v13730_v9 = vld [vmem:[#allocation73_spill] sm:$0xff] }
 0x7e8   :  { %v858_v27 = vmax.f32 %v842_v32, 0.0  ;;  %v859_v26 = vmax.f32 %v843_v48, 0.0  ;;  %v4340_v25 = vpop.xlane.xlu1 %4339  ;;  %7351 = vrsqrt.f32 %v11292_v17  ;;  %v2138_v51 = vmax.f32 %v2122_v49, 0.0  ;;  %vm11355_vm4 = vmor %vm3653_vm3, %vm3654_vm1  ;;  %v7470_v32 = vld [vmem:[%s13339_s0 + $0x2c8] sm:$0xff] }
 0x7e9   :  { %v11323_v57 = vmul.f32 0.0051020407, %v4340_v25  ;;  %4142 = vrot.lane.b32.xlu0 %v11000_v43, %s7618_s26  ;;  %v2139_v54 = vmax.f32 %v2123_v61, 0.0  ;;  %v11336_v43 = vadd.f32 1e-05, %v3581_v50  ;;  %v4127_v30 = vmul.f32 %v11298_v52, %v10780_v12  ;;  %v13733_v61 = vld [vmem:[#allocation53_spill] sm:$0xff] }
 0x7ea   :  { %v867_v55 = vpack.c.bf16 %v859_v26, %v858_v27  ;;  %v3656_v23 = vsel %vm11355_vm4, %v11185_v16, %v3652_v15  ;;  %v4500_v49 = vmul.f32 0.5, %v4499_v2  ;;  %v13731_v27 = vld [vmem:[#allocation35_spill] sm:$0xff]  ;;  %vm4504_vm6 = vweird.f32 %v11274_v58 }
 0x7eb   :  { %v4433_v13 = vmul.f32 %v11323_v57, %v11323_v57  ;;  %v1170_v18 = vpop.permute.xlu0 %1169  ;;  %v2152_v36 = vpack.c.bf16 %v2139_v54, %v2138_v51  ;;  %v13732_v26 = vld [vmem:[#allocation23_spill] sm:$0xff]  ;;  %7353 = vrsqrt.f32 %v11336_v43  ;;  %vm4503_vm7 = vweird.f32 %v11205_v0 }
 0x7ec   :  { %4150 = vrot.lane.b32.xlu2 %v11218_v60, %s7618_s26  ;;  %877 = vst.msk [vmem:[#allocation2 + $0x78] sm:$0xff] %vm10284_vm15, %v867_v55  ;;  %v1204_v5 = vmul.f32 %v7468_v38, %v1170_v18  ;;  %v1205_v62 = vmul.f32 %v7469_v40, %v1170_v18  ;;  %v3622_v60 = vmul.f32 %v11158_v63, %v3621_v59  ;;  %v13736_v18 = vld [vmem:[#allocation43_spill] sm:$0xff]  ;;  %vm11465_vm9 = vmor %vm4503_vm7, %vm4504_vm6  ;;  %vm4493_vm10 = vweird.f32 %v11296_v3 }
 0x7ed   :  { %v11346_v37 = vpop.eup %7349  ;;  %v4441_v48 = vsub.f32 %v4425_v47, %v4433_v13  ;;  %2162 = vst.msk [vmem:[#allocation2 + $0x110] sm:$0xff] %vm10284_vm15, %v2152_v36  ;;  %v2101_v29 = vpop.permute.xlu2 %2100  ;;  %v11390_v13 = vmul.f32 %v6414_v56, %v3656_v23  ;;  %v11393_v36 = vmul.f32 0.0051020407, %v13736_v18  ;;  %v13738_v23 = vld [vmem:[#allocation3_spill] sm:$0xff]  ;;  %vm3633_vm12 = vweird.f32 %v11292_v17 }
 0x7ee   :  { %v4488_v59 = vmul.f32 %v11346_v37, %v11296_v3  ;;  %v1260_v1 = vadd.f32 %v13730_v9, %v1204_v5  ;;  %v1261_v47 = vadd.f32 %v13730_v9, %v1205_v62  ;;  %v11373_v12 = vpop.eup %7351  ;;  %1624 = vperm.xlu1 %7169, %v13731_v27   ;;  %v2126_v16 = vadd.f32 %v2101_v29, %v13732_v26  ;;  %v13751_v3 = vld [vmem:[#allocation34_spill] sm:$0xff] }
 0x7ef   :  { %v11375_v50 = vadd.f32 1e-05, %v4441_v48  ;;  %v2127_v25 = vadd.f32 %v2101_v29, %v13733_v61  ;;  %v3628_v8 = vmul.f32 %v11373_v12, %v11292_v17  ;;  %v13737_v48 = vld [vmem:[#allocation92_spill] sm:$0xff]  ;;  %v13739_v29 = vld [vmem:[#allocation9_spill] sm:$0xff]  ;;  %v4501_v26 = vsub.f32 1.5, %v4500_v49 }
 0x7f0   :  { %v4489_v15 = vmul.f32 %v11346_v37, %v4488_v59  ;;  %v1276_v55 = vmax.f32 %v1260_v1, 0.0  ;;  %v1277_v54 = vmax.f32 %v1261_v47, 0.0  ;;  %v4392_v2 = vpop.xlane.xlu1 %4391  ;;  %v2142_v38 = vmax.f32 %v2126_v16, 0.0  ;;  %v6411_v47 = vld [vmem:[%s13340_s1 + $0x210] sm:$0xff]  ;;  %v7472_v49 = vld [vmem:[%s13339_s0 + $0x168] sm:$0xff] }
 0x7f1   :  { %7355 = vrsqrt.f32 %v11375_v50  ;;  %4582 = vrot.lane.b32.xlu0 %v4560_v31, %s7618_s26  ;;  %v2143_v40 = vmax.f32 %v2127_v25, 0.0  ;;  %v4426_v62 = vmul.f32 0.0051020407, %v4392_v2  ;;  %v11403_v56 = vmul.f32 %v7470_v32, %v13737_v48  ;;  %v6715_v25 = vld [vmem:[#allocation2 + $0x70] sm:$0xf]  ;;  %v13740_v32 = vld [vmem:[#allocation54_spill] sm:$0xff] }
 0x7f2   :  { %v1291_v5 = vpack.c.bf16 %v1277_v54, %v1276_v55  ;;  %v3700_v59 = vmul.f32 %v11122_v33, %v13738_v23  ;;  %v3626_v1 = vsel %vm11384_vm5, %v11158_v63, %v3622_v60  ;;  %v11416_v27 = vmul.f32 %v11224_v20, %v13739_v29  ;;  %v7471_v60 = vld [vmem:[%s13339_s0 + $0x160] sm:$0xff]  ;;  %v11431_v54 = vpop.eup %7353  ;;  %v13743_v29 = vld [vmem:[#allocation56_spill] sm:$0xff] }
 0x7f3   :  { %v1195_v9 = vpop.permute.xlu0 %1194  ;;  %v7088_v31 = vld [vmem:[#allocation2 + $0x74] sm:$0xf0]  ;;  %v4490_v16 = vmul.f32 0.5, %v4489_v15  ;;  %v2154_v61 = vpack.c.bf16 %v2143_v40, %v2142_v38  ;;  %v11423_v63 = vmul.f32 %v11318_v14, %v11228_v28  ;;  %v3585_v2 = vsub.f32 %v11393_v36, %v11018_v34  ;;  %v13742_v34 = vld [vmem:[#allocation29_spill] sm:$0xff] }
 0x7f4   :  { %4146 = vrot.lane.b32.xlu2 %v4127_v30, %s7618_s26  ;;  %1301 = vst.msk [vmem:[#allocation2 + $0x88] sm:$0xff] %vm10284_vm15, %v1291_v5  ;;  %v4442_v30 = vsub.f32 %v4426_v62, %v11038_v4  ;;  %v1214_v51 = vmul.f32 %v7471_v60, %v1195_v9  ;;  %v1215_v15 = vmul.f32 %v7472_v49, %v1195_v9  ;;  %vm4494_vm8 = vweird.f32 %v11346_v37 }
 0x7f5   :  { %v6716_v55 = vor.u32 %v7088_v31, %v6715_v25  ;;  %v3699_v4 = vmul.f32 %v11390_v13, %v10972_v39  ;;  %v3629_v18 = vmul.f32 %v11373_v12, %v3628_v8  ;;  %2164 = vst.msk [vmem:[#allocation2 + $0x120] sm:$0xff] %vm10284_vm15, %v2154_v61  ;;  %v2116_v38 = vpop.permute.xlu2 %2115  ;;  %v11440_v5 = vmul.f32 %v6411_v47, %v3626_v1  ;;  %v13741_v39 = vld [vmem:[#allocation42_spill] sm:$0xff]  ;;  %vm11494_vm11 = vmor %vm4493_vm10, %vm4494_vm8 }
 0x7f6   :  { %v11444_v62 = vadd.f32 1e-05, %v4442_v30  ;;  %v1270_v48 = vadd.f32 %v13740_v32, %v1214_v51  ;;  %v1271_v23 = vadd.f32 %v13740_v32, %v1215_v15  ;;  %2024 = vperm.xlu1 %7169, %v13741_v39   ;;  %v2132_v36 = vadd.f32 %v2116_v38, %v13742_v34 }
 0x7f7   :  { %v11442_v40 = vpop.eup %7355  ;;  %5581 = vmatpush.bf16.msra.mxu0 %v6716_v55  ;;  %v4502_v8 = vmul.f32 %v11274_v58, %v4501_v26  ;;  %v4491_v9 = vsub.f32 1.5, %v4490_v16  ;;  %v2133_v61 = vadd.f32 %v2116_v38, %v13743_v29  ;;  %v3630_v25 = vmul.f32 0.5, %v3629_v18  ;;  %v7474_v38 = vld [vmem:[%s13339_s0 + $0x188] sm:$0xff] }
 0x7f8   :  { %v4458_v31 = vmul.f32 %v11442_v40, %v11375_v50  ;;  %v1286_v1 = vmax.f32 %v1270_v48, 0.0  ;;  %v1287_v47 = vmax.f32 %v1271_v23, 0.0  ;;  %v2148_v30 = vmax.f32 %v2132_v36, 0.0  ;;  %v13746_v23 = vld [vmem:[#allocation68_spill] sm:$0xff] }
 0x7f9   :  { %3720 = vrot.lane.b32.xlu0 %v3699_v4, %s7618_s26  ;;  %v3598_v60 = vmul.f32 %v11431_v54, %v11336_v43  ;;  %7357 = vrsqrt.f32 %v11444_v62  ;;  %v2149_v51 = vmax.f32 %v2133_v61, 0.0  ;;  %v4492_v0 = vmul.f32 %v11346_v37, %v4491_v9  ;;  %v7473_v4 = vld [vmem:[%s13339_s0 + $0x180] sm:$0xff] }
 0x7fa   :  { %v4459_v26 = vmul.f32 %v11442_v40, %v4458_v31  ;;  %v1296_v16 = vpack.c.bf16 %v1287_v47, %v1286_v1  ;;  %v3696_v39 = vmul.f32 %v11440_v5, %v13746_v23  ;;  %v4506_v34 = vsel %vm11465_vm9, %v11274_v58, %v4502_v8  ;;  %v13747_v9 = vld [vmem:[#allocation55_spill] sm:$0xff]  ;;  %v13750_v58 = vld [vmem:[#allocation45_spill] sm:$0xff] }
 0x7fb   :  { %v1595_v49 = vpop.permute.xlu0 %1594  ;;  %v2157_v48 = vpack.c.bf16 %v2149_v51, %v2148_v30  ;;  %v3631_v36 = vsub.f32 1.5, %v3630_v25  ;;  %v6461_v47 = vld [vmem:[%s13340_s1 + $0x2a0] sm:$0xff]  ;;  %v3599_v29 = vmul.f32 %v11431_v54, %v3598_v60  ;;  %v13752_v30 = vld [vmem:[#allocation6_spill] sm:$0xff]  ;;  %v4496_v60 = vsel %vm11494_vm11, %v11346_v37, %v4492_v0 }
 0x7fc   :  { %3722 = vrot.lane.b32.xlu2 %v3700_v59, %s7618_s26  ;;  %v4460_v55 = vmul.f32 0.5, %v4459_v26  ;;  %v1632_v18 = vmul.f32 %v7473_v4, %v1595_v49  ;;  %v1633_v32 = vmul.f32 %v7474_v38, %v1595_v49  ;;  %v11476_v59 = vadd.f32 1e-05, %v3585_v2  ;;  %1306 = vst.msk [vmem:[#allocation2 + $0xb0] sm:$0xff] %vm10284_vm15, %v1296_v16  ;;  %v6460_v49 = vld [vmem:[%s13340_s1 + $0x298] sm:$0xff] }
 0x7fd   :  { %v2521_v2 = vpop.permute.xlu2 %2520  ;;  %2167 = vst.msk [vmem:[#allocation2 + $0x138] sm:$0xff] %vm10284_vm15, %v2157_v48  ;;  %v11513_v38 = vmul.f32 %v6461_v47, %v4506_v34  ;;  %vm3634_vm13 = vweird.f32 %v11373_v12  ;;  %v3600_v0 = vmul.f32 0.5, %v3599_v29  ;;  %vm4464_vm14 = vweird.f32 %v11442_v40  ;;  %v7478_v29 = vld [vmem:[%s13339_s0 + $0x2f8] sm:$0xff] }
 0x7fe   :  { %v1688_v31 = vadd.f32 %v13747_v9, %v1632_v18  ;;  %v1689_v1 = vadd.f32 %v13747_v9, %v1633_v32  ;;  %2039 = vperm.xlu1 %7169, %v13750_v58   ;;  %v2552_v8 = vadd.f32 %v2521_v2, %v13751_v3  ;;  %v2553_v25 = vadd.f32 %v2521_v2, %v13752_v30  ;;  %v13753_v2 = vld [vmem:[#allocation94_spill] sm:$0xff]  ;;  %vm11552_vm1 = vmor %vm3633_vm12, %vm3634_vm13 }
 0x7ff   :  { %v4461_v26 = vsub.f32 1.5, %v4460_v55  ;;  %v11509_v15 = vpop.eup %7357  ;;  %7359 = vrsqrt.f32 %v11476_v59  ;;  %v3632_v55 = vmul.f32 %v11373_v12, %v3631_v36  ;;  %v11521_v23 = vmul.f32 %v6460_v49, %v4496_v60  ;;  %v7475_v36 = vld [vmem:[%s13339_s0 + $0x1d0] sm:$0xff]  ;;  %v13756_v30 = vld [vmem:[#allocation70_spill] sm:$0xff] }
 0x800   :  { %v1704_v16 = vmax.f32 %v1688_v31, 0.0  ;;  %v1705_v51 = vmax.f32 %v1689_v1, 0.0  ;;  %v2568_v4 = vmax.f32 %v2552_v8, 0.0  ;;  %v2569_v18 = vmax.f32 %v2553_v25, 0.0  ;;  %v7476_v31 = vld [vmem:[%s13339_s0 + $0x1d8] sm:$0xff]  ;;  %v7477_v1 = vld [vmem:[%s13339_s0 + $0x2f0] sm:$0xff] }
 0x801   :  { %3714 = vrot.lane.b32.xlu0 %v3696_v39, %s7618_s26  ;;  %v4462_v39 = vmul.f32 %v11442_v40, %v4461_v26  ;;  %v4468_v34 = vmul.f32 %v11509_v15, %v11444_v62  ;;  %v11538_v47 = vmul.f32 %v7477_v1, %v13753_v2  ;;  %v11544_v61 = vmul.f32 %v7478_v29, %v13753_v2 }
 0x802   :  { %v1720_v37 = vpack.c.bf16 %v1705_v51, %v1704_v16  ;;  %v2582_v32 = vpack.c.bf16 %v2569_v18, %v2568_v4  ;;  %v3669_v58 = vmul.f32 %v11318_v14, %v11423_v63  ;;  %v4558_v8 = vmul.f32 %v11513_v38, %v11021_v35  ;;  %v13759_v35 = vld [vmem:[#allocation47_spill] sm:$0xff] }
 0x803   :  { %v1620_v48 = vpop.permute.xlu0 %1619  ;;  %vm4463_vm2 = vweird.f32 %v11375_v50  ;;  %v3636_v17 = vsel %vm11552_vm1, %v11373_v12, %v3632_v55  ;;  %v3601_v51 = vsub.f32 1.5, %v3600_v0  ;;  %v13760_v50 = vld [vmem:[#allocation69_spill] sm:$0xff]  ;;  %v4557_v18 = vmul.f32 %v11521_v23, %v11211_v21  ;;  %v6412_v12 = vld [vmem:[%s13340_s1 + $0x218] sm:$0xff]  ;;  %v6457_v55 = vld [vmem:[%s13340_s1 + $0x280] sm:$0xff] }
 0x804   :  { %4584 = vrot.lane.b32.xlu2 %v11416_v27, %s7618_s26  ;;  %1730 = vst.msk [vmem:[#allocation2 + $0xc0] sm:$0xff] %vm10284_vm15, %v1720_v37  ;;  %v1642_v9 = vmul.f32 %v7475_v36, %v1620_v48  ;;  %v1643_v27 = vmul.f32 %v7476_v31, %v1620_v48  ;;  %vm11570_vm3 = vmor %vm4463_vm2, %vm4464_vm14  ;;  %v4469_v0 = vmul.f32 %v11509_v15, %v4468_v34  ;;  %v7479_v21 = vld [vmem:[%s13339_s0 + $0x20] sm:$0xff]  ;;  %vm3604_vm4 = vweird.f32 %v11431_v54 }
 0x805   :  { %2592 = vst.msk [vmem:[#allocation2 + $0x150] sm:$0xff] %vm10284_vm15, %v2582_v32  ;;  %v2531_v26 = vpop.permute.xlu2 %2530  ;;  %v11566_v16 = vpop.eup %7359  ;;  %v4466_v37 = vsel %vm11570_vm3, %v11442_v40, %v4462_v39  ;;  %v7481_v40 = vld [vmem:[%s13339_s0 + $0x320] sm:$0xff]  ;;  %v13761_v39 = vld [vmem:[#allocation96_spill] sm:$0xff]  ;;  %v11603_v29 = vmul.f32 %v6412_v12, %v3636_v17  ;;  %v7482_v17 = vld [vmem:[%s13339_s0 + $0x210] sm:$0xff]  ;;  %v3670_v12 = vmul.f32 0.5, %v3669_v58  ;;  %vm3603_vm5 = vweird.f32 %v11336_v43 }
 0x806   :  { %v1698_v25 = vadd.f32 %v13756_v30, %v1642_v9  ;;  %v1699_v63 = vadd.f32 %v13756_v30, %v1643_v27  ;;  %2049 = vperm.xlu1 %7169, %v13759_v35   ;;  %v2556_v49 = vadd.f32 %v2531_v26, %v13760_v50  ;;  %v2557_v4 = vadd.f32 %v2531_v26, %v11403_v56  ;;  %v7480_v27 = vld [vmem:[%s13339_s0 + $0x28] sm:$0xff]  ;;  %vm11630_vm6 = vmor %vm3603_vm5, %vm3604_vm4 }
 0x807   :  { %v11600_v34 = vmul.f32 %v7481_v40, %v13761_v39  ;;  %v11605_v3 = vmul.f32 %v6457_v55, %v4466_v37  ;;  %v3602_v35 = vmul.f32 %v11431_v54, %v3601_v51  ;;  %v4470_v50 = vmul.f32 0.5, %v4469_v0  ;;  %v13763_v37 = vld [vmem:[#allocation65_spill] sm:$0xff] }
 0x808   :  { %v1714_v32 = vmax.f32 %v1698_v25, 0.0  ;;  %v1715_v48 = vmax.f32 %v1699_v63, 0.0  ;;  %v312_v56 = vpop.permute.xlu1 %311  ;;  %v2572_v36 = vmax.f32 %v2556_v49, 0.0  ;;  %v2573_v9 = vmax.f32 %v2557_v4, 0.0  ;;  %v13762_v25 = vld [vmem:[#allocation50_spill] sm:$0xff] }
 0x809   :  { %v343_v31 = vmul.f32 %v7479_v21, %v312_v56  ;;  %v344_v1 = vmul.f32 %v7480_v27, %v312_v56  ;;  %4576 = vrot.lane.b32.xlu0 %v4557_v18, %s7618_s26  ;;  %v7483_v4 = vld [vmem:[%s13339_s0 + $0x218] sm:$0xff]  ;;  %v3697_v56 = vmul.f32 %v11603_v29, %v11079_v24  ;;  %v13766_v21 = vld [vmem:[#allocation59_spill] sm:$0xff]  ;;  %v3606_v27 = vsel %vm11630_vm6, %v11431_v54, %v3602_v35  ;;  %v7486_v54 = vld [vmem:[%s13339_s0 + $0x328] sm:$0xff] }
 0x80a   :  { %v1725_v2 = vpack.c.bf16 %v1715_v48, %v1714_v32  ;;  %v2584_v30 = vpack.c.bf16 %v2573_v9, %v2572_v36  ;;  %v4554_v36 = vmul.f32 %v11605_v3, %v11323_v57  ;;  %v6409_v24 = vld [vmem:[%s13340_s1 + $0x200] sm:$0xff]  ;;  %v3671_v35 = vsub.f32 1.5, %v3670_v12 }
 0x80b   :  { %v399_v63 = vadd.f32 %v13762_v25, %v343_v31  ;;  %v400_v26 = vadd.f32 %v13762_v25, %v344_v1  ;;  %v2030_v60 = vpop.permute.xlu0 %2029  ;;  %v4471_v1 = vsub.f32 1.5, %v4470_v50  ;;  %vm4474_vm7 = vweird.f32 %v11509_v15 }
 0x80c   :  { %4578 = vrot.lane.b32.xlu2 %v4558_v8, %s7618_s26  ;;  %1735 = vst.msk [vmem:[#allocation2 + $0xe8] sm:$0xff] %vm10284_vm15, %v1725_v2  ;;  %v2064_v49 = vmul.f32 %v7482_v17, %v2030_v60  ;;  %v2065_v18 = vmul.f32 %v7483_v4, %v2030_v60  ;;  %v3638_v8 = vmul.f32 %v11566_v16, %v11476_v59  ;;  %vm3673_vm8 = vweird.f32 %v11228_v28 }
 0x80d   :  { %2594 = vst.msk [vmem:[#allocation2 + $0x160] sm:$0xff] %vm10284_vm15, %v2584_v30  ;;  %v415_v51 = vmax.f32 %v399_v63, 0.0  ;;  %v416_v55 = vmax.f32 %v400_v26, 0.0  ;;  %v2546_v48 = vpop.permute.xlu2 %2545  ;;  %v7485_v63 = vld [vmem:[%s13339_s0 + $0x48] sm:$0xff]  ;;  %v2927_v60 = vmul.f32 %v7486_v54, %v13761_v39  ;;  %v7487_v39 = vld [vmem:[%s13339_s0 + $0x260] sm:$0xff]  ;;  %vm3674_vm9 = vweird.f32 %v11318_v14 }
 0x80e   :  { %v2120_v0 = vadd.f32 %v13763_v37, %v2064_v49  ;;  %v2121_v32 = vadd.f32 %v13763_v37, %v2065_v18  ;;  %2454 = vperm.xlu1 %7169, %v13766_v21   ;;  %v2562_v43 = vadd.f32 %v2546_v48, %v11538_v47  ;;  %v2563_v31 = vadd.f32 %v2546_v48, %v11544_v61  ;;  %v7484_v47 = vld [vmem:[%s13339_s0 + $0x40] sm:$0xff]  ;;  %v13767_v18 = vld [vmem:[#allocation57_spill] sm:$0xff]  ;;  %vm11711_vm12 = vmor %vm3673_vm8, %vm3674_vm9 }
 0x80f   :  { %v429_v9 = vpack.c.bf16 %v416_v55, %v415_v51  ;;  %v3639_v50 = vmul.f32 %v11566_v16, %v3638_v8  ;;  %v11659_v49 = vmul.f32 %v6409_v24, %v3606_v27  ;;  %v7488_v8 = vld [vmem:[%s13339_s0 + $0x268] sm:$0xff]  ;;  %v3672_v58 = vmul.f32 %v11318_v14, %v3671_v35  ;;  %v13777_v24 = vld [vmem:[#allocation82_spill] sm:$0xff] }
 0x810   :  { %v2136_v40 = vmax.f32 %v2120_v0, 0.0  ;;  %v2137_v2 = vmax.f32 %v2121_v32, 0.0  ;;  %v322_v30 = vpop.permute.xlu1 %321  ;;  %v2578_v57 = vmax.f32 %v2562_v43, 0.0  ;;  %v2579_v25 = vmax.f32 %v2563_v31, 0.0 }
 0x811   :  { %442 = vst.msk [vmem:[#allocation2 + $0x10] sm:$0xff] %vm10284_vm15, %v429_v9  ;;  %v347_v61 = vmul.f32 %v7484_v47, %v322_v30  ;;  %v348_v26 = vmul.f32 %v7485_v63, %v322_v30  ;;  %4570 = vrot.lane.b32.xlu0 %v4554_v36, %s7618_s26  ;;  %v4472_v0 = vmul.f32 %v11509_v15, %v4471_v1  ;;  %vm4473_vm10 = vweird.f32 %v11444_v62  ;;  %v13768_v36 = vld [vmem:[#allocation80_spill] sm:$0xff]  ;;  %v13771_v1 = vld [vmem:[#allocation62_spill] sm:$0xff] }
 0x812   :  { %v2151_v17 = vpack.c.bf16 %v2137_v2, %v2136_v40  ;;  %v2587_v4 = vpack.c.bf16 %v2579_v25, %v2578_v57  ;;  %v3640_v31 = vmul.f32 0.5, %v3639_v50  ;;  %vm11684_vm11 = vmor %vm4473_vm10, %vm4474_vm7  ;;  %v3694_v62 = vmul.f32 %v11659_v49, %v11260_v19  ;;  %v7490_v19 = vld [vmem:[%s13339_s0 + $0x78] sm:$0xff] }
 0x813   :  { %v403_v51 = vadd.f32 %v13767_v18, %v347_v61  ;;  %v404_v55 = vadd.f32 %v13767_v18, %v348_v26  ;;  %v2055_v37 = vpop.permute.xlu0 %2054  ;;  %v4476_v47 = vsel %vm11684_vm11, %v11509_v15, %v4472_v0  ;;  %v6458_v15 = vld [vmem:[%s13340_s1 + $0x288] sm:$0xff]  ;;  %v6416_v50 = vld [vmem:[%s13340_s1 + $0x238] sm:$0xff]  ;;  %vm3644_vm13 = vweird.f32 %v11566_v16 }
 0x814   :  { %3716 = vrot.lane.b32.xlu2 %v3697_v56, %s7618_s26  ;;  %2161 = vst.msk [vmem:[#allocation2 + $0x108] sm:$0xff] %vm10284_vm15, %v2151_v17  ;;  %v2074_v12 = vmul.f32 %v7487_v39, %v2055_v37  ;;  %v2075_v32 = vmul.f32 %v7488_v8, %v2055_v37  ;;  %v3641_v28 = vsub.f32 1.5, %v3640_v31  ;;  %v7491_v37 = vld [vmem:[%s13339_s0 + $0x290] sm:$0xff]  ;;  %v7493_v8 = vld [vmem:[%s13339_s0 + $0x340] sm:$0xff]  ;;  %vm3643_vm14 = vweird.f32 %v11476_v59 }
 0x815   :  { %2597 = vst.msk [vmem:[#allocation2 + $0x178] sm:$0xff] %vm10284_vm15, %v2587_v4  ;;  %v419_v48 = vmax.f32 %v403_v51, 0.0  ;;  %v420_v56 = vmax.f32 %v404_v55, 0.0  ;;  %v2951_v43 = vpop.permute.xlu2 %2950  ;;  %v13774_v4 = vld [vmem:[#allocation38_spill] sm:$0xff]  ;;  %vm11771_vm1 = vmor %vm3643_vm14, %vm3644_vm13  ;;  %v7497_v59 = vld [vmem:[%s13339_s0 + $0x2e0] sm:$0xff] }
 0x816   :  { %v2130_v9 = vadd.f32 %v13768_v36, %v2074_v12  ;;  %v2131_v21 = vadd.f32 %v13768_v36, %v2075_v32  ;;  %2469 = vperm.xlu1 %7169, %v13771_v1   ;;  %v2982_v40 = vadd.f32 %v2951_v43, %v11600_v34  ;;  %v2983_v2 = vadd.f32 %v2951_v43, %v2927_v60  ;;  %v7489_v34 = vld [vmem:[%s13339_s0 + $0x70] sm:$0xff]  ;;  %v13775_v32 = vld [vmem:[#allocation98_spill] sm:$0xff]  ;;  %v7496_v60 = vld [vmem:[%s13339_s0 + $0x88] sm:$0xff] }
 0x817   :  { %v431_v27 = vpack.c.bf16 %v420_v56, %v419_v48  ;;  %v11732_v12 = vmul.f32 %v6458_v15, %v4476_v47  ;;  %v2930_v48 = vmul.f32 %v7493_v8, %v13775_v32  ;;  %v7494_v56 = vld [vmem:[%s13339_s0 + $0x348] sm:$0xff] }
 0x818   :  { %v2146_v30 = vmax.f32 %v2130_v9, 0.0  ;;  %v2147_v57 = vmax.f32 %v2131_v21, 0.0  ;;  %v337_v25 = vpop.permute.xlu1 %336  ;;  %v2998_v61 = vmax.f32 %v2982_v40, 0.0  ;;  %v2999_v63 = vmax.f32 %v2983_v2, 0.0  ;;  %v13776_v21 = vld [vmem:[#allocation15_spill] sm:$0xff] }
 0x819   :  { %444 = vst.msk [vmem:[#allocation2 + $0x20] sm:$0xff] %vm10284_vm15, %v431_v27  ;;  %v353_v26 = vmul.f32 %v7489_v34, %v337_v25  ;;  %v354_v54 = vmul.f32 %v7490_v19, %v337_v25  ;;  %4209 = vperm.xlu0 %7168, %v10936_v22   ;;  %v3676_v22 = vsel %vm11711_vm12, %v11318_v14, %v3672_v58  ;;  %v7492_v14 = vld [vmem:[%s13339_s0 + $0x298] sm:$0xff]  ;;  %v11745_v43 = vmul.f32 0.0051020407, %v13776_v21 }
 0x81a   :  { %v2156_v35 = vpack.c.bf16 %v2147_v57, %v2146_v30  ;;  %v3012_v17 = vpack.c.bf16 %v2999_v63, %v2998_v61  ;;  %v2931_v58 = vmul.f32 %v7494_v56, %v13775_v32  ;;  %v11747_v31 = vmul.f32 %v6416_v50, %v3676_v22  ;;  %v6413_v32 = vld [vmem:[%s13340_s1 + $0x220] sm:$0xff]  ;;  %v13783_v56 = vld [vmem:[#allocation101_spill] sm:$0xff] }
 0x81b   :  { %v409_v18 = vadd.f32 %v13774_v4, %v353_v26  ;;  %v410_v51 = vadd.f32 %v13774_v4, %v354_v54  ;;  %v2460_v55 = vpop.permute.xlu0 %2459  ;;  %v4555_v63 = vmul.f32 %v11732_v12, %v10987_v53  ;;  %v3642_v34 = vmul.f32 %v11566_v16, %v3641_v28  ;;  %v7495_v54 = vld [vmem:[%s13339_s0 + $0x80] sm:$0xff]  ;;  %v13779_v53 = vld [vmem:[#allocation105_spill] sm:$0xff] }
 0x81c   :  { %3710 = vrot.lane.b32.xlu2 %v3694_v62, %s7618_s26  ;;  %2166 = vst.msk [vmem:[#allocation2 + $0x130] sm:$0xff] %vm10284_vm15, %v2156_v35  ;;  %v2494_v0 = vmul.f32 %v7491_v37, %v2460_v55  ;;  %v2495_v39 = vmul.f32 %v7492_v14, %v2460_v55  ;;  %v13778_v62 = vld [vmem:[#allocation64_spill] sm:$0xff]  ;;  %v3999_v50 = vmul.f32 0.0051020407, %v13779_v53  ;;  %v4007_v22 = vmul.f32 %v11745_v43, %v11745_v43  ;;  %v7502_v53 = vld [vmem:[%s13339_s0 + $0xb8] sm:$0xff] }
 0x81d   :  { %3022 = vst.msk [vmem:[#allocation2 + $0x190] sm:$0xff] %vm10284_vm15, %v3012_v17  ;;  %v425_v36 = vmax.f32 %v409_v18, 0.0  ;;  %v426_v9 = vmax.f32 %v410_v51, 0.0  ;;  %v2961_v40 = vpop.permute.xlu2 %2960  ;;  %v13782_v51 = vld [vmem:[#allocation63_spill] sm:$0xff]  ;;  %v7498_v14 = vld [vmem:[%s13339_s0 + $0x2e8] sm:$0xff]  ;;  %v3646_v8 = vsel %vm11771_vm1, %v11566_v16, %v3642_v34 }
 0x81e   :  { %v2550_v27 = vadd.f32 %v13777_v24, %v2494_v0  ;;  %v2551_v1 = vadd.f32 %v13777_v24, %v2495_v39  ;;  %2479 = vperm.xlu1 %7169, %v13778_v62   ;;  %v2986_v30 = vadd.f32 %v2961_v40, %v2930_v48  ;;  %v2987_v57 = vadd.f32 %v2961_v40, %v2931_v58  ;;  %v7499_v48 = vld [vmem:[%s13339_s0 + $0x370] sm:$0xff] }
 0x81f   :  { %v434_v2 = vpack.c.bf16 %v426_v9, %v425_v36  ;;  %v2936_v58 = vmul.f32 %v7499_v48, %v13783_v56  ;;  %v7500_v36 = vld [vmem:[%s13339_s0 + $0x378] sm:$0xff]  ;;  %v4015_v24 = vsub.f32 %v3999_v50, %v4007_v22  ;;  %v7505_v48 = vld [vmem:[%s13339_s0 + $0x380] sm:$0xff] }
 0x820   :  { %v2566_v25 = vmax.f32 %v2550_v27, 0.0  ;;  %v2567_v47 = vmax.f32 %v2551_v1, 0.0  ;;  %v735_v61 = vpop.permute.xlu1 %734  ;;  %v3002_v26 = vmax.f32 %v2986_v30, 0.0  ;;  %v3003_v19 = vmax.f32 %v2987_v57, 0.0  ;;  %v13784_v27 = vld [vmem:[#allocation84_spill] sm:$0xff]  ;;  %v13785_v30 = vld [vmem:[#allocation75_spill] sm:$0xff] }
 0x821   :  { %447 = vst.msk [vmem:[#allocation2 + $0x38] sm:$0xff] %vm10284_vm15, %v434_v2  ;;  %v772_v15 = vmul.f32 %v7495_v54, %v735_v61  ;;  %v773_v35 = vmul.f32 %v7496_v60, %v735_v61  ;;  %3779 = vperm.xlu0 %7168, %v11747_v31   ;;  %v2937_v9 = vmul.f32 %v7500_v36, %v13783_v56  ;;  %v13786_v61 = vld [vmem:[#allocation13_spill] sm:$0xff]  ;;  %v11819_v22 = vadd.f32 1e-05, %v4015_v24  ;;  %v13789_v56 = vld [vmem:[#allocation103_spill] sm:$0xff]  ;;  %v7506_v36 = vld [vmem:[%s13339_s0 + $0x388] sm:$0xff] }
 0x822   :  { %v2581_v17 = vpack.c.bf16 %v2567_v47, %v2566_v25  ;;  %v3014_v18 = vpack.c.bf16 %v3003_v19, %v3002_v26  ;;  %v11805_v47 = vmul.f32 %v6413_v32, %v3646_v8  ;;  %v7501_v60 = vld [vmem:[%s13339_s0 + $0xb0] sm:$0xff]  ;;  %v7504_v8 = vld [vmem:[%s13339_s0 + $0x308] sm:$0xff]  ;;  %v13790_v24 = vld [vmem:[#allocation86_spill] sm:$0xff] }
 0x823   :  { %v828_v55 = vadd.f32 %v13782_v51, %v772_v15  ;;  %v829_v28 = vadd.f32 %v13782_v51, %v773_v35  ;;  %v2485_v37 = vpop.permute.xlu0 %2484  ;;  %7361 = vrsqrt.f32 %v11819_v22  ;;  %vm4073_vm2 = vweird.f32 %v11819_v22 }
 0x824   :  { %4572 = vrot.lane.b32.xlu2 %v4555_v63, %s7618_s26  ;;  %2591 = vst.msk [vmem:[#allocation2 + $0x148] sm:$0xff] %vm10284_vm15, %v2581_v17  ;;  %v2504_v0 = vmul.f32 %v7497_v59, %v2485_v37  ;;  %v2505_v39 = vmul.f32 %v7498_v14, %v2485_v37  ;;  %v11808_v63 = vmul.f32 0.0051020407, %v13786_v61  ;;  %v13788_v59 = vld [vmem:[#allocation26_spill] sm:$0xff]  ;;  %v7503_v14 = vld [vmem:[%s13339_s0 + $0x300] sm:$0xff] }
 0x825   :  { %3024 = vst.msk [vmem:[#allocation2 + $0x1a0] sm:$0xff] %vm10284_vm15, %v3014_v18  ;;  %v844_v16 = vmax.f32 %v828_v55, 0.0  ;;  %v845_v21 = vmax.f32 %v829_v28, 0.0  ;;  %v2976_v2 = vpop.permute.xlu2 %2975  ;;  %v13787_v18 = vld [vmem:[#allocation52_spill] sm:$0xff] }
 0x826   :  { %v2560_v1 = vadd.f32 %v13784_v27, %v2504_v0  ;;  %v2561_v40 = vadd.f32 %v13784_v27, %v2505_v39  ;;  %2889 = vperm.xlu1 %7169, %v13785_v30   ;;  %v2992_v57 = vadd.f32 %v2976_v2, %v2936_v58  ;;  %v2993_v25 = vadd.f32 %v2976_v2, %v2937_v9 }
 0x827   :  { %v860_v62 = vpack.c.bf16 %v845_v21, %v844_v16  ;;  %v4003_v37 = vmul.f32 %v11808_v63, %v11808_v63  ;;  %v3995_v0 = vmul.f32 0.0051020407, %v13788_v59  ;;  %v3352_v58 = vmul.f32 %v7505_v48, %v13789_v56 }
 0x828   :  { %v2576_v34 = vmax.f32 %v2560_v1, 0.0  ;;  %v2577_v26 = vmax.f32 %v2561_v40, 0.0  ;;  %v750_v19 = vpop.permute.xlu1 %749  ;;  %v3008_v54 = vmax.f32 %v2992_v57, 0.0  ;;  %v3009_v15 = vmax.f32 %v2993_v25, 0.0 }
 0x829   :  { %870 = vst.msk [vmem:[#allocation2 + $0x40] sm:$0xff] %vm10284_vm15, %v860_v62  ;;  %v778_v35 = vmul.f32 %v7501_v60, %v750_v19  ;;  %v779_v50 = vmul.f32 %v7502_v53, %v750_v19  ;;  %3764 = vperm.xlu0 %7168, %v11805_v47   ;;  %v3353_v9 = vmul.f32 %v7506_v36, %v13789_v56  ;;  %v13791_v62 = vld [vmem:[#allocation76_spill] sm:$0xff]  ;;  %v11859_v59 = vpop.eup %7361 }
 0x82a   :  { %v2586_v17 = vpack.c.bf16 %v2577_v26, %v2576_v34  ;;  %v3017_v4 = vpack.c.bf16 %v3009_v15, %v3008_v54  ;;  %v4011_v25 = vsub.f32 %v3995_v0, %v4003_v37  ;;  %v7507_v15 = vld [vmem:[%s13339_s0 + $0xd0] sm:$0xff]  ;;  %v7120_v37 = vld [vmem:[#allocation2 + $0x174] sm:$0xf0]  ;;  %vm4074_vm3 = vweird.f32 %v11859_v59 }
 0x82b   :  { %v834_v51 = vadd.f32 %v13787_v18, %v778_v35  ;;  %v835_v55 = vadd.f32 %v13787_v18, %v779_v50  ;;  %v2885_v28 = vpop.permute.xlu0 %2884  ;;  %v7508_v35 = vld [vmem:[%s13339_s0 + $0xd8] sm:$0xff]  ;;  %v7509_v0 = vld [vmem:[%s13339_s0 + $0x350] sm:$0xff]  ;;  %vm11951_vm4 = vmor %vm4073_vm2, %vm4074_vm3 }
 0x82c   :  { %2596 = vst.msk [vmem:[#allocation2 + $0x170] sm:$0xff] %vm10284_vm15, %v2586_v17  ;;  %v2922_v39 = vmul.f32 %v7503_v14, %v2885_v28  ;;  %v2923_v32 = vmul.f32 %v7504_v8, %v2885_v28 }
 0x82d   :  { %3027 = vst.msk [vmem:[#allocation2 + $0x1b8] sm:$0xff] %vm10284_vm15, %v3017_v4  ;;  %v850_v16 = vmax.f32 %v834_v51, 0.0  ;;  %v851_v21 = vmax.f32 %v835_v55, 0.0  ;;  %v3371_v40 = vpop.permute.xlu2 %3370  ;;  %v13792_v4 = vld [vmem:[#allocation44_spill] sm:$0xff] }
 0x82e   :  { %v2978_v27 = vadd.f32 %v13790_v24, %v2922_v39  ;;  %v2979_v1 = vadd.f32 %v13790_v24, %v2923_v32  ;;  %2899 = vperm.xlu1 %7169, %v13791_v62   ;;  %v3408_v30 = vadd.f32 %v3371_v40, %v3352_v58  ;;  %v3409_v57 = vadd.f32 %v3371_v40, %v3353_v9  ;;  %v13793_v58 = vld [vmem:[#allocation88_spill] sm:$0xff]  ;;  %v7511_v62 = vld [vmem:[%s13339_s0 + $0x100] sm:$0xff] }
 0x82f   :  { %v863_v2 = vpack.c.bf16 %v851_v21, %v850_v16  ;;  %v11869_v32 = vadd.f32 1e-05, %v4011_v25  ;;  %v4068_v21 = vmul.f32 %v11859_v59, %v11819_v22 }
 0x830   :  { %v2994_v61 = vmax.f32 %v2978_v27, 0.0  ;;  %v2995_v34 = vmax.f32 %v2979_v1, 0.0  ;;  %v760_v26 = vpop.permute.xlu1 %759  ;;  %v3424_v19 = vmax.f32 %v3408_v30, 0.0  ;;  %v3425_v54 = vmax.f32 %v3409_v57, 0.0  ;;  %v13794_v27 = vld [vmem:[#allocation77_spill] sm:$0xff]  ;;  %v7512_v57 = vld [vmem:[%s13339_s0 + $0x108] sm:$0xff] }
 0x831   :  { %873 = vst.msk [vmem:[#allocation2 + $0x58] sm:$0xff] %vm10284_vm15, %v863_v2  ;;  %v782_v60 = vmul.f32 %v7507_v15, %v760_v26  ;;  %v783_v53 = vmul.f32 %v7508_v35, %v760_v26  ;;  %3754 = vperm.xlu0 %7168, %v11440_v5   ;;  %v7510_v5 = vld [vmem:[%s13339_s0 + $0x358] sm:$0xff]  ;;  %7363 = vrsqrt.f32 %v11869_v32  ;;  %v4069_v26 = vmul.f32 %v11859_v59, %v4068_v21  ;;  %v7513_v35 = vld [vmem:[%s13339_s0 + $0x390] sm:$0xff] }
 0x832   :  { %v3010_v50 = vpack.c.bf16 %v2995_v34, %v2994_v61  ;;  %v3440_v17 = vpack.c.bf16 %v3425_v54, %v3424_v19  ;;  %v13795_v34 = vmov 1   ;;  %v13796_v19 = vld [vmem:[#allocation46_spill] sm:$0xff]  ;;  %v7515_v21 = vld [vmem:[%s13339_s0 + $0x130] sm:$0xff]  ;;  %vm4033_vm6 = vweird.f32 %v11869_v32 }
 0x833   :  { %v838_v18 = vadd.f32 %v13792_v4, %v782_v60  ;;  %v839_v51 = vadd.f32 %v13792_v4, %v783_v53  ;;  %v2910_v55 = vpop.permute.xlu0 %2909  ;;  %v6843_v28 = vld [vmem:[#allocation2 + $0x170] sm:$0xf] }
 0x834   :  { %3020 = vst.msk [vmem:[#allocation2 + $0x180] sm:$0xff] %vm10284_vm15, %v3010_v50  ;;  %v2932_v14 = vmul.f32 %v7509_v0, %v2910_v55  ;;  %v2933_v39 = vmul.f32 %v7510_v5, %v2910_v55  ;;  %v6844_v8 = vor.u32 %v7120_v37, %v6843_v28  ;;  %v7514_v50 = vld [vmem:[%s13339_s0 + $0x398] sm:$0xff] }
 0x835   :  { %3450 = vst.msk [vmem:[#allocation2 + $0x1c0] sm:$0xff] %vm10284_vm15, %v3440_v17  ;;  %v854_v48 = vmax.f32 %v838_v18, 0.0  ;;  %v855_v56 = vmax.f32 %v839_v51, 0.0  ;;  %v11875_v16 = vpop.permute.xlu2 %3390  ;;  %v13797_v51 = vld [vmem:[#allocation25_spill] sm:$0xff] }
 0x836   :  { %v2988_v36 = vadd.f32 %v13793_v58, %v2932_v14  ;;  %v2989_v9 = vadd.f32 %v13793_v58, %v2933_v39  ;;  %5679 = vmatpush.bf16.msra.mxu2 %v6844_v8  ;;  %2914 = vperm.xlu1 %7169, %v13794_v27   ;;  %v4070_v14 = vmul.f32 0.5, %v4069_v26  ;;  %v13798_v39 = vld [vmem:[#allocation24_spill] sm:$0xff]  ;;  %v6707_v8 = vld [vmem:[#allocation2 + $0x60] sm:$0xf]  ;;  %v7516_v27 = vld [vmem:[%s13339_s0 + $0x138] sm:$0xff] }
 0x837   :  { %v865_v24 = vpack.c.bf16 %v855_v56, %v854_v48  ;;  %v11905_v0 = vpop.eup %7363  ;;  %v11909_v48 = vmul.f32 0.0051020407, %v10967_v44 }
 0x838   :  { %v3004_v1 = vmax.f32 %v2988_v36, 0.0  ;;  %v3005_v40 = vmax.f32 %v2989_v9, 0.0  ;;  %v1165_v2 = vpop.permute.xlu1 %1164  ;;  %v4028_v44 = vmul.f32 %v11905_v0, %v11869_v32  ;;  %vm4034_vm5 = vweird.f32 %v11905_v0 }
 0x839   :  { %875 = vst.msk [vmem:[#allocation2 + $0x68] sm:$0xff] %vm10284_vm15, %v865_v24  ;;  %v1202_v30 = vmul.f32 %v7511_v62, %v1165_v2  ;;  %v1203_v25 = vmul.f32 %v7512_v57, %v1165_v2  ;;  %7185 = vset.pattern.permute.xlu0 %v13795_v34  ;;  %v7084_v62 = vld [vmem:[#allocation2 + $0x54] sm:$0xf0]  ;;  %v13799_v57 = vld [vmem:[#allocation67_spill] sm:$0xff]  ;;  %vm12008_vm7 = vmor %vm4033_vm6, %vm4034_vm5 }
 0x83a   :  { %v3015_v61 = vpack.c.bf16 %v3005_v40, %v3004_v1 }
 0x83b   :  { %v1258_v54 = vadd.f32 %v13796_v19, %v1202_v30  ;;  %v1259_v15 = vadd.f32 %v13796_v19, %v1203_v25  ;;  %v3320_v60 = vpop.permute.xlu0 %3319  ;;  %v4071_v30 = vsub.f32 1.5, %v4070_v14  ;;  %v13800_v19 = vld [vmem:[#allocation16_spill] sm:$0xff] }
 0x83c   :  { %3025 = vst.msk [vmem:[#allocation2 + $0x1a8] sm:$0xff] %vm10284_vm15, %v3015_v61  ;;  %v3354_v53 = vmul.f32 %v7513_v35, %v3320_v60  ;;  %v3355_v17 = vmul.f32 %v7514_v50, %v3320_v60  ;;  %v7517_v60 = vld [vmem:[%s13339_s0 + $0x3e0] sm:$0xff] }
 0x83d   :  { %v1274_v4 = vmax.f32 %v1258_v54, 0.0  ;;  %v1275_v18 = vmax.f32 %v1259_v15, 0.0  ;;  %v11903_v37 = vpop.permute.xlu2 %3380  ;;  %v4430_v54 = vmul.f32 0.0051020407, %v13800_v19  ;;  %v4438_v15 = vmul.f32 %v11909_v48, %v11909_v48 }
 0x83e   :  { %v3410_v55 = vadd.f32 %v13797_v51, %v3354_v53  ;;  %v3411_v28 = vadd.f32 %v13797_v51, %v3355_v17  ;;  %3324 = vperm.xlu1 %7169, %v13798_v39   ;;  %v7518_v53 = vld [vmem:[%s13339_s0 + $0x3e8] sm:$0xff]  ;;  %v6699_v17 = vld [vmem:[#allocation2 + $0x50] sm:$0xf] }
 0x83f   :  { %v1290_v5 = vpack.c.bf16 %v1275_v18, %v1274_v4  ;;  %v6700_v51 = vor.u32 %v7084_v62, %v6699_v17  ;;  %v7082_v62 = vld [vmem:[#allocation2 + $0x44] sm:$0xf0] }
 0x840   :  { %v3426_v56 = vmax.f32 %v3410_v55, 0.0  ;;  %v3427_v58 = vmax.f32 %v3411_v28, 0.0  ;;  %v1180_v36 = vpop.permute.xlu1 %1179  ;;  %v7086_v9 = vld [vmem:[#allocation2 + $0x64] sm:$0xf0]  ;;  %v4029_v55 = vmul.f32 %v11905_v0, %v4028_v44 }
 0x841   :  { %1300 = vst.msk [vmem:[#allocation2 + $0x80] sm:$0xff] %vm10284_vm15, %v1290_v5  ;;  %v1208_v24 = vmul.f32 %v7515_v21, %v1180_v36  ;;  %v1209_v1 = vmul.f32 %v7516_v27, %v1180_v36  ;;  %v6708_v40 = vor.u32 %v7086_v9, %v6707_v8  ;;  %v13801_v28 = vld [vmem:[#allocation104_spill] sm:$0xff]  ;;  %v6691_v8 = vld [vmem:[#allocation2 + $0x40] sm:$0xf]  ;;  %v7519_v9 = vld [vmem:[%s13340_s1 + $0x270] sm:$0xff] }
 0x842   :  { %v3441_v2 = vpack.c.bf16 %v3427_v58, %v3426_v56  ;;  %v4072_v56 = vmul.f32 %v11859_v59, %v4071_v30  ;;  %v13802_v36 = vld [vmem:[#allocation60_spill] sm:$0xff]  ;;  %v6692_v19 = vor.u32 %v7082_v62, %v6691_v8  ;;  %v4030_v22 = vmul.f32 0.5, %v4029_v55  ;;  %v11976_v55 = vld [vmem:[%s13340_s1 + $0x260] sm:$0xff]  ;;  %v7522_v30 = vld [vmem:[%s13339_s0 + $0x190] sm:$0xff] }
 0x843   :  { %v1264_v25 = vadd.f32 %v13799_v57, %v1208_v24  ;;  %v1265_v61 = vadd.f32 %v13799_v57, %v1209_v1  ;;  %v3345_v26 = vpop.permute.xlu0 %3344  ;;  %5582 = vmatpush.bf16.msra.mxu0 %v6708_v40  ;;  %v13803_v24 = vld [vmem:[#allocation18_spill] sm:$0xff]  ;;  %v4446_v1 = vsub.f32 %v4430_v54, %v4438_v15  ;;  %v7520_v57 = vld [vmem:[%s13339_s0 + $0x150] sm:$0xff]  ;;  %v6675_v8 = vld [vmem:[#allocation2 + $0x20] sm:$0xf] }
 0x844   :  { %3451 = vst.msk [vmem:[#allocation2 + $0x1c8] sm:$0xff] %vm10284_vm15, %v3441_v2  ;;  %v3364_v35 = vmul.f32 %v7517_v60, %v3345_v26  ;;  %v3365_v50 = vmul.f32 %v7518_v53, %v3345_v26  ;;  %v11945_v27 = vmul.f32 0.0051020407, %v13803_v24  ;;  %v7080_v15 = vld [vmem:[#allocation2 + $0x34] sm:$0xf0]  ;;  %v13806_v60 = vld [vmem:[#allocation61_spill] sm:$0xff] }
 0x845   :  { %v1280_v4 = vmax.f32 %v1264_v25, 0.0  ;;  %v1281_v18 = vmax.f32 %v1265_v61, 0.0  ;;  %v4153_v39 = vpop.permute.xlu2 %4152  ;;  %v7521_v61 = vld [vmem:[%s13339_s0 + $0x158] sm:$0xff] }
 0x846   :  { %v3420_v14 = vadd.f32 %v13801_v28, %v3364_v35  ;;  %v3421_v5 = vadd.f32 %v13801_v28, %v3365_v50  ;;  %3334 = vperm.xlu1 %7169, %v13802_v36   ;;  %v4170_v21 = vsub.f32 %v7519_v9, %v4153_v39  ;;  %v4076_v50 = vsel %vm11951_vm4, %v11859_v59, %v4072_v56  ;;  %v13808_v56 = vld [vmem:[#allocation17_spill] sm:$0xff]  ;;  %v13809_v9 = vld [vmem:[#allocation71_spill] sm:$0xff] }
 0x847   :  { %v1293_v58 = vpack.c.bf16 %v1281_v18, %v1280_v4  ;;  %5583 = vmatpush.bf16.msra.mxu0 %v6700_v51  ;;  %v4435_v17 = vmul.f32 %v11945_v27, %v11945_v27  ;;  %v13807_v4 = vld [vmem:[#allocation39_spill] sm:$0xff]  ;;  %v6683_v51 = vld [vmem:[#allocation2 + $0x30] sm:$0xf]  ;;  %v11978_v28 = vadd.f32 1e-05, %v4446_v1  ;;  %v4031_v59 = vsub.f32 1.5, %v4030_v22 }
 0x848   :  { %v3436_v40 = vmax.f32 %v3420_v14, 0.0  ;;  %v3437_v44 = vmax.f32 %v3421_v5, 0.0  ;;  %v1190_v2 = vpop.permute.xlu1 %1189  ;;  %4260 = vperm.xlu2 %7167, %v4170_v21   ;;  %v4427_v18 = vmul.f32 0.0051020407, %v13807_v4  ;;  %v6684_v39 = vor.u32 %v7080_v15, %v6683_v51 }
 0x849   :  { %1303 = vst.msk [vmem:[#allocation2 + $0x98] sm:$0xff] %vm10284_vm15, %v1293_v58  ;;  %v1212_v25 = vmul.f32 %v7520_v57, %v1190_v2  ;;  %v1213_v26 = vmul.f32 %v7521_v61, %v1190_v2  ;;  %v11981_v58 = vmul.f32 0.0051020407, %v13808_v56  ;;  %v4120_v21 = vmul.f32 %v11976_v55, %v4076_v50  ;;  %v7076_v50 = vld [vmem:[#allocation2 + $0x14] sm:$0xf0] }
 0x84a   :  { %v3446_v54 = vpack.c.bf16 %v3437_v44, %v3436_v40  ;;  %v4443_v24 = vsub.f32 %v4427_v18, %v4435_v17  ;;  %v7078_v40 = vld [vmem:[#allocation2 + $0x24] sm:$0xf0]  ;;  %7365 = vrsqrt.f32 %v11978_v28  ;;  %v13810_v44 = vmov 0  }
 0x84b   :  { %v1268_v35 = vadd.f32 %v13806_v60, %v1212_v25  ;;  %v1269_v53 = vadd.f32 %v13806_v60, %v1213_v26  ;;  %5584 = vmatpush.bf16.msra.mxu0 %v6692_v19  ;;  %v6676_v2 = vor.u32 %v7078_v40, %v6675_v8  ;;  %v4032_v62 = vmul.f32 %v11905_v0, %v4031_v59  ;;  %v7523_v25 = vld [vmem:[%s13339_s0 + $0x198] sm:$0xff]  ;;  %v6667_v26 = vld [vmem:[#allocation2 + $0x10] sm:$0xf]  ;;  %v13812_v60 = vld [vmem:[#allocation79_spill] sm:$0xff] }
 0x84c   :  { %3456 = vst.msk [vmem:[#allocation2 + $0x1f0] sm:$0xff] %vm10284_vm15, %v3446_v54  ;;  %v3574_v19 = vmul.f32 %v11981_v58, %v11981_v58  ;;  %v12000_v22 = vadd.f32 1e-05, %v4443_v24  ;;  %v13811_v54 = vld [vmem:[#allocation4_spill] sm:$0xff]  ;;  %v4128_v17 = vmul.f32 %v4120_v21, %v11745_v43  ;;  %v6668_v18 = vor.u32 %v7076_v50, %v6667_v26  ;;  %v12018_v59 = vld [vmem:[%s13340_s1 + $0x240] sm:$0xff]  ;;  %v13815_v26 = vld [vmem:[#allocation81_spill] sm:$0xff] }
 0x84d   :  { %v1284_v14 = vmax.f32 %v1268_v35, 0.0  ;;  %v1285_v5 = vmax.f32 %v1269_v53, 0.0  ;;  %v3566_v15 = vmul.f32 0.0051020407, %v13811_v54  ;;  %v4151_v32 = vpop.permute.xlu2 %4150  ;;  %vm4513_vm9 = vweird.f32 %v11978_v28 }
 0x84e   :  { %3349 = vperm.xlu1 %7169, %v13809_v9   ;;  %7367 = vrsqrt.f32 %v12000_v22  ;;  %v7524_v9 = vld [vmem:[%s13340_s1 + $0x268] sm:$0xff]  ;;  %vm4483_vm11 = vweird.f32 %v12000_v22 }
 0x84f   :  { %v1295_v36 = vpack.c.bf16 %v1285_v5, %v1284_v14  ;;  %5585 = vmatpush.bf16.msra.mxu0 %v6684_v39  ;;  %v6659_v5 = vld [vmem:[#allocation2] sm:$0xf]  ;;  %v4036_v39 = vsel %vm12008_vm7, %v11905_v0, %v4032_v62  ;;  %v3582_v8 = vsub.f32 %v3566_v15, %v3574_v19  ;;  %v4169_v0 = vsub.f32 %v7524_v9, %v4151_v32 }
 0x850   :  { %v1600_v1 = vpop.permute.xlu1 %1599  ;;  %7171 = vset.pattern.permute.xlu2 %v13810_v44  ;;  %v12020_v43 = vpop.eup %7365  ;;  %v4116_v40 = vmul.f32 %v12018_v59, %v4036_v39  ;;  %v13816_v39 = vld [vmem:[#allocation83_spill] sm:$0xff] }
 0x851   :  { %1305 = vst.msk [vmem:[#allocation2 + $0xa8] sm:$0xff] %vm10284_vm15, %v1295_v36  ;;  %v1634_v57 = vmul.f32 %v7522_v30, %v1600_v1  ;;  %v1635_v61 = vmul.f32 %v7523_v25, %v1600_v1  ;;  %4194 = vperm.xlu2 %7171, %v4120_v21   ;;  %v7074_v36 = vld [vmem:[#allocation2 + $0x4] sm:$0xf0]  ;;  %v4508_v1 = vmul.f32 %v12020_v43, %v11978_v28  ;;  %v7526_v30 = vld [vmem:[%s13339_s0 + $0x1b8] sm:$0xff]  ;;  %v12039_v25 = vadd.f32 1e-05, %v3582_v8 }
 0x852   :  { %v6660_v24 = vor.u32 %v7074_v36, %v6659_v5  ;;  %v4124_v15 = vmul.f32 %v4116_v40, %v11808_v63  ;;  %v7527_v63 = vld [vmem:[%s13339_s0 + $0x1e0] sm:$0xff]  ;;  %v3701_v36 = vmul.f32 %v11747_v31, %v11105_v7  ;;  %vm4514_vm8 = vweird.f32 %v12020_v43 }
 0x853   :  { %5586 = vmatpush.bf16.msra.mxu0 %v6676_v2  ;;  %v1690_v35 = vadd.f32 %v13812_v60, %v1634_v57  ;;  %v1691_v53 = vadd.f32 %v13812_v60, %v1635_v61  ;;  %v7525_v2 = vld [vmem:[%s13339_s0 + $0x1b0] sm:$0xff]  ;;  %v12041_v61 = vpop.permute.xlu0 %4154  ;;  %7369 = vrsqrt.f32 %v12039_v25  ;;  %v7529_v7 = vld [vmem:[%s13339_s0 + $0x200] sm:$0xff]  ;;  %vm4515_vm10 = vmor %vm4513_vm9, %vm4514_vm8  ;;  %vm3613_vm14 = vweird.f32 %v12039_v25 }
 0x854   :  { %v12046_v60 = vpop.eup %7367 }
 0x855   :  { %v1706_v51 = vmax.f32 %v1690_v35, 0.0  ;;  %v1707_v14 = vmax.f32 %v1691_v53, 0.0  ;;  %v4509_v35 = vmul.f32 %v12020_v43, %v4508_v1  ;;  %v4478_v4 = vmul.f32 %v12046_v60, %v12000_v22  ;;  %v12097_v28 = vpop.permute.xlu2 %4146  ;;  %v7531_v22 = vld [vmem:[%s13339_s0 + $0x230] sm:$0xff] }
 0x856   :  { %4148 = vrot.lane.b32.xlu1 %v4128_v17, %s7618_s26  ;;  %vm4484_vm12 = vweird.f32 %v12046_v60 }
 0x857   :  { %5587 = vmatpush.bf16.msra.mxu0 %v6668_v18  ;;  %v1721_v56 = vpack.c.bf16 %v1707_v14, %v1706_v51  ;;  %v4510_v32 = vmul.f32 0.5, %v4509_v35  ;;  %v7528_v14 = vld [vmem:[%s13339_s0 + $0x1e8] sm:$0xff]  ;;  %v4479_v9 = vmul.f32 %v12046_v60, %v4478_v4  ;;  %vm12106_vm13 = vmor %vm4483_vm11, %vm4484_vm12 }
 0x858   :  { %v1610_v21 = vpop.permute.xlu1 %1609 }
 0x859   :  { %1731 = vst.msk [vmem:[#allocation2 + $0xc8] sm:$0xff] %vm10284_vm15, %v1721_v56  ;;  %v1638_v62 = vmul.f32 %v7525_v2, %v1610_v21  ;;  %v1639_v57 = vmul.f32 %v7526_v30, %v1610_v21  ;;  %7173 = vset.pattern.permute.xlu2 %v13795_v34  ;;  %v4511_v21 = vsub.f32 1.5, %v4510_v32  ;;  %v4480_v30 = vmul.f32 0.5, %v4479_v9  ;;  %v7532_v9 = vld [vmem:[%s13339_s0 + $0x238] sm:$0xff] }
 0x85a   :  { %4255 = vperm.xlu2 %7173, %v4169_v0   ;;  %v12068_v0 = vpop.eup %7369 }
 0x85b   :  { %5588 = vmatpush.bf16.msra.mxu0 %v6660_v24  ;;  %v1694_v19 = vadd.f32 %v13815_v26, %v1638_v62  ;;  %v1695_v54 = vadd.f32 %v13815_v26, %v1639_v57  ;;  %v12070_v24 = vpop.permute.xlu0 %4144  ;;  %v3608_v57 = vmul.f32 %v12068_v0, %v12039_v25  ;;  %v4512_v26 = vmul.f32 %v12020_v43, %v4511_v21  ;;  %v6755_v25 = vld [vmem:[#allocation2 + $0xc0] sm:$0xf] }
 0x85c   :  { %vm3614_vm1 = vweird.f32 %v12068_v0 }
 0x85d   :  { %v1710_v53 = vmax.f32 %v1694_v19, 0.0  ;;  %v1711_v50 = vmax.f32 %v1695_v54, 0.0  ;;  %v7530_v19 = vld [vmem:[%s13339_s0 + $0x208] sm:$0xff]  ;;  %v3609_v4 = vmul.f32 %v12068_v0, %v3608_v57  ;;  %v4516_v32 = vsel %vm4515_vm10, %v12020_v43, %v4512_v26  ;;  %v7104_v43 = vld [vmem:[#allocation2 + $0xf4] sm:$0xf0]  ;;  %v13820_v57 = vld [vmem:[#allocation87_spill] sm:$0xff] }
 0x85e   :  { %4140 = vrot.lane.b32.xlu1 %v4124_v15, %s7618_s26  ;;  %v13817_v15 = vld [vmem:[#allocation85_spill] sm:$0xff]  ;;  %vm12151_vm2 = vmor %vm3613_vm14, %vm3614_vm1 }
 0x85f   :  { %v1723_v17 = vpack.c.bf16 %v1711_v50, %v1710_v53  ;;  %v4481_v50 = vsub.f32 1.5, %v4480_v30  ;;  %v7102_v30 = vld [vmem:[#allocation2 + $0xe4] sm:$0xf0] }
 0x860   :  { %v1625_v18 = vpop.permute.xlu1 %1624 }
 0x861   :  { %1733 = vst.msk [vmem:[#allocation2 + $0xd8] sm:$0xff] %vm10284_vm15, %v1723_v17  ;;  %v1644_v51 = vmul.f32 %v7527_v63, %v1625_v18  ;;  %v1645_v5 = vmul.f32 %v7528_v14, %v1625_v18  ;;  %v3698_v17 = vmul.f32 %v11805_v47, %v10979_v41  ;;  %v12094_v18 = vld [vmem:[%s13340_s1 + $0x2a8] sm:$0xff] }
 0x862   :  { %7174 = vset.pattern.permute.xlu2 %v13810_v44  ;;  %v12104_v14 = vmul.f32 %v12094_v18, %v4516_v32  ;;  %v6763_v32 = vld [vmem:[#allocation2 + $0xd0] sm:$0xf] }
 0x863   :  { %v1700_v8 = vadd.f32 %v13816_v39, %v1644_v51  ;;  %v1701_v56 = vadd.f32 %v13816_v39, %v1645_v5  ;;  %4189 = vperm.xlu2 %7174, %v11298_v52   ;;  %v4143_v41 = vpop.permute.xlu0 %4142 }
 0x865   :  { %v1716_v1 = vmax.f32 %v1700_v8, 0.0  ;;  %v1717_v2 = vmax.f32 %v1701_v56, 0.0  ;;  %v3610_v56 = vmul.f32 0.5, %v3609_v4  ;;  %v7536_v8 = vld [vmem:[%s13340_s1 + $0x230] sm:$0xff] }
 0x866   :  { %3724 = vrot.lane.b32.xlu1 %v3701_v36, %s7618_s26 }
 0x867   :  { %v1726_v62 = vpack.c.bf16 %v1717_v2, %v1716_v1  ;;  %v7533_v2 = vld [vmem:[%s13340_s1 + $0x248] sm:$0xff] }
 0x868   :  { %v2025_v52 = vpop.permute.xlu1 %2024 }
 0x869   :  { %1736 = vst.msk [vmem:[#allocation2 + $0xf0] sm:$0xff] %vm10284_vm15, %v1726_v62  ;;  %v2062_v31 = vmul.f32 %v7529_v7, %v2025_v52  ;;  %v2063_v54 = vmul.f32 %v7530_v19, %v2025_v52  ;;  %v4165_v62 = vsub.f32 %v7533_v2, %v4143_v41  ;;  %v4559_v7 = vmul.f32 %v12104_v14, %v11909_v48  ;;  %v3723_v48 = vpop.permute.xlu2 %3722  ;;  %v7534_v41 = vld [vmem:[%s13339_s0 + $0x250] sm:$0xff] }
 0x86b   :  { %v2118_v35 = vadd.f32 %v13817_v15, %v2062_v31  ;;  %v2119_v53 = vadd.f32 %v13817_v15, %v2063_v54  ;;  %4174 = vperm.xlu2 %7174, %v4116_v40   ;;  %v4482_v40 = vmul.f32 %v12046_v60, %v4481_v50  ;;  %v6771_v31 = vld [vmem:[#allocation2 + $0xe0] sm:$0xf]  ;;  %v3611_v54 = vsub.f32 1.5, %v3610_v56  ;;  %v12132_v50 = vld [vmem:[%s13340_s1 + $0x290] sm:$0xff] }
 0x86c   :  { %v3740_v56 = vsub.f32 %v7536_v8, %v3723_v48  ;;  %v13824_v48 = vld [vmem:[#allocation90_spill] sm:$0xff]  ;;  %v6731_v8 = vld [vmem:[#allocation2 + $0x90] sm:$0xf] }
 0x86d   :  { %v2134_v63 = vmax.f32 %v2118_v35, 0.0  ;;  %v2135_v51 = vmax.f32 %v2119_v53, 0.0  ;;  %v4486_v19 = vsel %vm12106_vm13, %v12046_v60, %v4482_v40  ;;  %v6772_v53 = vor.u32 %v7102_v30, %v6771_v31  ;;  %v7535_v40 = vld [vmem:[%s13339_s0 + $0x258] sm:$0xff] }
 0x86e   :  { %3718 = vrot.lane.b32.xlu1 %v3698_v17, %s7618_s26  ;;  %v7100_v17 = vld [vmem:[#allocation2 + $0xd4] sm:$0xf0] }
 0x86f   :  { %v2150_v47 = vpack.c.bf16 %v2135_v51, %v2134_v63  ;;  %v12138_v63 = vmul.f32 %v12132_v50, %v4486_v19  ;;  %v3612_v51 = vmul.f32 %v12068_v0, %v3611_v54  ;;  %v7096_v31 = vld [vmem:[#allocation2 + $0xb4] sm:$0xf0] }
 0x870   :  { %v2040_v5 = vpop.permute.xlu1 %2039  ;;  %v6779_v39 = vld [vmem:[#allocation2 + $0xf0] sm:$0xf] }
 0x871   :  { %2160 = vst.msk [vmem:[#allocation2 + $0x100] sm:$0xff] %vm10284_vm15, %v2150_v47  ;;  %v2068_v36 = vmul.f32 %v7531_v22, %v2040_v5  ;;  %v2069_v21 = vmul.f32 %v7532_v9, %v2040_v5  ;;  %v6780_v1 = vor.u32 %v7104_v43, %v6779_v39  ;;  %v6764_v39 = vor.u32 %v7100_v17, %v6763_v32  ;;  %v7098_v22 = vld [vmem:[#allocation2 + $0xc4] sm:$0xf0] }
 0x872   :  { %v6756_v30 = vor.u32 %v7098_v22, %v6755_v25  ;;  %v7094_v17 = vld [vmem:[#allocation2 + $0xa4] sm:$0xf0]  ;;  %v7540_v22 = vld [vmem:[%s13339_s0 + $0x2b8] sm:$0xff] }
 0x873   :  { %v2124_v52 = vadd.f32 %v13820_v57, %v2068_v36  ;;  %v2125_v26 = vadd.f32 %v13820_v57, %v2069_v21  ;;  %5630 = vmatpush.bf16.msra.mxu1 %v6780_v1  ;;  %7177 = vset.pattern.permute.xlu2 %v13795_v34  ;;  %v13823_v36 = vld [vmem:[#allocation89_spill] sm:$0xff]  ;;  %v4556_v1 = vmul.f32 %v12138_v63, %v11945_v27 }
 0x874   :  { %4235 = vperm.xlu2 %7177, %v4165_v62   ;;  %v3616_v57 = vsel %vm12151_vm2, %v12068_v0, %v3612_v51  ;;  %v7537_v0 = vld [vmem:[%s13339_s0 + $0x280] sm:$0xff] }
 0x875   :  { %v2140_v15 = vmax.f32 %v2124_v52, 0.0  ;;  %v2141_v35 = vmax.f32 %v2125_v26, 0.0  ;;  %v12168_v52 = vld [vmem:[%s13340_s1 + $0x208] sm:$0xff]  ;;  %v6747_v26 = vld [vmem:[#allocation2 + $0xb0] sm:$0xf] }
 0x876   :  { %4580 = vrot.lane.b32.xlu1 %v4559_v7, %s7618_s26  ;;  %v12172_v19 = vmul.f32 %v12168_v52, %v3616_v57  ;;  %v6739_v51 = vld [vmem:[#allocation2 + $0xa0] sm:$0xf] }
 0x877   :  { %v2153_v4 = vpack.c.bf16 %v2141_v35, %v2140_v15  ;;  %5631 = vmatpush.bf16.msra.mxu1 %v6772_v53  ;;  %v7538_v15 = vld [vmem:[%s13339_s0 + $0x288] sm:$0xff]  ;;  %v6748_v53 = vor.u32 %v7096_v31, %v6747_v26 }
 0x878   :  { %v2050_v60 = vpop.permute.xlu1 %2049  ;;  %v3695_v32 = vmul.f32 %v12172_v19, %v11981_v58  ;;  %v7539_v58 = vld [vmem:[%s13339_s0 + $0x2b0] sm:$0xff] }
 0x879   :  { %2163 = vst.msk [vmem:[#allocation2 + $0x118] sm:$0xff] %vm10284_vm15, %v2153_v4  ;;  %v2072_v47 = vmul.f32 %v7534_v41, %v2050_v60  ;;  %v2073_v5 = vmul.f32 %v7535_v40, %v2050_v60  ;;  %v6740_v40 = vor.u32 %v7094_v17, %v6739_v51 }
 0x87b   :  { %v2128_v9 = vadd.f32 %v13823_v36, %v2072_v47  ;;  %v2129_v21 = vadd.f32 %v13823_v36, %v2073_v5  ;;  %5632 = vmatpush.bf16.msra.mxu1 %v6764_v39  ;;  %v7092_v5 = vld [vmem:[#allocation2 + $0x94] sm:$0xf0] }
 0x87c   :  { %3830 = vperm.xlu2 %7177, %v3740_v56   ;;  %v6732_v36 = vor.u32 %v7092_v5, %v6731_v8 }
 0x87d   :  { %v2144_v2 = vmax.f32 %v2128_v9, 0.0  ;;  %v2145_v62 = vmax.f32 %v2129_v21, 0.0  ;;  %v6723_v9 = vld [vmem:[#allocation2 + $0x80] sm:$0xf] }
 0x87e   :  { %4574 = vrot.lane.b32.xlu1 %v4556_v1, %s7618_s26  ;;  %v13825_v21 = vld [vmem:[#allocation91_spill] sm:$0xff] }
 0x87f   :  { %v2155_v7 = vpack.c.bf16 %v2145_v62, %v2144_v2  ;;  %5633 = vmatpush.bf16.msra.mxu1 %v6756_v30  ;;  %v7090_v2 = vld [vmem:[#allocation2 + $0x84] sm:$0xf0] }
 0x880   :  { %v2455_v27 = vpop.permute.xlu1 %2454  ;;  %v6724_v57 = vor.u32 %v7090_v2, %v6723_v9  ;;  %v7547_v9 = vld [vmem:[%s13339_s0 + $0x338] sm:$0xff]  ;;  %v13828_v2 = vld [vmem:[#allocation97_spill] sm:$0xff] }
 0x881   :  { %2165 = vst.msk [vmem:[#allocation2 + $0x128] sm:$0xff] %vm10284_vm15, %v2155_v7  ;;  %v2492_v54 = vmul.f32 %v7537_v0, %v2455_v27  ;;  %v2493_v35 = vmul.f32 %v7538_v15, %v2455_v27  ;;  %v7541_v27 = vld [vmem:[%s13339_s0 + $0x2d0] sm:$0xff]  ;;  %v7542_v0 = vld [vmem:[%s13339_s0 + $0x2d8] sm:$0xff] }
 0x882   :  { %v13826_v15 = vld [vmem:[#allocation93_spill] sm:$0xff] }
 0x883   :  { %v2548_v4 = vadd.f32 %v13824_v48, %v2492_v54  ;;  %v2549_v60 = vadd.f32 %v13824_v48, %v2493_v35  ;;  %5634 = vmatpush.bf16.msra.mxu1 %v6748_v53  ;;  %v7543_v35 = vld [vmem:[%s13340_s1 + $0x278] sm:$0xff] }
 0x884   :  { %7179 = vset.pattern.permute.xlu2 %v13810_v44  ;;  %v4171_v53 = vsub.f32 %v7543_v35, %v12041_v61  ;;  %v7545_v61 = vld [vmem:[%s13339_s0 + $0x318] sm:$0xff] }
 0x885   :  { %v2564_v41 = vmax.f32 %v2548_v4, 0.0  ;;  %v2565_v47 = vmax.f32 %v2549_v60, 0.0  ;;  %4634 = vperm.xlu2 %7179, %v11320_v11  }
 0x886   :  { %3712 = vrot.lane.b32.xlu1 %v3695_v32, %s7618_s26  ;;  %v7544_v32 = vld [vmem:[%s13339_s0 + $0x310] sm:$0xff] }
 0x887   :  { %v2580_v39 = vpack.c.bf16 %v2565_v47, %v2564_v41  ;;  %5635 = vmatpush.bf16.msra.mxu1 %v6740_v40  ;;  %v13827_v47 = vld [vmem:[#allocation95_spill] sm:$0xff] }
 0x888   :  { %v2470_v43 = vpop.permute.xlu1 %2469 }
 0x889   :  { %2590 = vst.msk [vmem:[#allocation2 + $0x140] sm:$0xff] %vm10284_vm15, %v2580_v39  ;;  %v2498_v56 = vmul.f32 %v7539_v58, %v2470_v43  ;;  %v2499_v11 = vmul.f32 %v7540_v22, %v2470_v43 }
 0x88b   :  { %v2554_v1 = vadd.f32 %v13825_v21, %v2498_v56  ;;  %v2555_v25 = vadd.f32 %v13825_v21, %v2499_v11  ;;  %5636 = vmatpush.bf16.msra.mxu1 %v6732_v36  ;;  %v6835_v56 = vld [vmem:[#allocation2 + $0x160] sm:$0xf]  ;;  %v7546_v11 = vld [vmem:[%s13339_s0 + $0x330] sm:$0xff] }
 0x88d   :  { %v2570_v62 = vmax.f32 %v2554_v1, 0.0  ;;  %v2571_v30 = vmax.f32 %v2555_v25, 0.0  ;;  %3769 = vperm.xlu2 %7179, %v11390_v13  }
 0x88e   :  { %4204 = vperm.xlu1 %7169, %v11089_v10  }
 0x88f   :  { %v2583_v26 = vpack.c.bf16 %v2571_v30, %v2570_v62  ;;  %5637 = vmatpush.bf16.msra.mxu1 %v6724_v57  ;;  %v6827_v30 = vld [vmem:[#allocation2 + $0x150] sm:$0xf] }
 0x890   :  { %v2480_v7 = vpop.permute.xlu1 %2479 }
 0x891   :  { %2593 = vst.msk [vmem:[#allocation2 + $0x158] sm:$0xff] %vm10284_vm15, %v2583_v26  ;;  %v2502_v31 = vmul.f32 %v7541_v27, %v2480_v7  ;;  %v2503_v54 = vmul.f32 %v7542_v0, %v2480_v7  ;;  %v6819_v27 = vld [vmem:[#allocation2 + $0x140] sm:$0xf] }
 0x893   :  { %v2558_v13 = vadd.f32 %v13826_v15, %v2502_v31  ;;  %v2559_v10 = vadd.f32 %v13826_v15, %v2503_v54  ;;  %v7114_v54 = vld [vmem:[#allocation2 + $0x144] sm:$0xf0]  ;;  %v7548_v15 = vld [vmem:[%s13339_s0 + $0x360] sm:$0xff] }
 0x895   :  { %v2574_v17 = vmax.f32 %v2558_v13, 0.0  ;;  %v2575_v48 = vmax.f32 %v2559_v10, 0.0  ;;  %7182 = vset.pattern.permute.xlu2 %v13795_v34  ;;  %v7549_v10 = vld [vmem:[%s13339_s0 + $0x368] sm:$0xff] }
 0x896   :  { %7170 = vset.pattern.permute.xlu1 %v13795_v34 }
 0x897   :  { %v2585_v4 = vpack.c.bf16 %v2575_v48, %v2574_v17  ;;  %4265 = vperm.xlu1 %7170, %v4171_v53   ;;  %v6820_v53 = vor.u32 %v7114_v54, %v6819_v27  ;;  %v6811_v17 = vld [vmem:[#allocation2 + $0x130] sm:$0xf]  ;;  %v13829_v48 = vld [vmem:[#allocation99_spill] sm:$0xff] }
 0x898   :  { %v2890_v60 = vpop.permute.xlu1 %2889  ;;  %v7116_v25 = vld [vmem:[#allocation2 + $0x154] sm:$0xf0] }
 0x899   :  { %2595 = vst.msk [vmem:[#allocation2 + $0x168] sm:$0xff] %vm10284_vm15, %v2585_v4  ;;  %v2924_v51 = vmul.f32 %v7544_v32, %v2890_v60  ;;  %v2925_v41 = vmul.f32 %v7545_v61, %v2890_v60  ;;  %v6828_v7 = vor.u32 %v7116_v25, %v6827_v30  ;;  %v7112_v60 = vld [vmem:[#allocation2 + $0x134] sm:$0xf0] }
 0x89a   :  { %v6812_v61 = vor.u32 %v7112_v60, %v6811_v17 }
 0x89b   :  { %v2980_v40 = vadd.f32 %v13827_v47, %v2924_v51  ;;  %v2981_v5 = vadd.f32 %v13827_v47, %v2925_v41  ;;  %v7110_v41 = vld [vmem:[#allocation2 + $0x124] sm:$0xf0]  ;;  %v7550_v47 = vld [vmem:[%s13340_s1 + $0x250] sm:$0xff] }
 0x89d   :  { %v2996_v39 = vmax.f32 %v2980_v40, 0.0  ;;  %v2997_v43 = vmax.f32 %v2981_v5, 0.0  ;;  %v4166_v40 = vsub.f32 %v7550_v47, %v12070_v24 }
 0x89f   :  { %v3011_v8 = vpack.c.bf16 %v2997_v43, %v2996_v39  ;;  %7172 = vset.pattern.permute.xlu1 %v13810_v44  ;;  %v6803_v43 = vld [vmem:[#allocation2 + $0x120] sm:$0xf] }
 0x8a0   :  { %v2900_v58 = vpop.permute.xlu1 %2899  ;;  %4199 = vperm.xlu1 %7172, %v11190_v42   ;;  %v7118_v22 = vld [vmem:[#allocation2 + $0x164] sm:$0xf0]  ;;  %v6804_v24 = vor.u32 %v7110_v41, %v6803_v43  ;;  %v7556_v41 = vld [vmem:[%s13339_s0 + $0x3f8] sm:$0xff] }
 0x8a1   :  { %3021 = vst.msk [vmem:[#allocation2 + $0x188] sm:$0xff] %vm10284_vm15, %v3011_v8  ;;  %v2928_v36 = vmul.f32 %v7546_v11, %v2900_v58  ;;  %v2929_v21 = vmul.f32 %v7547_v9, %v2900_v58  ;;  %v6836_v1 = vor.u32 %v7118_v22, %v6835_v56  ;;  %v7551_v8 = vld [vmem:[%s13339_s0 + $0x3a0] sm:$0xff]  ;;  %v7552_v56 = vld [vmem:[%s13339_s0 + $0x3a8] sm:$0xff]  ;;  %v7108_v11 = vld [vmem:[#allocation2 + $0x114] sm:$0xf0] }
 0x8a3   :  { %v2984_v62 = vadd.f32 %v13828_v2, %v2928_v36  ;;  %v2985_v42 = vadd.f32 %v13828_v2, %v2929_v21  ;;  %5680 = vmatpush.bf16.msra.mxu2 %v6836_v1  ;;  %v6795_v21 = vld [vmem:[#allocation2 + $0x110] sm:$0xf] }
 0x8a4   :  { %v6796_v2 = vor.u32 %v7108_v11, %v6795_v21 }
 0x8a5   :  { %v3000_v57 = vmax.f32 %v2984_v62, 0.0  ;;  %v3001_v26 = vmax.f32 %v2985_v42, 0.0  ;;  %v12265_v62 = vpop.permute.xlu2 %4584  ;;  %v6787_v42 = vld [vmem:[#allocation2 + $0x100] sm:$0xf] }
 0x8a7   :  { %v3013_v31 = vpack.c.bf16 %v3001_v26, %v3000_v57  ;;  %5681 = vmatpush.bf16.msra.mxu2 %v6828_v7  ;;  %v6717_v57 = vld [vmem:[#allocation2 + $0x78] sm:$0xf0]  ;;  %v7106_v7 = vld [vmem:[#allocation2 + $0x104] sm:$0xf0] }
 0x8a8   :  { %v2915_v0 = vpop.permute.xlu1 %2914  ;;  %4184 = vperm.xlu1 %7172, %v11192_v46   ;;  %v6788_v54 = vor.u32 %v7106_v7, %v6787_v42  ;;  %v7077_v42 = vld [vmem:[#allocation2 + $0x24] sm:$0xf] }
 0x8a9   :  { %3023 = vst.msk [vmem:[#allocation2 + $0x198] sm:$0xff] %vm10284_vm15, %v3013_v31  ;;  %v2934_v13 = vmul.f32 %v7548_v15, %v2915_v0  ;;  %v2935_v35 = vmul.f32 %v7549_v10, %v2915_v0  ;;  %v7554_v31 = vld [vmem:[%s13339_s0 + $0x3c8] sm:$0xff]  ;;  %v7087_v15 = vld [vmem:[#allocation2 + $0x74] sm:$0xf] }
 0x8ab   :  { %v2990_v4 = vadd.f32 %v13829_v48, %v2934_v13  ;;  %v2991_v46 = vadd.f32 %v13829_v48, %v2935_v35  ;;  %5682 = vmatpush.bf16.msra.mxu2 %v6820_v53  ;;  %v6720_v13 = vor.u32 %v7087_v15, %v6717_v57  ;;  %v6709_v53 = vld [vmem:[#allocation2 + $0x68] sm:$0xf0] }
 0x8ad   :  { %v3006_v32 = vmax.f32 %v2990_v4, 0.0  ;;  %v3007_v51 = vmax.f32 %v2991_v46, 0.0  ;;  %v7085_v4 = vld [vmem:[#allocation2 + $0x64] sm:$0xf] }
 0x8ae   :  { %v6712_v46 = vor.u32 %v7085_v4, %v6709_v53  ;;  %v6661_v4 = vld [vmem:[#allocation2 + $0x8] sm:$0xf0] }
 0x8af   :  { %v3016_v5 = vpack.c.bf16 %v3007_v51, %v3006_v32  ;;  %5683 = vmatpush.bf16.msra.mxu2 %v6812_v61  ;;  %v6701_v32 = vld [vmem:[#allocation2 + $0x58] sm:$0xf0]  ;;  %v12279_v51 = vpop.permute.xlu2 %4578 }
 0x8b0   :  { %v3325_v39 = vpop.permute.xlu1 %3324  ;;  %7175 = vset.pattern.permute.xlu1 %v13795_v34 }
 0x8b1   :  { %3026 = vst.msk [vmem:[#allocation2 + $0x1b0] sm:$0xff] %vm10284_vm15, %v3016_v5  ;;  %v3356_v58 = vmul.f32 %v7551_v8, %v3325_v39  ;;  %v3357_v22 = vmul.f32 %v7552_v56, %v3325_v39  ;;  %4240 = vperm.xlu1 %7175, %v4166_v40   ;;  %v7083_v40 = vld [vmem:[#allocation2 + $0x54] sm:$0xf]  ;;  %v13830_v39 = vld [vmem:[#allocation14_spill] sm:$0xff] }
 0x8b2   :  { %v6704_v5 = vor.u32 %v7083_v40, %v6701_v32  ;;  %v6883_v40 = vld [vmem:[#allocation2 + $0x1c0] sm:$0xf] }
 0x8b3   :  { %v3412_v36 = vadd.f32 %v11903_v37, %v3356_v58  ;;  %v3413_v9 = vadd.f32 %v11903_v37, %v3357_v22  ;;  %5684 = vmatpush.bf16.msra.mxu2 %v6804_v24  ;;  %v7553_v37 = vld [vmem:[%s13339_s0 + $0x3c0] sm:$0xff]  ;;  %v6693_v24 = vld [vmem:[#allocation2 + $0x48] sm:$0xf0] }
 0x8b4   :  { %v7081_v58 = vld [vmem:[#allocation2 + $0x44] sm:$0xf] }
 0x8b5   :  { %v3428_v1 = vmax.f32 %v3412_v36, 0.0  ;;  %v3429_v25 = vmax.f32 %v3413_v9, 0.0  ;;  %v6696_v11 = vor.u32 %v7081_v58, %v6693_v24  ;;  %v6685_v9 = vld [vmem:[#allocation2 + $0x38] sm:$0xf0]  ;;  %v7560_v24 = vld [vmem:[%s13340_s1 + $0x220] sm:$0xff] }
 0x8b7   :  { %v3442_v30 = vpack.c.bf16 %v3429_v25, %v3428_v1  ;;  %5685 = vmatpush.bf16.msra.mxu2 %v6796_v2  ;;  %v7079_v1 = vld [vmem:[#allocation2 + $0x34] sm:$0xf]  ;;  %v12295_v25 = vpop.permute.xlu2 %3716 }
 0x8b8   :  { %v3335_v26 = vpop.permute.xlu1 %3334  ;;  %v6688_v2 = vor.u32 %v7079_v1, %v6685_v9  ;;  %v7126_v9 = vld [vmem:[#allocation2 + $0x1a4] sm:$0xf0] }
 0x8b9   :  { %3452 = vst.msk [vmem:[#allocation2 + $0x1d0] sm:$0xff] %vm10284_vm15, %v3442_v30  ;;  %v3360_v27 = vmul.f32 %v7553_v37, %v3335_v26  ;;  %v3361_v0 = vmul.f32 %v7554_v31, %v3335_v26  ;;  %7176 = vset.pattern.permute.xlu1 %v13810_v44  ;;  %v6677_v30 = vld [vmem:[#allocation2 + $0x28] sm:$0xf0]  ;;  %v7075_v26 = vld [vmem:[#allocation2 + $0x14] sm:$0xf] }
 0x8ba   :  { %4179 = vperm.xlu1 %7176, %v10969_v6   ;;  %v7555_v6 = vld [vmem:[%s13339_s0 + $0x3f0] sm:$0xff]  ;;  %v6680_v57 = vor.u32 %v7077_v42, %v6677_v30 }
 0x8bb   :  { %v3416_v10 = vadd.f32 %v11875_v16, %v3360_v27  ;;  %v3417_v35 = vadd.f32 %v11875_v16, %v3361_v0  ;;  %5686 = vmatpush.bf16.msra.mxu2 %v6788_v54  ;;  %v6907_v37 = vld [vmem:[#allocation2 + $0x1f0] sm:$0xf]  ;;  %v6669_v54 = vld [vmem:[#allocation2 + $0x18] sm:$0xf0] }
 0x8bc   :  { %v6672_v15 = vor.u32 %v7075_v26, %v6669_v54  ;;  %v6859_v30 = vld [vmem:[#allocation2 + $0x190] sm:$0xf] }
 0x8bd   :  { %v3432_v17 = vmax.f32 %v3416_v10, 0.0  ;;  %v3433_v48 = vmax.f32 %v3417_v35, 0.0  ;;  %v12302_v10 = vpop.permute.xlu0 %4582  ;;  %v7073_v35 = vld [vmem:[#allocation2 + $0x4] sm:$0xf] }
 0x8bf   :  { %5875 = vmatpush.bf16.msrb.mxu2 %v6720_v13  ;;  %v3444_v60 = vpack.c.bf16 %v3433_v48, %v3432_v17  ;;  %v12304_v53 = vpop.permute.xlu2 %3710  ;;  %v7134_v17 = vld [vmem:[#allocation2 + $0x1e4] sm:$0xf0] }
 0x8c0   :  { %v3350_v61 = vpop.permute.xlu1 %3349 }
 0x8c1   :  { %3454 = vst.msk [vmem:[#allocation2 + $0x1e0] sm:$0xff] %vm10284_vm15, %v3444_v60  ;;  %v3366_v16 = vmul.f32 %v7555_v6, %v3350_v61  ;;  %v3367_v47 = vmul.f32 %v7556_v41, %v3350_v61  ;;  %v6891_v60 = vld [vmem:[#allocation2 + $0x1d0] sm:$0xf]  ;;  %v7558_v6 = vld [vmem:[%s13340_s1 + $0x238] sm:$0xff] }
 0x8c2   :  { %3774 = vperm.xlu1 %7176, %v11122_v33  }
 0x8c3   :  { %5876 = vmatpush.bf16.msrb.mxu2 %v6712_v46  ;;  %v3422_v43 = vadd.f32 %v13830_v39, %v3366_v16  ;;  %v3423_v8 = vadd.f32 %v13830_v39, %v3367_v47  ;;  %v6664_v46 = vor.u32 %v7073_v35, %v6661_v4  ;;  %v7130_v47 = vld [vmem:[#allocation2 + $0x1c4] sm:$0xf0] }
 0x8c4   :  { %v6884_v39 = vor.u32 %v7130_v47, %v6883_v40 }
 0x8c5   :  { %v3438_v56 = vmax.f32 %v3422_v43, 0.0  ;;  %v3439_v22 = vmax.f32 %v3423_v8, 0.0  ;;  %v6875_v8 = vld [vmem:[#allocation2 + $0x1b0] sm:$0xf] }
 0x8c7   :  { %5877 = vmatpush.bf16.msrb.mxu2 %v6704_v5  ;;  %v3447_v36 = vpack.c.bf16 %v3439_v22, %v3438_v56  ;;  %v3721_v5 = vpop.permute.xlu0 %3720  ;;  %v12310_v43 = vpop.permute.xlu2 %4572  ;;  %v7128_v56 = vld [vmem:[#allocation2 + $0x1b4] sm:$0xf0] }
 0x8c8   :  { %v4149_v21 = vpop.permute.xlu1 %4148  ;;  %v6899_v13 = vld [vmem:[#allocation2 + $0x1e0] sm:$0xf] }
 0x8c9   :  { %3457 = vst.msk [vmem:[#allocation2 + $0x1f8] sm:$0xff] %vm10284_vm15, %v3447_v36  ;;  %v4168_v33 = vsub.f32 %v11976_v55, %v4149_v21  ;;  %v7557_v55 = vld [vmem:[%s13340_s1 + $0x258] sm:$0xff]  ;;  %v6900_v48 = vor.u32 %v7134_v17, %v6899_v13  ;;  %v6876_v36 = vor.u32 %v7128_v56, %v6875_v8  ;;  %v6867_v21 = vld [vmem:[#allocation2 + $0x1a0] sm:$0xf] }
 0x8ca   :  { %7178 = vset.pattern.permute.xlu1 %v13795_v34  ;;  %v4167_v31 = vsub.f32 %v7557_v55, %v12097_v28  ;;  %v7132_v28 = vld [vmem:[#allocation2 + $0x1d4] sm:$0xf0] }
 0x8cb   :  { %5878 = vmatpush.bf16.msrb.mxu2 %v6696_v11  ;;  %4250 = vperm.xlu0 %7185, %v4168_v33   ;;  %v6892_v41 = vor.u32 %v7132_v28, %v6891_v60  ;;  %v6868_v33 = vor.u32 %v7126_v9, %v6867_v21  ;;  %v7566_v9 = vld [vmem:[%s13339_s0 + $0x4e8] sm:$0xff]  ;;  %v7093_v21 = vld [vmem:[#allocation2 + $0xa4] sm:$0xf] }
 0x8cf   :  { %5879 = vmatpush.bf16.msrb.mxu2 %v6688_v2  ;;  %v12321_v1 = vpop.permute.xlu2 %4260  ;;  %v7124_v2 = vld [vmem:[#allocation2 + $0x194] sm:$0xf0] }
 0x8d0   :  { %v4141_v7 = vpop.permute.xlu1 %4140  ;;  %v7136_v27 = vld [vmem:[#allocation2 + $0x1f4] sm:$0xf0] }
 0x8d1   :  { %v6908_v0 = vor.u32 %v7136_v27, %v6907_v37  ;;  %v4164_v61 = vsub.f32 %v12018_v59, %v4141_v7  ;;  %v7559_v59 = vld [vmem:[%s13340_s1 + $0x2b8] sm:$0xff]  ;;  %v6860_v7 = vor.u32 %v7124_v2, %v6859_v30  ;;  %v7122_v37 = vld [vmem:[#allocation2 + $0x184] sm:$0xf0]  ;;  %v7562_v27 = vld [vmem:[%s13340_s1 + $0x2b0] sm:$0xff] }
 0x8d2   :  { %v4601_v22 = vsub.f32 %v7559_v59, %v12265_v62  ;;  %v12323_v62 = vpop.permute.xlu0 %3714  ;;  %v4600_v55 = vsub.f32 %v7562_v27, %v12302_v10  ;;  %v6741_v59 = vld [vmem:[#allocation2 + $0xa8] sm:$0xf0]  ;;  %v6733_v30 = vld [vmem:[#allocation2 + $0x98] sm:$0xf0]  ;;  %v7567_v27 = vld [vmem:[%s13340_s1 + $0x2a0] sm:$0xff] }
 0x8d3   :  { %5880 = vmatpush.bf16.msrb.mxu2 %v6680_v57  ;;  %4245 = vperm.xlu0 %7185, %v4167_v31   ;;  %v7561_v57 = vld [vmem:[%s13340_s1 + $0x218] sm:$0xff]  ;;  %v6851_v31 = vld [vmem:[#allocation2 + $0x180] sm:$0xf] }
 0x8d4   :  { %5728 = vmatpush.bf16.msra.mxu3 %v6908_v0  ;;  %v3737_v26 = vsub.f32 %v7561_v57, %v12295_v25  ;;  %v6852_v0 = vor.u32 %v7122_v37, %v6851_v31  ;;  %v6781_v25 = vld [vmem:[#allocation2 + $0xf8] sm:$0xf0] }
 0x8d7   :  { %5881 = vmatpush.bf16.msrb.mxu2 %v6672_v15  ;;  %v6773_v15 = vld [vmem:[#allocation2 + $0xe8] sm:$0xf0]  ;;  %v12336_v13 = vpop.permute.xlu2 %4194 }
 0x8d8   :  { %5729 = vmatpush.bf16.msra.mxu3 %v6900_v48  ;;  %v3725_v32 = vpop.permute.xlu1 %3724  ;;  %v7101_v48 = vld [vmem:[#allocation2 + $0xe4] sm:$0xf] }
 0x8d9   :  { %v3741_v16 = vsub.f32 %v7558_v6, %v3725_v32  ;;  %v6776_v4 = vor.u32 %v7101_v48, %v6773_v15  ;;  %v7099_v32 = vld [vmem:[#allocation2 + $0xd4] sm:$0xf]  ;;  %v7569_v15 = vld [vmem:[%s13339_s0 + $0x4f8] sm:$0xff] }
 0x8da   :  { %v12338_v17 = vpop.permute.xlu0 %4576 }
 0x8db   :  { %5882 = vmatpush.bf16.msrb.mxu2 %v6664_v46  ;;  %4230 = vperm.xlu0 %7185, %v4164_v61   ;;  %v6765_v46 = vld [vmem:[#allocation2 + $0xd8] sm:$0xf0]  ;;  %v6757_v61 = vld [vmem:[#allocation2 + $0xc8] sm:$0xf0] }
 0x8dc   :  { %5730 = vmatpush.bf16.msra.mxu3 %v6892_v41  ;;  %3835 = vperm.xlu1 %7178, %v3741_v16   ;;  %v6768_v28 = vor.u32 %v7099_v32, %v6765_v46  ;;  %v7097_v16 = vld [vmem:[#allocation2 + $0xc4] sm:$0xf] }
 0x8dd   :  { %v6760_v47 = vor.u32 %v7097_v16, %v6757_v61 }
 0x8df   :  { %v12346_v41 = vpop.permute.xlu2 %4255 }
 0x8e0   :  { %5731 = vmatpush.bf16.msra.mxu3 %v6884_v39  ;;  %v3719_v58 = vpop.permute.xlu1 %3718  ;;  %v7095_v39 = vld [vmem:[#allocation2 + $0xb4] sm:$0xf] }
 0x8e1   :  { %v3738_v11 = vsub.f32 %v7560_v24, %v3719_v58 }
 0x8e2   :  { %v4571_v40 = vpop.permute.xlu0 %4570 }
 0x8e3   :  { %4695 = vperm.xlu0 %7185, %v4601_v22   ;;  %3820 = vperm.xlu2 %7182, %v3738_v11   ;;  %v7565_v11 = vld [vmem:[%s13339_s0 + $0x4e0] sm:$0xff] }
 0x8e4   :  { %5732 = vmatpush.bf16.msra.mxu3 %v6876_v36  ;;  %7180 = vset.pattern.permute.xlu1 %v13810_v44 }
 0x8e5   :  { %4639 = vperm.xlu1 %7180, %v11224_v20   ;;  %v7103_v20 = vld [vmem:[#allocation2 + $0xf4] sm:$0xf] }
 0x8e6   :  { %v6784_v54 = vor.u32 %v7103_v20, %v6781_v25  ;;  %v7091_v20 = vld [vmem:[#allocation2 + $0x94] sm:$0xf] }
 0x8e7   :  { %v12372_v57 = vpop.permute.xlu2 %4189  ;;  %v6736_v31 = vor.u32 %v7091_v20, %v6733_v30  ;;  %v7568_v25 = vld [vmem:[%s13339_s0 + $0x4f0] sm:$0xff] }
 0x8e8   :  { %5733 = vmatpush.bf16.msra.mxu3 %v6868_v33  ;;  %v4581_v42 = vpop.permute.xlu1 %4580  ;;  %v6744_v33 = vor.u32 %v7093_v21, %v6741_v59 }
 0x8e9   :  { %v4599_v8 = vsub.f32 %v12094_v18, %v4581_v42  ;;  %v7564_v18 = vld [vmem:[%s13340_s1 + $0x280] sm:$0xff] }
 0x8ea   :  { %v4594_v24 = vsub.f32 %v7564_v18, %v4571_v40 }
 0x8eb   :  { %3815 = vperm.xlu0 %7185, %v3737_v26   ;;  %7183 = vset.pattern.permute.xlu2 %v13810_v44  ;;  %v4210_v26 = vpop.permute.xlu0 %4209 }
 0x8ec   :  { %5734 = vmatpush.bf16.msra.mxu3 %v6860_v7  ;;  %4624 = vperm.xlu2 %7183, %v11513_v38   ;;  %v7563_v38 = vld [vmem:[%s13340_s1 + $0x228] sm:$0xff] }
 0x8ed   :  { %7181 = vset.pattern.permute.xlu1 %v13795_v34  ;;  %v3739_v60 = vsub.f32 %v7563_v38, %v3721_v5  ;;  %v6475_v5 = vld [vmem:[%s13341_s2 + $0x8] sm:$0xf] }
 0x8ee   :  { %4690 = vperm.xlu1 %7181, %v4600_v55   ;;  %v4598_v55 = vsub.f32 %v7567_v27, %v12279_v51  ;;  %v6501_v27 = vld [vmem:[%s13341_s2 + $0x50] sm:$0xf0] }
 0x8f0   :  { %5735 = vmatpush.bf16.msra.mxu3 %v6852_v0  ;;  %v4575_v35 = vpop.permute.xlu1 %4574 }
 0x8f1   :  { %v4596_v10 = vsub.f32 %v12132_v50, %v4575_v35  ;;  %v4227_v35 = vmul.f32 %v7569_v15, %v4210_v26  ;;  %v6493_v15 = vld [vmem:[%s13341_s2 + $0x48] sm:$0xf0] }
 0x8f3   :  { %4670 = vperm.xlu0 %7185, %v4596_v10  }
 0x8f4   :  { %5924 = vmatpush.bf16.msrb.mxu3 %v6784_v54  ;;  %3759 = vperm.xlu2 %7183, %v11603_v29   ;;  %v7029_v29 = vld [vmem:[%s13341_s2 + $0x1c] sm:$0xf0]  ;;  %v4226_v54 = vmul.f32 %v7568_v25, %v4210_v26 }
 0x8f5   :  { %v12355_v58 = vor.u32 %v7029_v29, %v6475_v5  ;;  %v6469_v5 = vld [vmem:[%s13341_s2 + $0x18] sm:$0xf0]  ;;  %v7571_v29 = vld [vmem:[%s13339_s0 + $0x4d0] sm:$0xff] }
 0x8f6   :  { %3825 = vperm.xlu1 %7181, %v3739_v60   ;;  %v7570_v60 = vld [vmem:[%s13340_s1 + $0x210] sm:$0xff] }
 0x8f7   :  { %5687 = vmatmul.bf16.vlgmr.msra.gmra.mxu2 %v12355_v58  ;;  %v3736_v32 = vsub.f32 %v7570_v60, %v12323_v62  ;;  %v6467_v62 = vld [vmem:[%s13341_s2] sm:$0xf] }
 0x8f8   :  { %5925 = vmatpush.bf16.msrb.mxu3 %v6776_v4  ;;  %v3713_v6 = vpop.permute.xlu1 %3712 }
 0x8f9   :  { %v3735_v50 = vsub.f32 %v12168_v52, %v3713_v6  ;;  %v6749_v52 = vld [vmem:[#allocation2 + $0xb8] sm:$0xf0]  ;;  %v7026_v6 = vld [vmem:[%s13341_s2 + $0xc] sm:$0xf] }
 0x8fa   :  { %v6752_v56 = vor.u32 %v7095_v39, %v6749_v52  ;;  %v7572_v52 = vld [vmem:[%s13339_s0 + $0x4d8] sm:$0xff] }
 0x8fb   :  { %3805 = vperm.xlu0 %7185, %v3735_v50   ;;  %v6477_v50 = vld [vmem:[%s13341_s2 + $0x20] sm:$0xf0] }
 0x8fc   :  { %5926 = vmatpush.bf16.msrb.mxu3 %v6768_v28  ;;  %7187 = vset.pattern.permute.xlu2 %v13795_v34  ;;  %v12393_v28 = vpop.permute.xlu2 %4174  ;;  %v12404_v16 = vor.u32 %v7026_v6, %v6477_v50  ;;  %v7577_v6 = vld [vmem:[%s13340_s1 + $0x288] sm:$0xff] }
 0x8fd   :  { %4685 = vperm.xlu2 %7187, %v4599_v8   ;;  %v4595_v50 = vsub.f32 %v7577_v6, %v12310_v43  ;;  %v7579_v43 = vld [vmem:[%s13339_s0 + $0x498] sm:$0xff] }
 0x8fe   :  { %7184 = vset.pattern.permute.xlu1 %v13810_v44  ;;  %5736 = vmatmul.bf16.vlgmr.msra.gmra.mxu3 %v12404_v16 }
 0x8ff   :  { %4629 = vperm.xlu1 %7184, %v12104_v14  }
 0x900   :  { %5927 = vmatpush.bf16.msrb.mxu3 %v6760_v47  ;;  %v4205_v22 = vpop.permute.xlu1 %4204  ;;  %v7025_v47 = vld [vmem:[%s13341_s2 + $0x4] sm:$0xf] }
 0x901   :  { %v4224_v36 = vmul.f32 %v7565_v11, %v4205_v22  ;;  %v4225_v14 = vmul.f32 %v7566_v9, %v4205_v22  ;;  %v12427_v59 = vor.u32 %v7025_v47, %v6469_v5 }
 0x903   :  { %v4280_v2 = vadd.f32 %v12321_v1, %v4224_v36  ;;  %v4281_v42 = vadd.f32 %v12321_v1, %v4225_v14  ;;  %4660 = vperm.xlu0 %7185, %v4594_v24   ;;  %v7089_v1 = vld [vmem:[#allocation2 + $0x84] sm:$0xf]  ;;  %5638 = vmatmul.bf16.vlgmr.msra.gmra.mxu1 %v12427_v59  ;;  %v7573_v24 = vld [vmem:[%s13340_s1 + $0x298] sm:$0xff] }
 0x904   :  { %5928 = vmatpush.bf16.msrb.mxu3 %v6752_v56  ;;  %v4597_v11 = vsub.f32 %v7573_v24, %v12338_v17  ;;  %v6499_v17 = vld [vmem:[%s13341_s2 + $0x38] sm:$0xf]  ;;  %v6525_v24 = vld [vmem:[%s13341_s2 + $0x80] sm:$0xf0] }
 0x905   :  { %v4296_v7 = vmax.f32 %v4280_v2, 0.0  ;;  %v4297_v37 = vmax.f32 %v4281_v42, 0.0  ;;  %7188 = vset.pattern.permute.xlu2 %v13810_v44  ;;  %v4236_v42 = vpop.permute.xlu2 %4235 }
 0x906   :  { %4614 = vperm.xlu2 %7188, %v12138_v63   ;;  %v6725_v63 = vld [vmem:[#allocation2 + $0x88] sm:$0xf0] }
 0x907   :  { %v4306_v0 = vpack.c.bf16 %v4297_v37, %v4296_v7  ;;  %7186 = vset.pattern.permute.xlu1 %v13795_v34  ;;  %v6728_v4 = vor.u32 %v7089_v1, %v6725_v63  ;;  %v7035_v37 = vld [vmem:[%s13341_s2 + $0x4c] sm:$0xf0]  ;;  %v12466_v1 = vpop.permute.xlu0 %3779 }
 0x908   :  { %5929 = vmatpush.bf16.msrb.mxu3 %v6744_v33  ;;  %4680 = vperm.xlu1 %7186, %v4598_v55   ;;  %v12448_v20 = vor.u32 %v7035_v37, %v6499_v17  ;;  %v6491_v55 = vld [vmem:[%s13341_s2 + $0x30] sm:$0xf]  ;;  %v7581_v37 = vld [vmem:[%s13339_s0 + $0x468] sm:$0xff] }
 0x909   :  { %4316 = vst.msk [vmem:[#allocation2 + $0x270] sm:$0xff] %vm10284_vm15, %v4306_v0  ;;  %v4266_v51 = vpop.permute.xlu1 %4265 }
 0x90a   :  { %v4282_v10 = vadd.f32 %v4266_v51, %v4226_v54  ;;  %v4283_v48 = vadd.f32 %v4266_v51, %v4227_v35  ;;  %5692 = vmatmul.bf16.gmra.mxu2 %v12448_v20  ;;  %v7031_v54 = vld [vmem:[%s13341_s2 + $0x34] sm:$0xf]  ;;  %v7574_v51 = vld [vmem:[%s13339_s0 + $0x4a0] sm:$0xff] }
 0x90c   :  { %5930 = vmatpush.bf16.msrb.mxu3 %v6736_v31  ;;  %v4298_v46 = vmax.f32 %v4282_v10, 0.0  ;;  %v4299_v38 = vmax.f32 %v4283_v48, 0.0  ;;  %v7034_v31 = vld [vmem:[%s13341_s2 + $0x44] sm:$0xf0]  ;;  %v12487_v10 = vor.u32 %v7031_v54, %v6493_v15 }
 0x90d   :  { %v12470_v25 = vor.u32 %v7034_v31, %v6491_v55  ;;  %v12478_v35 = vpop.permute.xlu2 %3830 }
 0x90e   :  { %v4307_v61 = vpack.c.bf16 %v4299_v38, %v4298_v46  ;;  %3744 = vperm.xlu2 %7188, %v11659_v49   ;;  %v7028_v49 = vld [vmem:[%s13341_s2 + $0x14] sm:$0xf0] }
 0x90f   :  { %v12415_v39 = vor.u32 %v7028_v49, %v6467_v62  ;;  %v3765_v49 = vpop.permute.xlu0 %3764 }
 0x910   :  { %5931 = vmatpush.bf16.msrb.mxu3 %v6728_v4  ;;  %4317 = vst.msk [vmem:[#allocation2 + $0x278] sm:$0xff] %vm10284_vm15, %v4307_v61  ;;  %3810 = vperm.xlu1 %7186, %v3736_v32   ;;  %v6971_v36 = vld [vmem:[#allocation2 + $0x270] sm:$0xf]  ;;  %v7151_v9 = vld [vmem:[#allocation2 + $0x274] sm:$0xf]  ;;  %v7576_v32 = vld [vmem:[%s13340_s1 + $0x200] sm:$0xff] }
 0x911   :  { %5589 = vmatmul.bf16.vlgmr.msra.gmra.mxu0 %v12415_v39  ;;  %v3734_v61 = vsub.f32 %v7576_v32, %v12304_v53 }
 0x912   :  { %v4200_v40 = vpop.permute.xlu1 %4199 }
 0x913   :  { %v4222_v8 = vmul.f32 %v7571_v29, %v4200_v40  ;;  %v4223_v56 = vmul.f32 %v7572_v52, %v4200_v40  ;;  %5643 = vmatmul.bf16.gmra.mxu1 %v12487_v10  ;;  %v7578_v40 = vld [vmem:[%s13339_s0 + $0x490] sm:$0xff] }
 0x915   :  { %v4278_v22 = vadd.f32 %v12346_v41, %v4222_v8  ;;  %v4279_v18 = vadd.f32 %v12346_v41, %v4223_v56  ;;  %v12503_v47 = vpop.permute.xlu2 %4634  ;;  %v7041_v8 = vld [vmem:[%s13341_s2 + $0x7c] sm:$0xf0] }
 0x916   :  { %7190 = vset.pattern.permute.xlu2 %v13795_v34 }
 0x917   :  { %v4294_v14 = vmax.f32 %v4278_v22, 0.0  ;;  %v4295_v21 = vmax.f32 %v4279_v18, 0.0  ;;  %v7152_v33 = vld [vmem:[#allocation2 + $0x274] sm:$0xf0]  ;;  %v6973_v2 = vld [vmem:[#allocation2 + $0x278] sm:$0xf0]  ;;  %4675 = vperm.xlu2 %7190, %v4597_v11  }
 0x918   :  { %7189 = vset.pattern.permute.xlu1 %v13810_v44  ;;  %v6972_v41 = vor.u32 %v7152_v33, %v6971_v36  ;;  %v6976_v30 = vor.u32 %v7151_v9, %v6973_v2  ;;  %v7038_v18 = vld [vmem:[%s13341_s2 + $0x6c] sm:$0xf]  ;;  %v6515_v11 = vld [vmem:[%s13341_s2 + $0x60] sm:$0xf]  ;;  %v7040_v36 = vld [vmem:[%s13341_s2 + $0x74] sm:$0xf0] }
 0x919   :  { %v4305_v26 = vpack.c.bf16 %v4295_v21, %v4294_v14  ;;  %4619 = vperm.xlu1 %7189, %v11521_v23   ;;  %v7032_v23 = vld [vmem:[%s13341_s2 + $0x3c] sm:$0xf]  ;;  %v12532_v9 = vor.u32 %v7038_v18, %v6525_v24  ;;  %v12534_v33 = vor.u32 %v7040_v36, %v6515_v11  ;;  %v7037_v2 = vld [vmem:[%s13341_s2 + $0x64] sm:$0xf]  ;;  %v7043_v24 = vld [vmem:[%s13341_s2 + $0x94] sm:$0xf] }
 0x91a   :  { %v4185_v7 = vpop.permute.xlu1 %4184  ;;  %5777 = vmatpush.bf16.msrb.mxu0 %v6972_v41  ;;  %6071 = vmatpush.bf16.msra.mxu2 %v6976_v30  ;;  %v12464_v0 = vor.u32 %v7032_v23, %v6501_v27  ;;  %v6541_v11 = vld [vmem:[%s13341_s2 + $0xa8] sm:$0xf0] }
 0x91b   :  { %4315 = vst.msk [vmem:[#allocation2 + $0x268] sm:$0xff] %vm10284_vm15, %v4305_v26  ;;  %v4216_v63 = vmul.f32 %v7574_v51, %v4185_v7  ;;  %v7582_v51 = vld [vmem:[%s13339_s0 + $0x4c0] sm:$0xff] }
 0x91c   :  { %5741 = vmatmul.bf16.gmra.mxu3 %v12464_v0 }
 0x91d   :  { %v12559_v23 = vpop.permute.xlu2 %3769 }
 0x91f   :  { %7192 = vset.pattern.permute.xlu2 %v13810_v44 }
 0x920   :  { %4604 = vperm.xlu2 %7192, %v11605_v3   ;;  %v7575_v3 = vld [vmem:[%s13339_s0 + $0x4a8] sm:$0xff] }
 0x921   :  { %3749 = vperm.xlu1 %7189, %v12172_v19   ;;  %v4217_v19 = vmul.f32 %v7575_v3, %v4185_v7  ;;  %5594 = vmatmul.bf16.gmra.mxu0 %v12470_v25  ;;  %v12548_v7 = vpop.permute.xlu0 %3754  ;;  %v7583_v3 = vld [vmem:[%s13339_s0 + $0x4c8] sm:$0xff] }
 0x923   :  { %v4241_v48 = vpop.permute.xlu1 %4240 }
 0x924   :  { %v4272_v4 = vadd.f32 %v4241_v48, %v4216_v63  ;;  %v4273_v46 = vadd.f32 %v4241_v48, %v4217_v19  ;;  %v4220_v63 = vmul.f32 %v7582_v51, %v12336_v13  ;;  %v4221_v19 = vmul.f32 %v7583_v3, %v12336_v13  ;;  %v7584_v48 = vld [vmem:[%s13339_s0 + $0x440] sm:$0xff]  ;;  %v7047_v13 = vld [vmem:[%s13341_s2 + $0xac] sm:$0xf0]  ;;  %v6965_v51 = vld [vmem:[#allocation2 + $0x268] sm:$0xf0] }
 0x926   :  { %v4288_v38 = vmax.f32 %v4272_v4, 0.0  ;;  %v4289_v60 = vmax.f32 %v4273_v46, 0.0  ;;  %v7585_v4 = vld [vmem:[%s13339_s0 + $0x448] sm:$0xff] }
 0x927   :  { %v3791_v46 = vmul.f32 %v7585_v4, %v3765_v49 }
 0x928   :  { %v4302_v62 = vpack.c.bf16 %v4289_v60, %v4288_v38  ;;  %7194 = vset.pattern.permute.xlu2 %v13795_v34  ;;  %v6547_v60 = vld [vmem:[%s13341_s2 + $0x98] sm:$0xf] }
 0x929   :  { %7191 = vset.pattern.permute.xlu1 %v13795_v34  ;;  %4665 = vperm.xlu2 %7194, %v4595_v50   ;;  %v6523_v34 = vld [vmem:[%s13341_s2 + $0x68] sm:$0xf]  ;;  %v12585_v50 = vor.u32 %v7047_v13, %v6547_v60  ;;  %v7591_v60 = vld [vmem:[%s13339_s0 + $0x478] sm:$0xff] }
 0x92a   :  { %4312 = vst.msk [vmem:[#allocation2 + $0x250] sm:$0xff] %vm10284_vm15, %v4302_v62  ;;  %3800 = vperm.xlu1 %7191, %v3734_v61   ;;  %v12517_v52 = vor.u32 %v7041_v8, %v6523_v34  ;;  %v7046_v34 = vld [vmem:[%s13341_s2 + $0xa4] sm:$0xf0]  ;;  %v3797_v13 = vmul.f32 %v7591_v60, %v12466_v1  ;;  %v7594_v60 = vld [vmem:[%s13339_s0 + $0x430] sm:$0xff] }
 0x92c   :  { %v4180_v53 = vpop.permute.xlu1 %4179  ;;  %5697 = vmatmul.bf16.gmra.mxu2 %v12517_v52  ;;  %5746 = vmatmul.bf16.gmra.mxu3 %v12532_v9 }
 0x92d   :  { %v4214_v5 = vmul.f32 %v7578_v40, %v4180_v53  ;;  %v4215_v29 = vmul.f32 %v7579_v43, %v4180_v53  ;;  %v6549_v40 = vld [vmem:[%s13341_s2 + $0xb0] sm:$0xf0] }
 0x92f   :  { %v4270_v56 = vadd.f32 %v4236_v42, %v4214_v5  ;;  %v4271_v22 = vadd.f32 %v4236_v42, %v4215_v29  ;;  %v6517_v42 = vld [vmem:[%s13341_s2 + $0x78] sm:$0xf0]  ;;  %v6539_v29 = vld [vmem:[%s13341_s2 + $0x90] sm:$0xf] }
 0x930   :  { %v12545_v30 = vor.u32 %v7037_v2, %v6517_v42  ;;  %v12602_v18 = vor.u32 %v7046_v34, %v6539_v29  ;;  %v7586_v2 = vld [vmem:[%s13339_s0 + $0x4b0] sm:$0xff]  ;;  %v7052_v29 = vld [vmem:[%s13341_s2 + $0xd4] sm:$0xf0]  ;;  %v7050_v34 = vld [vmem:[%s13341_s2 + $0xcc] sm:$0xf] }
 0x931   :  { %v4286_v14 = vmax.f32 %v4270_v56, 0.0  ;;  %v4287_v21 = vmax.f32 %v4271_v22, 0.0  ;;  %5599 = vmatmul.bf16.gmra.mxu0 %v12534_v33  ;;  %v4218_v42 = vmul.f32 %v7586_v2, %v12372_v57 }
 0x932   :  { %7193 = vset.pattern.permute.xlu1 %v13810_v44  ;;  %v7580_v44 = vld [vmem:[%s13339_s0 + $0x460] sm:$0xff]  ;;  %5648 = vmatmul.bf16.gmra.mxu1 %v12545_v30 }
 0x933   :  { %v4301_v41 = vpack.c.bf16 %v4287_v21, %v4286_v14  ;;  %4609 = vperm.xlu1 %7193, %v11732_v12   ;;  %v12611_v14 = vor.u32 %v7043_v24, %v6541_v11  ;;  %v6573_v24 = vld [vmem:[%s13341_s2 + $0xe0] sm:$0xf0] }
 0x934   :  { %v3775_v26 = vpop.permute.xlu1 %3774  ;;  %v12670_v2 = vor.u32 %v7050_v34, %v6573_v24  ;;  %v7059_v24 = vld [vmem:[%s13341_s2 + $0x10c] sm:$0xf0] }
 0x935   :  { %4311 = vst.msk [vmem:[#allocation2 + $0x248] sm:$0xff] %vm10284_vm15, %v4301_v41  ;;  %v3794_v17 = vmul.f32 %v7580_v44, %v3775_v26  ;;  %v3795_v12 = vmul.f32 %v7581_v37, %v3775_v26  ;;  %v7587_v41 = vld [vmem:[%s13339_s0 + $0x4b8] sm:$0xff] }
 0x936   :  { %v4219_v26 = vmul.f32 %v7587_v41, %v12372_v57  ;;  %v6565_v41 = vld [vmem:[%s13341_s2 + $0xd8] sm:$0xf0] }
 0x937   :  { %v3850_v27 = vadd.f32 %v12478_v35, %v3794_v17  ;;  %v3851_v55 = vadd.f32 %v12478_v35, %v3795_v12  ;;  %v3790_v35 = vmul.f32 %v7584_v48, %v3765_v49  ;;  %v7044_v49 = vld [vmem:[%s13341_s2 + $0x9c] sm:$0xf] }
 0x938   :  { %v12600_v8 = vor.u32 %v7044_v49, %v6549_v40 }
 0x939   :  { %v3866_v31 = vmax.f32 %v3850_v27, 0.0  ;;  %v3867_v54 = vmax.f32 %v3851_v55, 0.0 }
 0x93b   :  { %v3876_v15 = vpack.c.bf16 %v3867_v54, %v3866_v31  ;;  %v7150_v54 = vld [vmem:[#allocation2 + $0x264] sm:$0xf0] }
 0x93c   :  { %5702 = vmatmul.bf16.gmra.mxu2 %v12585_v50  ;;  %5751 = vmatmul.bf16.gmra.mxu3 %v12600_v8 }
 0x93d   :  { %3886 = vst.msk [vmem:[#allocation2 + $0x230] sm:$0xff] %vm10284_vm15, %v3876_v15  ;;  %v4251_v38 = vpop.permute.xlu0 %4250  ;;  %v3821_v32 = vpop.permute.xlu2 %3820 }
 0x93e   :  { %v4276_v61 = vadd.f32 %v4251_v38, %v4220_v63  ;;  %v4277_v6 = vadd.f32 %v4251_v38, %v4221_v19  ;;  %v3846_v62 = vadd.f32 %v3821_v32, %v3790_v35  ;;  %v3847_v53 = vadd.f32 %v3821_v32, %v3791_v46  ;;  %v7588_v63 = vld [vmem:[%s13339_s0 + $0x480] sm:$0xff]  ;;  %v7589_v19 = vld [vmem:[%s13339_s0 + $0x488] sm:$0xff]  ;;  %v7590_v46 = vld [vmem:[%s13339_s0 + $0x470] sm:$0xff] }
 0x93f   :  { %v4212_v3 = vmul.f32 %v7588_v63, %v12393_v28  ;;  %v4213_v48 = vmul.f32 %v7589_v19, %v12393_v28  ;;  %v3796_v38 = vmul.f32 %v7590_v46, %v12466_v1  ;;  %v6571_v28 = vld [vmem:[%s13341_s2 + $0xc8] sm:$0xf]  ;;  %v6563_v1 = vld [vmem:[%s13341_s2 + $0xc0] sm:$0xf]  ;;  %v7592_v63 = vld [vmem:[%s13339_s0 + $0x570] sm:$0xff] }
 0x940   :  { %v4292_v5 = vmax.f32 %v4276_v61, 0.0  ;;  %v4293_v43 = vmax.f32 %v4277_v6, 0.0  ;;  %v3862_v56 = vmax.f32 %v3846_v62, 0.0  ;;  %v3863_v22 = vmax.f32 %v3847_v53, 0.0  ;;  %v7053_v61 = vld [vmem:[%s13341_s2 + $0xdc] sm:$0xf0] }
 0x941   :  { %5604 = vmatmul.bf16.gmra.mxu0 %v12602_v18  ;;  %v12653_v49 = vor.u32 %v7053_v61, %v6571_v28  ;;  %v7593_v19 = vld [vmem:[%s13339_s0 + $0x578] sm:$0xff] }
 0x942   :  { %v4304_v36 = vpack.c.bf16 %v4293_v43, %v4292_v5  ;;  %v3874_v21 = vpack.c.bf16 %v3863_v22, %v3862_v56  ;;  %5653 = vmatmul.bf16.gmra.mxu1 %v12611_v14 }
 0x944   :  { %4314 = vst.msk [vmem:[#allocation2 + $0x260] sm:$0xff] %vm10284_vm15, %v4304_v36 }
 0x945   :  { %3884 = vst.msk [vmem:[#allocation2 + $0x220] sm:$0xff] %vm10284_vm15, %v3874_v21  ;;  %v4246_v44 = vpop.permute.xlu0 %4245  ;;  %v12668_v21 = vor.u32 %v7052_v29, %v6563_v1 }
 0x946   :  { %v4274_v17 = vadd.f32 %v4246_v44, %v4218_v42  ;;  %v4275_v37 = vadd.f32 %v4246_v44, %v4219_v26  ;;  %v12627_v12 = vpop.permute.xlu2 %4624  ;;  %v7049_v42 = vld [vmem:[%s13341_s2 + $0xc4] sm:$0xf]  ;;  %v6955_v44 = vld [vmem:[#allocation2 + $0x250] sm:$0xf] }
 0x948   :  { %v4290_v27 = vmax.f32 %v4274_v17, 0.0  ;;  %v4291_v55 = vmax.f32 %v4275_v37, 0.0  ;;  %v12678_v17 = vor.u32 %v7049_v42, %v6565_v41  ;;  %v6939_v42 = vld [vmem:[#allocation2 + $0x230] sm:$0xf]  ;;  %v7596_v41 = vld [vmem:[%s13339_s0 + $0x560] sm:$0xff] }
 0x94a   :  { %v4303_v31 = vpack.c.bf16 %v4291_v55, %v4290_v27  ;;  %v7147_v55 = vld [vmem:[#allocation2 + $0x254] sm:$0xf] }
 0x94b   :  { %v6963_v57 = vld [vmem:[#allocation2 + $0x260] sm:$0xf]  ;;  %v7149_v15 = vld [vmem:[#allocation2 + $0x264] sm:$0xf] }
 0x94c   :  { %4313 = vst.msk [vmem:[#allocation2 + $0x258] sm:$0xff] %vm10284_vm15, %v4303_v31  ;;  %v6964_v35 = vor.u32 %v7150_v54, %v6963_v57  ;;  %v6968_v4 = vor.u32 %v7149_v15, %v6965_v51  ;;  %5707 = vmatmul.bf16.gmra.mxu2 %v12653_v49  ;;  %5756 = vmatmul.bf16.gmra.mxu3 %v12670_v2 }
 0x94d   :  { %v4231_v32 = vpop.permute.xlu0 %4230 }
 0x94e   :  { %v3836_v6 = vpop.permute.xlu1 %3835  ;;  %v4268_v62 = vadd.f32 %v4231_v32, %v4212_v3  ;;  %v4269_v53 = vadd.f32 %v4231_v32, %v4213_v48  ;;  %5778 = vmatpush.bf16.msrb.mxu0 %v6964_v35  ;;  %6072 = vmatpush.bf16.msra.mxu2 %v6968_v4  ;;  %v3760_v43 = vpop.permute.xlu2 %3759  ;;  %v7595_v32 = vld [vmem:[%s13339_s0 + $0x438] sm:$0xff] }
 0x94f   :  { %v3852_v40 = vadd.f32 %v3836_v6, %v3796_v38  ;;  %v3853_v5 = vadd.f32 %v3836_v6, %v3797_v13  ;;  %v7146_v38 = vld [vmem:[#allocation2 + $0x244] sm:$0xf0]  ;;  %v3788_v13 = vmul.f32 %v7594_v60, %v3760_v43  ;;  %v3789_v28 = vmul.f32 %v7595_v32, %v3760_v43  ;;  %v7055_v60 = vld [vmem:[%s13341_s2 + $0xf4] sm:$0xf] }
 0x950   :  { %v4284_v56 = vmax.f32 %v4268_v62, 0.0  ;;  %v4285_v22 = vmax.f32 %v4269_v53, 0.0  ;;  %v6949_v62 = vld [vmem:[#allocation2 + $0x248] sm:$0xf0] }
 0x951   :  { %v3868_v11 = vmax.f32 %v3852_v40, 0.0  ;;  %v3869_v36 = vmax.f32 %v3853_v5, 0.0  ;;  %5609 = vmatmul.bf16.gmra.mxu0 %v12668_v21 }
 0x952   :  { %v4300_v26 = vpack.c.bf16 %v4285_v22, %v4284_v56  ;;  %5658 = vmatmul.bf16.gmra.mxu1 %v12678_v17  ;;  %v6595_v22 = vld [vmem:[%s13341_s2 + $0xf8] sm:$0xf] }
 0x953   :  { %v3877_v37 = vpack.c.bf16 %v3869_v36, %v3868_v11  ;;  %v7148_v27 = vld [vmem:[#allocation2 + $0x254] sm:$0xf0]  ;;  %v6957_v31 = vld [vmem:[#allocation2 + $0x258] sm:$0xf0] }
 0x954   :  { %4310 = vst.msk [vmem:[#allocation2 + $0x240] sm:$0xff] %vm10284_vm15, %v4300_v26  ;;  %v6956_v54 = vor.u32 %v7148_v27, %v6955_v44  ;;  %v6960_v57 = vor.u32 %v7147_v55, %v6957_v31  ;;  %v4654_v26 = vmul.f32 %v7596_v41, %v12503_v47  ;;  %v7597_v44 = vld [vmem:[%s13339_s0 + $0x568] sm:$0xff]  ;;  %v7143_v55 = vld [vmem:[#allocation2 + $0x234] sm:$0xf]  ;;  %v12715_v31 = vor.u32 %v7059_v24, %v6595_v22 }
 0x955   :  { %3887 = vst.msk [vmem:[#allocation2 + $0x238] sm:$0xff] %vm10284_vm15, %v3877_v37  ;;  %v4696_v15 = vpop.permute.xlu0 %4695  ;;  %v4655_v37 = vmul.f32 %v7597_v44, %v12503_v47  ;;  %v6587_v47 = vld [vmem:[%s13341_s2 + $0xf0] sm:$0xf] }
 0x956   :  { %5779 = vmatpush.bf16.msrb.mxu0 %v6956_v54  ;;  %6073 = vmatpush.bf16.msra.mxu2 %v6960_v57  ;;  %v7056_v54 = vld [vmem:[%s13341_s2 + $0xfc] sm:$0xf]  ;;  %v6597_v57 = vld [vmem:[%s13341_s2 + $0x110] sm:$0xf0] }
 0x957   :  { %v4640_v51 = vpop.permute.xlu1 %4639  ;;  %v12693_v35 = vpop.permute.xlu2 %4685  ;;  %v7600_v24 = vld [vmem:[%s13339_s0 + $0x450] sm:$0xff] }
 0x958   :  { %v4656_v3 = vmul.f32 %v7592_v63, %v4640_v51  ;;  %v4657_v48 = vmul.f32 %v7593_v19, %v4640_v51  ;;  %v12728_v19 = vor.u32 %v7056_v54, %v6597_v57 }
 0x95a   :  { %v4712_v4 = vadd.f32 %v4696_v15, %v4656_v3  ;;  %v4713_v46 = vadd.f32 %v4696_v15, %v4657_v48 }
 0x95b   :  { %v6947_v61 = vld [vmem:[#allocation2 + $0x240] sm:$0xf]  ;;  %v7145_v6 = vld [vmem:[#allocation2 + $0x244] sm:$0xf] }
 0x95c   :  { %v4728_v53 = vmax.f32 %v4712_v4, 0.0  ;;  %v4729_v40 = vmax.f32 %v4713_v46, 0.0  ;;  %v6948_v5 = vor.u32 %v7146_v38, %v6947_v61  ;;  %v6952_v1 = vor.u32 %v7145_v6, %v6949_v62  ;;  %v7144_v29 = vld [vmem:[#allocation2 + $0x234] sm:$0xf0]  ;;  %v6941_v56 = vld [vmem:[#allocation2 + $0x238] sm:$0xf0]  ;;  %5712 = vmatmul.bf16.gmra.mxu2 %v12715_v31  ;;  %5761 = vmatmul.bf16.gmra.mxu3 %v12728_v19 }
 0x95d   :  { %v3816_v34 = vpop.permute.xlu0 %3815  ;;  %v6940_v27 = vor.u32 %v7144_v29, %v6939_v42  ;;  %v6944_v3 = vor.u32 %v7143_v55, %v6941_v56  ;;  %v7058_v38 = vld [vmem:[%s13341_s2 + $0x104] sm:$0xf0] }
 0x95e   :  { %v4737_v11 = vpack.c.bf16 %v4729_v40, %v4728_v53  ;;  %v3844_v43 = vadd.f32 %v3816_v34, %v3788_v13  ;;  %v3845_v36 = vadd.f32 %v3816_v34, %v3789_v28  ;;  %5780 = vmatpush.bf16.msrb.mxu0 %v6948_v5  ;;  %6074 = vmatpush.bf16.msra.mxu2 %v6952_v1  ;;  %v6589_v13 = vld [vmem:[%s13341_s2 + $0x108] sm:$0xf0]  ;;  %v7598_v53 = vld [vmem:[%s13339_s0 + $0x520] sm:$0xff] }
 0x95f   :  { %v12740_v6 = vor.u32 %v7058_v38, %v6587_v47  ;;  %v12743_v62 = vor.u32 %v7055_v60, %v6589_v13  ;;  %v7599_v5 = vld [vmem:[%s13339_s0 + $0x528] sm:$0xff]  ;;  %v6621_v13 = vld [vmem:[%s13341_s2 + $0x140] sm:$0xf0] }
 0x960   :  { %4747 = vst.msk [vmem:[#allocation2 + $0x2b8] sm:$0xff] %vm10284_vm15, %v4737_v11  ;;  %v3860_v15 = vmax.f32 %v3844_v43, 0.0  ;;  %v3861_v51 = vmax.f32 %v3845_v36, 0.0  ;;  %v4691_v63 = vpop.permute.xlu1 %4690  ;;  %v4615_v46 = vpop.permute.xlu2 %4614  ;;  %v3792_v11 = vmul.f32 %v7600_v24, %v12559_v23  ;;  %v7601_v43 = vld [vmem:[%s13339_s0 + $0x458] sm:$0xff]  ;;  %v7062_v60 = vld [vmem:[%s13341_s2 + $0x12c] sm:$0xf] }
 0x961   :  { %v4710_v48 = vadd.f32 %v4691_v63, %v4654_v26  ;;  %v4711_v4 = vadd.f32 %v4691_v63, %v4655_v37  ;;  %v4646_v40 = vmul.f32 %v7598_v53, %v4615_v46  ;;  %v4647_v1 = vmul.f32 %v7599_v5, %v4615_v46  ;;  %5614 = vmatmul.bf16.gmra.mxu0 %v12740_v6  ;;  %v7065_v63 = vld [vmem:[%s13341_s2 + $0x13c] sm:$0xf0]  ;;  %v7061_v5 = vld [vmem:[%s13341_s2 + $0x124] sm:$0xf] }
 0x962   :  { %v3873_v32 = vpack.c.bf16 %v3861_v51, %v3860_v15  ;;  %5781 = vmatpush.bf16.msrb.mxu0 %v6940_v27  ;;  %6075 = vmatpush.bf16.msra.mxu2 %v6944_v3  ;;  %v3793_v36 = vmul.f32 %v7601_v43, %v12559_v23  ;;  %v6619_v23 = vld [vmem:[%s13341_s2 + $0x128] sm:$0xf] }
 0x963   :  { %v4726_v28 = vmax.f32 %v4710_v48, 0.0  ;;  %v4727_v61 = vmax.f32 %v4711_v4, 0.0  ;;  %5663 = vmatmul.bf16.gmra.mxu1 %v12743_v62  ;;  %v12775_v4 = vor.u32 %v7065_v63, %v6619_v23  ;;  %v7604_v23 = vld [vmem:[%s13339_s0 + $0x540] sm:$0xff] }
 0x964   :  { %3883 = vst.msk [vmem:[#allocation2 + $0x218] sm:$0xff] %vm10284_vm15, %v3873_v32  ;;  %v6611_v32 = vld [vmem:[%s13341_s2 + $0x120] sm:$0xf]  ;;  %v4650_v63 = vmul.f32 %v7604_v23, %v12627_v12 }
 0x965   :  { %v4736_v29 = vpack.c.bf16 %v4727_v61, %v4726_v28  ;;  %v4671_v34 = vpop.permute.xlu0 %4670  ;;  %v7064_v28 = vld [vmem:[%s13341_s2 + $0x134] sm:$0xf0]  ;;  %v12791_v61 = vor.u32 %v7062_v60, %v6621_v13  ;;  %v7606_v60 = vld [vmem:[%s13339_s0 + $0x500] sm:$0xff] }
 0x966   :  { %v4702_v56 = vadd.f32 %v4671_v34, %v4646_v40  ;;  %v4703_v22 = vadd.f32 %v4671_v34, %v4647_v1  ;;  %v12793_v40 = vor.u32 %v7064_v28, %v6611_v32  ;;  %v6613_v1 = vld [vmem:[%s13341_s2 + $0x138] sm:$0xf0]  ;;  %v7607_v32 = vld [vmem:[%s13339_s0 + $0x508] sm:$0xff] }
 0x967   :  { %4746 = vst.msk [vmem:[#allocation2 + $0x2b0] sm:$0xff] %vm10284_vm15, %v4736_v29  ;;  %v7160_v51 = vld [vmem:[#allocation2 + $0x2b4] sm:$0xf0]  ;;  %v7005_v48 = vld [vmem:[#allocation2 + $0x2b8] sm:$0xf0]  ;;  %v7602_v29 = vld [vmem:[%s13339_s0 + $0x550] sm:$0xff] }
 0x968   :  { %v4718_v42 = vmax.f32 %v4702_v56, 0.0  ;;  %v4719_v41 = vmax.f32 %v4703_v22, 0.0  ;;  %v3826_v26 = vpop.permute.xlu1 %3825  ;;  %v12765_v27 = vpop.permute.xlu2 %3744  ;;  %v7603_v56 = vld [vmem:[%s13339_s0 + $0x558] sm:$0xff] }
 0x969   :  { %v3848_v44 = vadd.f32 %v3826_v26, %v3792_v11  ;;  %v3849_v37 = vadd.f32 %v3826_v26, %v3793_v36  ;;  %v12810_v11 = vor.u32 %v7061_v5, %v6613_v1  ;;  %v7141_v26 = vld [vmem:[#allocation2 + $0x224] sm:$0xf]  ;;  %v6643_v1 = vld [vmem:[%s13341_s2 + $0x158] sm:$0xf] }
 0x96a   :  { %v4732_v55 = vpack.c.bf16 %v4719_v41, %v4718_v42  ;;  %v6931_v41 = vld [vmem:[#allocation2 + $0x220] sm:$0xf] }
 0x96b   :  { %v3864_v54 = vmax.f32 %v3848_v44, 0.0  ;;  %v3865_v57 = vmax.f32 %v3849_v37, 0.0 }
 0x96c   :  { %4742 = vst.msk [vmem:[#allocation2 + $0x290] sm:$0xff] %vm10284_vm15, %v4732_v55  ;;  %5717 = vmatmul.bf16.gmra.mxu2 %v12775_v4  ;;  %5766 = vmatmul.bf16.gmra.mxu3 %v12791_v61 }
 0x96d   :  { %v3875_v15 = vpack.c.bf16 %v3865_v57, %v3864_v54  ;;  %v12812_v43 = vpop.permute.xlu0 %3805 }
 0x96e   :  { %v7003_v3 = vld [vmem:[#allocation2 + $0x2b0] sm:$0xf]  ;;  %v7159_v47 = vld [vmem:[#allocation2 + $0x2b4] sm:$0xf] }
 0x96f   :  { %3885 = vst.msk [vmem:[#allocation2 + $0x228] sm:$0xff] %vm10284_vm15, %v3875_v15  ;;  %v7004_v46 = vor.u32 %v7160_v51, %v7003_v3  ;;  %v7008_v38 = vor.u32 %v7159_v47, %v7005_v48 }
 0x971   :  { %v4630_v53 = vpop.permute.xlu1 %4629  ;;  %5830 = vmatpush.bf16.msrb.mxu1 %v7004_v46  ;;  %6124 = vmatpush.bf16.msra.mxu3 %v7008_v38  ;;  %v12807_v24 = vpop.permute.xlu2 %4675 }
 0x972   :  { %v4652_v34 = vmul.f32 %v7602_v29, %v4630_v53  ;;  %v4653_v22 = vmul.f32 %v7603_v56, %v4630_v53  ;;  %5619 = vmatmul.bf16.gmra.mxu0 %v12793_v40  ;;  %v7071_v29 = vld [vmem:[%s13341_s2 + $0x16c] sm:$0xf0] }
 0x973   :  { %5668 = vmatmul.bf16.gmra.mxu1 %v12810_v11 }
 0x974   :  { %v4708_v36 = vadd.f32 %v12693_v35, %v4652_v34  ;;  %v4709_v42 = vadd.f32 %v12693_v35, %v4653_v22  ;;  %v7605_v35 = vld [vmem:[%s13339_s0 + $0x548] sm:$0xff]  ;;  %v12841_v22 = vor.u32 %v7071_v29, %v6643_v1 }
 0x975   :  { %v4651_v3 = vmul.f32 %v7605_v35, %v12627_v12  ;;  %v4661_v12 = vpop.permute.xlu0 %4660 }
 0x976   :  { %v4724_v44 = vmax.f32 %v4708_v36, 0.0  ;;  %v4725_v37 = vmax.f32 %v4709_v42, 0.0  ;;  %v7142_v55 = vld [vmem:[#allocation2 + $0x224] sm:$0xf0]  ;;  %v6933_v54 = vld [vmem:[#allocation2 + $0x228] sm:$0xf0] }
 0x977   :  { %v6932_v57 = vor.u32 %v7142_v55, %v6931_v41  ;;  %v6936_v15 = vor.u32 %v7141_v26, %v6933_v54  ;;  %v7068_v42 = vld [vmem:[%s13341_s2 + $0x15c] sm:$0xf]  ;;  %v6645_v41 = vld [vmem:[%s13341_s2 + $0x170] sm:$0xf0]  ;;  %v7070_v55 = vld [vmem:[%s13341_s2 + $0x164] sm:$0xf0] }
 0x978   :  { %v4735_v51 = vpack.c.bf16 %v4725_v37, %v4724_v44  ;;  %v6635_v37 = vld [vmem:[%s13341_s2 + $0x150] sm:$0xf]  ;;  %v12855_v54 = vor.u32 %v7068_v42, %v6645_v41  ;;  %v7611_v42 = vld [vmem:[%s13339_s0 + $0x538] sm:$0xff] }
 0x979   :  { %5782 = vmatpush.bf16.msrb.mxu0 %v6932_v57  ;;  %6076 = vmatpush.bf16.msra.mxu2 %v6936_v15  ;;  %v7608_v57 = vld [vmem:[%s13339_s0 + $0x420] sm:$0xff] }
 0x97a   :  { %4745 = vst.msk [vmem:[#allocation2 + $0x2a8] sm:$0xff] %vm10284_vm15, %v4735_v51  ;;  %v4681_v47 = vpop.permute.xlu1 %4680  ;;  %v4605_v38 = vpop.permute.xlu2 %4604  ;;  %v3786_v15 = vmul.f32 %v7608_v57, %v12548_v7  ;;  %v7609_v51 = vld [vmem:[%s13339_s0 + $0x428] sm:$0xff] }
 0x97b   :  { %v4706_v48 = vadd.f32 %v4681_v47, %v4650_v63  ;;  %v4707_v46 = vadd.f32 %v4681_v47, %v4651_v3  ;;  %v4642_v13 = vmul.f32 %v7606_v60, %v4605_v38  ;;  %v4643_v28 = vmul.f32 %v7607_v32, %v4605_v38  ;;  %v7067_v47 = vld [vmem:[%s13341_s2 + $0x154] sm:$0xf] }
 0x97c   :  { %v3787_v23 = vmul.f32 %v7609_v51, %v12548_v7  ;;  %v12867_v63 = vor.u32 %v7070_v55, %v6635_v37  ;;  %5722 = vmatmul.bf16.gmra.mxu2 %v12841_v22  ;;  %5771 = vmatmul.bf16.gmra.mxu3 %v12855_v54  ;;  %v7140_v37 = vld [vmem:[#allocation2 + $0x214] sm:$0xf0]  ;;  %v6925_v55 = vld [vmem:[#allocation2 + $0x218] sm:$0xf0] }
 0x97d   :  { %v4722_v53 = vmax.f32 %v4706_v48, 0.0  ;;  %v4723_v5 = vmax.f32 %v4707_v46, 0.0  ;;  %v4698_v34 = vadd.f32 %v4661_v12, %v4642_v13  ;;  %v4699_v56 = vadd.f32 %v4661_v12, %v4643_v28  ;;  %v6637_v48 = vld [vmem:[%s13341_s2 + $0x168] sm:$0xf0] }
 0x97e   :  { %v12877_v7 = vor.u32 %v7067_v47, %v6637_v48 }
 0x97f   :  { %v4734_v36 = vpack.c.bf16 %v4723_v5, %v4722_v53  ;;  %v4714_v26 = vmax.f32 %v4698_v34, 0.0  ;;  %v4715_v44 = vmax.f32 %v4699_v56, 0.0  ;;  %v7610_v56 = vld [vmem:[%s13339_s0 + $0x530] sm:$0xff] }
 0x981   :  { %4744 = vst.msk [vmem:[#allocation2 + $0x2a0] sm:$0xff] %vm10284_vm15, %v4734_v36  ;;  %v4730_v35 = vpack.c.bf16 %v4715_v44, %v4714_v26  ;;  %v7158_v28 = vld [vmem:[#allocation2 + $0x2a4] sm:$0xf0]  ;;  %v6997_v5 = vld [vmem:[#allocation2 + $0x2a8] sm:$0xf0] }
 0x982   :  { %v3811_v3 = vpop.permute.xlu1 %3810  ;;  %5624 = vmatmul.bf16.gmra.mxu0 %v12867_v63 }
 0x983   :  { %v3842_v46 = vadd.f32 %v3811_v3, %v3786_v15  ;;  %v3843_v38 = vadd.f32 %v3811_v3, %v3787_v23  ;;  %4740 = vst.msk [vmem:[#allocation2 + $0x280] sm:$0xff] %vm10284_vm15, %v4730_v35  ;;  %5673 = vmatmul.bf16.gmra.mxu1 %v12877_v7 }
 0x985   :  { %v3858_v60 = vmax.f32 %v3842_v46, 0.0  ;;  %v3859_v13 = vmax.f32 %v3843_v38, 0.0  ;;  %v5639_v46 = vpop.f32.mrf.mxu1 }
 0x987   :  { %v3872_v32 = vpack.c.bf16 %v3859_v13, %v3858_v60  ;;  %v5688_v60 = vpop.f32.mrf.mxu2 }
 0x988   :  { %v6995_v12 = vld [vmem:[#allocation2 + $0x2a0] sm:$0xf]  ;;  %v7157_v53 = vld [vmem:[#allocation2 + $0x2a4] sm:$0xf] }
 0x989   :  { %3882 = vst.msk [vmem:[#allocation2 + $0x210] sm:$0xff] %vm10284_vm15, %v3872_v32  ;;  %v6996_v1 = vor.u32 %v7158_v28, %v6995_v12  ;;  %v7000_v29 = vor.u32 %v7157_v53, %v6997_v5  ;;  %v7613_v32 = vld [vmem:[%s13339_s0 + $0x418] sm:$0xff] }
 0x98a   :  { %v6979_v45 = vld [vmem:[#allocation2 + $0x280] sm:$0xf] }
 0x98b   :  { %v4620_v34 = vpop.permute.xlu1 %4619  ;;  %5831 = vmatpush.bf16.msrb.mxu1 %v6996_v1  ;;  %6125 = vmatpush.bf16.msra.mxu3 %v7000_v29 }
 0x98c   :  { %v4648_v36 = vmul.f32 %v7610_v56, %v4620_v34  ;;  %v4649_v41 = vmul.f32 %v7611_v42, %v4620_v34  ;;  %5883 = vmatmul.bf16.vlgmr.msrb.gmra.mxu2 %v12415_v39  ;;  %5932 = vmatmul.bf16.vlgmr.msrb.gmra.mxu3 %v12427_v59  ;;  %v5737_v39 = vpop.f32.mrf.mxu3  ;;  %v6987_v42 = vld [vmem:[#allocation2 + $0x290] sm:$0xf]  ;;  %v7615_v59 = vld [vmem:[%s13339_s0 + $0x408] sm:$0xff] }
 0x98e   :  { %v4704_v26 = vadd.f32 %v12807_v24, %v4648_v36  ;;  %v4705_v44 = vadd.f32 %v12807_v24, %v4649_v41  ;;  %v5590_v47 = vpop.f32.mrf.mxu0  ;;  %v7612_v24 = vld [vmem:[%s13339_s0 + $0x410] sm:$0xff]  ;;  %v5641_v41 = vpop.f32.mrf.mxu1 }
 0x98f   :  { %v5640_v5 = vadd.f32 %v5639_v46, %v5590_v47 }
 0x990   :  { %v4720_v57 = vmax.f32 %v4704_v26, 0.0  ;;  %v4721_v15 = vmax.f32 %v4705_v44, 0.0  ;;  %v6923_v51 = vld [vmem:[#allocation2 + $0x210] sm:$0xf]  ;;  %v7139_v23 = vld [vmem:[#allocation2 + $0x214] sm:$0xf] }
 0x991   :  { %v6924_v35 = vor.u32 %v7140_v37, %v6923_v51  ;;  %v6928_v3 = vor.u32 %v7139_v23, %v6925_v55  ;;  %v5689_v56 = vadd.f32 %v5688_v60, %v5640_v5  ;;  %v7614_v26 = vld [vmem:[%s13339_s0 + $0x400] sm:$0xff]  ;;  %v7155_v55 = vld [vmem:[#allocation2 + $0x294] sm:$0xf]  ;;  %v5690_v23 = vpop.f32.mrf.mxu2 }
 0x992   :  { %v4733_v48 = vpack.c.bf16 %v4721_v15, %v4720_v57  ;;  %v3782_v44 = vmul.f32 %v7614_v26, %v12765_v27  ;;  %v7119_v26 = vld [vmem:[#allocation2 + $0x174] sm:$0xf] }
 0x993   :  { %v3750_v38 = vpop.permute.xlu1 %3749  ;;  %5783 = vmatpush.bf16.msrb.mxu0 %v6924_v35  ;;  %6077 = vmatpush.bf16.msra.mxu2 %v6928_v3  ;;  %v12913_v15 = vadd.f32 %v5737_v39, %v5689_v56 }
 0x994   :  { %4743 = vst.msk [vmem:[#allocation2 + $0x298] sm:$0xff] %vm10284_vm15, %v4733_v48  ;;  %v3784_v13 = vmul.f32 %v7612_v24, %v3750_v38  ;;  %v3785_v28 = vmul.f32 %v7613_v32, %v3750_v38  ;;  %v5739_v60 = vpop.f32.mrf.mxu3 }
 0x996   :  { %v3840_v12 = vadd.f32 %v12812_v43, %v3784_v13  ;;  %v3841_v53 = vadd.f32 %v12812_v43, %v3785_v28  ;;  %v5592_v34 = vpop.f32.mrf.mxu0  ;;  %v3783_v43 = vmul.f32 %v7615_v59, %v12765_v27  ;;  %v5644_v39 = vpop.f32.mrf.mxu1 }
 0x997   :  { %v5642_v51 = vadd.f32 %v5641_v41, %v5592_v34  ;;  %v7617_v34 = vld [vmem:[%s13339_s0 + $0x518] sm:$0xff] }
 0x998   :  { %v3856_v1 = vmax.f32 %v3840_v12, 0.0  ;;  %v3857_v29 = vmax.f32 %v3841_v53, 0.0 }
 0x999   :  { %v5691_v38 = vadd.f32 %v5690_v23, %v5642_v51  ;;  %v5693_v12 = vpop.f32.mrf.mxu2 }
 0x99a   :  { %v3871_v36 = vpack.c.bf16 %v3857_v29, %v3856_v1  ;;  %v7616_v1 = vld [vmem:[%s13339_s0 + $0x510] sm:$0xff] }
 0x99b   :  { %v7156_v37 = vld [vmem:[#allocation2 + $0x294] sm:$0xf0]  ;;  %v6989_v57 = vld [vmem:[#allocation2 + $0x298] sm:$0xf0]  ;;  %v12917_v13 = vadd.f32 %v5739_v60, %v5691_v38 }
 0x99c   :  { %3881 = vst.msk [vmem:[#allocation2 + $0x208] sm:$0xff] %vm10284_vm15, %v3871_v36  ;;  %v3801_v35 = vpop.permute.xlu1 %3800  ;;  %v6988_v3 = vor.u32 %v7156_v37, %v6987_v42  ;;  %v6992_v47 = vor.u32 %v7155_v55, %v6989_v57  ;;  %5888 = vmatmul.bf16.gmra.mxu2 %v12470_v25  ;;  %5937 = vmatmul.bf16.gmra.mxu3 %v12487_v10  ;;  %v4666_v36 = vpop.permute.xlu2 %4665  ;;  %v6483_v10 = vld [vmem:[%s13341_s2 + $0x10] sm:$0xf] }
 0x99d   :  { %v3838_v48 = vadd.f32 %v3801_v35, %v3782_v44  ;;  %v3839_v46 = vadd.f32 %v3801_v35, %v3783_v43  ;;  %v7030_v43 = vld [vmem:[%s13341_s2 + $0x24] sm:$0xf0] }
 0x99e   :  { %5832 = vmatpush.bf16.msrb.mxu1 %v6988_v3  ;;  %6126 = vmatpush.bf16.msra.mxu3 %v6992_v47  ;;  %v5595_v28 = vpop.f32.mrf.mxu0  ;;  %v5646_v3 = vpop.f32.mrf.mxu1 }
 0x99f   :  { %v3854_v27 = vmax.f32 %v3838_v48, 0.0  ;;  %v3855_v24 = vmax.f32 %v3839_v46, 0.0  ;;  %v5742_v5 = vpop.f32.mrf.mxu3  ;;  %v5645_v25 = vadd.f32 %v5644_v39, %v5595_v28  ;;  %v6845_v46 = vld [vmem:[#allocation2 + $0x178] sm:$0xf0]  ;;  %v12937_v28 = vor.u32 %v7030_v43, %v6483_v10  ;;  %v6837_v39 = vld [vmem:[#allocation2 + $0x168] sm:$0xf0] }
 0x9a1   :  { %v3870_v32 = vpack.c.bf16 %v3855_v24, %v3854_v27  ;;  %v5694_v55 = vadd.f32 %v5693_v12, %v5645_v25  ;;  %v5695_v27 = vpop.f32.mrf.mxu2 }
 0x9a3   :  { %3880 = vst.msk [vmem:[#allocation2 + $0x200] sm:$0xff] %vm10284_vm15, %v3870_v32  ;;  %v7138_v44 = vld [vmem:[#allocation2 + $0x204] sm:$0xf0]  ;;  %v6917_v59 = vld [vmem:[#allocation2 + $0x208] sm:$0xf0]  ;;  %v12935_v38 = vadd.f32 %v5742_v5, %v5694_v55  ;;  %v6848_v32 = vor.u32 %v7119_v26, %v6845_v46 }
 0x9a5   :  { %v4610_v53 = vpop.permute.xlu1 %4609 }
 0x9a6   :  { %v4644_v29 = vmul.f32 %v7616_v1, %v4610_v53  ;;  %v4645_v56 = vmul.f32 %v7617_v34, %v4610_v53  ;;  %v5597_v37 = vpop.f32.mrf.mxu0  ;;  %v7117_v1 = vld [vmem:[#allocation2 + $0x164] sm:$0xf]  ;;  %v6829_v34 = vld [vmem:[#allocation2 + $0x158] sm:$0xf0] }
 0x9a7   :  { %v5647_v60 = vadd.f32 %v5646_v3, %v5597_v37  ;;  %v5744_v53 = vpop.f32.mrf.mxu3  ;;  %v6840_v5 = vor.u32 %v7117_v1, %v6837_v39  ;;  %v7153_v37 = vld [vmem:[#allocation2 + $0x284] sm:$0xf] }
 0x9a8   :  { %v4700_v42 = vadd.f32 %v4666_v36, %v4644_v29  ;;  %v4701_v41 = vadd.f32 %v4666_v36, %v4645_v56  ;;  %v7115_v36 = vld [vmem:[#allocation2 + $0x154] sm:$0xf] }
 0x9a9   :  { %v5696_v12 = vadd.f32 %v5695_v27, %v5647_v60  ;;  %v6832_v10 = vor.u32 %v7115_v36, %v6829_v34  ;;  %v7133_v27 = vld [vmem:[#allocation2 + $0x1e4] sm:$0xf] }
 0x9aa   :  { %v4716_v57 = vmax.f32 %v4700_v42, 0.0  ;;  %v4717_v51 = vmax.f32 %v4701_v41, 0.0  ;;  %v6915_v23 = vld [vmem:[#allocation2 + $0x200] sm:$0xf]  ;;  %v7137_v35 = vld [vmem:[#allocation2 + $0x204] sm:$0xf] }
 0x9ab   :  { %v6916_v47 = vor.u32 %v7138_v44, %v6915_v23  ;;  %v6920_v48 = vor.u32 %v7137_v35, %v6917_v59  ;;  %v12941_v29 = vadd.f32 %v5744_v53, %v5696_v12  ;;  %v6909_v42 = vld [vmem:[#allocation2 + $0x1f8] sm:$0xf0]  ;;  %v7113_v41 = vld [vmem:[#allocation2 + $0x144] sm:$0xf]  ;;  %v7027_v44 = vld [vmem:[%s13341_s2 + $0x14] sm:$0xf] }
 0x9ac   :  { %v4731_v24 = vpack.c.bf16 %v4717_v51, %v4716_v57  ;;  %5893 = vmatmul.bf16.gmra.mxu2 %v12534_v33  ;;  %v6485_v59 = vld [vmem:[%s13341_s2 + $0x28] sm:$0xf0]  ;;  %5942 = vmatmul.bf16.gmra.mxu3 %v12545_v30  ;;  %v7135_v35 = vld [vmem:[#allocation2 + $0x1f4] sm:$0xf] }
 0x9ad   :  { %5784 = vmatpush.bf16.msrb.mxu0 %v6916_v47  ;;  %6078 = vmatpush.bf16.msra.mxu2 %v6920_v48  ;;  %v6912_v3 = vor.u32 %v7135_v35, %v6909_v42  ;;  %v6821_v47 = vld [vmem:[#allocation2 + $0x148] sm:$0xf0]  ;;  %v12952_v48 = vor.u32 %v7027_v44, %v6485_v59  ;;  %v7111_v30 = vld [vmem:[#allocation2 + $0x134] sm:$0xf]  ;;  %v6893_v44 = vld [vmem:[#allocation2 + $0x1d8] sm:$0xf0] }
 0x9ae   :  { %4741 = vst.msk [vmem:[#allocation2 + $0x288] sm:$0xff] %vm10284_vm15, %v4731_v24  ;;  %v5600_v56 = vpop.f32.mrf.mxu0  ;;  %v6824_v60 = vor.u32 %v7113_v41, %v6821_v47  ;;  %vm5556_vm15 = vcmask 523264   ;;  %v6507_v24 = vld [vmem:[%s13341_s2 + $0x40] sm:$0xf]  ;;  %v6901_v12 = vld [vmem:[#allocation2 + $0x1e8] sm:$0xf0] }
 0x9af   :  { %v5649_v25 = vpop.f32.mrf.mxu1  ;;  %v5698_v26 = vpop.f32.mrf.mxu2  ;;  %v6904_v1 = vor.u32 %v7133_v27, %v6901_v12  ;;  %v7131_v41 = vld [vmem:[#allocation2 + $0x1d4] sm:$0xf] }
 0x9b0   :  { %5785 = vmatmul.bf16.vlgmr.msrb.gmra.mxu0 %v12937_v28  ;;  %v5650_v55 = vadd.f32 %v5649_v25, %v5600_v56  ;;  %v5747_v57 = vpop.f32.mrf.mxu3  ;;  %v6896_v59 = vor.u32 %v7131_v41, %v6893_v44  ;;  %v7107_v47 = vld [vmem:[#allocation2 + $0x114] sm:$0xf]  ;;  %v6531_v41 = vld [vmem:[%s13341_s2 + $0x70] sm:$0xf] }
 0x9b1   :  { %5973 = vmatpush.bf16.msra.mxu0 %v6848_v32  ;;  %v7036_v32 = vld [vmem:[%s13341_s2 + $0x54] sm:$0xf0] }
 0x9b2   :  { %v5699_v46 = vadd.f32 %v5698_v26, %v5650_v55  ;;  %v12964_v42 = vor.u32 %v7036_v32, %v6507_v24  ;;  %v6805_v26 = vld [vmem:[#allocation2 + $0x128] sm:$0xf0]  ;;  %v7033_v24 = vld [vmem:[%s13341_s2 + $0x44] sm:$0xf]  ;;  %v6509_v32 = vld [vmem:[%s13341_s2 + $0x58] sm:$0xf0] }
 0x9b3   :  { %v6885_v55 = vld [vmem:[#allocation2 + $0x1c8] sm:$0xf0] }
 0x9b4   :  { %v12962_v34 = vadd.f32 %v5747_v57, %v5699_v46  ;;  %v6797_v57 = vld [vmem:[#allocation2 + $0x118] sm:$0xf0] }
 0x9b5   :  { %5974 = vmatpush.bf16.msra.mxu0 %v6840_v5  ;;  %v7154_v43 = vld [vmem:[#allocation2 + $0x284] sm:$0xf0]  ;;  %v6981_v33 = vld [vmem:[#allocation2 + $0x288] sm:$0xf0]  ;;  %v6813_v5 = vld [vmem:[#allocation2 + $0x138] sm:$0xf0]  ;;  %v6800_v27 = vor.u32 %v7107_v47, %v6797_v57 }
 0x9b6   :  { %v6980_v51 = vor.u32 %v7154_v43, %v6979_v45  ;;  %v6984_v23 = vor.u32 %v7153_v37, %v6981_v33  ;;  %v5602_v39 = vpop.f32.mrf.mxu0  ;;  %v6816_v36 = vor.u32 %v7111_v30, %v6813_v5  ;;  %v7109_v43 = vld [vmem:[#allocation2 + $0x124] sm:$0xf]  ;;  %v7127_v30 = vld [vmem:[#allocation2 + $0x1b4] sm:$0xf]  ;;  %v6789_v5 = vld [vmem:[#allocation2 + $0x108] sm:$0xf0] }
 0x9b7   :  { %v5651_v53 = vpop.f32.mrf.mxu1  ;;  %v5700_v25 = vpop.f32.mrf.mxu2  ;;  %v6808_v33 = vor.u32 %v7109_v43, %v6805_v26  ;;  %v6861_v57 = vld [vmem:[#allocation2 + $0x198] sm:$0xf0] }
 0x9b8   :  { %5833 = vmatpush.bf16.msrb.mxu1 %v6980_v51  ;;  %6127 = vmatpush.bf16.msra.mxu3 %v6984_v23  ;;  %v5652_v56 = vadd.f32 %v5651_v53, %v5602_v39  ;;  %v5749_v45 = vpop.f32.mrf.mxu3  ;;  %v7129_v23 = vld [vmem:[#allocation2 + $0x1c4] sm:$0xf]  ;;  %v6877_v53 = vld [vmem:[#allocation2 + $0x1b8] sm:$0xf0] }
 0x9b9   :  { %5975 = vmatpush.bf16.msra.mxu0 %v6832_v10  ;;  %v7105_v39 = vld [vmem:[#allocation2 + $0x104] sm:$0xf] }
 0x9ba   :  { %v5701_v10 = vadd.f32 %v5700_v25, %v5652_v56  ;;  %v12977_v56 = vor.u32 %v7033_v24, %v6509_v32  ;;  %v6792_v25 = vor.u32 %v7105_v39, %v6789_v5 }
 0x9bb   :  { %7009 = vmatmul.msk.bf16.vlgmr.msrb.gmra.mxu1 %vm5556_vm15, %v12952_v48 }
 0x9bc   :  { %6022 = vmatpush.bf16.msra.mxu1 %v6912_v3  ;;  %v12966_v37 = vadd.f32 %v5749_v45, %v5701_v10  ;;  %5898 = vmatmul.bf16.gmra.mxu2 %v12602_v18  ;;  %v6888_v3 = vor.u32 %v7129_v23, %v6885_v55  ;;  %v7125_v10 = vld [vmem:[#allocation2 + $0x1a4] sm:$0xf] }
 0x9bd   :  { %5976 = vmatpush.bf16.msra.mxu0 %v6824_v60  ;;  %5947 = vmatmul.bf16.gmra.mxu3 %v12611_v14  ;;  %v7042_v14 = vld [vmem:[%s13341_s2 + $0x84] sm:$0xf0] }
 0x9be   :  { %v5605_v51 = vpop.f32.mrf.mxu0  ;;  %v12989_v55 = vor.u32 %v7042_v14, %v6531_v41 }
 0x9bf   :  { %v5654_v35 = vpop.f32.mrf.mxu1  ;;  %v5703_v60 = vpop.f32.mrf.mxu2 }
 0x9c0   :  { %6023 = vmatpush.bf16.msra.mxu1 %v6904_v1  ;;  %5790 = vmatmul.bf16.gmra.mxu0 %v12964_v42  ;;  %v5655_v46 = vadd.f32 %v5654_v35, %v5605_v51  ;;  %v5752_v12 = vpop.f32.mrf.mxu3  ;;  %v6880_v1 = vor.u32 %v7127_v30, %v6877_v53  ;;  %v7123_v35 = vld [vmem:[#allocation2 + $0x194] sm:$0xf] }
 0x9c1   :  { %5977 = vmatpush.bf16.msra.mxu0 %v6816_v36  ;;  %v6869_v36 = vld [vmem:[#allocation2 + $0x1a8] sm:$0xf0] }
 0x9c2   :  { %v5704_v18 = vadd.f32 %v5703_v60, %v5655_v46  ;;  %v6872_v44 = vor.u32 %v7125_v10, %v6869_v36  ;;  %v6853_v46 = vld [vmem:[#allocation2 + $0x188] sm:$0xf0] }
 0x9c4   :  { %6024 = vmatpush.bf16.msra.mxu1 %v6896_v59  ;;  %v12987_v59 = vadd.f32 %v5752_v12, %v5704_v18  ;;  %v7039_v18 = vld [vmem:[%s13341_s2 + $0x74] sm:$0xf]  ;;  %v6533_v12 = vld [vmem:[%s13341_s2 + $0x88] sm:$0xf0] }
 0x9c5   :  { %5978 = vmatpush.bf16.msra.mxu0 %v6808_v33  ;;  %v13002_v5 = vor.u32 %v7039_v18, %v6533_v12 }
 0x9c6   :  { %v5607_v26 = vpop.f32.mrf.mxu0 }
 0x9c7   :  { %v5656_v45 = vpop.f32.mrf.mxu1  ;;  %v5705_v33 = vpop.f32.mrf.mxu2 }
 0x9c8   :  { %6025 = vmatpush.bf16.msra.mxu1 %v6888_v3  ;;  %v5657_v43 = vadd.f32 %v5656_v45, %v5607_v26  ;;  %v5754_v23 = vpop.f32.mrf.mxu3  ;;  %v6864_v3 = vor.u32 %v7123_v35, %v6861_v57  ;;  %v6557_v35 = vld [vmem:[%s13341_s2 + $0xb8] sm:$0xf0] }
 0x9c9   :  { %5979 = vmatpush.bf16.msra.mxu0 %v6800_v27  ;;  %v7121_v27 = vld [vmem:[#allocation2 + $0x184] sm:$0xf] }
 0x9ca   :  { %v5706_v51 = vadd.f32 %v5705_v33, %v5657_v43  ;;  %v6856_v24 = vor.u32 %v7121_v27, %v6853_v46 }
 0x9cb   :  { %7010 = vmatmul.msk.bf16.gmra.mxu1 %vm5556_vm15, %v12977_v56 }
 0x9cc   :  { %6026 = vmatpush.bf16.msra.mxu1 %v6880_v1  ;;  %v12991_v47 = vadd.f32 %v5754_v23, %v5706_v51  ;;  %5903 = vmatmul.bf16.gmra.mxu2 %v12668_v21  ;;  %v6555_v21 = vld [vmem:[%s13341_s2 + $0xa0] sm:$0xf]  ;;  %v7045_v23 = vld [vmem:[%s13341_s2 + $0xa4] sm:$0xf] }
 0x9cd   :  { %5980 = vmatpush.bf16.msra.mxu0 %v6792_v25  ;;  %5952 = vmatmul.bf16.gmra.mxu3 %v12678_v17  ;;  %v7048_v25 = vld [vmem:[%s13341_s2 + $0xb4] sm:$0xf0]  ;;  %v13027_v27 = vor.u32 %v7045_v23, %v6557_v35 }
 0x9ce   :  { %v5610_v60 = vpop.f32.mrf.mxu0  ;;  %v13014_v10 = vor.u32 %v7048_v25, %v6555_v21 }
 0x9cf   :  { %v5659_v30 = vpop.f32.mrf.mxu1  ;;  %v5708_v39 = vpop.f32.mrf.mxu2 }
 0x9d0   :  { %6027 = vmatpush.bf16.msra.mxu1 %v6872_v44  ;;  %5795 = vmatmul.bf16.gmra.mxu0 %v12989_v55  ;;  %v5660_v32 = vadd.f32 %v5659_v30, %v5610_v60  ;;  %v5757_v1 = vpop.f32.mrf.mxu3  ;;  %v7054_v30 = vld [vmem:[%s13341_s2 + $0xe4] sm:$0xf0] }
 0x9d2   :  { %v5709_v53 = vadd.f32 %v5708_v39, %v5660_v32 }
 0x9d4   :  { %6028 = vmatpush.bf16.msra.mxu1 %v6864_v3  ;;  %v13012_v14 = vadd.f32 %v5757_v1, %v5709_v53 }
 0x9d6   :  { %v5612_v36 = vpop.f32.mrf.mxu0 }
 0x9d7   :  { %v5661_v41 = vpop.f32.mrf.mxu1  ;;  %v5710_v26 = vpop.f32.mrf.mxu2 }
 0x9d8   :  { %6029 = vmatpush.bf16.msra.mxu1 %v6856_v24  ;;  %v5662_v17 = vadd.f32 %v5661_v41, %v5612_v36  ;;  %v5759_v44 = vpop.f32.mrf.mxu3 }
 0x9da   :  { %v5711_v45 = vadd.f32 %v5710_v26, %v5662_v17  ;;  %v7051_v17 = vld [vmem:[%s13341_s2 + $0xd4] sm:$0xf]  ;;  %v6581_v26 = vld [vmem:[%s13341_s2 + $0xe8] sm:$0xf0] }
 0x9db   :  { %7011 = vmatmul.msk.bf16.gmra.mxu1 %vm5556_vm15, %v13002_v5 }
 0x9dc   :  { %v13016_v43 = vadd.f32 %v5759_v44, %v5711_v45  ;;  %5908 = vmatmul.bf16.gmra.mxu2 %v12740_v6  ;;  %v6579_v6 = vld [vmem:[%s13341_s2 + $0xd0] sm:$0xf] }
 0x9dd   :  { %5957 = vmatmul.bf16.gmra.mxu3 %v12743_v62  ;;  %v13039_v18 = vor.u32 %v7054_v30, %v6579_v6 }
 0x9de   :  { %v5615_v33 = vpop.f32.mrf.mxu0 }
 0x9df   :  { %v5713_v3 = vpop.f32.mrf.mxu2 }
 0x9e0   :  { %5800 = vmatmul.bf16.gmra.mxu0 %v13014_v10  ;;  %v5664_v57 = vpop.f32.mrf.mxu1  ;;  %v5762_v60 = vpop.f32.mrf.mxu3 }
 0x9e1   :  { %v5665_v51 = vadd.f32 %v5664_v57, %v5615_v33  ;;  %v13052_v57 = vor.u32 %v7051_v17, %v6581_v26  ;;  %v7066_v26 = vld [vmem:[%s13341_s2 + $0x144] sm:$0xf0] }
 0x9e3   :  { %v5714_v46 = vadd.f32 %v5713_v3, %v5665_v51  ;;  %v7060_v51 = vld [vmem:[%s13341_s2 + $0x114] sm:$0xf0] }
 0x9e5   :  { %v13037_v39 = vadd.f32 %v5762_v60, %v5714_v46 }
 0x9e6   :  { %v5617_v24 = vpop.f32.mrf.mxu0 }
 0x9e7   :  { %v5715_v12 = vpop.f32.mrf.mxu2 }
 0x9e8   :  { %v5666_v32 = vpop.f32.mrf.mxu1  ;;  %v5764_v1 = vpop.f32.mrf.mxu3 }
 0x9e9   :  { %v5667_v62 = vadd.f32 %v5666_v32, %v5617_v24 }
 0x9eb   :  { %7012 = vmatmul.msk.bf16.gmra.mxu1 %vm5556_vm15, %v13027_v27  ;;  %v5716_v53 = vadd.f32 %v5715_v12, %v5667_v62 }
 0x9ec   :  { %5913 = vmatmul.bf16.gmra.mxu2 %v12793_v40  ;;  %v6603_v40 = vld [vmem:[%s13341_s2 + $0x100] sm:$0xf] }
 0x9ed   :  { %v13041_v21 = vadd.f32 %v5764_v1, %v5716_v53  ;;  %5962 = vmatmul.bf16.gmra.mxu3 %v12810_v11  ;;  %v13064_v46 = vor.u32 %v7060_v51, %v6603_v40  ;;  %v7057_v53 = vld [vmem:[%s13341_s2 + $0x104] sm:$0xf]  ;;  %v6605_v1 = vld [vmem:[%s13341_s2 + $0x118] sm:$0xf0] }
 0x9ee   :  { %v13077_v17 = vor.u32 %v7057_v53, %v6605_v1 }
 0x9ef   :  { %v5620_v25 = vpop.f32.mrf.mxu0  ;;  %v5718_v45 = vpop.f32.mrf.mxu2 }
 0x9f0   :  { %5805 = vmatmul.bf16.gmra.mxu0 %v13039_v18  ;;  %v5669_v36 = vpop.f32.mrf.mxu1  ;;  %v5767_v33 = vpop.f32.mrf.mxu3 }
 0x9f1   :  { %v5670_v41 = vadd.f32 %v5669_v36, %v5620_v25 }
 0x9f3   :  { %v5719_v44 = vadd.f32 %v5718_v45, %v5670_v41 }
 0x9f5   :  { %v13062_v3 = vadd.f32 %v5767_v33, %v5719_v44 }
 0x9f7   :  { %v5622_v23 = vpop.f32.mrf.mxu0  ;;  %v5720_v60 = vpop.f32.mrf.mxu2 }
 0x9f8   :  { %v5671_v35 = vpop.f32.mrf.mxu1  ;;  %v5769_v30 = vpop.f32.mrf.mxu3 }
 0x9f9   :  { %v5672_v11 = vadd.f32 %v5671_v35, %v5622_v23 }
 0x9fb   :  { %7013 = vmatmul.msk.bf16.gmra.mxu1 %vm5556_vm15, %v13052_v57  ;;  %v5721_v6 = vadd.f32 %v5720_v60, %v5672_v11  ;;  %v7063_v60 = vld [vmem:[%s13341_s2 + $0x134] sm:$0xf] }
 0x9fc   :  { %5918 = vmatmul.bf16.gmra.mxu2 %v12867_v63  ;;  %v6627_v63 = vld [vmem:[%s13341_s2 + $0x130] sm:$0xf] }
 0x9fd   :  { %v13067_v24 = vadd.f32 %v5769_v30, %v5721_v6  ;;  %5967 = vmatmul.bf16.gmra.mxu3 %v12877_v7  ;;  %v13089_v40 = vor.u32 %v7066_v26, %v6627_v63  ;;  %v6629_v6 = vld [vmem:[%s13341_s2 + $0x148] sm:$0xf0]  ;;  %v6653_v63 = vld [vmem:[%s13341_s2 + $0x178] sm:$0xf0] }
 0x9ff   :  { %v5625_v32 = vpop.f32.mrf.mxu0  ;;  %v5723_v25 = vpop.f32.mrf.mxu2 }
 0xa00   :  { %5810 = vmatmul.bf16.gmra.mxu0 %v13064_v46  ;;  %v5674_v62 = vpop.f32.mrf.mxu1  ;;  %v5772_v41 = vpop.f32.mrf.mxu3 }
 0xa01   :  { %v5675_v12 = vadd.f32 %v5674_v62, %v5625_v32  ;;  %v13103_v32 = vor.u32 %v7063_v60, %v6629_v6 }
 0xa03   :  { %v5724_v36 = vadd.f32 %v5723_v25, %v5675_v12  ;;  %v6651_v12 = vld [vmem:[%s13341_s2 + $0x160] sm:$0xf] }
 0xa05   :  { %v13087_v33 = vadd.f32 %v5772_v41, %v5724_v36  ;;  %v7069_v41 = vld [vmem:[%s13341_s2 + $0x164] sm:$0xf] }
 0xa07   :  { %v5627_v45 = vpop.f32.mrf.mxu0  ;;  %v5725_v51 = vpop.f32.mrf.mxu2 }
 0xa08   :  { %v5676_v44 = vpop.f32.mrf.mxu1  ;;  %v5774_v35 = vpop.f32.mrf.mxu3 }
 0xa09   :  { %v5677_v7 = vadd.f32 %v5676_v44, %v5627_v45  ;;  %v13129_v45 = vor.u32 %v7069_v41, %v6653_v63 }
 0xa0b   :  { %7014 = vmatmul.msk.bf16.gmra.mxu1 %vm5556_vm15, %v13077_v17  ;;  %v5726_v23 = vadd.f32 %v5725_v51, %v5677_v7 }
 0xa0c   :  { %6079 = vmatmul.bf16.vlgmr.msra.gmra.mxu2 %v12937_v28  ;;  %v7072_v28 = vld [vmem:[%s13341_s2 + $0x174] sm:$0xf0] }
 0xa0d   :  { %v13092_v11 = vadd.f32 %v5774_v35, %v5726_v23  ;;  %7017 = vmatmul.msk.bf16.vlgmr.msra.gmra.mxu3 %vm5556_vm15, %v12952_v48  ;;  %v13115_v1 = vor.u32 %v7072_v28, %v6651_v12 }
 0xa0f   :  { %v5884_v30 = vpop.f32.mrf.mxu2 }
 0xa10   :  { %5815 = vmatmul.bf16.gmra.mxu0 %v13089_v40  ;;  %v5933_v62 = vpop.f32.mrf.mxu3 }
 0xa11   :  { %v13113_v53 = vadd.f32 %v5933_v62, %v5884_v30 }
 0xa17   :  { %v5886_v48 = vpop.f32.mrf.mxu2 }
 0xa18   :  { %v5935_v25 = vpop.f32.mrf.mxu3 }
 0xa19   :  { %v13118_v36 = vadd.f32 %v5935_v25, %v5886_v48 }
 0xa1b   :  { %7015 = vmatmul.msk.bf16.gmra.mxu1 %vm5556_vm15, %v13103_v32 }
 0xa1c   :  { %6084 = vmatmul.bf16.gmra.mxu2 %v12964_v42 }
 0xa1d   :  { %7018 = vmatmul.msk.bf16.gmra.mxu3 %vm5556_vm15, %v12977_v56 }
 0xa1f   :  { %v5889_v26 = vpop.f32.mrf.mxu2 }
 0xa20   :  { %5820 = vmatmul.bf16.gmra.mxu0 %v13115_v1  ;;  %v5938_v44 = vpop.f32.mrf.mxu3 }
 0xa21   :  { %v13133_v7 = vadd.f32 %v5938_v44, %v5889_v26 }
 0xa27   :  { %v5891_v51 = vpop.f32.mrf.mxu2 }
 0xa28   :  { %v5940_v23 = vpop.f32.mrf.mxu3 }
 0xa29   :  { %v13136_v35 = vadd.f32 %v5940_v23, %v5891_v51 }
 0xa2b   :  { %7016 = vmatmul.msk.bf16.gmra.mxu1 %vm5556_vm15, %v13129_v45 }
 0xa2c   :  { %6089 = vmatmul.bf16.gmra.mxu2 %v12989_v55 }
 0xa2d   :  { %v5786_v42 = vpop.f32.mrf.mxu0  ;;  %7019 = vmatmul.msk.bf16.gmra.mxu3 %vm5556_vm15, %v13002_v5 }
 0xa2e   :  { %v5787_v6 = vadd.f32 %v5786_v42, %v12913_v15 }
 0xa2f   :  { %v5894_v60 = vpop.f32.mrf.mxu2 }
 0xa30   :  { %5981 = vmatmul.bf16.vlgmr.msra.gmra.mxu0 %v12355_v58  ;;  %v5943_v30 = vpop.f32.mrf.mxu3 }
 0xa31   :  { %v13146_v58 = vadd.f32 %v5943_v30, %v5894_v60 }
 0xa35   :  { %v5788_v56 = vpop.f32.mrf.mxu0 }
 0xa36   :  { %v5789_v48 = vadd.f32 %v5788_v56, %v12917_v13 }
 0xa37   :  { %v5896_v55 = vpop.f32.mrf.mxu2 }
 0xa38   :  { %v5835_v62 = vpop.f32.mrf.mxu1  ;;  %v5945_v5 = vpop.f32.mrf.mxu3 }
 0xa39   :  { %v5836_v12 = vadd.f32 %v5835_v62, %v5787_v6  ;;  %v13150_v15 = vadd.f32 %v5945_v5, %v5896_v55 }
 0xa3b   :  { %6169 = vst [vmem:[%s13342_s3] sm:$0xff] %v5836_v12  ;;  %6030 = vmatmul.bf16.vlgmr.msra.gmra.mxu1 %v12404_v16 }
 0xa3c   :  { %6094 = vmatmul.bf16.gmra.mxu2 %v13014_v10 }
 0xa3d   :  { %v5791_v28 = vpop.f32.mrf.mxu0  ;;  %7020 = vmatmul.msk.bf16.gmra.mxu3 %vm5556_vm15, %v13027_v27 }
 0xa3e   :  { %v5792_v13 = vadd.f32 %v5791_v28, %v12935_v38 }
 0xa3f   :  { %v5899_v63 = vpop.f32.mrf.mxu2 }
 0xa40   :  { %v5837_v25 = vpop.f32.mrf.mxu1  ;;  %5986 = vmatmul.bf16.gmra.mxu0 %v12448_v20  ;;  %v5948_v26 = vpop.f32.mrf.mxu3 }
 0xa41   :  { %v5838_v41 = vadd.f32 %v5837_v25, %v5789_v48  ;;  %v13163_v20 = vadd.f32 %v5948_v26, %v5899_v63 }
 0xa43   :  { %6171 = vst [vmem:[%s13342_s3 + $0x10] sm:$0xff] %v5838_v41 }
 0xa45   :  { %v5793_v16 = vpop.f32.mrf.mxu0 }
 0xa46   :  { %v5794_v23 = vadd.f32 %v5793_v16, %v12941_v29 }
 0xa47   :  { %v5901_v51 = vpop.f32.mrf.mxu2 }
 0xa48   :  { %v5840_v44 = vpop.f32.mrf.mxu1  ;;  %v5950_v27 = vpop.f32.mrf.mxu3 }
 0xa49   :  { %v5841_v42 = vadd.f32 %v5840_v44, %v5792_v13  ;;  %v13167_v38 = vadd.f32 %v5950_v27, %v5901_v51 }
 0xa4b   :  { %6173 = vst [vmem:[%s13342_s3 + $0x20] sm:$0xff] %v5841_v42  ;;  %6035 = vmatmul.bf16.gmra.mxu1 %v12464_v0 }
 0xa4c   :  { %6099 = vmatmul.bf16.gmra.mxu2 %v13039_v18 }
 0xa4d   :  { %v5796_v10 = vpop.f32.mrf.mxu0  ;;  %7021 = vmatmul.msk.bf16.gmra.mxu3 %vm5556_vm15, %v13052_v57 }
 0xa4e   :  { %v5797_v29 = vadd.f32 %v5796_v10, %v12962_v34 }
 0xa4f   :  { %v5904_v6 = vpop.f32.mrf.mxu2 }
 0xa50   :  { %v5842_v56 = vpop.f32.mrf.mxu1  ;;  %5991 = vmatmul.bf16.gmra.mxu0 %v12517_v52  ;;  %v5953_v30 = vpop.f32.mrf.mxu3 }
 0xa51   :  { %v5843_v60 = vadd.f32 %v5842_v56, %v5794_v23  ;;  %v13180_v52 = vadd.f32 %v5953_v30, %v5904_v6 }
 0xa53   :  { %6175 = vst [vmem:[%s13342_s3 + $0x30] sm:$0xff] %v5843_v60 }
 0xa55   :  { %v5798_v0 = vpop.f32.mrf.mxu0 }
 0xa56   :  { %v5799_v55 = vadd.f32 %v5798_v0, %v12966_v37 }
 0xa57   :  { %v5906_v28 = vpop.f32.mrf.mxu2 }
 0xa58   :  { %v5845_v62 = vpop.f32.mrf.mxu1  ;;  %v5955_v57 = vpop.f32.mrf.mxu3 }
 0xa59   :  { %v5846_v12 = vadd.f32 %v5845_v62, %v5797_v29  ;;  %v13184_v34 = vadd.f32 %v5955_v57, %v5906_v28 }
 0xa5b   :  { %6177 = vst [vmem:[%s13342_s3 + $0x40] sm:$0xff] %v5846_v12  ;;  %6040 = vmatmul.bf16.gmra.mxu1 %v12532_v9 }
 0xa5c   :  { %6104 = vmatmul.bf16.gmra.mxu2 %v13064_v46 }
 0xa5d   :  { %v5801_v18 = vpop.f32.mrf.mxu0  ;;  %7022 = vmatmul.msk.bf16.gmra.mxu3 %vm5556_vm15, %v13077_v17 }
 0xa5e   :  { %v5802_v37 = vadd.f32 %v5801_v18, %v12987_v59 }
 0xa5f   :  { %v5909_v25 = vpop.f32.mrf.mxu2 }
 0xa60   :  { %v5847_v48 = vpop.f32.mrf.mxu1  ;;  %5996 = vmatmul.bf16.gmra.mxu0 %v12585_v50  ;;  %v5958_v41 = vpop.f32.mrf.mxu3 }
 0xa61   :  { %v5848_v5 = vadd.f32 %v5847_v48, %v5799_v55  ;;  %v13197_v50 = vadd.f32 %v5958_v41, %v5909_v25 }
 0xa63   :  { %6179 = vst [vmem:[%s13342_s3 + $0x50] sm:$0xff] %v5848_v5 }
 0xa65   :  { %v5803_v9 = vpop.f32.mrf.mxu0 }
 0xa66   :  { %v5804_v26 = vadd.f32 %v5803_v9, %v12991_v47 }
 0xa67   :  { %v5911_v13 = vpop.f32.mrf.mxu2 }
 0xa68   :  { %v5850_v16 = vpop.f32.mrf.mxu1  ;;  %v5960_v17 = vpop.f32.mrf.mxu3 }
 0xa69   :  { %v5851_v63 = vadd.f32 %v5850_v16, %v5802_v37  ;;  %v13201_v59 = vadd.f32 %v5960_v17, %v5911_v13 }
 0xa6b   :  { %6181 = vst [vmem:[%s13342_s3 + $0x60] sm:$0xff] %v5851_v63  ;;  %6045 = vmatmul.bf16.gmra.mxu1 %v12600_v8 }
 0xa6c   :  { %6109 = vmatmul.bf16.gmra.mxu2 %v13089_v40 }
 0xa6d   :  { %v5806_v46 = vpop.f32.mrf.mxu0  ;;  %7023 = vmatmul.msk.bf16.gmra.mxu3 %vm5556_vm15, %v13103_v32 }
 0xa6e   :  { %v5807_v47 = vadd.f32 %v5806_v46, %v13012_v14 }
 0xa6f   :  { %v5914_v10 = vpop.f32.mrf.mxu2 }
 0xa70   :  { %v5852_v44 = vpop.f32.mrf.mxu1  ;;  %6001 = vmatmul.bf16.gmra.mxu0 %v12653_v49  ;;  %v5963_v51 = vpop.f32.mrf.mxu3 }
 0xa71   :  { %v5853_v42 = vadd.f32 %v5852_v44, %v5804_v26  ;;  %v13214_v49 = vadd.f32 %v5963_v51, %v5914_v10 }
 0xa73   :  { %6183 = vst [vmem:[%s13342_s3 + $0x70] sm:$0xff] %v5853_v42 }
 0xa75   :  { %v5808_v8 = vpop.f32.mrf.mxu0 }
 0xa76   :  { %v5809_v60 = vadd.f32 %v5808_v8, %v13016_v43 }
 0xa77   :  { %v5916_v56 = vpop.f32.mrf.mxu2 }
 0xa78   :  { %v5855_v23 = vpop.f32.mrf.mxu1  ;;  %v5965_v32 = vpop.f32.mrf.mxu3 }
 0xa79   :  { %v5856_v27 = vadd.f32 %v5855_v23, %v5807_v47  ;;  %v13218_v14 = vadd.f32 %v5965_v32, %v5916_v56 }
 0xa7b   :  { %6185 = vst [vmem:[%s13342_s3 + $0x80] sm:$0xff] %v5856_v27  ;;  %6050 = vmatmul.bf16.gmra.mxu1 %v12670_v2 }
 0xa7c   :  { %6114 = vmatmul.bf16.gmra.mxu2 %v13115_v1 }
 0xa7d   :  { %v5811_v40 = vpop.f32.mrf.mxu0  ;;  %7024 = vmatmul.msk.bf16.gmra.mxu3 %vm5556_vm15, %v13129_v45 }
 0xa7e   :  { %v5812_v43 = vadd.f32 %v5811_v40, %v13037_v39 }
 0xa7f   :  { %v5919_v29 = vpop.f32.mrf.mxu2 }
 0xa80   :  { %v5857_v0 = vpop.f32.mrf.mxu1  ;;  %6006 = vmatmul.bf16.gmra.mxu0 %v12715_v31  ;;  %v5968_v30 = vpop.f32.mrf.mxu3 }
 0xa81   :  { %v5858_v6 = vadd.f32 %v5857_v0, %v5809_v60  ;;  %v13231_v31 = vadd.f32 %v5968_v30, %v5919_v29 }
 0xa83   :  { %6187 = vst [vmem:[%s13342_s3 + $0x90] sm:$0xff] %v5858_v6 }
 0xa85   :  { %v5813_v2 = vpop.f32.mrf.mxu0 }
 0xa86   :  { %v5814_v28 = vadd.f32 %v5813_v2, %v13041_v21 }
 0xa87   :  { %v5921_v18 = vpop.f32.mrf.mxu2 }
 0xa88   :  { %v5860_v62 = vpop.f32.mrf.mxu1  ;;  %v5970_v45 = vpop.f32.mrf.mxu3 }
 0xa89   :  { %v5861_v12 = vadd.f32 %v5860_v62, %v5812_v43  ;;  %v13235_v39 = vadd.f32 %v5970_v45, %v5921_v18 }
 0xa8b   :  { %6189 = vst [vmem:[%s13342_s3 + $0xa0] sm:$0xff] %v5861_v12  ;;  %6055 = vmatmul.bf16.gmra.mxu1 %v12728_v19 }
 0xa8d   :  { %v5816_v1 = vpop.f32.mrf.mxu0 }
 0xa8e   :  { %v5817_v19 = vadd.f32 %v5816_v1, %v13062_v3 }
 0xa8f   :  { %v6080_v21 = vpop.f32.mrf.mxu2 }
 0xa90   :  { %v5862_v55 = vpop.f32.mrf.mxu1  ;;  %6011 = vmatmul.bf16.gmra.mxu0 %v12775_v4  ;;  %v6129_v25 = vpop.f32.mrf.mxu3 }
 0xa91   :  { %v5863_v57 = vadd.f32 %v5862_v55, %v5814_v28 }
 0xa93   :  { %6191 = vst [vmem:[%s13342_s3 + $0xb0] sm:$0xff] %v5863_v57 }
 0xa95   :  { %v5818_v48 = vpop.f32.mrf.mxu0 }
 0xa96   :  { %v5819_v37 = vadd.f32 %v5818_v48, %v13067_v24 }
 0xa97   :  { %v6082_v63 = vpop.f32.mrf.mxu2 }
 0xa98   :  { %v5865_v5 = vpop.f32.mrf.mxu1  ;;  %v6131_v26 = vpop.f32.mrf.mxu3 }
 0xa99   :  { %v5866_v9 = vadd.f32 %v5865_v5, %v5817_v19 }
 0xa9b   :  { %6193 = vst [vmem:[%s13342_s3 + $0xc0] sm:$0xff] %v5866_v9  ;;  %6060 = vmatmul.bf16.gmra.mxu1 %v12791_v61 }
 0xa9d   :  { %v5821_v4 = vpop.f32.mrf.mxu0 }
 0xa9e   :  { %v5822_v46 = vadd.f32 %v5821_v4, %v13087_v33 }
 0xa9f   :  { %v6085_v44 = vpop.f32.mrf.mxu2 }
 0xaa0   :  { %v5867_v41 = vpop.f32.mrf.mxu1  ;;  %6016 = vmatmul.bf16.gmra.mxu0 %v12841_v22  ;;  %v6134_v8 = vpop.f32.mrf.mxu3 }
 0xaa1   :  { %v5868_v16 = vadd.f32 %v5867_v41, %v5819_v37 }
 0xaa3   :  { %6195 = vst [vmem:[%s13342_s3 + $0xd0] sm:$0xff] %v5868_v16 }
 0xaa5   :  { %v5823_v3 = vpop.f32.mrf.mxu0 }
 0xaa6   :  { %v5824_v22 = vadd.f32 %v5823_v3, %v13092_v11 }
 0xaa7   :  { %v6087_v23 = vpop.f32.mrf.mxu2 }
 0xaa8   :  { %v5870_v13 = vpop.f32.mrf.mxu1  ;;  %v6136_v40 = vpop.f32.mrf.mxu3 }
 0xaa9   :  { %v5871_v61 = vadd.f32 %v5870_v13, %v5822_v46 }
 0xaab   :  { %6197 = vst [vmem:[%s13342_s3 + $0xe0] sm:$0xff] %v5871_v61  ;;  %6065 = vmatmul.bf16.gmra.mxu1 %v12855_v54 }
 0xaad   :  { %v5982_v24 = vpop.f32.mrf.mxu0 }
 0xaae   :  { %v5983_v10 = vadd.f32 %v5982_v24, %v13113_v53 }
 0xaaf   :  { %v6090_v6 = vpop.f32.mrf.mxu2 }
 0xab0   :  { %v5872_v17 = vpop.f32.mrf.mxu1  ;;  %v6139_v29 = vpop.f32.mrf.mxu3 }
 0xab1   :  { %v5873_v42 = vadd.f32 %v5872_v17, %v5824_v22 }
 0xab3   :  { %6199 = vst [vmem:[%s13342_s3 + $0xf0] sm:$0xff] %v5873_v42 }
 0xab5   :  { %v5984_v33 = vpop.f32.mrf.mxu0 }
 0xab6   :  { %v5985_v11 = vadd.f32 %v5984_v33, %v13118_v36 }
 0xab7   :  { %v6092_v18 = vpop.f32.mrf.mxu2 }
 0xab8   :  { %v6031_v47 = vpop.f32.mrf.mxu1 }
 0xab9   :  { %v6032_v51 = vadd.f32 %v6031_v47, %v5983_v10 }
 0xabb   :  { %v6081_v27 = vadd.f32 %v6080_v21, %v6032_v51 }
 0xabd   :  { %v6130_v54 = vadd.f32 %v6129_v25, %v6081_v27  ;;  %v5987_v56 = vpop.f32.mrf.mxu0 }
 0xabe   :  { %v5988_v43 = vadd.f32 %v5987_v56, %v13133_v7  ;;  %v6141_v7 = vpop.f32.mrf.mxu3 }
 0xabf   :  { %6170 = vst.msk [vmem:[%s13342_s3 + $0x8] sm:$0xff] %vm34_vm0, %v6130_v54 }
 0xac0   :  { %v6033_v60 = vpop.f32.mrf.mxu1 }
 0xac1   :  { %v6034_v32 = vadd.f32 %v6033_v60, %v5985_v11 }
 0xac3   :  { %v6083_v0 = vadd.f32 %v6082_v63, %v6034_v32 }
 0xac5   :  { %v6132_v2 = vadd.f32 %v6131_v26, %v6083_v0  ;;  %v5989_v53 = vpop.f32.mrf.mxu0 }
 0xac6   :  { %v5990_v28 = vadd.f32 %v5989_v53, %v13136_v35  ;;  %v6095_v35 = vpop.f32.mrf.mxu2  ;;  %v6144_v4 = vpop.f32.mrf.mxu3 }
 0xac7   :  { %6172 = vst.msk [vmem:[%s13342_s3 + $0x18] sm:$0xff] %vm34_vm0, %v6132_v2 }
 0xac8   :  { %v6036_v36 = vpop.f32.mrf.mxu1 }
 0xac9   :  { %v6037_v30 = vadd.f32 %v6036_v36, %v5988_v43 }
 0xacb   :  { %v6086_v62 = vadd.f32 %v6085_v44, %v6037_v30 }
 0xacd   :  { %v6135_v12 = vadd.f32 %v6134_v8, %v6086_v62  ;;  %v5992_v1 = vpop.f32.mrf.mxu0 }
 0xace   :  { %v5993_v5 = vadd.f32 %v5992_v1, %v13146_v58  ;;  %v6097_v63 = vpop.f32.mrf.mxu2  ;;  %v6146_v13 = vpop.f32.mrf.mxu3 }
 0xacf   :  { %6174 = vst.msk [vmem:[%s13342_s3 + $0x28] sm:$0xff] %vm34_vm0, %v6135_v12 }
 0xad0   :  { %v6038_v45 = vpop.f32.mrf.mxu1 }
 0xad1   :  { %v6039_v55 = vadd.f32 %v6038_v45, %v5990_v28 }
 0xad3   :  { %v6088_v57 = vadd.f32 %v6087_v23, %v6039_v55 }
 0xad5   :  { %v6137_v48 = vadd.f32 %v6136_v40, %v6088_v57  ;;  %v5994_v19 = vpop.f32.mrf.mxu0 }
 0xad6   :  { %v5995_v16 = vadd.f32 %v5994_v19, %v13150_v15  ;;  %v6100_v44 = vpop.f32.mrf.mxu2  ;;  %v6149_v33 = vpop.f32.mrf.mxu3 }
 0xad7   :  { %6176 = vst.msk [vmem:[%s13342_s3 + $0x38] sm:$0xff] %vm34_vm0, %v6137_v48 }
 0xad8   :  { %v6041_v9 = vpop.f32.mrf.mxu1 }
 0xad9   :  { %v6042_v21 = vadd.f32 %v6041_v9, %v5993_v5 }
 0xadb   :  { %v6091_v25 = vadd.f32 %v6090_v6, %v6042_v21 }
 0xadd   :  { %v6140_v37 = vadd.f32 %v6139_v29, %v6091_v25  ;;  %v5997_v41 = vpop.f32.mrf.mxu0 }
 0xade   :  { %v5998_v24 = vadd.f32 %v5997_v41, %v13163_v20  ;;  %v6102_v40 = vpop.f32.mrf.mxu2 }
 0xadf   :  { %6178 = vst.msk [vmem:[%s13342_s3 + $0x48] sm:$0xff] %vm34_vm0, %v6140_v37 }
 0xae0   :  { %v6043_v58 = vpop.f32.mrf.mxu1 }
 0xae1   :  { %v6044_v3 = vadd.f32 %v6043_v58, %v5995_v16 }
 0xae3   :  { %v6093_v46 = vadd.f32 %v6092_v18, %v6044_v3 }
 0xae5   :  { %v6142_v26 = vadd.f32 %v6141_v7, %v6093_v46  ;;  %v5999_v61 = vpop.f32.mrf.mxu0 }
 0xae6   :  { %v6000_v10 = vadd.f32 %v5999_v61, %v13167_v38  ;;  %v6151_v38 = vpop.f32.mrf.mxu3 }
 0xae7   :  { %6180 = vst.msk [vmem:[%s13342_s3 + $0x58] sm:$0xff] %vm34_vm0, %v6142_v26 }
 0xae8   :  { %v6046_v15 = vpop.f32.mrf.mxu1 }
 0xae9   :  { %v6047_v22 = vadd.f32 %v6046_v15, %v5998_v24 }
 0xaeb   :  { %v6096_v17 = vadd.f32 %v6095_v35, %v6047_v22 }
 0xaed   :  { %v6145_v42 = vadd.f32 %v6144_v4, %v6096_v17  ;;  %v6002_v8 = vpop.f32.mrf.mxu0 }
 0xaee   :  { %v6003_v54 = vadd.f32 %v6002_v8, %v13180_v52  ;;  %v6105_v52 = vpop.f32.mrf.mxu2  ;;  %v6154_v29 = vpop.f32.mrf.mxu3 }
 0xaef   :  { %6182 = vst.msk [vmem:[%s13342_s3 + $0x68] sm:$0xff] %vm34_vm0, %v6145_v42 }
 0xaf0   :  { %v6048_v20 = vpop.f32.mrf.mxu1 }
 0xaf1   :  { %v6049_v47 = vadd.f32 %v6048_v20, %v6000_v10 }
 0xaf3   :  { %v6098_v51 = vadd.f32 %v6097_v63, %v6049_v47 }
 0xaf5   :  { %v6147_v23 = vadd.f32 %v6146_v13, %v6098_v51  ;;  %v6004_v27 = vpop.f32.mrf.mxu0 }
 0xaf6   :  { %v6005_v6 = vadd.f32 %v6004_v27, %v13184_v34  ;;  %v6107_v1 = vpop.f32.mrf.mxu2  ;;  %v6156_v28 = vpop.f32.mrf.mxu3 }
 0xaf7   :  { %6184 = vst.msk [vmem:[%s13342_s3 + $0x78] sm:$0xff] %vm34_vm0, %v6147_v23 }
 0xaf8   :  { %v6051_v56 = vpop.f32.mrf.mxu1 }
 0xaf9   :  { %v6052_v11 = vadd.f32 %v6051_v56, %v6003_v54 }
 0xafb   :  { %v6101_v60 = vadd.f32 %v6100_v44, %v6052_v11 }
 0xafd   :  { %v6150_v32 = vadd.f32 %v6149_v33, %v6101_v60  ;;  %v6007_v0 = vpop.f32.mrf.mxu0 }
 0xafe   :  { %v6008_v62 = vadd.f32 %v6007_v0, %v13197_v50  ;;  %v6110_v19 = vpop.f32.mrf.mxu2  ;;  %v6159_v9 = vpop.f32.mrf.mxu3 }
 0xaff   :  { %6186 = vst.msk [vmem:[%s13342_s3 + $0x88] sm:$0xff] %vm34_vm0, %v6150_v32 }
 0xb00   :  { %v6053_v2 = vpop.f32.mrf.mxu1 }
 0xb01   :  { %v6054_v53 = vadd.f32 %v6053_v2, %v6005_v6 }
 0xb03   :  { %v6103_v43 = vadd.f32 %v6102_v40, %v6054_v53 }
 0xb05   :  { %v6152_v36 = vadd.f32 %v6151_v38, %v6103_v43  ;;  %v6009_v30 = vpop.f32.mrf.mxu0 }
 0xb06   :  { %v6010_v55 = vadd.f32 %v6009_v30, %v13201_v59  ;;  %v6112_v41 = vpop.f32.mrf.mxu2 }
 0xb07   :  { %6188 = vst.msk [vmem:[%s13342_s3 + $0x98] sm:$0xff] %vm34_vm0, %v6152_v36 }
 0xb08   :  { %v6056_v34 = vpop.f32.mrf.mxu1 }
 0xb09   :  { %v6057_v12 = vadd.f32 %v6056_v34, %v6008_v62 }
 0xb0b   :  { %v6106_v18 = vadd.f32 %v6105_v52, %v6057_v12 }
 0xb0d   :  { %v6155_v45 = vadd.f32 %v6154_v29, %v6106_v18  ;;  %v6012_v7 = vpop.f32.mrf.mxu0 }
 0xb0e   :  { %v6013_v35 = vadd.f32 %v6012_v7, %v13214_v49  ;;  %v6161_v49 = vpop.f32.mrf.mxu3 }
 0xb0f   :  { %6190 = vst.msk [vmem:[%s13342_s3 + $0xa8] sm:$0xff] %vm34_vm0, %v6155_v45 }
 0xb10   :  { %v6058_v50 = vpop.f32.mrf.mxu1 }
 0xb11   :  { %v6059_v57 = vadd.f32 %v6058_v50, %v6010_v55 }
 0xb13   :  { %v6108_v48 = vadd.f32 %v6107_v1, %v6059_v57 }
 0xb15   :  { %v6157_v5 = vadd.f32 %v6156_v28, %v6108_v48  ;;  %v6014_v21 = vpop.f32.mrf.mxu0 }
 0xb16   :  { %v6015_v16 = vadd.f32 %v6014_v21, %v13218_v14  ;;  %v6115_v14 = vpop.f32.mrf.mxu2  ;;  %v6164_v15 = vpop.f32.mrf.mxu3 }
 0xb17   :  { %6192 = vst.msk [vmem:[%s13342_s3 + $0xb8] sm:$0xff] %vm34_vm0, %v6157_v5 }
 0xb18   :  { %v6061_v59 = vpop.f32.mrf.mxu1 }
 0xb19   :  { %v6062_v4 = vadd.f32 %v6061_v59, %v6013_v35 }
 0xb1b   :  { %v6111_v25 = vadd.f32 %v6110_v19, %v6062_v4 }
 0xb1d   :  { %v6160_v37 = vadd.f32 %v6159_v9, %v6111_v25  ;;  %v6017_v63 = vpop.f32.mrf.mxu0 }
 0xb1e   :  { %v6018_v26 = vadd.f32 %v6017_v63, %v13231_v31  ;;  %v6117_v33 = vpop.f32.mrf.mxu2  ;;  %v6166_v20 = vpop.f32.mrf.mxu3 }
 0xb1f   :  { %6194 = vst.msk [vmem:[%s13342_s3 + $0xc8] sm:$0xff] %vm34_vm0, %v6160_v37 }
 0xb20   :  { %v6063_v58 = vpop.f32.mrf.mxu1 }
 0xb21   :  { %v6064_v3 = vadd.f32 %v6063_v58, %v6015_v16 }
 0xb23   :  { %v6113_v46 = vadd.f32 %v6112_v41, %v6064_v3 }
 0xb25   :  { %v6162_v13 = vadd.f32 %v6161_v49, %v6113_v46  ;;  %v6019_v17 = vpop.f32.mrf.mxu0 }
 0xb26   :  { %v6020_v42 = vadd.f32 %v6019_v17, %v13235_v39 }
 0xb27   :  { %6196 = vst.msk [vmem:[%s13342_s3 + $0xd8] sm:$0xff] %vm34_vm0, %v6162_v13 }
 0xb28   :  { %v6066_v61 = vpop.f32.mrf.mxu1 }
 0xb29   :  { %v6067_v24 = vadd.f32 %v6066_v61, %v6018_v26 }
 0xb2b   :  { %v6116_v22 = vadd.f32 %v6115_v14, %v6067_v24 }
 0xb2d   :  { %v6165_v44 = vadd.f32 %v6164_v15, %v6116_v22 }
 0xb2f   :  { %6198 = vst.msk [vmem:[%s13342_s3 + $0xe8] sm:$0xff] %vm34_vm0, %v6165_v44 }
 0xb30   :  { %v6068_v31 = vpop.f32.mrf.mxu1 }
 0xb31   :  { %v6069_v8 = vadd.f32 %v6068_v31, %v6020_v42 }
 0xb33   :  { %v6118_v10 = vadd.f32 %v6117_v33, %v6069_v8 }
 0xb35   :  { %v6167_v47 = vadd.f32 %v6166_v20, %v6118_v10 }
 0xb37   :  { %6200 = vst.msk [vmem:[%s13342_s3 + $0xf8] sm:$0xff] %vm34_vm0, %v6167_v47 }

</bundles_post_ra>
